<compile_context>
chip_gen: v7x
topology: tpu7x:2x2x1
jax: 0.10.0
libtpu: 0.0.40
codegen_flags: <defaults>
</compile_context>

<pallas_src>
import functools

import jax
import jax.numpy as jnp
from jax.experimental import pallas as pl
from jax.experimental.pallas import tpu as pltpu

SB = 8                 # samples per conv-kernel grid step
ROWS_PER_SAMPLE = 88   # 81 conv2 output positions padded to a multiple of 8
PATCH_K = 1664         # 4*20*20 = 1600 padded to a multiple of 128
FC_K = 2816            # 88 * 32 (= 22 * 128, lane aligned)


def _round_up(x, m):
    return (x + m - 1) // m * m


# ---------------------------------------------------------------------------
# Kernel 1: conv1 (8x8, s4) + ReLU + conv2 (4x4, s2) + ReLU, SB samples/step
# ---------------------------------------------------------------------------
def _conv_stack_kernel(p_ref, w1_ref, b1_ref, w2_ref, b2_ref, o_ref):
    # conv1 over the expanded (di,dj,c1) output columns -- one matmul.
    a1 = jnp.dot(p_ref[...], w1_ref[...], preferred_element_type=jnp.float32)
    a1 = jnp.maximum(a1 + b1_ref[...], 0.0).astype(jnp.bfloat16)   # (rows, 256)
    # conv2 -- one matmul over the stacked (di,dj,c1) -> c2 weight.
    a2 = jnp.dot(a1, w2_ref[...], preferred_element_type=jnp.float32)
    o_ref[...] = jnp.maximum(a2 + b2_ref[...], 0.0).astype(o_ref.dtype)


# ---------------------------------------------------------------------------
# Kernel 2: fc1 + ReLU + fc2 over a tile of FT samples
# ---------------------------------------------------------------------------
def _fc_stack_kernel(x_ref, w3_ref, b3_ref, w4_ref, b4_ref, o_ref):
    h = jnp.dot(x_ref[...], w3_ref[...], preferred_element_type=jnp.float32)
    h = jnp.maximum(h + b3_ref[...], 0.0).astype(jnp.bfloat16)      # (FT, 256)
    y = jnp.dot(h, w4_ref[...], preferred_element_type=jnp.float32) + b4_ref[...]
    o_ref[...] = y


# ---------------------------------------------------------------------------
# XLA glue: fused conv1->conv2 im2col (one row per conv2 output position)
# ---------------------------------------------------------------------------
def _fused_conv_patches(x, b_pad):
    """x: (B, 4, 84, 84) f32 -> (b_pad*88, 1664) bf16 patch matrix.

    Row s*88 + p (p = oh*9+ow, p<81; rows 81..87 per sample are zero pad)
    holds in column ic*400 + u*20 + v the value x[s, ic, 8*oh+u, 8*ow+v]
    (the 20x20 input window feeding conv2 output (oh, ow)); columns
    1600..1663 are zero padding.
    """
    B = x.shape[0]
    xb = x.astype(jnp.bfloat16)
    # (B,4,20,9,84): index [b, ic, u, oh, col]
    rows = jnp.stack([xb[:, :, u:u + 65:8, :] for u in range(20)], axis=2)
    # (B,4,20,20,9,9): index [b, ic, u, v, oh, ow]
    wins = jnp.stack([rows[..., v:v + 65:8] for v in range(20)], axis=3)
    p = wins.transpose(0, 4, 5, 1, 2, 3).reshape(B, 81, 1600)
    p = jnp.pad(p, ((0, b_pad - B), (0, ROWS_PER_SAMPLE - 81), (0, PATCH_K - 1600)))
    return p.reshape(b_pad * ROWS_PER_SAMPLE, PATCH_K)


# ---------------------------------------------------------------------------
# Parameters: PyTorch-style init + one-time preprocessing (out of hot path)
# ---------------------------------------------------------------------------
def init_params(key, action_size):
    ks = jax.random.split(key, 8)

    def unif(k, shape, fan_in):
        bound = 1.0 / jnp.sqrt(jnp.float32(fan_in))
        return jax.random.uniform(k, shape, jnp.float32, -bound, bound)

    return {
        "conv1_w": unif(ks[0], (16, 4, 8, 8), 4 * 8 * 8),
        "conv1_b": unif(ks[1], (16,), 4 * 8 * 8),
        "conv2_w": unif(ks[2], (32, 16, 4, 4), 16 * 4 * 4),
        "conv2_b": unif(ks[3], (32,), 16 * 4 * 4),
        "fc1_w": unif(ks[4], (256, 32 * 9 * 9), 32 * 9 * 9),
        "fc1_b": unif(ks[5], (256,), 32 * 9 * 9),
        "fc2_w": unif(ks[6], (action_size, 256), 256),
        "fc2_b": unif(ks[7], (action_size,), 256),
    }


def prepare_params(params):
    """One-time weight reshape/expand/pad/cast -- keeps the forward glue-free."""
    a = params["fc2_w"].shape[0]
    a_pad = _round_up(a, 128)

    # conv1 weight expanded over the 4x4 conv2 window:
    #   w1e[ic*400 + u*20 + v, (di*4+dj)*16 + c1] = conv1_w[c1, ic, u-4di, v-4dj]
    w1 = params["conv1_w"].transpose(1, 2, 3, 0)                 # (4,8,8,16) [ic,ki,kj,c1]
    w1e = jnp.zeros((4, 20, 20, 4, 4, 16), jnp.float32)
    for di in range(4):
        for dj in range(4):
            w1e = w1e.at[:, 4 * di:4 * di + 8, 4 * dj:4 * dj + 8, di, dj, :].set(w1)
    w1e = jnp.pad(w1e.reshape(1600, 256), ((0, PATCH_K - 1600), (0, 0)))

    # conv1 bias tiled over the 16 (di,dj) offsets -> matches w1e's column order.
    b1e = jnp.tile(params["conv1_b"], 16).reshape(1, 256)

    # conv2 weight stacked: rows (di*4+dj)*16 + c1, cols c2.
    w2 = params["conv2_w"].transpose(2, 3, 1, 0).reshape(256, 32)

    # fc1 weight reordered to the (p, c2) flatten produced by kernel 1,
    # zero rows for the p = 81..87 pad positions -> K = 2816 (lane aligned).
    w3 = params["fc1_w"].reshape(256, 32, 81).transpose(2, 1, 0)  # (81, 32, 256) [p,c2,n]
    w3 = jnp.pad(w3, ((0, ROWS_PER_SAMPLE - 81), (0, 0), (0, 0))).reshape(FC_K, 256)

    return {
        "w1": w1e.astype(jnp.bfloat16),                                       # (1664, 256)
        "b1": b1e.astype(jnp.float32),                                        # (1, 256)
        "w2": w2.astype(jnp.bfloat16),                                        # (256, 32)
        "b2": params["conv2_b"].reshape(1, 32).astype(jnp.float32),
        "w3": w3.astype(jnp.bfloat16),                                        # (2816, 256)
        "b3": params["fc1_b"].reshape(1, 256).astype(jnp.float32),
        "w4": jnp.pad(params["fc2_w"].T, ((0, 0), (0, a_pad - a))).astype(jnp.bfloat16),
        "b4": jnp.pad(params["fc2_b"], ((0, a_pad - a),)).reshape(1, a_pad).astype(jnp.float32),
    }


# ---------------------------------------------------------------------------
# Forward
# ---------------------------------------------------------------------------
@functools.partial(jax.jit, static_argnames=("action_size",))
def qnetwork_forward(prep, state, action_size):
    """state: (B, 4, 84, 84) f32 -> (B, action_size) f32."""
    B = state.shape[0]
    bc = _round_up(B, SB)
    rows = SB * ROWS_PER_SAMPLE
    a_pad = prep["w4"].shape[1]

    patches = _fused_conv_patches(state, bc)               # (bc*88, 1664) bf16

    conv_out = pl.pallas_call(
        _conv_stack_kernel,
        out_shape=jax.ShapeDtypeStruct((bc * ROWS_PER_SAMPLE, 32), jnp.bfloat16),
        grid=(bc // SB,),
        in_specs=[
            pl.BlockSpec((rows, PATCH_K), lambda i: (i, 0)),
            pl.BlockSpec((PATCH_K, 256), lambda i: (0, 0)),
            pl.BlockSpec((1, 256), lambda i: (0, 0)),
            pl.BlockSpec((256, 32), lambda i: (0, 0)),
            pl.BlockSpec((1, 32), lambda i: (0, 0)),
        ],
        out_specs=pl.BlockSpec((rows, 32), lambda i: (i, 0)),
        compiler_params=pltpu.CompilerParams(dimension_semantics=("parallel",)),
    )(patches, prep["w1"], prep["b1"], prep["w2"], prep["b2"])

    # (bc*88, 32) -> (bc, 2816): row-major contiguous, free bitcast reshape.
    x = conv_out.reshape(bc, FC_K)

    # Largest batch tile <= 128 that divides bc (bc is always a multiple of 8).
    ft = next(t for t in (128, 64, 32, 16, 8) if bc % t == 0)

    out = pl.pallas_call(
        _fc_stack_kernel,
        out_shape=jax.ShapeDtypeStruct((bc, a_pad), jnp.float32),
        grid=(bc // ft,),
        in_specs=[
            pl.BlockSpec((ft, FC_K), lambda i: (i, 0)),
            pl.BlockSpec((FC_K, 256), lambda i: (0, 0)),
            pl.BlockSpec((1, 256), lambda i: (0, 0)),
            pl.BlockSpec((256, a_pad), lambda i: (0, 0)),
            pl.BlockSpec((1, a_pad), lambda i: (0, 0)),
        ],
        out_specs=pl.BlockSpec((ft, a_pad), lambda i: (i, 0)),
        compiler_params=pltpu.CompilerParams(dimension_semantics=("parallel",)),
    )(x, prep["w3"], prep["b3"], prep["w4"], prep["b4"])

    return out[:B, :action_size]


# ---------------------------------------------------------------------------
# Pure-JAX reference (sanity check)
# ---------------------------------------------------------------------------
def qnetwork_forward_ref(params, state):
    def conv(x, w, b, s):
        y = jax.lax.conv_general_dilated(
            x, w, (s, s), "VALID",
            dimension_numbers=("NCHW", "OIHW", "NCHW"))
        return jax.nn.relu(y + b[None, :, None, None])

    x = conv(state, params["conv1_w"], params["conv1_b"], 4)
    x = conv(x, params["conv2_w"], params["conv2_b"], 2)
    x = x.reshape(x.shape[0], -1)
    x = jax.nn.relu(x @ params["fc1_w"].T + params["fc1_b"])
    return x @ params["fc2_w"].T + params["fc2_b"]


if __name__ == "__main__":
    action_size = 6
    batch = 2

    key = jax.random.PRNGKey(0)
    k_params, k_state = jax.random.split(key)
    params = init_params(k_params, action_size)
    prep = prepare_params(params)        # one-time preprocessing, outside hot path
    # 84x84 spatial is required so that conv2's output is 32*9*9 (fc1 input).
    state = jax.random.normal(k_state, (batch, 4, 84, 84), dtype=jnp.float32)

    out = qnetwork_forward(prep, state, action_size=action_size)
    out = jax.block_until_ready(out)
    assert out.shape == (batch, action_size), out.shape

    ref = jax.block_until_ready(qnetwork_forward_ref(params, state))
    max_err = float(jnp.max(jnp.abs(out - ref)))
    assert jnp.allclose(out, ref, rtol=2e-2, atol=2e-2), max_err

    print("KERNEL_OK")
</pallas_src>

<mosaic_0001>
module attributes {stable_mosaic.version = 11 : i64} {
  func.func @_conv_stack_kernel(%arg0: i32, %arg1: memref<704x1664xbf16, #tpu.memory_space<vmem>>, %arg2: memref<1664x256xbf16, #tpu.memory_space<vmem>>, %arg3: memref<1x256xf32, #tpu.memory_space<vmem>>, %arg4: memref<256x32xbf16, #tpu.memory_space<vmem>>, %arg5: memref<1x32xf32, #tpu.memory_space<vmem>>, %arg6: memref<704x32xbf16, #tpu.memory_space<vmem>>) attributes {dimension_semantics = [#tpu.dimension_semantics<parallel>], iteration_bounds = array<i64: 1>, scalar_prefetch = 0 : i64, scratch_operands = 0 : i64, tpu.core_type = #tpu.core_type<tc>, window_params = [{transform_indices = @transform_0, window_bounds = array<i64: 704, 1664>}, {pipeline_mode = #tpu.pipeline_mode<synchronous>, transform_indices = @transform_1, window_bounds = array<i64: 1664, 256>}, {pipeline_mode = #tpu.pipeline_mode<synchronous>, transform_indices = @transform_2, window_bounds = array<i64: 1, 256>}, {pipeline_mode = #tpu.pipeline_mode<synchronous>, transform_indices = @transform_3, window_bounds = array<i64: 256, 32>}, {pipeline_mode = #tpu.pipeline_mode<synchronous>, transform_indices = @transform_4, window_bounds = array<i64: 1, 32>}, {transform_indices = @transform_5, window_bounds = array<i64: 704, 32>}]} {
    %c0 = arith.constant 0 : index
    %c0_0 = arith.constant 0 : index
    %0 = vector.load %arg1[%c0, %c0_0] : memref<704x1664xbf16, #tpu.memory_space<vmem>>, vector<704x1664xbf16>
    %c0_1 = arith.constant 0 : index
    %c0_2 = arith.constant 0 : index
    %1 = vector.load %arg2[%c0_1, %c0_2] : memref<1664x256xbf16, #tpu.memory_space<vmem>>, vector<1664x256xbf16>
    %cst = arith.constant dense<0.000000e+00> : vector<704x256xf32>
    %2 = tpu.matmul %0, %1, %cst {dimension_numbers = #tpu.dot_dimension_numbers<[1], [0], [0], [1], [0, 0, 1, 1], [], []>} : vector<704x1664xbf16>, vector<1664x256xbf16>, vector<704x256xf32> -> vector<704x256xf32>
    %c0_3 = arith.constant 0 : index
    %c0_4 = arith.constant 0 : index
    %3 = vector.load %arg3[%c0_3, %c0_4] : memref<1x256xf32, #tpu.memory_space<vmem>>, vector<1x256xf32>
    %4 = vector.broadcast %3 : vector<1x256xf32> to vector<704x256xf32>
    %5 = arith.addf %2, %4 : vector<704x256xf32>
    %cst_5 = arith.constant 0.000000e+00 : f32
    %6 = vector.broadcast %cst_5 : f32 to vector<704x256xf32>
    %7 = arith.maximumf %5, %6 : vector<704x256xf32>
    %8 = arith.truncf %7 : vector<704x256xf32> to vector<704x256xbf16>
    %c0_6 = arith.constant 0 : index
    %c0_7 = arith.constant 0 : index
    %9 = vector.load %arg4[%c0_6, %c0_7] : memref<256x32xbf16, #tpu.memory_space<vmem>>, vector<256x32xbf16>
    %cst_8 = arith.constant dense<0.000000e+00> : vector<704x32xf32>
    %10 = tpu.matmul %8, %9, %cst_8 {dimension_numbers = #tpu.dot_dimension_numbers<[1], [0], [0], [1], [0, 0, 1, 1], [], []>} : vector<704x256xbf16>, vector<256x32xbf16>, vector<704x32xf32> -> vector<704x32xf32>
    %c0_9 = arith.constant 0 : index
    %c0_10 = arith.constant 0 : index
    %11 = vector.load %arg5[%c0_9, %c0_10] : memref<1x32xf32, #tpu.memory_space<vmem>>, vector<1x32xf32>
    %12 = vector.broadcast %11 : vector<1x32xf32> to vector<704x32xf32>
    %13 = arith.addf %10, %12 : vector<704x32xf32>
    %cst_11 = arith.constant 0.000000e+00 : f32
    %14 = vector.broadcast %cst_11 : f32 to vector<704x32xf32>
    %15 = arith.maximumf %13, %14 : vector<704x32xf32>
    %16 = arith.truncf %15 : vector<704x32xf32> to vector<704x32xbf16>
    %c0_12 = arith.constant 0 : index
    %c0_13 = arith.constant 0 : index
    %17 = vector.load %arg6[%c0_12, %c0_13] : memref<704x32xbf16, #tpu.memory_space<vmem>>, vector<704x32xbf16>
    tpu.vector_store %arg6[%c0_12, %c0_13], %16 {strides = array<i32>} : memref<704x32xbf16, #tpu.memory_space<vmem>>, vector<704x32xbf16>,
    return
  }
  func.func @transform_0(%arg0: i32) -> (i32, i32) {
    %c0_i32 = arith.constant 0 : i32
    %c0_i32_0 = arith.constant 0 : i32
    return %arg0, %c0_i32 : i32, i32
  }
  func.func @transform_1(%arg0: i32) -> (i32, i32) {
    %c0_i32 = arith.constant 0 : i32
    %c0_i32_0 = arith.constant 0 : i32
    %c0_i32_1 = arith.constant 0 : i32
    return %c0_i32, %c0_i32_0 : i32, i32
  }
  func.func @transform_2(%arg0: i32) -> (i32, i32) {
    %c0_i32 = arith.constant 0 : i32
    %c0_i32_0 = arith.constant 0 : i32
    %c0_i32_1 = arith.constant 0 : i32
    return %c0_i32, %c0_i32_0 : i32, i32
  }
  func.func @transform_3(%arg0: i32) -> (i32, i32) {
    %c0_i32 = arith.constant 0 : i32
    %c0_i32_0 = arith.constant 0 : i32
    %c0_i32_1 = arith.constant 0 : i32
    return %c0_i32, %c0_i32_0 : i32, i32
  }
  func.func @transform_4(%arg0: i32) -> (i32, i32) {
    %c0_i32 = arith.constant 0 : i32
    %c0_i32_0 = arith.constant 0 : i32
    %c0_i32_1 = arith.constant 0 : i32
    return %c0_i32, %c0_i32_0 : i32, i32
  }
  func.func @transform_5(%arg0: i32) -> (i32, i32) {
    %c0_i32 = arith.constant 0 : i32
    %c0_i32_0 = arith.constant 0 : i32
    return %arg0, %c0_i32 : i32, i32
  }
}

module attributes {stable_mosaic.version = 11 : i64} {
  func.func @_fc_stack_kernel(%arg0: i32, %arg1: memref<8x2816xbf16, #tpu.memory_space<vmem>>, %arg2: memref<2816x256xbf16, #tpu.memory_space<vmem>>, %arg3: memref<1x256xf32, #tpu.memory_space<vmem>>, %arg4: memref<256x128xbf16, #tpu.memory_space<vmem>>, %arg5: memref<1x128xf32, #tpu.memory_space<vmem>>, %arg6: memref<8x128xf32, #tpu.memory_space<vmem>>) attributes {dimension_semantics = [#tpu.dimension_semantics<parallel>], iteration_bounds = array<i64: 1>, scalar_prefetch = 0 : i64, scratch_operands = 0 : i64, tpu.core_type = #tpu.core_type<tc>, window_params = [{transform_indices = @transform_0, window_bounds = array<i64: 8, 2816>}, {pipeline_mode = #tpu.pipeline_mode<synchronous>, transform_indices = @transform_1, window_bounds = array<i64: 2816, 256>}, {pipeline_mode = #tpu.pipeline_mode<synchronous>, transform_indices = @transform_2, window_bounds = array<i64: 1, 256>}, {pipeline_mode = #tpu.pipeline_mode<synchronous>, transform_indices = @transform_3, window_bounds = array<i64: 256, 128>}, {pipeline_mode = #tpu.pipeline_mode<synchronous>, transform_indices = @transform_4, window_bounds = array<i64: 1, 128>}, {transform_indices = @transform_5, window_bounds = array<i64: 8, 128>}]} {
    %c0 = arith.constant 0 : index
    %c0_0 = arith.constant 0 : index
    %0 = vector.load %arg1[%c0, %c0_0] : memref<8x2816xbf16, #tpu.memory_space<vmem>>, vector<8x2816xbf16>
    %c0_1 = arith.constant 0 : index
    %c0_2 = arith.constant 0 : index
    %1 = vector.load %arg2[%c0_1, %c0_2] : memref<2816x256xbf16, #tpu.memory_space<vmem>>, vector<2816x256xbf16>
    %cst = arith.constant dense<0.000000e+00> : vector<8x256xf32>
    %2 = tpu.matmul %0, %1, %cst {dimension_numbers = #tpu.dot_dimension_numbers<[1], [0], [0], [1], [0, 0, 1, 1], [], []>} : vector<8x2816xbf16>, vector<2816x256xbf16>, vector<8x256xf32> -> vector<8x256xf32>
    %c0_3 = arith.constant 0 : index
    %c0_4 = arith.constant 0 : index
    %3 = vector.load %arg3[%c0_3, %c0_4] : memref<1x256xf32, #tpu.memory_space<vmem>>, vector<1x256xf32>
    %4 = vector.broadcast %3 : vector<1x256xf32> to vector<8x256xf32>
    %5 = arith.addf %2, %4 : vector<8x256xf32>
    %cst_5 = arith.constant 0.000000e+00 : f32
    %6 = vector.broadcast %cst_5 : f32 to vector<8x256xf32>
    %7 = arith.maximumf %5, %6 : vector<8x256xf32>
    %8 = arith.truncf %7 : vector<8x256xf32> to vector<8x256xbf16>
    %c0_6 = arith.constant 0 : index
    %c0_7 = arith.constant 0 : index
    %9 = vector.load %arg4[%c0_6, %c0_7] : memref<256x128xbf16, #tpu.memory_space<vmem>>, vector<256x128xbf16>
    %cst_8 = arith.constant dense<0.000000e+00> : vector<8x128xf32>
    %10 = tpu.matmul %8, %9, %cst_8 {dimension_numbers = #tpu.dot_dimension_numbers<[1], [0], [0], [1], [0, 0, 1, 1], [], []>} : vector<8x256xbf16>, vector<256x128xbf16>, vector<8x128xf32> -> vector<8x128xf32>
    %c0_9 = arith.constant 0 : index
    %c0_10 = arith.constant 0 : index
    %11 = vector.load %arg5[%c0_9, %c0_10] : memref<1x128xf32, #tpu.memory_space<vmem>>, vector<1x128xf32>
    %12 = vector.broadcast %11 : vector<1x128xf32> to vector<8x128xf32>
    %13 = arith.addf %10, %12 : vector<8x128xf32>
    %c0_11 = arith.constant 0 : index
    %c0_12 = arith.constant 0 : index
    %14 = vector.load %arg6[%c0_11, %c0_12] : memref<8x128xf32, #tpu.memory_space<vmem>>, vector<8x128xf32>
    tpu.vector_store %arg6[%c0_11, %c0_12], %13 {strides = array<i32>} : memref<8x128xf32, #tpu.memory_space<vmem>>, vector<8x128xf32>,
    return
  }
  func.func @transform_0(%arg0: i32) -> (i32, i32) {
    %c0_i32 = arith.constant 0 : i32
    %c0_i32_0 = arith.constant 0 : i32
    return %arg0, %c0_i32 : i32, i32
  }
  func.func @transform_1(%arg0: i32) -> (i32, i32) {
    %c0_i32 = arith.constant 0 : i32
    %c0_i32_0 = arith.constant 0 : i32
    %c0_i32_1 = arith.constant 0 : i32
    return %c0_i32, %c0_i32_0 : i32, i32
  }
  func.func @transform_2(%arg0: i32) -> (i32, i32) {
    %c0_i32 = arith.constant 0 : i32
    %c0_i32_0 = arith.constant 0 : i32
    %c0_i32_1 = arith.constant 0 : i32
    return %c0_i32, %c0_i32_0 : i32, i32
  }
  func.func @transform_3(%arg0: i32) -> (i32, i32) {
    %c0_i32 = arith.constant 0 : i32
    %c0_i32_0 = arith.constant 0 : i32
    %c0_i32_1 = arith.constant 0 : i32
    return %c0_i32, %c0_i32_0 : i32, i32
  }
  func.func @transform_4(%arg0: i32) -> (i32, i32) {
    %c0_i32 = arith.constant 0 : i32
    %c0_i32_0 = arith.constant 0 : i32
    %c0_i32_1 = arith.constant 0 : i32
    return %c0_i32, %c0_i32_0 : i32, i32
  }
  func.func @transform_5(%arg0: i32) -> (i32, i32) {
    %c0_i32 = arith.constant 0 : i32
    %c0_i32_0 = arith.constant 0 : i32
    return %arg0, %c0_i32 : i32, i32
  }
}

</mosaic_0001>

<bundles_post_ra>
// kernel: qnetwork_forward.3
= control target key start
LH: loop header
LB: loop body
LE: loop exit
PB: predicated region body
PF: predicated region fallthrough
CT: control target
= control target key end

     0   :  { %s5117_s1 = inlined_call_operand.vmem [shape: bf16[2816,256], index: 1, kind: input, shape index: {}]   ;;  %s5118_s0 = inlined_call_operand.vmem [shape: bf16[8,2816], index: 0, kind: input, shape index: {}]   ;;  %s5119_s3 = inlined_call_operand.vmem [shape: bf16[256,128], index: 3, kind: input, shape index: {}]   ;;  %s5120_s2 = inlined_call_operand.vmem [shape: f32[1,256], index: 2, kind: input, shape index: {}]   ;;  %s5121_s4 = inlined_call_operand.vmem [shape: f32[1,128], index: 4, kind: input, shape index: {}]   ;;  %s5122_s5 = inlined_call_operand.vmem [shape: f32[8,128], index: 5, kind: output, shape index: {}]  }
   0x1   :  { %v3321_v0 = vld [vmem:[%s5117_s1 + $0x4] ss:$8 sps:$4 sm:$0xff]   ;;  %v3325_v2 = vld [vmem:[%s5117_s1] ss:$8 sps:$4 sm:$0xff]   ;;  %v3327_v4 = vld [vmem:[%s5117_s1 + $0x14] ss:$8 sps:$4 sm:$0xff]  }
   0x2   :  { %v3323_v1 = vld [vmem:[%s5117_s1 + $0x504] ss:$8 sps:$4 sm:$0xff]   ;;  %2233 = vmatprep.subr.bf16.mxu1 %v3321_v0  ;;  %v3326_v3 = vld [vmem:[%s5117_s1 + $0x500] ss:$8 sps:$4 sm:$0xff]   ;;  %v3329_v5 = vld [vmem:[%s5117_s1 + $0x514] ss:$8 sps:$4 sm:$0xff]  }
   0x3   :  { %2438 = vmatprep.subr.bf16.mxu0 %v3323_v1  ;;  %2234 = vmatpush1.bf16.msra.mxu1 %v3325_v2  ;;  %v3331_v6 = vld [vmem:[%s5117_s1 + $0x10] ss:$8 sps:$4 sm:$0xff]   ;;  %v3333_v8 = vld [vmem:[%s5117_s1 + $0x24] ss:$8 sps:$4 sm:$0xff]   ;;  %v3337_v10 = vld [vmem:[%s5117_s1 + $0x20] ss:$8 sps:$4 sm:$0xff]  }
   0x4   :  { %2439 = vmatpush1.bf16.msra.mxu0 %v3326_v3  ;;  %2235 = vmatprep.subr.bf16.mxu1 %v3327_v4  ;;  %v3332_v7 = vld [vmem:[%s5117_s1 + $0x510] ss:$8 sps:$4 sm:$0xff]   ;;  %v3335_v9 = vld [vmem:[%s5117_s1 + $0x524] ss:$8 sps:$4 sm:$0xff]   ;;  %v3338_v11 = vld [vmem:[%s5117_s1 + $0x520] ss:$8 sps:$4 sm:$0xff]  }
   0x5   :  { %2440 = vmatprep.subr.bf16.mxu0 %v3329_v5  ;;  %v3339_v12 = vld [vmem:[%s5117_s1 + $0x34] ss:$8 sps:$4 sm:$0xff]   ;;  %v3343_v14 = vld [vmem:[%s5117_s1 + $0x30] ss:$8 sps:$4 sm:$0xff]   ;;  %v3345_v16 = vld [vmem:[%s5117_s1 + $0x44] ss:$8 sps:$4 sm:$0xff]  }
   0x6   :  { %v3341_v13 = vld [vmem:[%s5117_s1 + $0x534] ss:$8 sps:$4 sm:$0xff]   ;;  %v3344_v15 = vld [vmem:[%s5117_s1 + $0x530] ss:$8 sps:$4 sm:$0xff]   ;;  %v3347_v17 = vld [vmem:[%s5117_s1 + $0x544] ss:$8 sps:$4 sm:$0xff]  }
   0x7   :  { %2236 = vmatpush1.bf16.msra.mxu1 %v3331_v6  ;;  %v3349_v18 = vld [vmem:[%s5117_s1 + $0x40] ss:$8 sps:$4 sm:$0xff]   ;;  %v3351_v20 = vld [vmem:[%s5117_s1 + $0x54] ss:$8 sps:$4 sm:$0xff]   ;;  %v3355_v22 = vld [vmem:[%s5117_s1 + $0x50] ss:$8 sps:$4 sm:$0xff]  }
   0x8   :  { %2441 = vmatpush1.bf16.msra.mxu0 %v3332_v7  ;;  %2237 = vmatprep.subr.bf16.mxu1 %v3333_v8  ;;  %v3350_v19 = vld [vmem:[%s5117_s1 + $0x540] ss:$8 sps:$4 sm:$0xff]   ;;  %v3353_v21 = vld [vmem:[%s5117_s1 + $0x554] ss:$8 sps:$4 sm:$0xff]   ;;  %v3356_v23 = vld [vmem:[%s5117_s1 + $0x550] ss:$8 sps:$4 sm:$0xff]  }
   0x9   :  { %2442 = vmatprep.subr.bf16.mxu0 %v3335_v9  ;;  %v3357_v24 = vld [vmem:[%s5117_s1 + $0x64] ss:$8 sps:$4 sm:$0xff]   ;;  %v3361_v26 = vld [vmem:[%s5117_s1 + $0x60] ss:$8 sps:$4 sm:$0xff]   ;;  %v3363_v28 = vld [vmem:[%s5117_s1 + $0x74] ss:$8 sps:$4 sm:$0xff]  }
   0xa   :  { %v3359_v25 = vld [vmem:[%s5117_s1 + $0x564] ss:$8 sps:$4 sm:$0xff]   ;;  %v3362_v27 = vld [vmem:[%s5117_s1 + $0x560] ss:$8 sps:$4 sm:$0xff]   ;;  %v3365_v29 = vld [vmem:[%s5117_s1 + $0x574] ss:$8 sps:$4 sm:$0xff]  }
   0xb   :  { %2238 = vmatpush1.bf16.msra.mxu1 %v3337_v10  ;;  %v3367_v30 = vld [vmem:[%s5117_s1 + $0x70] ss:$8 sps:$4 sm:$0xff]   ;;  %v3369_v32 = vld [vmem:[%s5117_s1 + $0x84] ss:$8 sps:$4 sm:$0xff]   ;;  %v3373_v34 = vld [vmem:[%s5117_s1 + $0x80] ss:$8 sps:$4 sm:$0xff]  }
   0xc   :  { %2443 = vmatpush1.bf16.msra.mxu0 %v3338_v11  ;;  %2239 = vmatprep.subr.bf16.mxu1 %v3339_v12  ;;  %v3368_v31 = vld [vmem:[%s5117_s1 + $0x570] ss:$8 sps:$4 sm:$0xff]   ;;  %v3371_v33 = vld [vmem:[%s5117_s1 + $0x584] ss:$8 sps:$4 sm:$0xff]   ;;  %v3374_v35 = vld [vmem:[%s5117_s1 + $0x580] ss:$8 sps:$4 sm:$0xff]  }
   0xd   :  { %2444 = vmatprep.subr.bf16.mxu0 %v3341_v13  ;;  %v3375_v36 = vld [vmem:[%s5117_s1 + $0x94] ss:$8 sps:$4 sm:$0xff]   ;;  %v3379_v38 = vld [vmem:[%s5117_s1 + $0x90] ss:$8 sps:$4 sm:$0xff]   ;;  %v3381_v40 = vld [vmem:[%s5117_s1 + $0xa4] ss:$8 sps:$4 sm:$0xff]  }
   0xe   :  { %v3377_v37 = vld [vmem:[%s5117_s1 + $0x594] ss:$8 sps:$4 sm:$0xff]   ;;  %v3380_v39 = vld [vmem:[%s5117_s1 + $0x590] ss:$8 sps:$4 sm:$0xff]   ;;  %v3383_v41 = vld [vmem:[%s5117_s1 + $0x5a4] ss:$8 sps:$4 sm:$0xff]  }
   0xf   :  { %2240 = vmatpush1.bf16.msra.mxu1 %v3343_v14  ;;  %v3385_v42 = vld [vmem:[%s5117_s1 + $0xa0] ss:$8 sps:$4 sm:$0xff]   ;;  %v3387_v44 = vld [vmem:[%s5117_s1 + $0xb4] ss:$8 sps:$4 sm:$0xff]   ;;  %v3391_v47 = vld [vmem:[%s5117_s1 + $0xb0] ss:$8 sps:$4 sm:$0xff]  }
  0x10   :  { %2445 = vmatpush1.bf16.msra.mxu0 %v3344_v15  ;;  %2241 = vmatprep.subr.bf16.mxu1 %v3345_v16  ;;  %v3386_v43 = vld [vmem:[%s5117_s1 + $0x5a0] ss:$8 sps:$4 sm:$0xff]   ;;  %v3389_v45 = vld [vmem:[%s5117_s1 + $0x5b4] ss:$8 sps:$4 sm:$0xff]   ;;  %v3392_v49 = vld [vmem:[%s5117_s1 + $0x5b0] ss:$8 sps:$4 sm:$0xff]  }
  0x11   :  { %2446 = vmatprep.subr.bf16.mxu0 %v3347_v17  ;;  %v21_v46 = vld [vmem:[%s5118_s0] sm:$0xff]  ;;  %v26_v50 = vld [vmem:[%s5118_s0 + $0x28] sm:$0xff]  ;;  %v3399_v56 = vld [vmem:[%s5117_s1 + $0xd4] ss:$8 sps:$4 sm:$0xff]  }
  0x12   :  { %v2869_v48 = vcombine.high %v21_v46, %v21_v46  ;;  %v3393_v51 = vld [vmem:[%s5117_s1 + $0xc4] ss:$8 sps:$4 sm:$0xff]   ;;  %v2879_v53 = vcombine.high %v26_v50, %v26_v50  ;;  %v3397_v54 = vld [vmem:[%s5117_s1 + $0xc0] ss:$8 sps:$4 sm:$0xff]   ;;  %v3401_v57 = vld [vmem:[%s5117_s1 + $0x5d4] ss:$8 sps:$4 sm:$0xff]   ;;  %v2868_v6 = vcombine.low %v21_v46, %v21_v46  ;;  %v2878_v7 = vcombine.low %v26_v50, %v26_v50 }
  0x13   :  { %2242 = vmatpush1.bf16.msra.mxu1 %v3349_v18  ;;  %v3395_v52 = vld [vmem:[%s5117_s1 + $0x5c4] ss:$8 sps:$4 sm:$0xff]   ;;  %v3398_v55 = vld [vmem:[%s5117_s1 + $0x5c0] ss:$8 sps:$4 sm:$0xff]   ;;  %v3403_v58 = vld [vmem:[%s5117_s1 + $0xd0] ss:$8 sps:$4 sm:$0xff]  }
  0x14   :  { %2447 = vmatpush1.bf16.msra.mxu0 %v3350_v19  ;;  %2243 = vmatprep.subr.bf16.mxu1 %v3351_v20  ;;  %v3404_v59 = vld [vmem:[%s5117_s1 + $0x5d0] ss:$8 sps:$4 sm:$0xff]   ;;  %v3405_v60 = vld [vmem:[%s5117_s1 + $0xe4] ss:$8 sps:$4 sm:$0xff]   ;;  %v3409_v62 = vld [vmem:[%s5117_s1 + $0xe0] ss:$8 sps:$4 sm:$0xff]  }
  0x15   :  { %2448 = vmatprep.subr.bf16.mxu0 %v3353_v21  ;;  %2265 = vmatprep.mubr.bf16.mxu1 %v2869_v48  ;;  %v3407_v61 = vld [vmem:[%s5117_s1 + $0x5e4] ss:$8 sps:$4 sm:$0xff]   ;;  %v3410_v63 = vld [vmem:[%s5117_s1 + $0x5e0] ss:$8 sps:$4 sm:$0xff]   ;;  %v3411_v0 = vld [vmem:[%s5117_s1 + $0xf4] ss:$8 sps:$4 sm:$0xff]  }
  0x16   :  { %2470 = vmatprep.mubr.bf16.mxu0 %v2879_v53  ;;  %v3413_v1 = vld [vmem:[%s5117_s1 + $0x5f4] ss:$8 sps:$4 sm:$0xff]   ;;  %v3415_v2 = vld [vmem:[%s5117_s1 + $0xf0] ss:$8 sps:$4 sm:$0xff]   ;;  %v3421_v4 = vld [vmem:[%s5117_s1 + $0x104] ss:$8 sps:$4 sm:$0xff]  }
  0x17   :  { %2244 = vmatpush1.bf16.msra.mxu1 %v3355_v22  ;;  %v3416_v3 = vld [vmem:[%s5117_s1 + $0x5f0] ss:$8 sps:$4 sm:$0xff]   ;;  %v3426_v5 = vld [vmem:[%s5117_s1 + $0x604] ss:$8 sps:$4 sm:$0xff]   ;;  %v3419_v8 = vld [vmem:[%s5117_s1 + $0x100] ss:$8 sps:$4 sm:$0xff]  }
  0x18   :  { %2449 = vmatpush1.bf16.msra.mxu0 %v3356_v23  ;;  %2245 = vmatprep.subr.bf16.mxu1 %v3357_v24  ;;  %v3424_v9 = vld [vmem:[%s5117_s1 + $0x600] ss:$8 sps:$4 sm:$0xff]   ;;  %v3429_v10 = vld [vmem:[%s5117_s1 + $0x114] ss:$8 sps:$4 sm:$0xff]   ;;  %v3427_v12 = vld [vmem:[%s5117_s1 + $0x110] ss:$8 sps:$4 sm:$0xff]  }
  0x19   :  { %2450 = vmatprep.subr.bf16.mxu0 %v3359_v25  ;;  %v3432_v11 = vld [vmem:[%s5117_s1 + $0x614] ss:$8 sps:$4 sm:$0xff]   ;;  %v3430_v13 = vld [vmem:[%s5117_s1 + $0x610] ss:$8 sps:$4 sm:$0xff]   ;;  %v3435_v14 = vld [vmem:[%s5117_s1 + $0x124] ss:$8 sps:$4 sm:$0xff]  }
  0x1a   :  { %v3438_v15 = vld [vmem:[%s5117_s1 + $0x624] ss:$8 sps:$4 sm:$0xff]   ;;  %v3433_v16 = vld [vmem:[%s5117_s1 + $0x120] ss:$8 sps:$4 sm:$0xff]   ;;  %v3441_v18 = vld [vmem:[%s5117_s1 + $0x134] ss:$8 sps:$4 sm:$0xff]  }
  0x1b   :  { %2246 = vmatpush1.bf16.msra.mxu1 %v3361_v26  ;;  %v3436_v17 = vld [vmem:[%s5117_s1 + $0x620] ss:$8 sps:$4 sm:$0xff]   ;;  %v3444_v19 = vld [vmem:[%s5117_s1 + $0x634] ss:$8 sps:$4 sm:$0xff]   ;;  %v3439_v20 = vld [vmem:[%s5117_s1 + $0x130] ss:$8 sps:$4 sm:$0xff]  }
  0x1c   :  { %2451 = vmatpush1.bf16.msra.mxu0 %v3362_v27  ;;  %2247 = vmatprep.subr.bf16.mxu1 %v3363_v28  ;;  %v3442_v21 = vld [vmem:[%s5117_s1 + $0x630] ss:$8 sps:$4 sm:$0xff]   ;;  %v3447_v22 = vld [vmem:[%s5117_s1 + $0x144] ss:$8 sps:$4 sm:$0xff]   ;;  %v3445_v24 = vld [vmem:[%s5117_s1 + $0x140] ss:$8 sps:$4 sm:$0xff]  }
  0x1d   :  { %2452 = vmatprep.subr.bf16.mxu0 %v3365_v29  ;;  %v3450_v23 = vld [vmem:[%s5117_s1 + $0x644] ss:$8 sps:$4 sm:$0xff]   ;;  %v3448_v25 = vld [vmem:[%s5117_s1 + $0x640] ss:$8 sps:$4 sm:$0xff]   ;;  %v3453_v26 = vld [vmem:[%s5117_s1 + $0x154] ss:$8 sps:$4 sm:$0xff]  }
  0x1e   :  { %v3456_v27 = vld [vmem:[%s5117_s1 + $0x654] ss:$8 sps:$4 sm:$0xff]   ;;  %v3451_v28 = vld [vmem:[%s5117_s1 + $0x150] ss:$8 sps:$4 sm:$0xff]   ;;  %v3483_v50 = vld [vmem:[%s5117_s1 + $0x1a4] ss:$8 sps:$4 sm:$0xff]  }
  0x1f   :  { %2248 = vmatpush1.bf16.msra.mxu1 %v3367_v30  ;;  %v3454_v29 = vld [vmem:[%s5117_s1 + $0x650] ss:$8 sps:$4 sm:$0xff]   ;;  %v3459_v30 = vld [vmem:[%s5117_s1 + $0x164] ss:$8 sps:$4 sm:$0xff]   ;;  %v3477_v46 = vld [vmem:[%s5117_s1 + $0x194] ss:$8 sps:$4 sm:$0xff]  }
  0x20   :  { %2453 = vmatpush1.bf16.msra.mxu0 %v3368_v31  ;;  %2249 = vmatprep.subr.bf16.mxu1 %v3369_v32  ;;  %v3462_v31 = vld [vmem:[%s5117_s1 + $0x664] ss:$8 sps:$4 sm:$0xff]   ;;  %v3475_v48 = vld [vmem:[%s5117_s1 + $0x190] ss:$8 sps:$4 sm:$0xff]   ;;  %v3484_v53 = vld [vmem:[%s5117_s1 + $0x6a0] ss:$8 sps:$4 sm:$0xff]  }
  0x21   :  { %2454 = vmatprep.subr.bf16.mxu0 %v3371_v33  ;;  %v4196_v32 = vld [vmem:[%s5118_s0 + $0x8] sm:$0xff] }
  0x22   :  { %v3457_v33 = vld [vmem:[%s5117_s1 + $0x160] ss:$8 sps:$4 sm:$0xff]  }
  0x23   :  { %2250 = vmatpush1.bf16.msra.mxu1 %v3373_v34  ;;  %v3460_v34 = vld [vmem:[%s5117_s1 + $0x660] ss:$8 sps:$4 sm:$0xff]  }
  0x24   :  { %2455 = vmatpush1.bf16.msra.mxu0 %v3374_v35  ;;  %2251 = vmatprep.subr.bf16.mxu1 %v3375_v36  ;;  %v2871_v35 = vcombine.high %v4196_v32, %v4196_v32  ;;  %v4209_v36 = vld [vmem:[%s5118_s0 + $0x30] sm:$0xff] }
  0x25   :  { %2456 = vmatprep.subr.bf16.mxu0 %v3377_v37  ;;  %v3465_v37 = vld [vmem:[%s5117_s1 + $0x174] ss:$8 sps:$4 sm:$0xff]  }
  0x27   :  { %2252 = vmatpush1.bf16.msra.mxu1 %v3379_v38  ;;  %v2881_v38 = vcombine.high %v4209_v36, %v4209_v36 }
  0x28   :  { %2457 = vmatpush1.bf16.msra.mxu0 %v3380_v39  ;;  %2253 = vmatprep.subr.bf16.mxu1 %v3381_v40  ;;  %v3468_v39 = vld [vmem:[%s5117_s1 + $0x674] ss:$8 sps:$4 sm:$0xff]   ;;  %v3463_v40 = vld [vmem:[%s5117_s1 + $0x170] ss:$8 sps:$4 sm:$0xff]  }
  0x29   :  { %2458 = vmatprep.subr.bf16.mxu0 %v3383_v41  ;;  %v3466_v41 = vld [vmem:[%s5117_s1 + $0x670] ss:$8 sps:$4 sm:$0xff]  }
  0x2b   :  { %2254 = vmatpush1.bf16.msra.mxu1 %v3385_v42  ;;  %v3471_v42 = vld [vmem:[%s5117_s1 + $0x184] ss:$8 sps:$4 sm:$0xff]  }
  0x2c   :  { %2459 = vmatpush1.bf16.msra.mxu0 %v3386_v43  ;;  %2255 = vmatprep.subr.bf16.mxu1 %v3387_v44  ;;  %v3474_v43 = vld [vmem:[%s5117_s1 + $0x684] ss:$8 sps:$4 sm:$0xff]   ;;  %v3469_v44 = vld [vmem:[%s5117_s1 + $0x180] ss:$8 sps:$4 sm:$0xff]  }
  0x2d   :  { %2460 = vmatprep.subr.bf16.mxu0 %v3389_v45  ;;  %v3472_v45 = vld [vmem:[%s5117_s1 + $0x680] ss:$8 sps:$4 sm:$0xff]  }
  0x2f   :  { %2256 = vmatpush1.bf16.msra.mxu1 %v3391_v47  ;;  %v3480_v47 = vld [vmem:[%s5117_s1 + $0x694] ss:$8 sps:$4 sm:$0xff]  }
  0x30   :  { %2461 = vmatpush1.bf16.msra.mxu0 %v3392_v49  ;;  %2257 = vmatprep.subr.bf16.mxu1 %v3393_v51  ;;  %v3478_v49 = vld [vmem:[%s5117_s1 + $0x690] ss:$8 sps:$4 sm:$0xff]   ;;  %v3486_v51 = vld [vmem:[%s5117_s1 + $0x6a4] ss:$8 sps:$4 sm:$0xff]  }
  0x31   :  { %2462 = vmatprep.subr.bf16.mxu0 %v3395_v52  ;;  %v3481_v52 = vld [vmem:[%s5117_s1 + $0x1a0] ss:$8 sps:$4 sm:$0xff]  }
  0x33   :  { %2258 = vmatpush1.bf16.msra.mxu1 %v3397_v54  ;;  %v3489_v54 = vld [vmem:[%s5117_s1 + $0x1b4] ss:$8 sps:$4 sm:$0xff]  }
  0x34   :  { %2463 = vmatpush1.bf16.msra.mxu0 %v3398_v55  ;;  %2259 = vmatprep.subr.bf16.mxu1 %v3399_v56  ;;  %v3492_v55 = vld [vmem:[%s5117_s1 + $0x6b4] ss:$8 sps:$4 sm:$0xff]   ;;  %v3487_v56 = vld [vmem:[%s5117_s1 + $0x1b0] ss:$8 sps:$4 sm:$0xff]  }
  0x35   :  { %2464 = vmatprep.subr.bf16.mxu0 %v3401_v57  ;;  %v3490_v57 = vld [vmem:[%s5117_s1 + $0x6b0] ss:$8 sps:$4 sm:$0xff]  }
  0x37   :  { %2260 = vmatpush1.bf16.msra.mxu1 %v3403_v58  ;;  %v3495_v58 = vld [vmem:[%s5117_s1 + $0x1c4] ss:$8 sps:$4 sm:$0xff]  }
  0x38   :  { %2465 = vmatpush1.bf16.msra.mxu0 %v3404_v59  ;;  %2261 = vmatprep.subr.bf16.mxu1 %v3405_v60  ;;  %v3498_v59 = vld [vmem:[%s5117_s1 + $0x6c4] ss:$8 sps:$4 sm:$0xff]   ;;  %v3493_v60 = vld [vmem:[%s5117_s1 + $0x1c0] ss:$8 sps:$4 sm:$0xff]  }
  0x39   :  { %2466 = vmatprep.subr.bf16.mxu0 %v3407_v61  ;;  %v3496_v61 = vld [vmem:[%s5117_s1 + $0x6c0] ss:$8 sps:$4 sm:$0xff]  }
  0x3b   :  { %2262 = vmatpush1.bf16.msra.mxu1 %v3409_v62  ;;  %v3501_v62 = vld [vmem:[%s5117_s1 + $0x1d4] ss:$8 sps:$4 sm:$0xff]  }
  0x3c   :  { %2467 = vmatpush1.bf16.msra.mxu0 %v3410_v63  ;;  %2263 = vmatprep.subr.bf16.mxu1 %v3411_v0  ;;  %v3504_v63 = vld [vmem:[%s5117_s1 + $0x6d4] ss:$8 sps:$4 sm:$0xff]   ;;  %v3499_v0 = vld [vmem:[%s5117_s1 + $0x1d0] ss:$8 sps:$4 sm:$0xff]  }
  0x3d   :  { %2468 = vmatprep.subr.bf16.mxu0 %v3413_v1  ;;  %v3502_v1 = vld [vmem:[%s5117_s1 + $0x6d0] ss:$8 sps:$4 sm:$0xff]  }
  0x3f   :  { %2264 = vmatpush1.bf16.msra.mxu1 %v3415_v2  ;;  %v3507_v2 = vld [vmem:[%s5117_s1 + $0x1e4] ss:$8 sps:$4 sm:$0xff]  }
  0x40   :  { %2469 = vmatpush1.bf16.msra.mxu0 %v3416_v3  ;;  %2274 = vmatprep.subr.bf16.mxu1 %v3421_v4  ;;  %v3510_v3 = vld [vmem:[%s5117_s1 + $0x6e4] ss:$8 sps:$4 sm:$0xff]   ;;  %v3505_v4 = vld [vmem:[%s5117_s1 + $0x1e0] ss:$8 sps:$4 sm:$0xff]  }
  0x41   :  { %2479 = vmatprep.subr.bf16.mxu0 %v3426_v5  ;;  %v3508_v5 = vld [vmem:[%s5117_s1 + $0x6e0] ss:$8 sps:$4 sm:$0xff]  }
  0x42   :  { %2266 = vmatmul.mubr.bf16.vlgmr.msra.gmra.mrb[0].mxu1 %v2868_v6  ;;  %v3513_v6 = vld [vmem:[%s5117_s1 + $0x1f4] ss:$8 sps:$4 sm:$0xff]  }
  0x43   :  { %2471 = vmatmul.mubr.bf16.vlgmr.msra.gmra.mrb[0].mxu0 %v2878_v7  ;;  %2275 = vmatpush1.bf16.msra.mxu1 %v3419_v8  ;;  %v3516_v7 = vld [vmem:[%s5117_s1 + $0x6f4] ss:$8 sps:$4 sm:$0xff]   ;;  %v3511_v8 = vld [vmem:[%s5117_s1 + $0x1f0] ss:$8 sps:$4 sm:$0xff]  }
  0x44   :  { %2480 = vmatpush1.bf16.msra.mxu0 %v3424_v9  ;;  %2276 = vmatprep.subr.bf16.mxu1 %v3429_v10  ;;  %v3514_v9 = vld [vmem:[%s5117_s1 + $0x6f0] ss:$8 sps:$4 sm:$0xff]   ;;  %v3521_v10 = vld [vmem:[%s5117_s1 + $0x204] ss:$8 sps:$4 sm:$0xff]  }
  0x45   :  { %2481 = vmatprep.subr.bf16.mxu0 %v3432_v11  ;;  %2306 = vmatprep.mubr.bf16.mxu1 %v2871_v35  ;;  %v3526_v11 = vld [vmem:[%s5117_s1 + $0x704] ss:$8 sps:$4 sm:$0xff]   ;;  %v3548_v35 = vld [vmem:[%s5117_s1 + $0x740] ss:$8 sps:$4 sm:$0xff]  }
  0x46   :  { %2511 = vmatprep.mubr.bf16.mxu0 %v2881_v38  ;;  %v3551_v38 = vld [vmem:[%s5117_s1 + $0x250] ss:$8 sps:$4 sm:$0xff]  }
  0x47   :  { %2277 = vmatpush1.bf16.msra.mxu1 %v3427_v12  ;;  %v2870_v12 = vcombine.low %v4196_v32, %v4196_v32  ;;  %v3547_v32 = vld [vmem:[%s5117_s1 + $0x244] ss:$8 sps:$4 sm:$0xff]  }
  0x48   :  { %2482 = vmatpush1.bf16.msra.mxu0 %v3430_v13  ;;  %2278 = vmatprep.subr.bf16.mxu1 %v3435_v14  ;;  %v3519_v13 = vld [vmem:[%s5117_s1 + $0x200] ss:$8 sps:$4 sm:$0xff]   ;;  %v2880_v14 = vcombine.low %v4209_v36, %v4209_v36  ;;  %v3553_v36 = vld [vmem:[%s5117_s1 + $0x254] ss:$8 sps:$4 sm:$0xff]  }
  0x49   :  { %2483 = vmatprep.subr.bf16.mxu0 %v3438_v15  ;;  %v3524_v15 = vld [vmem:[%s5117_s1 + $0x700] ss:$8 sps:$4 sm:$0xff]  }
  0x4b   :  { %2279 = vmatpush1.bf16.msra.mxu1 %v3433_v16  ;;  %v3529_v16 = vld [vmem:[%s5117_s1 + $0x214] ss:$8 sps:$4 sm:$0xff]  }
  0x4c   :  { %2484 = vmatpush1.bf16.msra.mxu0 %v3436_v17  ;;  %2280 = vmatprep.subr.bf16.mxu1 %v3441_v18  ;;  %v3532_v17 = vld [vmem:[%s5117_s1 + $0x714] ss:$8 sps:$4 sm:$0xff]  }
  0x4d   :  { %2485 = vmatprep.subr.bf16.mxu0 %v3444_v19  ;;  %v4346_v18 = vld [vmem:[%s5118_s0 + $0x10] sm:$0xff] }
  0x4e   :  { %v2873_v19 = vcombine.high %v4346_v18, %v4346_v18 }
  0x4f   :  { %2281 = vmatpush1.bf16.msra.mxu1 %v3439_v20  ;;  %v4353_v20 = vld [vmem:[%s5118_s0 + $0x38] sm:$0xff] }
  0x50   :  { %2486 = vmatpush1.bf16.msra.mxu0 %v3442_v21  ;;  %2282 = vmatprep.subr.bf16.mxu1 %v3447_v22  ;;  %v3527_v21 = vld [vmem:[%s5117_s1 + $0x210] ss:$8 sps:$4 sm:$0xff]  }
  0x51   :  { %2487 = vmatprep.subr.bf16.mxu0 %v3450_v23  ;;  %v3530_v22 = vld [vmem:[%s5117_s1 + $0x710] ss:$8 sps:$4 sm:$0xff]   ;;  %v2883_v23 = vcombine.high %v4353_v20, %v4353_v20 }
  0x53   :  { %2283 = vmatpush1.bf16.msra.mxu1 %v3445_v24  ;;  %v3535_v24 = vld [vmem:[%s5117_s1 + $0x224] ss:$8 sps:$4 sm:$0xff]  }
  0x54   :  { %2488 = vmatpush1.bf16.msra.mxu0 %v3448_v25  ;;  %2284 = vmatprep.subr.bf16.mxu1 %v3453_v26  ;;  %v3538_v25 = vld [vmem:[%s5117_s1 + $0x724] ss:$8 sps:$4 sm:$0xff]   ;;  %v3533_v26 = vld [vmem:[%s5117_s1 + $0x220] ss:$8 sps:$4 sm:$0xff]  }
  0x55   :  { %2489 = vmatprep.subr.bf16.mxu0 %v3456_v27  ;;  %v3536_v27 = vld [vmem:[%s5117_s1 + $0x720] ss:$8 sps:$4 sm:$0xff]  }
  0x57   :  { %2285 = vmatpush1.bf16.msra.mxu1 %v3451_v28  ;;  %v3541_v28 = vld [vmem:[%s5117_s1 + $0x234] ss:$8 sps:$4 sm:$0xff]  }
  0x58   :  { %2490 = vmatpush1.bf16.msra.mxu0 %v3454_v29  ;;  %2286 = vmatprep.subr.bf16.mxu1 %v3459_v30  ;;  %v3544_v29 = vld [vmem:[%s5117_s1 + $0x734] ss:$8 sps:$4 sm:$0xff]   ;;  %v3539_v30 = vld [vmem:[%s5117_s1 + $0x230] ss:$8 sps:$4 sm:$0xff]  }
  0x59   :  { %2491 = vmatprep.subr.bf16.mxu0 %v3462_v31  ;;  %v3542_v31 = vld [vmem:[%s5117_s1 + $0x730] ss:$8 sps:$4 sm:$0xff]  }
  0x5b   :  { %2287 = vmatpush1.bf16.msra.mxu1 %v3457_v33  ;;  %v3550_v33 = vld [vmem:[%s5117_s1 + $0x744] ss:$8 sps:$4 sm:$0xff]  }
  0x5c   :  { %2492 = vmatpush1.bf16.msra.mxu0 %v3460_v34  ;;  %2288 = vmatprep.subr.bf16.mxu1 %v3465_v37  ;;  %v3545_v34 = vld [vmem:[%s5117_s1 + $0x240] ss:$8 sps:$4 sm:$0xff]   ;;  %v3556_v37 = vld [vmem:[%s5117_s1 + $0x754] ss:$8 sps:$4 sm:$0xff]  }
  0x5d   :  { %2493 = vmatprep.subr.bf16.mxu0 %v3468_v39  ;;  %v3554_v39 = vld [vmem:[%s5117_s1 + $0x750] ss:$8 sps:$4 sm:$0xff]  }
  0x5f   :  { %2289 = vmatpush1.bf16.msra.mxu1 %v3463_v40  ;;  %v3559_v40 = vld [vmem:[%s5117_s1 + $0x264] ss:$8 sps:$4 sm:$0xff]  }
  0x60   :  { %2494 = vmatpush1.bf16.msra.mxu0 %v3466_v41  ;;  %2290 = vmatprep.subr.bf16.mxu1 %v3471_v42  ;;  %v3562_v41 = vld [vmem:[%s5117_s1 + $0x764] ss:$8 sps:$4 sm:$0xff]   ;;  %v3557_v42 = vld [vmem:[%s5117_s1 + $0x260] ss:$8 sps:$4 sm:$0xff]  }
  0x61   :  { %2495 = vmatprep.subr.bf16.mxu0 %v3474_v43  ;;  %v3560_v43 = vld [vmem:[%s5117_s1 + $0x760] ss:$8 sps:$4 sm:$0xff]  }
  0x63   :  { %2291 = vmatpush1.bf16.msra.mxu1 %v3469_v44  ;;  %v3565_v44 = vld [vmem:[%s5117_s1 + $0x274] ss:$8 sps:$4 sm:$0xff]  }
  0x64   :  { %2496 = vmatpush1.bf16.msra.mxu0 %v3472_v45  ;;  %2292 = vmatprep.subr.bf16.mxu1 %v3477_v46  ;;  %v3568_v45 = vld [vmem:[%s5117_s1 + $0x774] ss:$8 sps:$4 sm:$0xff]   ;;  %v3563_v46 = vld [vmem:[%s5117_s1 + $0x270] ss:$8 sps:$4 sm:$0xff]  }
  0x65   :  { %2497 = vmatprep.subr.bf16.mxu0 %v3480_v47  ;;  %v3566_v47 = vld [vmem:[%s5117_s1 + $0x770] ss:$8 sps:$4 sm:$0xff]  }
  0x67   :  { %2293 = vmatpush1.bf16.msra.mxu1 %v3475_v48  ;;  %v3571_v48 = vld [vmem:[%s5117_s1 + $0x284] ss:$8 sps:$4 sm:$0xff]  }
  0x68   :  { %2498 = vmatpush1.bf16.msra.mxu0 %v3478_v49  ;;  %2294 = vmatprep.subr.bf16.mxu1 %v3483_v50  ;;  %v3574_v49 = vld [vmem:[%s5117_s1 + $0x784] ss:$8 sps:$4 sm:$0xff]   ;;  %v3569_v50 = vld [vmem:[%s5117_s1 + $0x280] ss:$8 sps:$4 sm:$0xff]  }
  0x69   :  { %2499 = vmatprep.subr.bf16.mxu0 %v3486_v51  ;;  %v3572_v51 = vld [vmem:[%s5117_s1 + $0x780] ss:$8 sps:$4 sm:$0xff]  }
  0x6b   :  { %2295 = vmatpush1.bf16.msra.mxu1 %v3481_v52  ;;  %v3577_v52 = vld [vmem:[%s5117_s1 + $0x294] ss:$8 sps:$4 sm:$0xff]  }
  0x6c   :  { %2500 = vmatpush1.bf16.msra.mxu0 %v3484_v53  ;;  %2296 = vmatprep.subr.bf16.mxu1 %v3489_v54  ;;  %v3580_v53 = vld [vmem:[%s5117_s1 + $0x794] ss:$8 sps:$4 sm:$0xff]   ;;  %v3575_v54 = vld [vmem:[%s5117_s1 + $0x290] ss:$8 sps:$4 sm:$0xff]  }
  0x6d   :  { %2501 = vmatprep.subr.bf16.mxu0 %v3492_v55  ;;  %v3578_v55 = vld [vmem:[%s5117_s1 + $0x790] ss:$8 sps:$4 sm:$0xff]  }
  0x6f   :  { %2297 = vmatpush1.bf16.msra.mxu1 %v3487_v56  ;;  %v3583_v56 = vld [vmem:[%s5117_s1 + $0x2a4] ss:$8 sps:$4 sm:$0xff]  }
  0x70   :  { %2502 = vmatpush1.bf16.msra.mxu0 %v3490_v57  ;;  %2298 = vmatprep.subr.bf16.mxu1 %v3495_v58  ;;  %v3586_v57 = vld [vmem:[%s5117_s1 + $0x7a4] ss:$8 sps:$4 sm:$0xff]   ;;  %v3581_v58 = vld [vmem:[%s5117_s1 + $0x2a0] ss:$8 sps:$4 sm:$0xff]  }
  0x71   :  { %2503 = vmatprep.subr.bf16.mxu0 %v3498_v59  ;;  %v3584_v59 = vld [vmem:[%s5117_s1 + $0x7a0] ss:$8 sps:$4 sm:$0xff]  }
  0x73   :  { %2299 = vmatpush1.bf16.msra.mxu1 %v3493_v60  ;;  %v3589_v60 = vld [vmem:[%s5117_s1 + $0x2b4] ss:$8 sps:$4 sm:$0xff]  }
  0x74   :  { %2504 = vmatpush1.bf16.msra.mxu0 %v3496_v61  ;;  %2300 = vmatprep.subr.bf16.mxu1 %v3501_v62  ;;  %v3592_v61 = vld [vmem:[%s5117_s1 + $0x7b4] ss:$8 sps:$4 sm:$0xff]   ;;  %v3587_v62 = vld [vmem:[%s5117_s1 + $0x2b0] ss:$8 sps:$4 sm:$0xff]  }
  0x75   :  { %2505 = vmatprep.subr.bf16.mxu0 %v3504_v63  ;;  %v3590_v63 = vld [vmem:[%s5117_s1 + $0x7b0] ss:$8 sps:$4 sm:$0xff]  }
  0x77   :  { %2301 = vmatpush1.bf16.msra.mxu1 %v3499_v0  ;;  %v3595_v0 = vld [vmem:[%s5117_s1 + $0x2c4] ss:$8 sps:$4 sm:$0xff]  }
  0x78   :  { %2506 = vmatpush1.bf16.msra.mxu0 %v3502_v1  ;;  %2302 = vmatprep.subr.bf16.mxu1 %v3507_v2  ;;  %v3598_v1 = vld [vmem:[%s5117_s1 + $0x7c4] ss:$8 sps:$4 sm:$0xff]   ;;  %v3593_v2 = vld [vmem:[%s5117_s1 + $0x2c0] ss:$8 sps:$4 sm:$0xff]  }
  0x79   :  { %2507 = vmatprep.subr.bf16.mxu0 %v3510_v3  ;;  %v3596_v3 = vld [vmem:[%s5117_s1 + $0x7c0] ss:$8 sps:$4 sm:$0xff]  }
  0x7b   :  { %2303 = vmatpush1.bf16.msra.mxu1 %v3505_v4  ;;  %v3601_v4 = vld [vmem:[%s5117_s1 + $0x2d4] ss:$8 sps:$4 sm:$0xff]  }
  0x7c   :  { %2508 = vmatpush1.bf16.msra.mxu0 %v3508_v5  ;;  %2304 = vmatprep.subr.bf16.mxu1 %v3513_v6  ;;  %v3604_v5 = vld [vmem:[%s5117_s1 + $0x7d4] ss:$8 sps:$4 sm:$0xff]   ;;  %v3599_v6 = vld [vmem:[%s5117_s1 + $0x2d0] ss:$8 sps:$4 sm:$0xff]  }
  0x7d   :  { %2509 = vmatprep.subr.bf16.mxu0 %v3516_v7  ;;  %v3602_v7 = vld [vmem:[%s5117_s1 + $0x7d0] ss:$8 sps:$4 sm:$0xff]  }
  0x7f   :  { %2305 = vmatpush1.bf16.msra.mxu1 %v3511_v8  ;;  %v3607_v8 = vld [vmem:[%s5117_s1 + $0x2e4] ss:$8 sps:$4 sm:$0xff]  }
  0x80   :  { %2510 = vmatpush1.bf16.msra.mxu0 %v3514_v9  ;;  %2315 = vmatprep.subr.bf16.mxu1 %v3521_v10  ;;  %v3610_v9 = vld [vmem:[%s5117_s1 + $0x7e4] ss:$8 sps:$4 sm:$0xff]   ;;  %v3605_v10 = vld [vmem:[%s5117_s1 + $0x2e0] ss:$8 sps:$4 sm:$0xff]  }
  0x81   :  { %2520 = vmatprep.subr.bf16.mxu0 %v3526_v11  ;;  %v3608_v11 = vld [vmem:[%s5117_s1 + $0x7e0] ss:$8 sps:$4 sm:$0xff]  }
  0x82   :  { %2307 = vmatmul.mubr.bf16.vlgmr.msra.gmra.mrb[0].mxu1 %v2870_v12  ;;  %v3613_v12 = vld [vmem:[%s5117_s1 + $0x2f4] ss:$8 sps:$4 sm:$0xff]  }
  0x83   :  { %2512 = vmatmul.mubr.bf16.vlgmr.msra.gmra.mrb[0].mxu0 %v2880_v14  ;;  %2316 = vmatpush1.bf16.msra.mxu1 %v3519_v13  ;;  %v3616_v13 = vld [vmem:[%s5117_s1 + $0x7f4] ss:$8 sps:$4 sm:$0xff]   ;;  %v3611_v14 = vld [vmem:[%s5117_s1 + $0x2f0] ss:$8 sps:$4 sm:$0xff]  }
  0x84   :  { %2521 = vmatpush1.bf16.msra.mxu0 %v3524_v15  ;;  %2317 = vmatprep.subr.bf16.mxu1 %v3529_v16  ;;  %v3614_v15 = vld [vmem:[%s5117_s1 + $0x7f0] ss:$8 sps:$4 sm:$0xff]   ;;  %v3621_v16 = vld [vmem:[%s5117_s1 + $0x304] ss:$8 sps:$4 sm:$0xff]  }
  0x85   :  { %2522 = vmatprep.subr.bf16.mxu0 %v3532_v17  ;;  %2347 = vmatprep.mubr.bf16.mxu1 %v2873_v19  ;;  %v3626_v17 = vld [vmem:[%s5117_s1 + $0x804] ss:$8 sps:$4 sm:$0xff]   ;;  %v3619_v19 = vld [vmem:[%s5117_s1 + $0x300] ss:$8 sps:$4 sm:$0xff]  }
  0x86   :  { %2552 = vmatprep.mubr.bf16.mxu0 %v2883_v23  ;;  %v2882_v23 = vcombine.low %v4353_v20, %v4353_v20 }
  0x87   :  { %2318 = vmatpush1.bf16.msra.mxu1 %v3527_v21  ;;  %v3624_v21 = vld [vmem:[%s5117_s1 + $0x800] ss:$8 sps:$4 sm:$0xff]  }
  0x88   :  { %2523 = vmatpush1.bf16.msra.mxu0 %v3530_v22  ;;  %2319 = vmatprep.subr.bf16.mxu1 %v3535_v24  ;;  %v2872_v22 = vcombine.low %v4346_v18, %v4346_v18  ;;  %v4550_v24 = vld [vmem:[%s5118_s0 + $0x18] sm:$0xff] }
  0x89   :  { %2524 = vmatprep.subr.bf16.mxu0 %v3538_v25  ;;  %v4555_v25 = vld [vmem:[%s5118_s0 + $0x40] sm:$0xff]  ;;  %v3632_v18 = vld [vmem:[%s5117_s1 + $0x814] ss:$8 sps:$4 sm:$0xff]   ;;  %v2875_v20 = vcombine.high %v4550_v24, %v4550_v24 }
  0x8b   :  { %2320 = vmatpush1.bf16.msra.mxu1 %v3533_v26  ;;  %v3629_v26 = vld [vmem:[%s5117_s1 + $0x314] ss:$8 sps:$4 sm:$0xff]  }
  0x8c   :  { %2525 = vmatpush1.bf16.msra.mxu0 %v3536_v27  ;;  %2321 = vmatprep.subr.bf16.mxu1 %v3541_v28  ;;  %v2885_v27 = vcombine.high %v4555_v25, %v4555_v25  ;;  %v3627_v28 = vld [vmem:[%s5117_s1 + $0x310] ss:$8 sps:$4 sm:$0xff]  }
  0x8d   :  { %2526 = vmatprep.subr.bf16.mxu0 %v3544_v29  ;;  %v3630_v29 = vld [vmem:[%s5117_s1 + $0x810] ss:$8 sps:$4 sm:$0xff]  }
  0x8f   :  { %2322 = vmatpush1.bf16.msra.mxu1 %v3539_v30  ;;  %v3635_v30 = vld [vmem:[%s5117_s1 + $0x324] ss:$8 sps:$4 sm:$0xff]  }
  0x90   :  { %2527 = vmatpush1.bf16.msra.mxu0 %v3542_v31  ;;  %2323 = vmatprep.subr.bf16.mxu1 %v3547_v32  ;;  %v3638_v31 = vld [vmem:[%s5117_s1 + $0x824] ss:$8 sps:$4 sm:$0xff]   ;;  %v3633_v32 = vld [vmem:[%s5117_s1 + $0x320] ss:$8 sps:$4 sm:$0xff]  }
  0x91   :  { %2528 = vmatprep.subr.bf16.mxu0 %v3550_v33  ;;  %v3636_v33 = vld [vmem:[%s5117_s1 + $0x820] ss:$8 sps:$4 sm:$0xff]  }
  0x93   :  { %2324 = vmatpush1.bf16.msra.mxu1 %v3545_v34  ;;  %v3641_v34 = vld [vmem:[%s5117_s1 + $0x334] ss:$8 sps:$4 sm:$0xff]  }
  0x94   :  { %2529 = vmatpush1.bf16.msra.mxu0 %v3548_v35  ;;  %2325 = vmatprep.subr.bf16.mxu1 %v3553_v36  ;;  %v3644_v35 = vld [vmem:[%s5117_s1 + $0x834] ss:$8 sps:$4 sm:$0xff]   ;;  %v3639_v36 = vld [vmem:[%s5117_s1 + $0x330] ss:$8 sps:$4 sm:$0xff]  }
  0x95   :  { %2530 = vmatprep.subr.bf16.mxu0 %v3556_v37  ;;  %v3642_v37 = vld [vmem:[%s5117_s1 + $0x830] ss:$8 sps:$4 sm:$0xff]  }
  0x97   :  { %2326 = vmatpush1.bf16.msra.mxu1 %v3551_v38  ;;  %v3647_v38 = vld [vmem:[%s5117_s1 + $0x344] ss:$8 sps:$4 sm:$0xff]  }
  0x98   :  { %2531 = vmatpush1.bf16.msra.mxu0 %v3554_v39  ;;  %2327 = vmatprep.subr.bf16.mxu1 %v3559_v40  ;;  %v3650_v39 = vld [vmem:[%s5117_s1 + $0x844] ss:$8 sps:$4 sm:$0xff]   ;;  %v3645_v40 = vld [vmem:[%s5117_s1 + $0x340] ss:$8 sps:$4 sm:$0xff]  }
  0x99   :  { %2532 = vmatprep.subr.bf16.mxu0 %v3562_v41  ;;  %v3648_v41 = vld [vmem:[%s5117_s1 + $0x840] ss:$8 sps:$4 sm:$0xff]  }
  0x9b   :  { %2328 = vmatpush1.bf16.msra.mxu1 %v3557_v42  ;;  %v3653_v42 = vld [vmem:[%s5117_s1 + $0x354] ss:$8 sps:$4 sm:$0xff]  }
  0x9c   :  { %2533 = vmatpush1.bf16.msra.mxu0 %v3560_v43  ;;  %2329 = vmatprep.subr.bf16.mxu1 %v3565_v44  ;;  %v3656_v43 = vld [vmem:[%s5117_s1 + $0x854] ss:$8 sps:$4 sm:$0xff]   ;;  %v3651_v44 = vld [vmem:[%s5117_s1 + $0x350] ss:$8 sps:$4 sm:$0xff]  }
  0x9d   :  { %2534 = vmatprep.subr.bf16.mxu0 %v3568_v45  ;;  %v3654_v45 = vld [vmem:[%s5117_s1 + $0x850] ss:$8 sps:$4 sm:$0xff]  }
  0x9f   :  { %2330 = vmatpush1.bf16.msra.mxu1 %v3563_v46  ;;  %v3659_v46 = vld [vmem:[%s5117_s1 + $0x364] ss:$8 sps:$4 sm:$0xff]  }
  0xa0   :  { %2535 = vmatpush1.bf16.msra.mxu0 %v3566_v47  ;;  %2331 = vmatprep.subr.bf16.mxu1 %v3571_v48  ;;  %v3662_v47 = vld [vmem:[%s5117_s1 + $0x864] ss:$8 sps:$4 sm:$0xff]   ;;  %v3657_v48 = vld [vmem:[%s5117_s1 + $0x360] ss:$8 sps:$4 sm:$0xff]  }
  0xa1   :  { %2536 = vmatprep.subr.bf16.mxu0 %v3574_v49  ;;  %v3660_v49 = vld [vmem:[%s5117_s1 + $0x860] ss:$8 sps:$4 sm:$0xff]  }
  0xa3   :  { %2332 = vmatpush1.bf16.msra.mxu1 %v3569_v50  ;;  %v3665_v50 = vld [vmem:[%s5117_s1 + $0x374] ss:$8 sps:$4 sm:$0xff]  }
  0xa4   :  { %2537 = vmatpush1.bf16.msra.mxu0 %v3572_v51  ;;  %2333 = vmatprep.subr.bf16.mxu1 %v3577_v52  ;;  %v3668_v51 = vld [vmem:[%s5117_s1 + $0x874] ss:$8 sps:$4 sm:$0xff]   ;;  %v3663_v52 = vld [vmem:[%s5117_s1 + $0x370] ss:$8 sps:$4 sm:$0xff]  }
  0xa5   :  { %2538 = vmatprep.subr.bf16.mxu0 %v3580_v53  ;;  %v3666_v53 = vld [vmem:[%s5117_s1 + $0x870] ss:$8 sps:$4 sm:$0xff]  }
  0xa7   :  { %2334 = vmatpush1.bf16.msra.mxu1 %v3575_v54  ;;  %v3671_v54 = vld [vmem:[%s5117_s1 + $0x384] ss:$8 sps:$4 sm:$0xff]  }
  0xa8   :  { %2539 = vmatpush1.bf16.msra.mxu0 %v3578_v55  ;;  %2335 = vmatprep.subr.bf16.mxu1 %v3583_v56  ;;  %v3674_v55 = vld [vmem:[%s5117_s1 + $0x884] ss:$8 sps:$4 sm:$0xff]   ;;  %v3669_v56 = vld [vmem:[%s5117_s1 + $0x380] ss:$8 sps:$4 sm:$0xff]  }
  0xa9   :  { %2540 = vmatprep.subr.bf16.mxu0 %v3586_v57  ;;  %v3672_v57 = vld [vmem:[%s5117_s1 + $0x880] ss:$8 sps:$4 sm:$0xff]  }
  0xab   :  { %2336 = vmatpush1.bf16.msra.mxu1 %v3581_v58  ;;  %v3677_v58 = vld [vmem:[%s5117_s1 + $0x394] ss:$8 sps:$4 sm:$0xff]  }
  0xac   :  { %2541 = vmatpush1.bf16.msra.mxu0 %v3584_v59  ;;  %2337 = vmatprep.subr.bf16.mxu1 %v3589_v60  ;;  %v3680_v59 = vld [vmem:[%s5117_s1 + $0x894] ss:$8 sps:$4 sm:$0xff]   ;;  %v3675_v60 = vld [vmem:[%s5117_s1 + $0x390] ss:$8 sps:$4 sm:$0xff]  }
  0xad   :  { %2542 = vmatprep.subr.bf16.mxu0 %v3592_v61  ;;  %v3678_v61 = vld [vmem:[%s5117_s1 + $0x890] ss:$8 sps:$4 sm:$0xff]  }
  0xaf   :  { %2338 = vmatpush1.bf16.msra.mxu1 %v3587_v62  ;;  %v3683_v62 = vld [vmem:[%s5117_s1 + $0x3a4] ss:$8 sps:$4 sm:$0xff]  }
  0xb0   :  { %2543 = vmatpush1.bf16.msra.mxu0 %v3590_v63  ;;  %2339 = vmatprep.subr.bf16.mxu1 %v3595_v0  ;;  %v3686_v63 = vld [vmem:[%s5117_s1 + $0x8a4] ss:$8 sps:$4 sm:$0xff]   ;;  %v3681_v0 = vld [vmem:[%s5117_s1 + $0x3a0] ss:$8 sps:$4 sm:$0xff]  }
  0xb1   :  { %2544 = vmatprep.subr.bf16.mxu0 %v3598_v1  ;;  %v3684_v1 = vld [vmem:[%s5117_s1 + $0x8a0] ss:$8 sps:$4 sm:$0xff]  }
  0xb3   :  { %2340 = vmatpush1.bf16.msra.mxu1 %v3593_v2  ;;  %v3689_v2 = vld [vmem:[%s5117_s1 + $0x3b4] ss:$8 sps:$4 sm:$0xff]  }
  0xb4   :  { %2545 = vmatpush1.bf16.msra.mxu0 %v3596_v3  ;;  %2341 = vmatprep.subr.bf16.mxu1 %v3601_v4  ;;  %v3692_v3 = vld [vmem:[%s5117_s1 + $0x8b4] ss:$8 sps:$4 sm:$0xff]   ;;  %v3687_v4 = vld [vmem:[%s5117_s1 + $0x3b0] ss:$8 sps:$4 sm:$0xff]  }
  0xb5   :  { %2546 = vmatprep.subr.bf16.mxu0 %v3604_v5  ;;  %v3690_v5 = vld [vmem:[%s5117_s1 + $0x8b0] ss:$8 sps:$4 sm:$0xff]  }
  0xb7   :  { %2342 = vmatpush1.bf16.msra.mxu1 %v3599_v6  ;;  %v3695_v6 = vld [vmem:[%s5117_s1 + $0x3c4] ss:$8 sps:$4 sm:$0xff]  }
  0xb8   :  { %2547 = vmatpush1.bf16.msra.mxu0 %v3602_v7  ;;  %2343 = vmatprep.subr.bf16.mxu1 %v3607_v8  ;;  %v3698_v7 = vld [vmem:[%s5117_s1 + $0x8c4] ss:$8 sps:$4 sm:$0xff]   ;;  %v3693_v8 = vld [vmem:[%s5117_s1 + $0x3c0] ss:$8 sps:$4 sm:$0xff]  }
  0xb9   :  { %2548 = vmatprep.subr.bf16.mxu0 %v3610_v9  ;;  %v3696_v9 = vld [vmem:[%s5117_s1 + $0x8c0] ss:$8 sps:$4 sm:$0xff]  }
  0xbb   :  { %2344 = vmatpush1.bf16.msra.mxu1 %v3605_v10  ;;  %v3701_v10 = vld [vmem:[%s5117_s1 + $0x3d4] ss:$8 sps:$4 sm:$0xff]  }
  0xbc   :  { %2549 = vmatpush1.bf16.msra.mxu0 %v3608_v11  ;;  %2345 = vmatprep.subr.bf16.mxu1 %v3613_v12  ;;  %v3704_v11 = vld [vmem:[%s5117_s1 + $0x8d4] ss:$8 sps:$4 sm:$0xff]   ;;  %v3699_v12 = vld [vmem:[%s5117_s1 + $0x3d0] ss:$8 sps:$4 sm:$0xff]  }
  0xbd   :  { %2550 = vmatprep.subr.bf16.mxu0 %v3616_v13  ;;  %v3702_v13 = vld [vmem:[%s5117_s1 + $0x8d0] ss:$8 sps:$4 sm:$0xff]  }
  0xbf   :  { %2346 = vmatpush1.bf16.msra.mxu1 %v3611_v14  ;;  %v3707_v14 = vld [vmem:[%s5117_s1 + $0x3e4] ss:$8 sps:$4 sm:$0xff]  }
  0xc0   :  { %2551 = vmatpush1.bf16.msra.mxu0 %v3614_v15  ;;  %2356 = vmatprep.subr.bf16.mxu1 %v3621_v16  ;;  %v3710_v15 = vld [vmem:[%s5117_s1 + $0x8e4] ss:$8 sps:$4 sm:$0xff]   ;;  %v3705_v16 = vld [vmem:[%s5117_s1 + $0x3e0] ss:$8 sps:$4 sm:$0xff]  }
  0xc1   :  { %2561 = vmatprep.subr.bf16.mxu0 %v3626_v17  ;;  %v3708_v17 = vld [vmem:[%s5117_s1 + $0x8e0] ss:$8 sps:$4 sm:$0xff]  }
  0xc2   :  { %2348 = vmatmul.mubr.bf16.vlgmr.msra.gmra.mrb[0].mxu1 %v2872_v22  ;;  %v3711_v22 = vld [vmem:[%s5117_s1 + $0x3f0] ss:$8 sps:$4 sm:$0xff]  }
  0xc3   :  { %2553 = vmatmul.mubr.bf16.vlgmr.msra.gmra.mrb[0].mxu0 %v2882_v23  ;;  %2357 = vmatpush1.bf16.msra.mxu1 %v3619_v19  ;;  %v3713_v19 = vld [vmem:[%s5117_s1 + $0x3f4] ss:$8 sps:$4 sm:$0xff]   ;;  %v3714_v23 = vld [vmem:[%s5117_s1 + $0x8f0] ss:$8 sps:$4 sm:$0xff]  }
  0xc4   :  { %2562 = vmatpush1.bf16.msra.mxu0 %v3624_v21  ;;  %2358 = vmatprep.subr.bf16.mxu1 %v3629_v26  ;;  %v3716_v21 = vld [vmem:[%s5117_s1 + $0x8f4] ss:$8 sps:$4 sm:$0xff]   ;;  %v3721_v26 = vld [vmem:[%s5117_s1 + $0x404] ss:$8 sps:$4 sm:$0xff]  }
  0xc5   :  { %2563 = vmatprep.subr.bf16.mxu0 %v3632_v18  ;;  %2388 = vmatprep.mubr.bf16.mxu1 %v2875_v20  ;;  %v3726_v18 = vld [vmem:[%s5117_s1 + $0x904] ss:$8 sps:$4 sm:$0xff]   ;;  %v2874_v20 = vcombine.low %v4550_v24, %v4550_v24  ;;  %v3724_v24 = vld [vmem:[%s5117_s1 + $0x900] ss:$8 sps:$4 sm:$0xff]  }
  0xc6   :  { %2593 = vmatprep.mubr.bf16.mxu0 %v2885_v27  ;;  %v2884_v27 = vcombine.low %v4555_v25, %v4555_v25  ;;  %v3729_v25 = vld [vmem:[%s5117_s1 + $0x414] ss:$8 sps:$4 sm:$0xff]  }
  0xc7   :  { %2359 = vmatpush1.bf16.msra.mxu1 %v3627_v28  ;;  %v4754_v28 = vld [vmem:[%s5118_s0 + $0x20] sm:$0xff] }
  0xc8   :  { %2564 = vmatpush1.bf16.msra.mxu0 %v3630_v29  ;;  %2360 = vmatprep.subr.bf16.mxu1 %v3635_v30  ;;  %v4759_v29 = vld [vmem:[%s5118_s0 + $0x48] sm:$0xff] }
  0xc9   :  { %2565 = vmatprep.subr.bf16.mxu0 %v3638_v31  ;;  %v3719_v30 = vld [vmem:[%s5117_s1 + $0x400] ss:$8 sps:$4 sm:$0xff]   ;;  %v3732_v31 = vld [vmem:[%s5117_s1 + $0x914] ss:$8 sps:$4 sm:$0xff]  }
  0xcb   :  { %2361 = vmatpush1.bf16.msra.mxu1 %v3633_v32  ;;  %v2877_v32 = vcombine.high %v4754_v28, %v4754_v28 }
  0xcc   :  { %2566 = vmatpush1.bf16.msra.mxu0 %v3636_v33  ;;  %2362 = vmatprep.subr.bf16.mxu1 %v3641_v34  ;;  %v2887_v33 = vcombine.high %v4759_v29, %v4759_v29  ;;  %v3727_v34 = vld [vmem:[%s5117_s1 + $0x410] ss:$8 sps:$4 sm:$0xff]  }
  0xcd   :  { %2567 = vmatprep.subr.bf16.mxu0 %v3644_v35  ;;  %v3730_v35 = vld [vmem:[%s5117_s1 + $0x910] ss:$8 sps:$4 sm:$0xff]  }
  0xcf   :  { %2363 = vmatpush1.bf16.msra.mxu1 %v3639_v36  ;;  %v3735_v36 = vld [vmem:[%s5117_s1 + $0x424] ss:$8 sps:$4 sm:$0xff]  }
  0xd0   :  { %2568 = vmatpush1.bf16.msra.mxu0 %v3642_v37  ;;  %2364 = vmatprep.subr.bf16.mxu1 %v3647_v38  ;;  %v3738_v37 = vld [vmem:[%s5117_s1 + $0x924] ss:$8 sps:$4 sm:$0xff]   ;;  %v3733_v38 = vld [vmem:[%s5117_s1 + $0x420] ss:$8 sps:$4 sm:$0xff]  }
  0xd1   :  { %2569 = vmatprep.subr.bf16.mxu0 %v3650_v39  ;;  %v3736_v39 = vld [vmem:[%s5117_s1 + $0x920] ss:$8 sps:$4 sm:$0xff]  }
  0xd3   :  { %2365 = vmatpush1.bf16.msra.mxu1 %v3645_v40  ;;  %v3741_v40 = vld [vmem:[%s5117_s1 + $0x434] ss:$8 sps:$4 sm:$0xff]  }
  0xd4   :  { %2570 = vmatpush1.bf16.msra.mxu0 %v3648_v41  ;;  %2366 = vmatprep.subr.bf16.mxu1 %v3653_v42  ;;  %v3744_v41 = vld [vmem:[%s5117_s1 + $0x934] ss:$8 sps:$4 sm:$0xff]   ;;  %v3739_v42 = vld [vmem:[%s5117_s1 + $0x430] ss:$8 sps:$4 sm:$0xff]  }
  0xd5   :  { %2571 = vmatprep.subr.bf16.mxu0 %v3656_v43  ;;  %v3742_v43 = vld [vmem:[%s5117_s1 + $0x930] ss:$8 sps:$4 sm:$0xff]  }
  0xd7   :  { %2367 = vmatpush1.bf16.msra.mxu1 %v3651_v44  ;;  %v3747_v44 = vld [vmem:[%s5117_s1 + $0x444] ss:$8 sps:$4 sm:$0xff]  }
  0xd8   :  { %2572 = vmatpush1.bf16.msra.mxu0 %v3654_v45  ;;  %2368 = vmatprep.subr.bf16.mxu1 %v3659_v46  ;;  %v3750_v45 = vld [vmem:[%s5117_s1 + $0x944] ss:$8 sps:$4 sm:$0xff]   ;;  %v3745_v46 = vld [vmem:[%s5117_s1 + $0x440] ss:$8 sps:$4 sm:$0xff]  }
  0xd9   :  { %2573 = vmatprep.subr.bf16.mxu0 %v3662_v47  ;;  %v3748_v47 = vld [vmem:[%s5117_s1 + $0x940] ss:$8 sps:$4 sm:$0xff]  }
  0xdb   :  { %2369 = vmatpush1.bf16.msra.mxu1 %v3657_v48  ;;  %v3753_v48 = vld [vmem:[%s5117_s1 + $0x454] ss:$8 sps:$4 sm:$0xff]  }
  0xdc   :  { %2574 = vmatpush1.bf16.msra.mxu0 %v3660_v49  ;;  %2370 = vmatprep.subr.bf16.mxu1 %v3665_v50  ;;  %v3756_v49 = vld [vmem:[%s5117_s1 + $0x954] ss:$8 sps:$4 sm:$0xff]   ;;  %v3751_v50 = vld [vmem:[%s5117_s1 + $0x450] ss:$8 sps:$4 sm:$0xff]  }
  0xdd   :  { %2575 = vmatprep.subr.bf16.mxu0 %v3668_v51  ;;  %v3754_v51 = vld [vmem:[%s5117_s1 + $0x950] ss:$8 sps:$4 sm:$0xff]  }
  0xdf   :  { %2371 = vmatpush1.bf16.msra.mxu1 %v3663_v52  ;;  %v3759_v52 = vld [vmem:[%s5117_s1 + $0x464] ss:$8 sps:$4 sm:$0xff]  }
  0xe0   :  { %2576 = vmatpush1.bf16.msra.mxu0 %v3666_v53  ;;  %2372 = vmatprep.subr.bf16.mxu1 %v3671_v54  ;;  %v3762_v53 = vld [vmem:[%s5117_s1 + $0x964] ss:$8 sps:$4 sm:$0xff]   ;;  %v3757_v54 = vld [vmem:[%s5117_s1 + $0x460] ss:$8 sps:$4 sm:$0xff]  }
  0xe1   :  { %2577 = vmatprep.subr.bf16.mxu0 %v3674_v55  ;;  %v3760_v55 = vld [vmem:[%s5117_s1 + $0x960] ss:$8 sps:$4 sm:$0xff]  }
  0xe3   :  { %2373 = vmatpush1.bf16.msra.mxu1 %v3669_v56  ;;  %v3765_v56 = vld [vmem:[%s5117_s1 + $0x474] ss:$8 sps:$4 sm:$0xff]  }
  0xe4   :  { %2578 = vmatpush1.bf16.msra.mxu0 %v3672_v57  ;;  %2374 = vmatprep.subr.bf16.mxu1 %v3677_v58  ;;  %v3768_v57 = vld [vmem:[%s5117_s1 + $0x974] ss:$8 sps:$4 sm:$0xff]   ;;  %v3763_v58 = vld [vmem:[%s5117_s1 + $0x470] ss:$8 sps:$4 sm:$0xff]  }
  0xe5   :  { %2579 = vmatprep.subr.bf16.mxu0 %v3680_v59  ;;  %v3766_v59 = vld [vmem:[%s5117_s1 + $0x970] ss:$8 sps:$4 sm:$0xff]  }
  0xe7   :  { %2375 = vmatpush1.bf16.msra.mxu1 %v3675_v60  ;;  %v3771_v60 = vld [vmem:[%s5117_s1 + $0x484] ss:$8 sps:$4 sm:$0xff]  }
  0xe8   :  { %2580 = vmatpush1.bf16.msra.mxu0 %v3678_v61  ;;  %2376 = vmatprep.subr.bf16.mxu1 %v3683_v62  ;;  %v3774_v61 = vld [vmem:[%s5117_s1 + $0x984] ss:$8 sps:$4 sm:$0xff]   ;;  %v3769_v62 = vld [vmem:[%s5117_s1 + $0x480] ss:$8 sps:$4 sm:$0xff]  }
  0xe9   :  { %2581 = vmatprep.subr.bf16.mxu0 %v3686_v63  ;;  %v3772_v63 = vld [vmem:[%s5117_s1 + $0x980] ss:$8 sps:$4 sm:$0xff]  }
  0xeb   :  { %2377 = vmatpush1.bf16.msra.mxu1 %v3681_v0  ;;  %v3777_v0 = vld [vmem:[%s5117_s1 + $0x494] ss:$8 sps:$4 sm:$0xff]  }
  0xec   :  { %2582 = vmatpush1.bf16.msra.mxu0 %v3684_v1  ;;  %2378 = vmatprep.subr.bf16.mxu1 %v3689_v2  ;;  %v3780_v1 = vld [vmem:[%s5117_s1 + $0x994] ss:$8 sps:$4 sm:$0xff]   ;;  %v3775_v2 = vld [vmem:[%s5117_s1 + $0x490] ss:$8 sps:$4 sm:$0xff]  }
  0xed   :  { %2583 = vmatprep.subr.bf16.mxu0 %v3692_v3  ;;  %v3778_v3 = vld [vmem:[%s5117_s1 + $0x990] ss:$8 sps:$4 sm:$0xff]  }
  0xef   :  { %2379 = vmatpush1.bf16.msra.mxu1 %v3687_v4  ;;  %v3783_v4 = vld [vmem:[%s5117_s1 + $0x4a4] ss:$8 sps:$4 sm:$0xff]  }
  0xf0   :  { %2584 = vmatpush1.bf16.msra.mxu0 %v3690_v5  ;;  %2380 = vmatprep.subr.bf16.mxu1 %v3695_v6  ;;  %v3786_v5 = vld [vmem:[%s5117_s1 + $0x9a4] ss:$8 sps:$4 sm:$0xff]   ;;  %v3781_v6 = vld [vmem:[%s5117_s1 + $0x4a0] ss:$8 sps:$4 sm:$0xff]  }
  0xf1   :  { %2585 = vmatprep.subr.bf16.mxu0 %v3698_v7  ;;  %v3784_v7 = vld [vmem:[%s5117_s1 + $0x9a0] ss:$8 sps:$4 sm:$0xff]  }
  0xf3   :  { %2381 = vmatpush1.bf16.msra.mxu1 %v3693_v8  ;;  %v3789_v8 = vld [vmem:[%s5117_s1 + $0x4b4] ss:$8 sps:$4 sm:$0xff]  }
  0xf4   :  { %2586 = vmatpush1.bf16.msra.mxu0 %v3696_v9  ;;  %2382 = vmatprep.subr.bf16.mxu1 %v3701_v10  ;;  %v3792_v9 = vld [vmem:[%s5117_s1 + $0x9b4] ss:$8 sps:$4 sm:$0xff]   ;;  %v3787_v10 = vld [vmem:[%s5117_s1 + $0x4b0] ss:$8 sps:$4 sm:$0xff]  }
  0xf5   :  { %2587 = vmatprep.subr.bf16.mxu0 %v3704_v11  ;;  %v3790_v11 = vld [vmem:[%s5117_s1 + $0x9b0] ss:$8 sps:$4 sm:$0xff]  }
  0xf7   :  { %2383 = vmatpush1.bf16.msra.mxu1 %v3699_v12  ;;  %v3795_v12 = vld [vmem:[%s5117_s1 + $0x4c4] ss:$8 sps:$4 sm:$0xff]  }
  0xf8   :  { %2588 = vmatpush1.bf16.msra.mxu0 %v3702_v13  ;;  %2384 = vmatprep.subr.bf16.mxu1 %v3707_v14  ;;  %v3798_v13 = vld [vmem:[%s5117_s1 + $0x9c4] ss:$8 sps:$4 sm:$0xff]   ;;  %v3793_v14 = vld [vmem:[%s5117_s1 + $0x4c0] ss:$8 sps:$4 sm:$0xff]  }
  0xf9   :  { %2589 = vmatprep.subr.bf16.mxu0 %v3710_v15  ;;  %v3796_v15 = vld [vmem:[%s5117_s1 + $0x9c0] ss:$8 sps:$4 sm:$0xff]  }
  0xfb   :  { %2385 = vmatpush1.bf16.msra.mxu1 %v3705_v16  ;;  %v3801_v16 = vld [vmem:[%s5117_s1 + $0x4d4] ss:$8 sps:$4 sm:$0xff]  }
  0xfc   :  { %2590 = vmatpush1.bf16.msra.mxu0 %v3708_v17  ;;  %2386 = vmatprep.subr.bf16.mxu1 %v3713_v19  ;;  %v3804_v17 = vld [vmem:[%s5117_s1 + $0x9d4] ss:$8 sps:$4 sm:$0xff]   ;;  %v3799_v19 = vld [vmem:[%s5117_s1 + $0x4d0] ss:$8 sps:$4 sm:$0xff]  }
  0xfd   :  { %2591 = vmatprep.subr.bf16.mxu0 %v3716_v21  ;;  %v3802_v21 = vld [vmem:[%s5117_s1 + $0x9d0] ss:$8 sps:$4 sm:$0xff]  }
  0xff   :  { %2387 = vmatpush1.bf16.msra.mxu1 %v3711_v22  ;;  %v3807_v22 = vld [vmem:[%s5117_s1 + $0x4e4] ss:$8 sps:$4 sm:$0xff]  }
 0x100   :  { %2592 = vmatpush1.bf16.msra.mxu0 %v3714_v23  ;;  %2397 = vmatprep.subr.bf16.mxu1 %v3721_v26  ;;  %v3810_v23 = vld [vmem:[%s5117_s1 + $0x9e4] ss:$8 sps:$4 sm:$0xff]   ;;  %v3805_v26 = vld [vmem:[%s5117_s1 + $0x4e0] ss:$8 sps:$4 sm:$0xff]  }
 0x101   :  { %2602 = vmatprep.subr.bf16.mxu0 %v3726_v18  ;;  %v3808_v18 = vld [vmem:[%s5117_s1 + $0x9e0] ss:$8 sps:$4 sm:$0xff]  }
 0x102   :  { %2389 = vmatmul.mubr.bf16.vlgmr.msra.gmra.mrb[0].mxu1 %v2874_v20  ;;  %v3813_v20 = vld [vmem:[%s5117_s1 + $0x4f4] ss:$8 sps:$4 sm:$0xff]  }
 0x103   :  { %2594 = vmatmul.mubr.bf16.vlgmr.msra.gmra.mrb[0].mxu0 %v2884_v27  ;;  %2398 = vmatpush1.bf16.msra.mxu1 %v3719_v30  ;;  %v3816_v27 = vld [vmem:[%s5117_s1 + $0x9f4] ss:$8 sps:$4 sm:$0xff]   ;;  %v3811_v30 = vld [vmem:[%s5117_s1 + $0x4f0] ss:$8 sps:$4 sm:$0xff]  }
 0x104   :  { %2603 = vmatpush1.bf16.msra.mxu0 %v3724_v24  ;;  %2399 = vmatprep.subr.bf16.mxu1 %v3729_v25  ;;  %v3814_v24 = vld [vmem:[%s5117_s1 + $0x9f0] ss:$8 sps:$4 sm:$0xff]   ;;  %v3823_v25 = vld [vmem:[%s5117_s1 + $0xa04] ss:$8 sps:$4 sm:$0xff]  }
 0x105   :  { %2604 = vmatprep.subr.bf16.mxu0 %v3732_v31  ;;  %2429 = vmatprep.mubr.bf16.mxu1 %v2877_v32  ;;  %v4957_v31 = vld [vmem:[%s5118_s0 + $0x50] sm:$0xff]  ;;  %v2876_v32 = vcombine.low %v4754_v28, %v4754_v28 }
 0x106   :  { %2634 = vmatprep.mubr.bf16.mxu0 %v2887_v33  ;;  %v2886_v33 = vcombine.low %v4759_v29, %v4759_v29  ;;  %v3824_v28 = vld [vmem:[%s5117_s1 + $0xa10] ss:$8 sps:$4 sm:$0xff]   ;;  %v3829_v29 = vld [vmem:[%s5117_s1 + $0xa24] ss:$8 sps:$4 sm:$0xff]  }
 0x107   :  { %2400 = vmatpush1.bf16.msra.mxu1 %v3727_v34  ;;  %v3821_v34 = vld [vmem:[%s5117_s1 + $0xa00] ss:$8 sps:$4 sm:$0xff]  }
 0x108   :  { %2605 = vmatpush1.bf16.msra.mxu0 %v3730_v35  ;;  %2401 = vmatprep.subr.bf16.mxu1 %v3735_v36  ;;  %v2889_v35 = vcombine.high %v4957_v31, %v4957_v31  ;;  %v3826_v36 = vld [vmem:[%s5117_s1 + $0xa14] ss:$8 sps:$4 sm:$0xff]  }
 0x109   :  { %2606 = vmatprep.subr.bf16.mxu0 %v3738_v37  ;;  %v3827_v37 = vld [vmem:[%s5117_s1 + $0xa20] ss:$8 sps:$4 sm:$0xff]  }
 0x10b   :  { %2402 = vmatpush1.bf16.msra.mxu1 %v3733_v38  ;;  %v3832_v38 = vld [vmem:[%s5117_s1 + $0xa34] ss:$8 sps:$4 sm:$0xff]  }
 0x10c   :  { %2607 = vmatpush1.bf16.msra.mxu0 %v3736_v39  ;;  %2403 = vmatprep.subr.bf16.mxu1 %v3741_v40  ;;  %v3830_v39 = vld [vmem:[%s5117_s1 + $0xa30] ss:$8 sps:$4 sm:$0xff]   ;;  %v3835_v40 = vld [vmem:[%s5117_s1 + $0xa44] ss:$8 sps:$4 sm:$0xff]  }
 0x10d   :  { %2608 = vmatprep.subr.bf16.mxu0 %v3744_v41  ;;  %v3833_v41 = vld [vmem:[%s5117_s1 + $0xa40] ss:$8 sps:$4 sm:$0xff]  }
 0x10f   :  { %2404 = vmatpush1.bf16.msra.mxu1 %v3739_v42  ;;  %v3838_v42 = vld [vmem:[%s5117_s1 + $0xa54] ss:$8 sps:$4 sm:$0xff]  }
 0x110   :  { %2609 = vmatpush1.bf16.msra.mxu0 %v3742_v43  ;;  %2405 = vmatprep.subr.bf16.mxu1 %v3747_v44  ;;  %v3836_v43 = vld [vmem:[%s5117_s1 + $0xa50] ss:$8 sps:$4 sm:$0xff]   ;;  %v3841_v44 = vld [vmem:[%s5117_s1 + $0xa64] ss:$8 sps:$4 sm:$0xff]  }
 0x111   :  { %2610 = vmatprep.subr.bf16.mxu0 %v3750_v45  ;;  %v3839_v45 = vld [vmem:[%s5117_s1 + $0xa60] ss:$8 sps:$4 sm:$0xff]  }
 0x113   :  { %2406 = vmatpush1.bf16.msra.mxu1 %v3745_v46  ;;  %v3844_v46 = vld [vmem:[%s5117_s1 + $0xa74] ss:$8 sps:$4 sm:$0xff]  }
 0x114   :  { %2611 = vmatpush1.bf16.msra.mxu0 %v3748_v47  ;;  %2407 = vmatprep.subr.bf16.mxu1 %v3753_v48  ;;  %v3842_v47 = vld [vmem:[%s5117_s1 + $0xa70] ss:$8 sps:$4 sm:$0xff]   ;;  %v3847_v48 = vld [vmem:[%s5117_s1 + $0xa84] ss:$8 sps:$4 sm:$0xff]  }
 0x115   :  { %2612 = vmatprep.subr.bf16.mxu0 %v3756_v49  ;;  %v3845_v49 = vld [vmem:[%s5117_s1 + $0xa80] ss:$8 sps:$4 sm:$0xff]  }
 0x117   :  { %2408 = vmatpush1.bf16.msra.mxu1 %v3751_v50  ;;  %v3850_v50 = vld [vmem:[%s5117_s1 + $0xa94] ss:$8 sps:$4 sm:$0xff]  }
 0x118   :  { %2613 = vmatpush1.bf16.msra.mxu0 %v3754_v51  ;;  %2409 = vmatprep.subr.bf16.mxu1 %v3759_v52  ;;  %v3848_v51 = vld [vmem:[%s5117_s1 + $0xa90] ss:$8 sps:$4 sm:$0xff]   ;;  %v3853_v52 = vld [vmem:[%s5117_s1 + $0xaa4] ss:$8 sps:$4 sm:$0xff]  }
 0x119   :  { %2614 = vmatprep.subr.bf16.mxu0 %v3762_v53  ;;  %v3851_v53 = vld [vmem:[%s5117_s1 + $0xaa0] ss:$8 sps:$4 sm:$0xff]  }
 0x11b   :  { %2410 = vmatpush1.bf16.msra.mxu1 %v3757_v54  ;;  %v3856_v54 = vld [vmem:[%s5117_s1 + $0xab4] ss:$8 sps:$4 sm:$0xff]  }
 0x11c   :  { %2615 = vmatpush1.bf16.msra.mxu0 %v3760_v55  ;;  %2411 = vmatprep.subr.bf16.mxu1 %v3765_v56  ;;  %v3854_v55 = vld [vmem:[%s5117_s1 + $0xab0] ss:$8 sps:$4 sm:$0xff]   ;;  %v3859_v56 = vld [vmem:[%s5117_s1 + $0xac4] ss:$8 sps:$4 sm:$0xff]  }
 0x11d   :  { %2616 = vmatprep.subr.bf16.mxu0 %v3768_v57  ;;  %v3857_v57 = vld [vmem:[%s5117_s1 + $0xac0] ss:$8 sps:$4 sm:$0xff]  }
 0x11f   :  { %2412 = vmatpush1.bf16.msra.mxu1 %v3763_v58  ;;  %v3862_v58 = vld [vmem:[%s5117_s1 + $0xad4] ss:$8 sps:$4 sm:$0xff]  }
 0x120   :  { %2617 = vmatpush1.bf16.msra.mxu0 %v3766_v59  ;;  %2413 = vmatprep.subr.bf16.mxu1 %v3771_v60  ;;  %v3860_v59 = vld [vmem:[%s5117_s1 + $0xad0] ss:$8 sps:$4 sm:$0xff]   ;;  %v3865_v60 = vld [vmem:[%s5117_s1 + $0xae4] ss:$8 sps:$4 sm:$0xff]  }
 0x121   :  { %2618 = vmatprep.subr.bf16.mxu0 %v3774_v61  ;;  %v3863_v61 = vld [vmem:[%s5117_s1 + $0xae0] ss:$8 sps:$4 sm:$0xff]  }
 0x123   :  { %2414 = vmatpush1.bf16.msra.mxu1 %v3769_v62  ;;  %v3868_v62 = vld [vmem:[%s5117_s1 + $0xaf4] ss:$8 sps:$4 sm:$0xff]  }
 0x124   :  { %2619 = vmatpush1.bf16.msra.mxu0 %v3772_v63  ;;  %2415 = vmatprep.subr.bf16.mxu1 %v3777_v0  ;;  %v3866_v63 = vld [vmem:[%s5117_s1 + $0xaf0] ss:$8 sps:$4 sm:$0xff]   ;;  %v2888_v0 = vcombine.low %v4957_v31, %v4957_v31 }
 0x125   :  { %2620 = vmatprep.subr.bf16.mxu0 %v3780_v1  ;;  %v3871_v1 = vld [vmem:[%s5119_s3 + $0x40] sm:$0xff]  }
 0x127   :  { %2416 = vmatpush1.bf16.msra.mxu1 %v3775_v2  ;;  %v3872_v2 = vld [vmem:[%s5119_s3] sm:$0xff]  }
 0x128   :  { %2621 = vmatpush1.bf16.msra.mxu0 %v3778_v3  ;;  %2417 = vmatprep.subr.bf16.mxu1 %v3783_v4  ;;  %v3873_v3 = vld [vmem:[%s5119_s3 + $0x48] sm:$0xff]  }
 0x129   :  { %2622 = vmatprep.subr.bf16.mxu0 %v3786_v5  ;;  %v3874_v4 = vld [vmem:[%s5119_s3 + $0x8] sm:$0xff]   ;;  %v3875_v5 = vld [vmem:[%s5119_s3 + $0x50] sm:$0xff]  }
 0x12b   :  { %2418 = vmatpush1.bf16.msra.mxu1 %v3781_v6  ;;  %v3876_v6 = vld [vmem:[%s5119_s3 + $0x10] sm:$0xff]  }
 0x12c   :  { %2623 = vmatpush1.bf16.msra.mxu0 %v3784_v7  ;;  %2419 = vmatprep.subr.bf16.mxu1 %v3789_v8  ;;  %v3877_v7 = vld [vmem:[%s5119_s3 + $0x58] sm:$0xff]  }
 0x12d   :  { %2624 = vmatprep.subr.bf16.mxu0 %v3792_v9  ;;  %v3878_v8 = vld [vmem:[%s5119_s3 + $0x18] sm:$0xff]   ;;  %v3879_v9 = vld [vmem:[%s5119_s3 + $0x60] sm:$0xff]  }
 0x12f   :  { %2420 = vmatpush1.bf16.msra.mxu1 %v3787_v10  ;;  %v3880_v10 = vld [vmem:[%s5119_s3 + $0x20] sm:$0xff]  }
 0x130   :  { %2625 = vmatpush1.bf16.msra.mxu0 %v3790_v11  ;;  %2421 = vmatprep.subr.bf16.mxu1 %v3795_v12  ;;  %v3881_v11 = vld [vmem:[%s5119_s3 + $0x68] sm:$0xff]  }
 0x131   :  { %2626 = vmatprep.subr.bf16.mxu0 %v3798_v13  ;;  %v3882_v12 = vld [vmem:[%s5119_s3 + $0x28] sm:$0xff]   ;;  %v3883_v13 = vld [vmem:[%s5119_s3 + $0x70] sm:$0xff]  }
 0x133   :  { %2422 = vmatpush1.bf16.msra.mxu1 %v3793_v14  ;;  %v3884_v14 = vld [vmem:[%s5119_s3 + $0x30] sm:$0xff]  }
 0x134   :  { %2627 = vmatpush1.bf16.msra.mxu0 %v3796_v15  ;;  %2423 = vmatprep.subr.bf16.mxu1 %v3801_v16  ;;  %v3885_v15 = vld [vmem:[%s5119_s3 + $0x78] sm:$0xff]  }
 0x135   :  { %2628 = vmatprep.subr.bf16.mxu0 %v3804_v17  ;;  %v3886_v16 = vld [vmem:[%s5119_s3 + $0x38] sm:$0xff]  }
 0x137   :  { %2424 = vmatpush1.bf16.msra.mxu1 %v3799_v19 }
 0x138   :  { %2629 = vmatpush1.bf16.msra.mxu0 %v3802_v21  ;;  %2425 = vmatprep.subr.bf16.mxu1 %v3807_v22 }
 0x139   :  { %2630 = vmatprep.subr.bf16.mxu0 %v3810_v23  ;;  %v386_v23 = vlaneseq }
 0x13b   :  { %2426 = vmatpush1.bf16.msra.mxu1 %v3805_v26  ;;  %v387_v26 = vshrl.u32 %v386_v23, 7 }
 0x13c   :  { %2631 = vmatpush1.bf16.msra.mxu0 %v3808_v18  ;;  %2427 = vmatprep.subr.bf16.mxu1 %v3813_v20  ;;  %v384_v20 = vld [vmem:[%s5120_s2] sm:$0x3] }
 0x13d   :  { %2632 = vmatprep.subr.bf16.mxu0 %v3816_v27  ;;  %v388_v18 = vsub.s32 0, %v387_v26  ;;  %v392_v27 = vsub.s32 1, %v387_v26 }
 0x13f   :  { %2428 = vmatpush1.bf16.msra.mxu1 %v3811_v30  ;;  %v389_v30 = vrot.slane %v384_v20, %v388_v18 }
 0x140   :  { %2633 = vmatpush1.bf16.msra.mxu0 %v3814_v24  ;;  %3259 = vmatprep.subr.bf16.mxu1 %v3871_v1  ;;  %v393_v24 = vrot.slane %v384_v20, %v392_v27 }
 0x141   :  { %2643 = vmatprep.subr.bf16.mxu0 %v3823_v25 }
 0x142   :  { %2430 = vmatmul.mubr.bf16.vlgmr.msra.gmra.mrb[0].mxu1 %v2876_v32 }
 0x143   :  { %2635 = vmatmul.mubr.bf16.vlgmr.msra.gmra.mrb[0].mxu0 %v2886_v33  ;;  %3260 = vmatpush3.bf16.msra.mxu1 %v3872_v2 }
 0x144   :  { %2644 = vmatpush1.bf16.msra.mxu0 %v3821_v34  ;;  %2675 = vmatprep.mubr.bf16.mxu0 %v2889_v35 }
 0x145   :  { %2645 = vmatprep.subr.bf16.mxu0 %v3826_v36  ;;  %3261 = vmatprep.subr.bf16.mxu1 %v3873_v3 }
 0x147   :  { %3262 = vmatpush3.bf16.msra.mxu1 %v3874_v4 }
 0x148   :  { %2646 = vmatpush1.bf16.msra.mxu0 %v3824_v28  ;;  %3263 = vmatprep.subr.bf16.mxu1 %v3875_v5 }
 0x149   :  { %2647 = vmatprep.subr.bf16.mxu0 %v3829_v29 }
 0x14b   :  { %3264 = vmatpush3.bf16.msra.mxu1 %v3876_v6 }
 0x14c   :  { %2648 = vmatpush1.bf16.msra.mxu0 %v3827_v37  ;;  %3265 = vmatprep.subr.bf16.mxu1 %v3877_v7 }
 0x14d   :  { %2649 = vmatprep.subr.bf16.mxu0 %v3832_v38 }
 0x14f   :  { %3266 = vmatpush3.bf16.msra.mxu1 %v3878_v8 }
 0x150   :  { %2650 = vmatpush1.bf16.msra.mxu0 %v3830_v39  ;;  %3267 = vmatprep.subr.bf16.mxu1 %v3879_v9 }
 0x151   :  { %2651 = vmatprep.subr.bf16.mxu0 %v3835_v40 }
 0x153   :  { %3268 = vmatpush3.bf16.msra.mxu1 %v3880_v10 }
 0x154   :  { %2652 = vmatpush1.bf16.msra.mxu0 %v3833_v41  ;;  %3269 = vmatprep.subr.bf16.mxu1 %v3881_v11  ;;  %v3242_v41 = vld [vmem:[%s5121_s4] ss:$0 sm:$0xff] }
 0x155   :  { %2653 = vmatprep.subr.bf16.mxu0 %v3838_v42 }
 0x157   :  { %3270 = vmatpush3.bf16.msra.mxu1 %v3882_v12 }
 0x158   :  { %2654 = vmatpush1.bf16.msra.mxu0 %v3836_v43  ;;  %3271 = vmatprep.subr.bf16.mxu1 %v3883_v13 }
 0x159   :  { %2655 = vmatprep.subr.bf16.mxu0 %v3841_v44 }
 0x15b   :  { %3272 = vmatpush3.bf16.msra.mxu1 %v3884_v14 }
 0x15c   :  { %2656 = vmatpush1.bf16.msra.mxu0 %v3839_v45  ;;  %3273 = vmatprep.subr.bf16.mxu1 %v3885_v15 }
 0x15d   :  { %2657 = vmatprep.subr.bf16.mxu0 %v3844_v46 }
 0x15f   :  { %3274 = vmatpush3.bf16.msra.mxu1 %v3886_v16 }
 0x160   :  { %2658 = vmatpush1.bf16.msra.mxu0 %v3842_v47 }
 0x161   :  { %2659 = vmatprep.subr.bf16.mxu0 %v3847_v48 }
 0x164   :  { %2660 = vmatpush1.bf16.msra.mxu0 %v3845_v49 }
 0x165   :  { %2661 = vmatprep.subr.bf16.mxu0 %v3850_v50 }
 0x168   :  { %2662 = vmatpush1.bf16.msra.mxu0 %v3848_v51 }
 0x169   :  { %2663 = vmatprep.subr.bf16.mxu0 %v3853_v52 }
 0x16c   :  { %2664 = vmatpush1.bf16.msra.mxu0 %v3851_v53 }
 0x16d   :  { %2665 = vmatprep.subr.bf16.mxu0 %v3856_v54 }
 0x170   :  { %2666 = vmatpush1.bf16.msra.mxu0 %v3854_v55 }
 0x171   :  { %2667 = vmatprep.subr.bf16.mxu0 %v3859_v56 }
 0x174   :  { %2668 = vmatpush1.bf16.msra.mxu0 %v3857_v57 }
 0x175   :  { %2669 = vmatprep.subr.bf16.mxu0 %v3862_v58 }
 0x178   :  { %2670 = vmatpush1.bf16.msra.mxu0 %v3860_v59 }
 0x179   :  { %2671 = vmatprep.subr.bf16.mxu0 %v3865_v60 }
 0x17c   :  { %2672 = vmatpush1.bf16.msra.mxu0 %v3863_v61 }
 0x17d   :  { %2673 = vmatprep.subr.bf16.mxu0 %v3868_v62 }
 0x180   :  { %2674 = vmatpush1.bf16.msra.mxu0 %v3866_v63 }
 0x183   :  { %2676 = vmatmul.mubr.bf16.vlgmr.msra.gmra.mrb[0].mxu0 %v2888_v0 }
 0x215   :  { %v2431_v17 = vpop.f32.mrb[0].mxu1 }
 0x216   :  { %v2433_v19 = vpop.f32.mrb[1].mxu1  ;;  %v3281_v25 = vadd.f32 %v2431_v17, %v389_v30 }
 0x217   :  { %v2435_v21 = vpop.f32.mrb[2].mxu1  ;;  %v3283_v31 = vadd.f32 %v2433_v19, %v393_v24 }
 0x218   :  { %v2436_v22 = vpop.f32.mrb[3].mxu1 }
 0x256   :  { %v2677_v32 = vpop.f32.mrb[0].mxu0 }
 0x257   :  { %v3282_v33 = vadd.f32 %v3281_v25, %v2677_v32  ;;  %v2679_v34 = vpop.f32.mrb[1].mxu0 }
 0x258   :  { %v3284_v35 = vadd.f32 %v3283_v31, %v2679_v34  ;;  %v2681_v36 = vpop.f32.mrb[2].mxu0 }
 0x259   :  { %v2684_v28 = vmax.f32 %v3282_v33, 0.0  ;;  %v2682_v29 = vpop.f32.mrb[3].mxu0 }
 0x25a   :  { %v2685_v37 = vmax.f32 %v3284_v35, 0.0 }
 0x25b   :  { %v2686_v39 = vpack.c.bf16 %v2684_v28, %v2684_v28 }
 0x25c   :  { %v2687_v38 = vpack.c.bf16 %v2685_v37, %v2685_v37 }
 0x25e   :  { %2855 = vmatprep.mubr.bf16.mxu1 %v2687_v38 }
 0x25f   :  { %2856 = vmatmul.mubr.bf16.vlgmr.msra.gmra.mrb[4].mxu1 %v2686_v39 }
 0x332   :  { %v3275_v40 = vpop.f32.mrb[4].mxu1 }
 0x333   :  { %v3276_v42 = vpop.f32.mrb[5].mxu1 }
 0x334   :  { %v3277_v43 = vadd.f32 %v3276_v42, %v3275_v40  ;;  %v3278_v44 = vpop.f32.mrb[6].mxu1 }
 0x335   :  { %v3279_v45 = vpop.f32.mrb[7].mxu1 }
 0x336   :  { %v2858_v46 = vadd.f32 %v3277_v43, %v3242_v41 }
 0x338   :  { %2863 = vst [vmem:[%s5122_s5] sm:$0xff] %v2858_v46 }

// kernel: qnetwork_forward.2
= control target key start
LH: loop header
LB: loop body
LE: loop exit
PB: predicated region body
PF: predicated region fallthrough
CT: control target
= control target key end

     0   :  { %vm9336_vm0 = vcmask 257024   ;;  %s16440_s1 = inlined_call_operand.vmem [shape: bf16[1664,256], index: 1, kind: input, shape index: {}]   ;;  %s16441_s0 = inlined_call_operand.vmem [shape: bf16[704,1664], index: 0, kind: input, shape index: {}]   ;;  %s16442_s3 = inlined_call_operand.vmem [shape: bf16[256,32], index: 3, kind: input, shape index: {}]   ;;  %s16443_s2 = inlined_call_operand.vmem [shape: f32[1,256], index: 2, kind: input, shape index: {}]   ;;  %s16444_s4 = inlined_call_operand.vmem [shape: f32[1,32], index: 4, kind: input, shape index: {}]   ;;  %s16445_s5 = inlined_call_operand.vmem [shape: bf16[704,32], index: 5, kind: output, shape index: {}]  }
   0x1   :  { %v11635_v0 = vld [vmem:[%s16440_s1 + $0x4] ss:$8 sps:$4 sm:$0xff]   ;;  %v11639_v2 = vld [vmem:[%s16440_s1] ss:$8 sps:$4 sm:$0xff]   ;;  %v11641_v4 = vld [vmem:[%s16440_s1 + $0x14] ss:$8 sps:$4 sm:$0xff]  }
   0x2   :  { %v11637_v1 = vld [vmem:[%s16440_s1 + $0x304] ss:$8 sps:$4 sm:$0xff]   ;;  %4801 = vmatprep.subr.bf16.mxu1 %v11635_v0  ;;  %v11640_v3 = vld [vmem:[%s16440_s1 + $0x300] ss:$8 sps:$4 sm:$0xff]   ;;  %v11643_v5 = vld [vmem:[%s16440_s1 + $0x314] ss:$8 sps:$4 sm:$0xff]  }
   0x3   :  { %6220 = vmatprep.subr.bf16.mxu0 %v11637_v1  ;;  %4802 = vmatpush1.bf16.msra.mxu1 %v11639_v2  ;;  %v11645_v6 = vld [vmem:[%s16440_s1 + $0x10] ss:$8 sps:$4 sm:$0xff]   ;;  %v11647_v8 = vld [vmem:[%s16440_s1 + $0x24] ss:$8 sps:$4 sm:$0xff]   ;;  %v11651_v10 = vld [vmem:[%s16440_s1 + $0x20] ss:$8 sps:$4 sm:$0xff]  }
   0x4   :  { %6221 = vmatpush1.bf16.msra.mxu0 %v11640_v3  ;;  %4803 = vmatprep.subr.bf16.mxu1 %v11641_v4  ;;  %v11646_v7 = vld [vmem:[%s16440_s1 + $0x310] ss:$8 sps:$4 sm:$0xff]   ;;  %v11649_v9 = vld [vmem:[%s16440_s1 + $0x324] ss:$8 sps:$4 sm:$0xff]   ;;  %v11652_v11 = vld [vmem:[%s16440_s1 + $0x320] ss:$8 sps:$4 sm:$0xff]  }
   0x5   :  { %6222 = vmatprep.subr.bf16.mxu0 %v11643_v5  ;;  %v11653_v12 = vld [vmem:[%s16440_s1 + $0x34] ss:$8 sps:$4 sm:$0xff]   ;;  %v11657_v14 = vld [vmem:[%s16440_s1 + $0x30] ss:$8 sps:$4 sm:$0xff]   ;;  %v11659_v16 = vld [vmem:[%s16440_s1 + $0x44] ss:$8 sps:$4 sm:$0xff]  }
   0x6   :  { %v11655_v13 = vld [vmem:[%s16440_s1 + $0x334] ss:$8 sps:$4 sm:$0xff]   ;;  %v11658_v15 = vld [vmem:[%s16440_s1 + $0x330] ss:$8 sps:$4 sm:$0xff]   ;;  %v11661_v17 = vld [vmem:[%s16440_s1 + $0x344] ss:$8 sps:$4 sm:$0xff]  }
   0x7   :  { %4804 = vmatpush1.bf16.msra.mxu1 %v11645_v6  ;;  %v11663_v18 = vld [vmem:[%s16440_s1 + $0x40] ss:$8 sps:$4 sm:$0xff]   ;;  %v11665_v20 = vld [vmem:[%s16440_s1 + $0x54] ss:$8 sps:$4 sm:$0xff]   ;;  %v11669_v22 = vld [vmem:[%s16440_s1 + $0x50] ss:$8 sps:$4 sm:$0xff]  }
   0x8   :  { %6223 = vmatpush1.bf16.msra.mxu0 %v11646_v7  ;;  %4805 = vmatprep.subr.bf16.mxu1 %v11647_v8  ;;  %v11664_v19 = vld [vmem:[%s16440_s1 + $0x340] ss:$8 sps:$4 sm:$0xff]   ;;  %v11667_v21 = vld [vmem:[%s16440_s1 + $0x354] ss:$8 sps:$4 sm:$0xff]   ;;  %v11670_v23 = vld [vmem:[%s16440_s1 + $0x350] ss:$8 sps:$4 sm:$0xff]  }
   0x9   :  { %6224 = vmatprep.subr.bf16.mxu0 %v11649_v9  ;;  %v11671_v24 = vld [vmem:[%s16440_s1 + $0x64] ss:$8 sps:$4 sm:$0xff]   ;;  %v11675_v26 = vld [vmem:[%s16440_s1 + $0x60] ss:$8 sps:$4 sm:$0xff]   ;;  %v11677_v28 = vld [vmem:[%s16440_s1 + $0x74] ss:$8 sps:$4 sm:$0xff]  }
   0xa   :  { %v11673_v25 = vld [vmem:[%s16440_s1 + $0x364] ss:$8 sps:$4 sm:$0xff]   ;;  %v11676_v27 = vld [vmem:[%s16440_s1 + $0x360] ss:$8 sps:$4 sm:$0xff]   ;;  %v11679_v29 = vld [vmem:[%s16440_s1 + $0x374] ss:$8 sps:$4 sm:$0xff]  }
   0xb   :  { %4806 = vmatpush1.bf16.msra.mxu1 %v11651_v10  ;;  %v11681_v30 = vld [vmem:[%s16440_s1 + $0x70] ss:$8 sps:$4 sm:$0xff]   ;;  %v11683_v32 = vld [vmem:[%s16440_s1 + $0x84] ss:$8 sps:$4 sm:$0xff]   ;;  %v11687_v34 = vld [vmem:[%s16440_s1 + $0x80] ss:$8 sps:$4 sm:$0xff]  }
   0xc   :  { %6225 = vmatpush1.bf16.msra.mxu0 %v11652_v11  ;;  %4807 = vmatprep.subr.bf16.mxu1 %v11653_v12  ;;  %v11682_v31 = vld [vmem:[%s16440_s1 + $0x370] ss:$8 sps:$4 sm:$0xff]   ;;  %v11685_v33 = vld [vmem:[%s16440_s1 + $0x384] ss:$8 sps:$4 sm:$0xff]   ;;  %v11688_v35 = vld [vmem:[%s16440_s1 + $0x380] ss:$8 sps:$4 sm:$0xff]  }
   0xd   :  { %6226 = vmatprep.subr.bf16.mxu0 %v11655_v13  ;;  %v11689_v36 = vld [vmem:[%s16440_s1 + $0x94] ss:$8 sps:$4 sm:$0xff]   ;;  %v11693_v38 = vld [vmem:[%s16440_s1 + $0x90] ss:$8 sps:$4 sm:$0xff]   ;;  %v11695_v40 = vld [vmem:[%s16440_s1 + $0xa4] ss:$8 sps:$4 sm:$0xff]  }
   0xe   :  { %v11691_v37 = vld [vmem:[%s16440_s1 + $0x394] ss:$8 sps:$4 sm:$0xff]   ;;  %v11694_v39 = vld [vmem:[%s16440_s1 + $0x390] ss:$8 sps:$4 sm:$0xff]   ;;  %v11697_v41 = vld [vmem:[%s16440_s1 + $0x3a4] ss:$8 sps:$4 sm:$0xff]  }
   0xf   :  { %4808 = vmatpush1.bf16.msra.mxu1 %v11657_v14  ;;  %v11699_v42 = vld [vmem:[%s16440_s1 + $0xa0] ss:$8 sps:$4 sm:$0xff]   ;;  %v11701_v44 = vld [vmem:[%s16440_s1 + $0xb4] ss:$8 sps:$4 sm:$0xff]   ;;  %v11705_v46 = vld [vmem:[%s16440_s1 + $0xb0] ss:$8 sps:$4 sm:$0xff]  }
  0x10   :  { %6227 = vmatpush1.bf16.msra.mxu0 %v11658_v15  ;;  %4809 = vmatprep.subr.bf16.mxu1 %v11659_v16  ;;  %v11700_v43 = vld [vmem:[%s16440_s1 + $0x3a0] ss:$8 sps:$4 sm:$0xff]   ;;  %v11703_v45 = vld [vmem:[%s16440_s1 + $0x3b4] ss:$8 sps:$4 sm:$0xff]   ;;  %v11706_v47 = vld [vmem:[%s16440_s1 + $0x3b0] ss:$8 sps:$4 sm:$0xff]  }
  0x11   :  { %6228 = vmatprep.subr.bf16.mxu0 %v11661_v17  ;;  %v11707_v48 = vld [vmem:[%s16440_s1 + $0xc4] ss:$8 sps:$4 sm:$0xff]   ;;  %v11736_v51 = vld [vmem:[%s16441_s0 + $0x1c] ss:$52 sps:$4 sm:$0xff]   ;;  %v11711_v52 = vld [vmem:[%s16440_s1 + $0xc0] ss:$8 sps:$4 sm:$0xff]  }
  0x12   :  { %v11733_v49 = vld [vmem:[%s16441_s0 + $0x4] ss:$52 sps:$4 sm:$0xff]   ;;  %6252 = vmatprep.mubr.bf16.mxu0 %v11736_v51  ;;  %v11712_v53 = vld [vmem:[%s16440_s1 + $0x3c0] ss:$8 sps:$4 sm:$0xff]   ;;  %v11713_v54 = vld [vmem:[%s16440_s1 + $0xd4] ss:$8 sps:$4 sm:$0xff]  }
  0x13   :  { %4810 = vmatpush1.bf16.msra.mxu1 %v11663_v18  ;;  %v11709_v50 = vld [vmem:[%s16440_s1 + $0x3c4] ss:$8 sps:$4 sm:$0xff]   ;;  %4833 = vmatprep.mubr.bf16.mxu1 %v11733_v49  ;;  %v11715_v55 = vld [vmem:[%s16440_s1 + $0x3d4] ss:$8 sps:$4 sm:$0xff]   ;;  %v11717_v56 = vld [vmem:[%s16440_s1 + $0xd0] ss:$8 sps:$4 sm:$0xff]  }
  0x14   :  { %6229 = vmatpush1.bf16.msra.mxu0 %v11664_v19  ;;  %4811 = vmatprep.subr.bf16.mxu1 %v11665_v20  ;;  %v11718_v57 = vld [vmem:[%s16440_s1 + $0x3d0] ss:$8 sps:$4 sm:$0xff]   ;;  %v11719_v58 = vld [vmem:[%s16440_s1 + $0xe4] ss:$8 sps:$4 sm:$0xff]   ;;  %v11723_v60 = vld [vmem:[%s16440_s1 + $0xe0] ss:$8 sps:$4 sm:$0xff]  }
  0x15   :  { %6230 = vmatprep.subr.bf16.mxu0 %v11667_v21  ;;  %v11721_v59 = vld [vmem:[%s16440_s1 + $0x3e4] ss:$8 sps:$4 sm:$0xff]   ;;  %v11724_v61 = vld [vmem:[%s16440_s1 + $0x3e0] ss:$8 sps:$4 sm:$0xff]   ;;  %v11725_v62 = vld [vmem:[%s16440_s1 + $0xf4] ss:$8 sps:$4 sm:$0xff]  }
  0x16   :  { %v11727_v63 = vld [vmem:[%s16440_s1 + $0x3f4] ss:$8 sps:$4 sm:$0xff]   ;;  %v11729_v0 = vld [vmem:[%s16440_s1 + $0xf0] ss:$8 sps:$4 sm:$0xff]   ;;  %v11739_v2 = vld [vmem:[%s16440_s1 + $0x404] ss:$8 sps:$4 sm:$0xff]  }
  0x17   :  { %4812 = vmatpush1.bf16.msra.mxu1 %v11669_v22  ;;  %v11730_v1 = vld [vmem:[%s16440_s1 + $0x3f0] ss:$8 sps:$4 sm:$0xff]   ;;  %v11731_v3 = vld [vmem:[%s16441_s0] ss:$52 sps:$4 sm:$0xff]   ;;  %v11775_v10 = vld [vmem:[%s16440_s1 + $0x424] ss:$8 sps:$4 sm:$0xff]  }
  0x18   :  { %6231 = vmatpush1.bf16.msra.mxu0 %v11670_v23  ;;  %4813 = vmatprep.subr.bf16.mxu1 %v11671_v24  ;;  %v11734_v4 = vld [vmem:[%s16441_s0 + $0x18] ss:$52 sps:$4 sm:$0xff]   ;;  %v11737_v5 = vld [vmem:[%s16440_s1 + $0x400] ss:$8 sps:$4 sm:$0xff]   ;;  %v11754_v8 = vld [vmem:[%s16440_s1 + $0x414] ss:$8 sps:$4 sm:$0xff]  }
  0x19   :  { %6232 = vmatprep.subr.bf16.mxu0 %v11673_v25  ;;  %v11740_v6 = vld [vmem:[%s16441_s0 + $0x6c] ss:$52 sps:$4 sm:$0xff]   ;;  %v11742_v7 = vld [vmem:[%s16441_s0 + $0x84] ss:$52 sps:$4 sm:$0xff]   ;;  %v11744_v11 = vld [vmem:[%s16441_s0 + $0x68] ss:$52 sps:$4 sm:$0xff]  }
  0x1a   :  { %v11752_v9 = vld [vmem:[%s16440_s1 + $0x410] ss:$8 sps:$4 sm:$0xff]   ;;  %v11745_v12 = vld [vmem:[%s16441_s0 + $0x80] ss:$52 sps:$4 sm:$0xff]   ;;  %v11751_v19 = vld [vmem:[%s16441_s0 + $0xe8] ss:$52 sps:$4 sm:$0xff]  }
  0x1b   :  { %4814 = vmatpush1.bf16.msra.mxu1 %v11675_v26  ;;  %v11746_v13 = vld [vmem:[%s16441_s0 + $0xd4] ss:$52 sps:$4 sm:$0xff]   ;;  %v11748_v14 = vld [vmem:[%s16441_s0 + $0xec] ss:$52 sps:$4 sm:$0xff]   ;;  %v11794_v17 = vld [vmem:[%s16440_s1 + $0x430] ss:$8 sps:$4 sm:$0xff]  }
  0x1c   :  { %6233 = vmatpush1.bf16.msra.mxu0 %v11676_v27  ;;  %4815 = vmatprep.subr.bf16.mxu1 %v11677_v28  ;;  %v11773_v15 = vld [vmem:[%s16440_s1 + $0x420] ss:$8 sps:$4 sm:$0xff]   ;;  %v11796_v16 = vld [vmem:[%s16440_s1 + $0x434] ss:$8 sps:$4 sm:$0xff]   ;;  %v11750_v18 = vld [vmem:[%s16441_s0 + $0xd0] ss:$52 sps:$4 sm:$0xff]  }
  0x1d   :  { %6234 = vmatprep.subr.bf16.mxu0 %v11679_v29  ;;  %v11755_v20 = vld [vmem:[%s16441_s0 + $0x13c] ss:$52 sps:$4 sm:$0xff]   ;;  %v11757_v21 = vld [vmem:[%s16441_s0 + $0x154] ss:$52 sps:$4 sm:$0xff]   ;;  %v11817_v22 = vld [vmem:[%s16440_s1 + $0x444] ss:$8 sps:$4 sm:$0xff]  }
  0x1e   :  { %v11815_v23 = vld [vmem:[%s16440_s1 + $0x440] ss:$8 sps:$4 sm:$0xff]   ;;  %v11759_v24 = vld [vmem:[%s16441_s0 + $0x138] ss:$52 sps:$4 sm:$0xff]   ;;  %v11760_v25 = vld [vmem:[%s16441_s0 + $0x150] ss:$52 sps:$4 sm:$0xff]  }
  0x1f   :  { %4816 = vmatpush1.bf16.msra.mxu1 %v11681_v30  ;;  %v11761_v26 = vld [vmem:[%s16441_s0 + $0x1a4] ss:$52 sps:$4 sm:$0xff]   ;;  %v11832_v28 = vld [vmem:[%s16440_s1 + $0x454] ss:$8 sps:$4 sm:$0xff]  }
  0x20   :  { %6235 = vmatpush1.bf16.msra.mxu0 %v11682_v31  ;;  %4817 = vmatprep.subr.bf16.mxu1 %v11683_v32  ;;  %v11830_v27 = vld [vmem:[%s16440_s1 + $0x450] ss:$8 sps:$4 sm:$0xff]   ;;  %v11765_v30 = vld [vmem:[%s16441_s0 + $0x1a0] ss:$52 sps:$4 sm:$0xff]  }
  0x21   :  { %6236 = vmatprep.subr.bf16.mxu0 %v11685_v33  ;;  %v11763_v29 = vld [vmem:[%s16441_s0 + $0x1bc] ss:$52 sps:$4 sm:$0xff]   ;;  %v11766_v31 = vld [vmem:[%s16441_s0 + $0x1b8] ss:$52 sps:$4 sm:$0xff]  }
  0x22   :  { %v11767_v32 = vld [vmem:[%s16441_s0 + $0x20c] ss:$52 sps:$4 sm:$0xff]   ;;  %v11769_v33 = vld [vmem:[%s16441_s0 + $0x224] ss:$52 sps:$4 sm:$0xff]   ;;  %v11790_v51 = vld [vmem:[%s16441_s0 + $0x35c] ss:$52 sps:$4 sm:$0xff]  }
  0x23   :  { %4818 = vmatpush1.bf16.msra.mxu1 %v11687_v34  ;;  %v11853_v34 = vld [vmem:[%s16440_s1 + $0x464] ss:$8 sps:$4 sm:$0xff]  }
  0x24   :  { %6237 = vmatpush1.bf16.msra.mxu0 %v11688_v35  ;;  %4819 = vmatprep.subr.bf16.mxu1 %v11689_v36  ;;  %v11851_v35 = vld [vmem:[%s16440_s1 + $0x460] ss:$8 sps:$4 sm:$0xff]   ;;  %v11787_v49 = vld [vmem:[%s16441_s0 + $0x2f0] ss:$52 sps:$4 sm:$0xff]  }
  0x25   :  { %6238 = vmatprep.subr.bf16.mxu0 %v11691_v37  ;;  %v11771_v36 = vld [vmem:[%s16441_s0 + $0x208] ss:$52 sps:$4 sm:$0xff]   ;;  %v11772_v37 = vld [vmem:[%s16441_s0 + $0x220] ss:$52 sps:$4 sm:$0xff]  }
  0x27   :  { %4820 = vmatpush1.bf16.msra.mxu1 %v11693_v38  ;;  %v11776_v38 = vld [vmem:[%s16441_s0 + $0x274] ss:$52 sps:$4 sm:$0xff]  }
  0x28   :  { %6239 = vmatpush1.bf16.msra.mxu0 %v11694_v39  ;;  %4821 = vmatprep.subr.bf16.mxu1 %v11695_v40  ;;  %v11778_v39 = vld [vmem:[%s16441_s0 + $0x28c] ss:$52 sps:$4 sm:$0xff]   ;;  %v11872_v40 = vld [vmem:[%s16440_s1 + $0x470] ss:$8 sps:$4 sm:$0xff]  }
  0x29   :  { %6240 = vmatprep.subr.bf16.mxu0 %v11697_v41  ;;  %v11874_v41 = vld [vmem:[%s16440_s1 + $0x474] ss:$8 sps:$4 sm:$0xff]  }
  0x2b   :  { %4822 = vmatpush1.bf16.msra.mxu1 %v11699_v42  ;;  %v11780_v42 = vld [vmem:[%s16441_s0 + $0x270] ss:$52 sps:$4 sm:$0xff]  }
  0x2c   :  { %6241 = vmatpush1.bf16.msra.mxu0 %v11700_v43  ;;  %4823 = vmatprep.subr.bf16.mxu1 %v11701_v44  ;;  %v11781_v43 = vld [vmem:[%s16441_s0 + $0x288] ss:$52 sps:$4 sm:$0xff]  }
  0x2d   :  { %6242 = vmatprep.subr.bf16.mxu0 %v11703_v45  ;;  %v11782_v44 = vld [vmem:[%s16441_s0 + $0x2dc] ss:$52 sps:$4 sm:$0xff]   ;;  %v11784_v45 = vld [vmem:[%s16441_s0 + $0x2f4] ss:$52 sps:$4 sm:$0xff]  }
  0x2f   :  { %4824 = vmatpush1.bf16.msra.mxu1 %v11705_v46  ;;  %v11893_v46 = vld [vmem:[%s16440_s1 + $0x480] ss:$8 sps:$4 sm:$0xff]  }
  0x30   :  { %6243 = vmatpush1.bf16.msra.mxu0 %v11706_v47  ;;  %4825 = vmatprep.subr.bf16.mxu1 %v11707_v48  ;;  %v11895_v47 = vld [vmem:[%s16440_s1 + $0x484] ss:$8 sps:$4 sm:$0xff]  }
  0x31   :  { %6244 = vmatprep.subr.bf16.mxu0 %v11709_v50  ;;  %v11786_v48 = vld [vmem:[%s16441_s0 + $0x2d8] ss:$52 sps:$4 sm:$0xff]  }
  0x32   :  { %v11788_v50 = vld [vmem:[%s16441_s0 + $0x344] ss:$52 sps:$4 sm:$0xff]  }
  0x33   :  { %4826 = vmatpush1.bf16.msra.mxu1 %v11711_v52  ;;  %v11792_v52 = vld [vmem:[%s16441_s0 + $0x340] ss:$52 sps:$4 sm:$0xff]  }
  0x34   :  { %6245 = vmatpush1.bf16.msra.mxu0 %v11712_v53  ;;  %4827 = vmatprep.subr.bf16.mxu1 %v11713_v54  ;;  %v11793_v53 = vld [vmem:[%s16441_s0 + $0x358] ss:$52 sps:$4 sm:$0xff]  }
  0x35   :  { %6246 = vmatprep.subr.bf16.mxu0 %v11715_v55  ;;  %v11797_v54 = vld [vmem:[%s16441_s0 + $0x3ac] ss:$52 sps:$4 sm:$0xff]   ;;  %v11799_v55 = vld [vmem:[%s16441_s0 + $0x3c4] ss:$52 sps:$4 sm:$0xff]  }
  0x37   :  { %4828 = vmatpush1.bf16.msra.mxu1 %v11717_v56  ;;  %v11908_v56 = vld [vmem:[%s16440_s1 + $0x490] ss:$8 sps:$4 sm:$0xff]  }
  0x38   :  { %6247 = vmatpush1.bf16.msra.mxu0 %v11718_v57  ;;  %4829 = vmatprep.subr.bf16.mxu1 %v11719_v58  ;;  %v11910_v57 = vld [vmem:[%s16440_s1 + $0x494] ss:$8 sps:$4 sm:$0xff]  }
  0x39   :  { %6248 = vmatprep.subr.bf16.mxu0 %v11721_v59  ;;  %v11801_v58 = vld [vmem:[%s16441_s0 + $0x3a8] ss:$52 sps:$4 sm:$0xff]   ;;  %v11802_v59 = vld [vmem:[%s16441_s0 + $0x3c0] ss:$52 sps:$4 sm:$0xff]  }
  0x3b   :  { %4830 = vmatpush1.bf16.msra.mxu1 %v11723_v60  ;;  %v11803_v60 = vld [vmem:[%s16441_s0 + $0x414] ss:$52 sps:$4 sm:$0xff]  }
  0x3c   :  { %6249 = vmatpush1.bf16.msra.mxu0 %v11724_v61  ;;  %4831 = vmatprep.subr.bf16.mxu1 %v11725_v62  ;;  %v11805_v61 = vld [vmem:[%s16441_s0 + $0x42c] ss:$52 sps:$4 sm:$0xff]   ;;  %v11807_v62 = vld [vmem:[%s16441_s0 + $0x410] ss:$52 sps:$4 sm:$0xff]  }
  0x3d   :  { %6250 = vmatprep.subr.bf16.mxu0 %v11727_v63  ;;  %v11808_v63 = vld [vmem:[%s16441_s0 + $0x428] ss:$52 sps:$4 sm:$0xff]  }
  0x3f   :  { %4832 = vmatpush1.bf16.msra.mxu1 %v11729_v0  ;;  %v11809_v0 = vld [vmem:[%s16441_s0 + $0x47c] ss:$52 sps:$4 sm:$0xff]  }
  0x40   :  { %6251 = vmatpush1.bf16.msra.mxu0 %v11730_v1  ;;  %v11811_v1 = vld [vmem:[%s16441_s0 + $0x494] ss:$52 sps:$4 sm:$0xff]  }
  0x41   :  { %6693 = vmatprep.subr.bf16.mxu0 %v11739_v2  ;;  %v11813_v2 = vld [vmem:[%s16441_s0 + $0x478] ss:$52 sps:$4 sm:$0xff]  }
  0x42   :  { %4834 = vmatmul.mubr.bf16.vlgmr.msra.gmra.mrb[0].mxu1 %v11731_v3  ;;  %v11814_v3 = vld [vmem:[%s16441_s0 + $0x490] ss:$52 sps:$4 sm:$0xff]  }
  0x43   :  { %6253 = vmatmul.mubr.bf16.vlgmr.msra.gmra.mrb[0].mxu0 %v11734_v4  ;;  %4843 = vmatprep.mubr.bf16.mxu1 %v11740_v6  ;;  %v11818_v4 = vld [vmem:[%s16441_s0 + $0x4e4] ss:$52 sps:$4 sm:$0xff]   ;;  %v11929_v6 = vld [vmem:[%s16440_s1 + $0x4a0] ss:$8 sps:$4 sm:$0xff]  }
  0x44   :  { %6694 = vmatpush1.bf16.msra.mxu0 %v11737_v5  ;;  %6262 = vmatprep.mubr.bf16.mxu0 %v11742_v7  ;;  %v11820_v5 = vld [vmem:[%s16441_s0 + $0x4fc] ss:$52 sps:$4 sm:$0xff]   ;;  %v11931_v7 = vld [vmem:[%s16440_s1 + $0x4a4] ss:$8 sps:$4 sm:$0xff]  }
  0x45   :  { %6695 = vmatprep.subr.bf16.mxu0 %v11754_v8  ;;  %v11932_v8 = vld [vmem:[%s16440_s1 + $0x100] ss:$8 sps:$4 sm:$0xff]  }
  0x48   :  { %6696 = vmatpush1.bf16.msra.mxu0 %v11752_v9  ;;  %v11934_v9 = vld [vmem:[%s16440_s1 + $0x104] ss:$8 sps:$4 sm:$0xff]  }
  0x49   :  { %6697 = vmatprep.subr.bf16.mxu0 %v11775_v10  ;;  %v11822_v10 = vld [vmem:[%s16441_s0 + $0x4e0] ss:$52 sps:$4 sm:$0xff]   ;;  %5274 = vmatprep.subr.bf16.mxu1 %v11934_v9  ;;  %v12022_v9 = vld [vmem:[%s16440_s1 + $0x150] ss:$8 sps:$4 sm:$0xff]  }
  0x4a   :  { %4844 = vmatmul.mubr.bf16.gmra.mrb[4].mxu1 %v11744_v11  ;;  %v11823_v11 = vld [vmem:[%s16441_s0 + $0x4f8] ss:$52 sps:$4 sm:$0xff]  }
  0x4b   :  { %6263 = vmatmul.mubr.bf16.gmra.mrb[4].mxu0 %v11745_v12  ;;  %4853 = vmatprep.mubr.bf16.mxu1 %v11746_v13  ;;  %v11824_v12 = vld [vmem:[%s16441_s0 + $0x54c] ss:$52 sps:$4 sm:$0xff]   ;;  %v11826_v13 = vld [vmem:[%s16441_s0 + $0x564] ss:$52 sps:$4 sm:$0xff]  }
  0x4c   :  { %6272 = vmatprep.mubr.bf16.mxu0 %v11748_v14  ;;  %6698 = vmatpush1.bf16.msra.mxu0 %v11773_v15  ;;  %v11828_v14 = vld [vmem:[%s16441_s0 + $0x548] ss:$52 sps:$4 sm:$0xff]   ;;  %v11829_v15 = vld [vmem:[%s16441_s0 + $0x560] ss:$52 sps:$4 sm:$0xff]  }
  0x4d   :  { %6699 = vmatprep.subr.bf16.mxu0 %v11796_v16  ;;  %5275 = vmatpush1.bf16.msra.mxu1 %v11932_v8  ;;  %v11833_v16 = vld [vmem:[%s16441_s0 + $0x5b4] ss:$52 sps:$4 sm:$0xff]   ;;  %v11901_v8 = vld [vmem:[%s16441_s0 + $0x970] ss:$52 sps:$4 sm:$0xff]  }
  0x50   :  { %6700 = vmatpush1.bf16.msra.mxu0 %v11794_v17  ;;  %v11835_v17 = vld [vmem:[%s16441_s0 + $0x5cc] ss:$52 sps:$4 sm:$0xff]  }
  0x51   :  { %6701 = vmatprep.subr.bf16.mxu0 %v11817_v22  ;;  %v11953_v22 = vld [vmem:[%s16440_s1 + $0x4b0] ss:$8 sps:$4 sm:$0xff]  }
  0x52   :  { %4854 = vmatmul.mubr.bf16.gmra.mrb[8].mxu1 %v11750_v18  ;;  %v11837_v18 = vld [vmem:[%s16441_s0 + $0x5b0] ss:$52 sps:$4 sm:$0xff]  }
  0x53   :  { %6273 = vmatmul.mubr.bf16.gmra.mrb[8].mxu0 %v11751_v19  ;;  %4863 = vmatprep.mubr.bf16.mxu1 %v11755_v20  ;;  %v11838_v19 = vld [vmem:[%s16441_s0 + $0x5c8] ss:$52 sps:$4 sm:$0xff]  }
  0x54   :  { %6282 = vmatprep.mubr.bf16.mxu0 %v11757_v21  ;;  %6702 = vmatpush1.bf16.msra.mxu0 %v11815_v23  ;;  %v11839_v20 = vld [vmem:[%s16441_s0 + $0x61c] ss:$52 sps:$4 sm:$0xff]   ;;  %v11841_v21 = vld [vmem:[%s16441_s0 + $0x634] ss:$52 sps:$4 sm:$0xff]  }
  0x55   :  { %6703 = vmatprep.subr.bf16.mxu0 %v11832_v28  ;;  %v11955_v23 = vld [vmem:[%s16440_s1 + $0x4b4] ss:$8 sps:$4 sm:$0xff]   ;;  %v11845_v28 = vld [vmem:[%s16441_s0 + $0x684] ss:$52 sps:$4 sm:$0xff]  }
  0x58   :  { %6704 = vmatpush1.bf16.msra.mxu0 %v11830_v27  ;;  %v11844_v27 = vld [vmem:[%s16441_s0 + $0x630] ss:$52 sps:$4 sm:$0xff]  }
  0x59   :  { %6705 = vmatprep.subr.bf16.mxu0 %v11853_v34  ;;  %v11858_v34 = vld [vmem:[%s16441_s0 + $0x6e8] ss:$52 sps:$4 sm:$0xff]  }
  0x5a   :  { %4864 = vmatmul.mubr.bf16.gmra.mrb[12].mxu1 %v11759_v24  ;;  %v11956_v24 = vld [vmem:[%s16440_s1 + $0x110] ss:$8 sps:$4 sm:$0xff]  }
  0x5b   :  { %6283 = vmatmul.mubr.bf16.gmra.mrb[12].mxu0 %v11760_v25  ;;  %4873 = vmatprep.mubr.bf16.mxu1 %v11761_v26  ;;  %v11958_v25 = vld [vmem:[%s16440_s1 + $0x114] ss:$8 sps:$4 sm:$0xff]   ;;  %v11843_v26 = vld [vmem:[%s16441_s0 + $0x618] ss:$52 sps:$4 sm:$0xff]  }
  0x5c   :  { %6292 = vmatprep.mubr.bf16.mxu0 %v11763_v29  ;;  %6706 = vmatpush1.bf16.msra.mxu0 %v11851_v35  ;;  %v11847_v29 = vld [vmem:[%s16441_s0 + $0x69c] ss:$52 sps:$4 sm:$0xff]   ;;  %v11859_v35 = vld [vmem:[%s16441_s0 + $0x700] ss:$52 sps:$4 sm:$0xff]  }
  0x5d   :  { %6707 = vmatprep.subr.bf16.mxu0 %v11874_v41  ;;  %5276 = vmatprep.subr.bf16.mxu1 %v11958_v25  ;;  %v11982_v41 = vld [vmem:[%s16440_s1 + $0x124] ss:$8 sps:$4 sm:$0xff]   ;;  %v11916_v25 = vld [vmem:[%s16441_s0 + $0xa40] ss:$52 sps:$4 sm:$0xff]  }
  0x5e   :  { %5277 = vmatpush1.bf16.msra.mxu1 %v11956_v24  ;;  %v11915_v24 = vld [vmem:[%s16441_s0 + $0xa28] ss:$52 sps:$4 sm:$0xff]  }
  0x5f   :  { %5278 = vmatprep.subr.bf16.mxu1 %v11982_v41  ;;  %v12076_v41 = vld [vmem:[%s16440_s1 + $0x1d0] ss:$8 sps:$4 sm:$0xff]  }
  0x60   :  { %6708 = vmatpush1.bf16.msra.mxu0 %v11872_v40  ;;  %v11980_v40 = vld [vmem:[%s16440_s1 + $0x120] ss:$8 sps:$4 sm:$0xff]  }
  0x61   :  { %6709 = vmatprep.subr.bf16.mxu0 %v11895_v47  ;;  %v11871_v47 = vld [vmem:[%s16441_s0 + $0x7d0] ss:$52 sps:$4 sm:$0xff]  }
  0x62   :  { %4874 = vmatmul.mubr.bf16.gmra.mrb[16].mxu1 %v11765_v30  ;;  %v11849_v30 = vld [vmem:[%s16441_s0 + $0x680] ss:$52 sps:$4 sm:$0xff]  }
  0x63   :  { %6293 = vmatmul.mubr.bf16.gmra.mrb[16].mxu0 %v11766_v31  ;;  %4883 = vmatprep.mubr.bf16.mxu1 %v11767_v32  ;;  %v11850_v31 = vld [vmem:[%s16441_s0 + $0x698] ss:$52 sps:$4 sm:$0xff]  }
  0x64   :  { %6302 = vmatprep.mubr.bf16.mxu0 %v11769_v33  ;;  %6710 = vmatpush1.bf16.msra.mxu0 %v11893_v46  ;;  %v11854_v32 = vld [vmem:[%s16441_s0 + $0x6ec] ss:$52 sps:$4 sm:$0xff]   ;;  %v11856_v33 = vld [vmem:[%s16441_s0 + $0x704] ss:$52 sps:$4 sm:$0xff]  }
  0x65   :  { %6711 = vmatprep.subr.bf16.mxu0 %v11910_v57  ;;  %5279 = vmatpush1.bf16.msra.mxu1 %v11980_v40  ;;  %v11870_v46 = vld [vmem:[%s16441_s0 + $0x7b8] ss:$52 sps:$4 sm:$0xff]   ;;  %v12005_v57 = vld [vmem:[%s16440_s1 + $0x134] ss:$8 sps:$4 sm:$0xff]  }
  0x66   :  { %5280 = vmatprep.subr.bf16.mxu1 %v12005_v57  ;;  %v12078_v40 = vld [vmem:[%s16440_s1 + $0x1d4] ss:$8 sps:$4 sm:$0xff]  }
  0x67   :  { %v11947_v57 = vld [vmem:[%s16441_s0 + $0xc34] ss:$52 sps:$4 sm:$0xff]  }
  0x68   :  { %6712 = vmatpush1.bf16.msra.mxu0 %v11908_v56  ;;  %v12003_v56 = vld [vmem:[%s16440_s1 + $0x130] ss:$8 sps:$4 sm:$0xff]  }
  0x69   :  { %6713 = vmatprep.subr.bf16.mxu0 %v11931_v7  ;;  %5281 = vmatpush1.bf16.msra.mxu1 %v12003_v56  ;;  %v11900_v7 = vld [vmem:[%s16441_s0 + $0x958] ss:$52 sps:$4 sm:$0xff]   ;;  %v11946_v56 = vld [vmem:[%s16441_s0 + $0xbe0] ss:$52 sps:$4 sm:$0xff]  }
  0x6a   :  { %4884 = vmatmul.mubr.bf16.gmra.mrb[20].mxu1 %v11771_v36  ;;  %v11860_v36 = vld [vmem:[%s16441_s0 + $0x754] ss:$52 sps:$4 sm:$0xff]  }
  0x6b   :  { %6303 = vmatmul.mubr.bf16.gmra.mrb[20].mxu0 %v11772_v37  ;;  %4893 = vmatprep.mubr.bf16.mxu1 %v11776_v38  ;;  %v11862_v37 = vld [vmem:[%s16441_s0 + $0x76c] ss:$52 sps:$4 sm:$0xff]  }
  0x6c   :  { %6312 = vmatprep.mubr.bf16.mxu0 %v11778_v39  ;;  %6714 = vmatpush1.bf16.msra.mxu0 %v11929_v6  ;;  %v11977_v38 = vld [vmem:[%s16440_s1 + $0x4c0] ss:$8 sps:$4 sm:$0xff]   ;;  %v11979_v39 = vld [vmem:[%s16440_s1 + $0x4c4] ss:$8 sps:$4 sm:$0xff]  }
  0x6d   :  { %6715 = vmatprep.subr.bf16.mxu0 %v11955_v23  ;;  %v12027_v6 = vld [vmem:[%s16440_s1 + $0x4e4] ss:$8 sps:$4 sm:$0xff]   ;;  %v12049_v23 = vld [vmem:[%s16440_s1 + $0x190] ss:$8 sps:$4 sm:$0xff]  }
  0x70   :  { %6716 = vmatpush1.bf16.msra.mxu0 %v11953_v22  ;;  %v12051_v22 = vld [vmem:[%s16440_s1 + $0x194] ss:$8 sps:$4 sm:$0xff]  }
  0x71   :  { %6717 = vmatprep.subr.bf16.mxu0 %v11979_v39  ;;  %v12072_v39 = vld [vmem:[%s16440_s1 + $0x1c0] ss:$8 sps:$4 sm:$0xff]  }
  0x72   :  { %4894 = vmatmul.mubr.bf16.gmra.mrb[24].mxu1 %v11780_v42  ;;  %v11864_v42 = vld [vmem:[%s16441_s0 + $0x750] ss:$52 sps:$4 sm:$0xff]  }
  0x73   :  { %6313 = vmatmul.mubr.bf16.gmra.mrb[24].mxu0 %v11781_v43  ;;  %4903 = vmatprep.mubr.bf16.mxu1 %v11782_v44  ;;  %v11865_v43 = vld [vmem:[%s16441_s0 + $0x768] ss:$52 sps:$4 sm:$0xff]  }
  0x74   :  { %6322 = vmatprep.mubr.bf16.mxu0 %v11784_v45  ;;  %v11866_v44 = vld [vmem:[%s16441_s0 + $0x7bc] ss:$52 sps:$4 sm:$0xff]   ;;  %v11868_v45 = vld [vmem:[%s16441_s0 + $0x7d4] ss:$52 sps:$4 sm:$0xff]   ;;  %6718 = vmatpush1.bf16.msra.mxu0 %v11977_v38  ;;  %v12074_v38 = vld [vmem:[%s16440_s1 + $0x1c4] ss:$8 sps:$4 sm:$0xff]  }
  0x7a   :  { %4904 = vmatmul.mubr.bf16.gmra.mrb[28].mxu1 %v11786_v48  ;;  %v11875_v48 = vld [vmem:[%s16441_s0 + $0x824] ss:$52 sps:$4 sm:$0xff]  }
  0x7b   :  { %6323 = vmatmul.mubr.bf16.gmra.mrb[28].mxu0 %v11787_v49  ;;  %4913 = vmatprep.mubr.bf16.mxu1 %v11788_v50  ;;  %v11877_v49 = vld [vmem:[%s16441_s0 + $0x83c] ss:$52 sps:$4 sm:$0xff]  }
  0x7c   :  { %6332 = vmatprep.mubr.bf16.mxu0 %v11790_v51  ;;  %v11995_v50 = vld [vmem:[%s16440_s1 + $0x4d0] ss:$8 sps:$4 sm:$0xff]   ;;  %v11997_v51 = vld [vmem:[%s16440_s1 + $0x4d4] ss:$8 sps:$4 sm:$0xff]  }
  0x7d   :  { %6719 = vmatprep.subr.bf16.mxu0 %v11997_v51  ;;  %v11940_v51 = vld [vmem:[%s16441_s0 + $0xb78] ss:$52 sps:$4 sm:$0xff]  }
  0x7e   :  { %6720 = vmatpush1.bf16.msra.mxu0 %v11995_v50  ;;  %v11939_v50 = vld [vmem:[%s16441_s0 + $0xb60] ss:$52 sps:$4 sm:$0xff]  }
  0x7f   :  { %6721 = vmatprep.subr.bf16.mxu0 %v12027_v6  ;;  %v11973_v6 = vld [vmem:[%s16441_s0 + $0xd84] ss:$52 sps:$4 sm:$0xff]  }
  0x82   :  { %4914 = vmatmul.mubr.bf16.gmra.mrb[32].mxu1 %v11792_v52  ;;  %v11879_v52 = vld [vmem:[%s16441_s0 + $0x820] ss:$52 sps:$4 sm:$0xff]  }
  0x83   :  { %6333 = vmatmul.mubr.bf16.gmra.mrb[32].mxu0 %v11793_v53  ;;  %4923 = vmatprep.mubr.bf16.mxu1 %v11797_v54  ;;  %v11880_v53 = vld [vmem:[%s16441_s0 + $0x838] ss:$52 sps:$4 sm:$0xff]  }
  0x84   :  { %6342 = vmatprep.mubr.bf16.mxu0 %v11799_v55  ;;  %v11881_v54 = vld [vmem:[%s16441_s0 + $0x88c] ss:$52 sps:$4 sm:$0xff]   ;;  %v11883_v55 = vld [vmem:[%s16441_s0 + $0x8a4] ss:$52 sps:$4 sm:$0xff]  }
  0x8a   :  { %4924 = vmatmul.mubr.bf16.gmra.mrb[36].mxu1 %v11801_v58  ;;  %v11885_v58 = vld [vmem:[%s16441_s0 + $0x888] ss:$52 sps:$4 sm:$0xff]  }
  0x8b   :  { %6343 = vmatmul.mubr.bf16.gmra.mrb[36].mxu0 %v11802_v59  ;;  %4933 = vmatprep.mubr.bf16.mxu1 %v11803_v60  ;;  %v11886_v59 = vld [vmem:[%s16441_s0 + $0x8a0] ss:$52 sps:$4 sm:$0xff]  }
  0x8c   :  { %6352 = vmatprep.mubr.bf16.mxu0 %v11805_v61  ;;  %v11887_v60 = vld [vmem:[%s16441_s0 + $0x8f4] ss:$52 sps:$4 sm:$0xff]   ;;  %v11889_v61 = vld [vmem:[%s16441_s0 + $0x90c] ss:$52 sps:$4 sm:$0xff]  }
  0x92   :  { %4934 = vmatmul.mubr.bf16.gmra.mrb[40].mxu1 %v11807_v62  ;;  %v11891_v62 = vld [vmem:[%s16441_s0 + $0x8f0] ss:$52 sps:$4 sm:$0xff]  }
  0x93   :  { %6353 = vmatmul.mubr.bf16.gmra.mrb[40].mxu0 %v11808_v63  ;;  %4943 = vmatprep.mubr.bf16.mxu1 %v11809_v0  ;;  %v11892_v63 = vld [vmem:[%s16441_s0 + $0x908] ss:$52 sps:$4 sm:$0xff]  }
  0x94   :  { %6362 = vmatprep.mubr.bf16.mxu0 %v11811_v1  ;;  %v11896_v0 = vld [vmem:[%s16441_s0 + $0x95c] ss:$52 sps:$4 sm:$0xff]   ;;  %v11898_v1 = vld [vmem:[%s16441_s0 + $0x974] ss:$52 sps:$4 sm:$0xff]  }
  0x9a   :  { %4944 = vmatmul.mubr.bf16.gmra.mrb[44].mxu1 %v11813_v2  ;;  %v12020_v2 = vld [vmem:[%s16440_s1 + $0x144] ss:$8 sps:$4 sm:$0xff]  }
  0x9b   :  { %6363 = vmatmul.mubr.bf16.gmra.mrb[44].mxu0 %v11814_v3  ;;  %4953 = vmatprep.mubr.bf16.mxu1 %v11818_v4  ;;  %v12018_v3 = vld [vmem:[%s16440_s1 + $0x140] ss:$8 sps:$4 sm:$0xff]   ;;  %v12024_v4 = vld [vmem:[%s16440_s1 + $0x154] ss:$8 sps:$4 sm:$0xff]  }
  0x9c   :  { %6372 = vmatprep.mubr.bf16.mxu0 %v11820_v5  ;;  %v12025_v5 = vld [vmem:[%s16440_s1 + $0x4e0] ss:$8 sps:$4 sm:$0xff]   ;;  %5282 = vmatprep.subr.bf16.mxu1 %v12020_v2  ;;  %v11967_v2 = vld [vmem:[%s16441_s0 + $0xd1c] ss:$52 sps:$4 sm:$0xff]  }
  0x9d   :  { %5283 = vmatpush1.bf16.msra.mxu1 %v12018_v3  ;;  %6722 = vmatpush1.bf16.msra.mxu0 %v12025_v5  ;;  %v11969_v3 = vld [vmem:[%s16441_s0 + $0xd00] ss:$52 sps:$4 sm:$0xff]  }
  0x9e   :  { %5284 = vmatprep.subr.bf16.mxu1 %v12024_v4  ;;  %v11970_v4 = vld [vmem:[%s16441_s0 + $0xd18] ss:$52 sps:$4 sm:$0xff]  }
  0x9f   :  { %v11971_v5 = vld [vmem:[%s16441_s0 + $0xd6c] ss:$52 sps:$4 sm:$0xff]  }
  0xa1   :  { %5285 = vmatpush1.bf16.msra.mxu1 %v12022_v9  ;;  %v11983_v9 = vld [vmem:[%s16441_s0 + $0xdd4] ss:$52 sps:$4 sm:$0xff]  }
  0xa2   :  { %4954 = vmatmul.mubr.bf16.gmra.mrb[48].mxu1 %v11822_v10  ;;  %v11902_v10 = vld [vmem:[%s16441_s0 + $0x9c4] ss:$52 sps:$4 sm:$0xff]  }
  0xa3   :  { %6373 = vmatmul.mubr.bf16.gmra.mrb[48].mxu0 %v11823_v11  ;;  %4963 = vmatprep.mubr.bf16.mxu1 %v11824_v12  ;;  %v11904_v11 = vld [vmem:[%s16441_s0 + $0x9dc] ss:$52 sps:$4 sm:$0xff]   ;;  %v12035_v12 = vld [vmem:[%s16440_s1 + $0x164] ss:$8 sps:$4 sm:$0xff]  }
  0xa4   :  { %6382 = vmatprep.mubr.bf16.mxu0 %v11826_v13  ;;  %v12033_v13 = vld [vmem:[%s16440_s1 + $0x160] ss:$8 sps:$4 sm:$0xff]   ;;  %5286 = vmatprep.subr.bf16.mxu1 %v12035_v12 }
  0xa5   :  { %5287 = vmatpush1.bf16.msra.mxu1 %v12033_v13  ;;  %v11988_v12 = vld [vmem:[%s16441_s0 + $0xde8] ss:$52 sps:$4 sm:$0xff]  }
  0xa6   :  { %v11989_v13 = vld [vmem:[%s16441_s0 + $0xe3c] ss:$52 sps:$4 sm:$0xff]  }
  0xaa   :  { %4964 = vmatmul.mubr.bf16.gmra.mrb[52].mxu1 %v11828_v14  ;;  %v12039_v14 = vld [vmem:[%s16440_s1 + $0x174] ss:$8 sps:$4 sm:$0xff]  }
  0xab   :  { %6383 = vmatmul.mubr.bf16.gmra.mrb[52].mxu0 %v11829_v15  ;;  %4973 = vmatprep.mubr.bf16.mxu1 %v11833_v16  ;;  %v12037_v15 = vld [vmem:[%s16440_s1 + $0x170] ss:$8 sps:$4 sm:$0xff]   ;;  %v11906_v16 = vld [vmem:[%s16441_s0 + $0x9c0] ss:$52 sps:$4 sm:$0xff]  }
  0xac   :  { %6392 = vmatprep.mubr.bf16.mxu0 %v11835_v17  ;;  %v11907_v17 = vld [vmem:[%s16441_s0 + $0x9d8] ss:$52 sps:$4 sm:$0xff]   ;;  %5288 = vmatprep.subr.bf16.mxu1 %v12039_v14  ;;  %v11991_v14 = vld [vmem:[%s16441_s0 + $0xe54] ss:$52 sps:$4 sm:$0xff]  }
  0xad   :  { %5289 = vmatpush1.bf16.msra.mxu1 %v12037_v15  ;;  %v11993_v15 = vld [vmem:[%s16441_s0 + $0xe38] ss:$52 sps:$4 sm:$0xff]  }
  0xb2   :  { %4974 = vmatmul.mubr.bf16.gmra.mrb[56].mxu1 %v11837_v18  ;;  %v11911_v18 = vld [vmem:[%s16441_s0 + $0xa2c] ss:$52 sps:$4 sm:$0xff]  }
  0xb3   :  { %6393 = vmatmul.mubr.bf16.gmra.mrb[56].mxu0 %v11838_v19  ;;  %4983 = vmatprep.mubr.bf16.mxu1 %v11839_v20  ;;  %v11913_v19 = vld [vmem:[%s16441_s0 + $0xa44] ss:$52 sps:$4 sm:$0xff]  }
  0xb4   :  { %6402 = vmatprep.mubr.bf16.mxu0 %v11841_v21  ;;  %v12047_v20 = vld [vmem:[%s16440_s1 + $0x184] ss:$8 sps:$4 sm:$0xff]   ;;  %v12045_v21 = vld [vmem:[%s16440_s1 + $0x180] ss:$8 sps:$4 sm:$0xff]  }
  0xb5   :  { %5290 = vmatprep.subr.bf16.mxu1 %v12047_v20  ;;  %v12006_v20 = vld [vmem:[%s16441_s0 + $0xeb8] ss:$52 sps:$4 sm:$0xff]  }
  0xb6   :  { %5291 = vmatpush1.bf16.msra.mxu1 %v12045_v21  ;;  %v12007_v21 = vld [vmem:[%s16441_s0 + $0xf0c] ss:$52 sps:$4 sm:$0xff]  }
  0xb7   :  { %5292 = vmatprep.subr.bf16.mxu1 %v12051_v22  ;;  %v12009_v22 = vld [vmem:[%s16441_s0 + $0xf24] ss:$52 sps:$4 sm:$0xff]  }
  0xba   :  { %4984 = vmatmul.mubr.bf16.gmra.mrb[60].mxu1 %v11843_v26  ;;  %v11917_v26 = vld [vmem:[%s16441_s0 + $0xa94] ss:$52 sps:$4 sm:$0xff]  }
  0xbb   :  { %6403 = vmatmul.mubr.bf16.gmra.mrb[60].mxu0 %v11844_v27  ;;  %4993 = vmatprep.mubr.bf16.mxu1 %v11845_v28  ;;  %v11919_v27 = vld [vmem:[%s16441_s0 + $0xaac] ss:$52 sps:$4 sm:$0xff]  }
  0xbc   :  { %6412 = vmatprep.mubr.bf16.mxu0 %v11847_v29  ;;  %v12059_v28 = vld [vmem:[%s16440_s1 + $0x1a4] ss:$8 sps:$4 sm:$0xff]   ;;  %5293 = vmatpush1.bf16.msra.mxu1 %v12049_v23  ;;  %v12057_v29 = vld [vmem:[%s16440_s1 + $0x1a0] ss:$8 sps:$4 sm:$0xff]  }
  0xbd   :  { %5294 = vmatprep.subr.bf16.mxu1 %v12059_v28  ;;  %v12011_v23 = vld [vmem:[%s16441_s0 + $0xf08] ss:$52 sps:$4 sm:$0xff]  }
  0xbe   :  { %v12021_v28 = vld [vmem:[%s16441_s0 + $0xf88] ss:$52 sps:$4 sm:$0xff]  }
  0xc0   :  { %5295 = vmatpush1.bf16.msra.mxu1 %v12057_v29  ;;  %v12028_v29 = vld [vmem:[%s16441_s0 + $0xfdc] ss:$52 sps:$4 sm:$0xff]  }
  0xc2   :  { %4994 = vmatmul.mubr.bf16.gmra.mrb[64].mxu1 %v11849_v30  ;;  %v12061_v30 = vld [vmem:[%s16440_s1 + $0x4f0] ss:$8 sps:$4 sm:$0xff]  }
  0xc3   :  { %6413 = vmatmul.mubr.bf16.gmra.mrb[64].mxu0 %v11850_v31  ;;  %5003 = vmatprep.mubr.bf16.mxu1 %v11854_v32  ;;  %v12063_v31 = vld [vmem:[%s16440_s1 + $0x4f4] ss:$8 sps:$4 sm:$0xff]  }
  0xc4   :  { %6422 = vmatprep.mubr.bf16.mxu0 %v11856_v33  ;;  %v12066_v32 = vld [vmem:[%s16440_s1 + $0x1b4] ss:$8 sps:$4 sm:$0xff]   ;;  %v11921_v33 = vld [vmem:[%s16441_s0 + $0xa90] ss:$52 sps:$4 sm:$0xff]   ;;  %6723 = vmatprep.subr.bf16.mxu0 %v12063_v31  ;;  %v12032_v31 = vld [vmem:[%s16441_s0 + $0xfd8] ss:$52 sps:$4 sm:$0xff]  }
  0xc5   :  { %6724 = vmatpush1.bf16.msra.mxu0 %v12061_v30  ;;  %5296 = vmatprep.subr.bf16.mxu1 %v12066_v32  ;;  %v12030_v30 = vld [vmem:[%s16441_s0 + $0xff4] ss:$52 sps:$4 sm:$0xff]   ;;  %v12036_v32 = vld [vmem:[%s16441_s0 + $0xff0] ss:$52 sps:$4 sm:$0xff]  }
  0xca   :  { %5004 = vmatmul.mubr.bf16.gmra.mrb[68].mxu1 %v11858_v34  ;;  %v11922_v34 = vld [vmem:[%s16441_s0 + $0xaa8] ss:$52 sps:$4 sm:$0xff]  }
  0xcb   :  { %6423 = vmatmul.mubr.bf16.gmra.mrb[68].mxu0 %v11859_v35  ;;  %5013 = vmatprep.mubr.bf16.mxu1 %v11860_v36  ;;  %v12064_v35 = vld [vmem:[%s16440_s1 + $0x1b0] ss:$8 sps:$4 sm:$0xff]  }
  0xcc   :  { %6432 = vmatprep.mubr.bf16.mxu0 %v11862_v37  ;;  %v11923_v36 = vld [vmem:[%s16441_s0 + $0xafc] ss:$52 sps:$4 sm:$0xff]   ;;  %v11925_v37 = vld [vmem:[%s16441_s0 + $0xb14] ss:$52 sps:$4 sm:$0xff]   ;;  %5297 = vmatpush1.bf16.msra.mxu1 %v12064_v35 }
  0xcd   :  { %5298 = vmatprep.subr.bf16.mxu1 %v12074_v38  ;;  %v12044_v35 = vld [vmem:[%s16441_s0 + $0x1040] ss:$52 sps:$4 sm:$0xff]   ;;  %v12054_v38 = vld [vmem:[%s16441_s0 + $0x10c4] ss:$52 sps:$4 sm:$0xff]  }
  0xd0   :  { %5299 = vmatpush1.bf16.msra.mxu1 %v12072_v39  ;;  %v12056_v39 = vld [vmem:[%s16441_s0 + $0x10a8] ss:$52 sps:$4 sm:$0xff]  }
  0xd1   :  { %5300 = vmatprep.subr.bf16.mxu1 %v12078_v40  ;;  %v12060_v40 = vld [vmem:[%s16441_s0 + $0x10c0] ss:$52 sps:$4 sm:$0xff]  }
  0xd2   :  { %5014 = vmatmul.mubr.bf16.gmra.mrb[72].mxu1 %v11864_v42  ;;  %v11927_v42 = vld [vmem:[%s16441_s0 + $0xaf8] ss:$52 sps:$4 sm:$0xff]  }
  0xd3   :  { %6433 = vmatmul.mubr.bf16.gmra.mrb[72].mxu0 %v11865_v43  ;;  %5023 = vmatprep.mubr.bf16.mxu1 %v11866_v44  ;;  %v11928_v43 = vld [vmem:[%s16441_s0 + $0xb10] ss:$52 sps:$4 sm:$0xff]  }
  0xd4   :  { %6442 = vmatprep.mubr.bf16.mxu0 %v11868_v45  ;;  %v11935_v44 = vld [vmem:[%s16441_s0 + $0xb64] ss:$52 sps:$4 sm:$0xff]   ;;  %v11937_v45 = vld [vmem:[%s16441_s0 + $0xb7c] ss:$52 sps:$4 sm:$0xff]   ;;  %5301 = vmatpush1.bf16.msra.mxu1 %v12076_v41  ;;  %v12067_v41 = vld [vmem:[%s16441_s0 + $0x1114] ss:$52 sps:$4 sm:$0xff]  }
  0xda   :  { %5024 = vmatmul.mubr.bf16.gmra.mrb[76].mxu1 %v11870_v46  ;;  %v12086_v46 = vld [vmem:[%s16440_s1 + $0x1e4] ss:$8 sps:$4 sm:$0xff]  }
  0xdb   :  { %6443 = vmatmul.mubr.bf16.gmra.mrb[76].mxu0 %v11871_v47  ;;  %5033 = vmatprep.mubr.bf16.mxu1 %v11875_v48  ;;  %v12084_v47 = vld [vmem:[%s16440_s1 + $0x1e0] ss:$8 sps:$4 sm:$0xff]   ;;  %v12090_v48 = vld [vmem:[%s16440_s1 + $0x1f4] ss:$8 sps:$4 sm:$0xff]  }
  0xdc   :  { %6452 = vmatprep.mubr.bf16.mxu0 %v11877_v49  ;;  %v12088_v49 = vld [vmem:[%s16440_s1 + $0x1f0] ss:$8 sps:$4 sm:$0xff]   ;;  %5302 = vmatprep.subr.bf16.mxu1 %v12086_v46  ;;  %v12081_v46 = vld [vmem:[%s16441_s0 + $0x1194] ss:$52 sps:$4 sm:$0xff]  }
  0xdd   :  { %5303 = vmatpush1.bf16.msra.mxu1 %v12084_v47  ;;  %v12083_v47 = vld [vmem:[%s16441_s0 + $0x1178] ss:$52 sps:$4 sm:$0xff]  }
  0xde   :  { %5304 = vmatprep.subr.bf16.mxu1 %v12090_v48  ;;  %v12087_v48 = vld [vmem:[%s16441_s0 + $0x1190] ss:$52 sps:$4 sm:$0xff]  }
  0xe1   :  { %5305 = vmatpush1.bf16.msra.mxu1 %v12088_v49  ;;  %v12093_v49 = vld [vmem:[%s16441_s0 + $0xc] ss:$52 sps:$4 sm:$0xff]  }
  0xe2   :  { %5034 = vmatmul.mubr.bf16.gmra.mrb[80].mxu1 %v11879_v52  ;;  %v11941_v52 = vld [vmem:[%s16441_s0 + $0xbcc] ss:$52 sps:$4 sm:$0xff]  }
  0xe3   :  { %6453 = vmatmul.mubr.bf16.gmra.mrb[80].mxu0 %v11880_v53  ;;  %5043 = vmatprep.mubr.bf16.mxu1 %v11881_v54  ;;  %v11943_v53 = vld [vmem:[%s16441_s0 + $0xbe4] ss:$52 sps:$4 sm:$0xff]  }
  0xe4   :  { %6462 = vmatprep.mubr.bf16.mxu0 %v11883_v55  ;;  %v12099_v54 = vld [vmem:[%s16440_s1 + $0x504] ss:$8 sps:$4 sm:$0xff]   ;;  %v11945_v55 = vld [vmem:[%s16441_s0 + $0xbc8] ss:$52 sps:$4 sm:$0xff]  }
  0xe5   :  { %7166 = vmatprep.subr.bf16.mxu0 %v12099_v54  ;;  %v12100_v54 = vld [vmem:[%s16441_s0 + $0x74] ss:$52 sps:$4 sm:$0xff]  }
  0xea   :  { %5044 = vmatmul.mubr.bf16.gmra.mrb[84].mxu1 %v11885_v58  ;;  %v11949_v58 = vld [vmem:[%s16441_s0 + $0xc4c] ss:$52 sps:$4 sm:$0xff]  }
  0xeb   :  { %6463 = vmatmul.mubr.bf16.gmra.mrb[84].mxu0 %v11886_v59  ;;  %5053 = vmatprep.mubr.bf16.mxu1 %v11887_v60  ;;  %v11951_v59 = vld [vmem:[%s16441_s0 + $0xc30] ss:$52 sps:$4 sm:$0xff]   ;;  %v11952_v60 = vld [vmem:[%s16441_s0 + $0xc48] ss:$52 sps:$4 sm:$0xff]  }
  0xec   :  { %6472 = vmatprep.mubr.bf16.mxu0 %v11889_v61  ;;  %v11959_v61 = vld [vmem:[%s16441_s0 + $0xc9c] ss:$52 sps:$4 sm:$0xff]  }
  0xf2   :  { %5054 = vmatmul.mubr.bf16.gmra.mrb[88].mxu1 %v11891_v62  ;;  %v11961_v62 = vld [vmem:[%s16441_s0 + $0xcb4] ss:$52 sps:$4 sm:$0xff]  }
  0xf3   :  { %6473 = vmatmul.mubr.bf16.gmra.mrb[88].mxu0 %v11892_v63  ;;  %5063 = vmatprep.mubr.bf16.mxu1 %v11896_v0  ;;  %v11963_v63 = vld [vmem:[%s16441_s0 + $0xc98] ss:$52 sps:$4 sm:$0xff]   ;;  %v11964_v0 = vld [vmem:[%s16441_s0 + $0xcb0] ss:$52 sps:$4 sm:$0xff]  }
  0xf4   :  { %6482 = vmatprep.mubr.bf16.mxu0 %v11898_v1  ;;  %v11965_v1 = vld [vmem:[%s16441_s0 + $0xd04] ss:$52 sps:$4 sm:$0xff]  }
  0xfa   :  { %5064 = vmatmul.mubr.bf16.gmra.mrb[92].mxu1 %v11900_v7  ;;  %v11975_v7 = vld [vmem:[%s16441_s0 + $0xd68] ss:$52 sps:$4 sm:$0xff]  }
  0xfb   :  { %6483 = vmatmul.mubr.bf16.gmra.mrb[92].mxu0 %v11901_v8  ;;  %5073 = vmatprep.mubr.bf16.mxu1 %v11902_v10  ;;  %v11976_v8 = vld [vmem:[%s16441_s0 + $0xd80] ss:$52 sps:$4 sm:$0xff]  }
  0xfc   :  { %6492 = vmatprep.mubr.bf16.mxu0 %v11904_v11  ;;  %v11985_v10 = vld [vmem:[%s16441_s0 + $0xdec] ss:$52 sps:$4 sm:$0xff]   ;;  %v11987_v11 = vld [vmem:[%s16441_s0 + $0xdd0] ss:$52 sps:$4 sm:$0xff]  }
 0x102   :  { %5074 = vmatmul.mubr.bf16.gmra.mrb[96].mxu1 %v11906_v16  ;;  %v11994_v16 = vld [vmem:[%s16441_s0 + $0xe50] ss:$52 sps:$4 sm:$0xff]  }
 0x103   :  { %6493 = vmatmul.mubr.bf16.gmra.mrb[96].mxu0 %v11907_v17  ;;  %5083 = vmatprep.mubr.bf16.mxu1 %v11911_v18  ;;  %v11998_v17 = vld [vmem:[%s16441_s0 + $0xea4] ss:$52 sps:$4 sm:$0xff]   ;;  %v12000_v18 = vld [vmem:[%s16441_s0 + $0xebc] ss:$52 sps:$4 sm:$0xff]  }
 0x104   :  { %6502 = vmatprep.mubr.bf16.mxu0 %v11913_v19  ;;  %v12002_v19 = vld [vmem:[%s16441_s0 + $0xea0] ss:$52 sps:$4 sm:$0xff]  }
 0x10a   :  { %5084 = vmatmul.mubr.bf16.gmra.mrb[100].mxu1 %v11915_v24  ;;  %v12012_v24 = vld [vmem:[%s16441_s0 + $0xf20] ss:$52 sps:$4 sm:$0xff]  }
 0x10b   :  { %6503 = vmatmul.mubr.bf16.gmra.mrb[100].mxu0 %v11916_v25  ;;  %5093 = vmatprep.mubr.bf16.mxu1 %v11917_v26  ;;  %v12013_v25 = vld [vmem:[%s16441_s0 + $0xf74] ss:$52 sps:$4 sm:$0xff]   ;;  %v12015_v26 = vld [vmem:[%s16441_s0 + $0xf8c] ss:$52 sps:$4 sm:$0xff]  }
 0x10c   :  { %6512 = vmatprep.mubr.bf16.mxu0 %v11919_v27  ;;  %v12017_v27 = vld [vmem:[%s16441_s0 + $0xf70] ss:$52 sps:$4 sm:$0xff]  }
 0x112   :  { %5094 = vmatmul.mubr.bf16.gmra.mrb[104].mxu1 %v11921_v33  ;;  %v12040_v33 = vld [vmem:[%s16441_s0 + $0x1044] ss:$52 sps:$4 sm:$0xff]  }
 0x113   :  { %6513 = vmatmul.mubr.bf16.gmra.mrb[104].mxu0 %v11922_v34  ;;  %5103 = vmatprep.mubr.bf16.mxu1 %v11923_v36  ;;  %v12042_v34 = vld [vmem:[%s16441_s0 + $0x105c] ss:$52 sps:$4 sm:$0xff]   ;;  %v12048_v36 = vld [vmem:[%s16441_s0 + $0x1058] ss:$52 sps:$4 sm:$0xff]  }
 0x114   :  { %6522 = vmatprep.mubr.bf16.mxu0 %v11925_v37  ;;  %v12052_v37 = vld [vmem:[%s16441_s0 + $0x10ac] ss:$52 sps:$4 sm:$0xff]  }
 0x11a   :  { %5104 = vmatmul.mubr.bf16.gmra.mrb[108].mxu1 %v11927_v42  ;;  %v12069_v42 = vld [vmem:[%s16441_s0 + $0x112c] ss:$52 sps:$4 sm:$0xff]  }
 0x11b   :  { %6523 = vmatmul.mubr.bf16.gmra.mrb[108].mxu0 %v11928_v43  ;;  %5113 = vmatprep.mubr.bf16.mxu1 %v11935_v44  ;;  %v12071_v43 = vld [vmem:[%s16441_s0 + $0x1110] ss:$52 sps:$4 sm:$0xff]   ;;  %v12075_v44 = vld [vmem:[%s16441_s0 + $0x1128] ss:$52 sps:$4 sm:$0xff]  }
 0x11c   :  { %6532 = vmatprep.mubr.bf16.mxu0 %v11937_v45  ;;  %v12079_v45 = vld [vmem:[%s16441_s0 + $0x117c] ss:$52 sps:$4 sm:$0xff]  }
 0x122   :  { %5114 = vmatmul.mubr.bf16.gmra.mrb[112].mxu1 %v11939_v50  ;;  %v12096_v50 = vld [vmem:[%s16441_s0 + $0x24] ss:$52 sps:$4 sm:$0xff]  }
 0x123   :  { %6533 = vmatmul.mubr.bf16.gmra.mrb[112].mxu0 %v11940_v51  ;;  %5123 = vmatprep.mubr.bf16.mxu1 %v11941_v52  ;;  %v12091_v51 = vld [vmem:[%s16441_s0 + $0x8] ss:$52 sps:$4 sm:$0xff]   ;;  %v12094_v52 = vld [vmem:[%s16441_s0 + $0x20] ss:$52 sps:$4 sm:$0xff]  }
 0x124   :  { %6542 = vmatprep.mubr.bf16.mxu0 %v11943_v53  ;;  %v12097_v53 = vld [vmem:[%s16440_s1 + $0x500] ss:$8 sps:$4 sm:$0xff]  }
 0x12a   :  { %5124 = vmatmul.mubr.bf16.gmra.mrb[116].mxu1 %v11945_v55  ;;  %v12102_v55 = vld [vmem:[%s16441_s0 + $0x8c] ss:$52 sps:$4 sm:$0xff]  }
 0x12b   :  { %6543 = vmatmul.mubr.bf16.gmra.mrb[116].mxu0 %v11946_v56  ;;  %5133 = vmatprep.mubr.bf16.mxu1 %v11947_v57  ;;  %v12114_v56 = vld [vmem:[%s16440_s1 + $0x514] ss:$8 sps:$4 sm:$0xff]   ;;  %v12112_v57 = vld [vmem:[%s16440_s1 + $0x510] ss:$8 sps:$4 sm:$0xff]  }
 0x12c   :  { %6552 = vmatprep.mubr.bf16.mxu0 %v11949_v58  ;;  %v12135_v58 = vld [vmem:[%s16440_s1 + $0x524] ss:$8 sps:$4 sm:$0xff]  }
 0x132   :  { %5134 = vmatmul.mubr.bf16.gmra.mrb[120].mxu1 %v11951_v59  ;;  %v12104_v59 = vld [vmem:[%s16441_s0 + $0x70] ss:$52 sps:$4 sm:$0xff]  }
 0x133   :  { %6553 = vmatmul.mubr.bf16.gmra.mrb[120].mxu0 %v11952_v60  ;;  %5143 = vmatprep.mubr.bf16.mxu1 %v11959_v61  ;;  %v12105_v60 = vld [vmem:[%s16441_s0 + $0x88] ss:$52 sps:$4 sm:$0xff]  }
 0x134   :  { %6562 = vmatprep.mubr.bf16.mxu0 %v11961_v62  ;;  %v12106_v61 = vld [vmem:[%s16441_s0 + $0xdc] ss:$52 sps:$4 sm:$0xff]   ;;  %v12108_v62 = vld [vmem:[%s16441_s0 + $0xf4] ss:$52 sps:$4 sm:$0xff]  }
 0x13a   :  { %5144 = vmatmul.mubr.bf16.gmra.mrb[124].mxu1 %v11963_v63  ;;  %v12133_v63 = vld [vmem:[%s16440_s1 + $0x520] ss:$8 sps:$4 sm:$0xff]  }
 0x13b   :  { %6563 = vmatmul.mubr.bf16.gmra.mrb[124].mxu0 %v11964_v0  ;;  %5153 = vmatprep.mubr.bf16.mxu1 %v11965_v1  ;;  %v12156_v0 = vld [vmem:[%s16440_s1 + $0x534] ss:$8 sps:$4 sm:$0xff]   ;;  %v12154_v1 = vld [vmem:[%s16440_s1 + $0x530] ss:$8 sps:$4 sm:$0xff]  }
 0x13c   :  { %6572 = vmatprep.mubr.bf16.mxu0 %v11967_v2  ;;  %v12177_v2 = vld [vmem:[%s16440_s1 + $0x544] ss:$8 sps:$4 sm:$0xff]  }
 0x142   :  { %5154 = vmatmul.mubr.bf16.gmra.mrb[128].mxu1 %v11969_v3  ;;  %v12110_v3 = vld [vmem:[%s16441_s0 + $0xd8] ss:$52 sps:$4 sm:$0xff]  }
 0x143   :  { %6573 = vmatmul.mubr.bf16.gmra.mrb[128].mxu0 %v11970_v4  ;;  %5163 = vmatprep.mubr.bf16.mxu1 %v11971_v5  ;;  %v12111_v4 = vld [vmem:[%s16441_s0 + $0xf0] ss:$52 sps:$4 sm:$0xff]  }
 0x144   :  { %6582 = vmatprep.mubr.bf16.mxu0 %v11973_v6  ;;  %v12115_v5 = vld [vmem:[%s16441_s0 + $0x144] ss:$52 sps:$4 sm:$0xff]   ;;  %v12117_v6 = vld [vmem:[%s16441_s0 + $0x15c] ss:$52 sps:$4 sm:$0xff]  }
 0x14a   :  { %5164 = vmatmul.mubr.bf16.gmra.mrb[132].mxu1 %v11975_v7  ;;  %v12175_v7 = vld [vmem:[%s16440_s1 + $0x540] ss:$8 sps:$4 sm:$0xff]  }
 0x14b   :  { %6583 = vmatmul.mubr.bf16.gmra.mrb[132].mxu0 %v11976_v8  ;;  %5173 = vmatprep.mubr.bf16.mxu1 %v11983_v9  ;;  %v12192_v8 = vld [vmem:[%s16440_s1 + $0x554] ss:$8 sps:$4 sm:$0xff]   ;;  %v12190_v9 = vld [vmem:[%s16440_s1 + $0x550] ss:$8 sps:$4 sm:$0xff]  }
 0x14c   :  { %6592 = vmatprep.mubr.bf16.mxu0 %v11985_v10  ;;  %v12213_v10 = vld [vmem:[%s16440_s1 + $0x564] ss:$8 sps:$4 sm:$0xff]  }
 0x152   :  { %5174 = vmatmul.mubr.bf16.gmra.mrb[136].mxu1 %v11987_v11  ;;  %v12119_v11 = vld [vmem:[%s16441_s0 + $0x140] ss:$52 sps:$4 sm:$0xff]  }
 0x153   :  { %6593 = vmatmul.mubr.bf16.gmra.mrb[136].mxu0 %v11988_v12  ;;  %5183 = vmatprep.mubr.bf16.mxu1 %v11989_v13  ;;  %v12120_v12 = vld [vmem:[%s16441_s0 + $0x158] ss:$52 sps:$4 sm:$0xff]  }
 0x154   :  { %6602 = vmatprep.mubr.bf16.mxu0 %v11991_v14  ;;  %v12121_v13 = vld [vmem:[%s16441_s0 + $0x1ac] ss:$52 sps:$4 sm:$0xff]   ;;  %v12123_v14 = vld [vmem:[%s16441_s0 + $0x1c4] ss:$52 sps:$4 sm:$0xff]  }
 0x15a   :  { %5184 = vmatmul.mubr.bf16.gmra.mrb[140].mxu1 %v11993_v15  ;;  %v12211_v15 = vld [vmem:[%s16440_s1 + $0x560] ss:$8 sps:$4 sm:$0xff]  }
 0x15b   :  { %6603 = vmatmul.mubr.bf16.gmra.mrb[140].mxu0 %v11994_v16  ;;  %5193 = vmatprep.mubr.bf16.mxu1 %v11998_v17  ;;  %v12234_v16 = vld [vmem:[%s16440_s1 + $0x574] ss:$8 sps:$4 sm:$0xff]   ;;  %v12232_v17 = vld [vmem:[%s16440_s1 + $0x570] ss:$8 sps:$4 sm:$0xff]  }
 0x15c   :  { %6612 = vmatprep.mubr.bf16.mxu0 %v12000_v18  ;;  %v12125_v18 = vld [vmem:[%s16441_s0 + $0x1a8] ss:$52 sps:$4 sm:$0xff]  }
 0x162   :  { %5194 = vmatmul.mubr.bf16.gmra.mrb[144].mxu1 %v12002_v19  ;;  %v12126_v19 = vld [vmem:[%s16441_s0 + $0x1c0] ss:$52 sps:$4 sm:$0xff]  }
 0x163   :  { %6613 = vmatmul.mubr.bf16.gmra.mrb[144].mxu0 %v12006_v20  ;;  %5203 = vmatprep.mubr.bf16.mxu1 %v12007_v21  ;;  %v12127_v20 = vld [vmem:[%s16441_s0 + $0x214] ss:$52 sps:$4 sm:$0xff]   ;;  %v12129_v21 = vld [vmem:[%s16441_s0 + $0x22c] ss:$52 sps:$4 sm:$0xff]  }
 0x164   :  { %6622 = vmatprep.mubr.bf16.mxu0 %v12009_v22  ;;  %v12131_v22 = vld [vmem:[%s16441_s0 + $0x210] ss:$52 sps:$4 sm:$0xff]  }
 0x16a   :  { %5204 = vmatmul.mubr.bf16.gmra.mrb[148].mxu1 %v12011_v23  ;;  %v12132_v23 = vld [vmem:[%s16441_s0 + $0x228] ss:$52 sps:$4 sm:$0xff]  }
 0x16b   :  { %6623 = vmatmul.mubr.bf16.gmra.mrb[148].mxu0 %v12012_v24  ;;  %5213 = vmatprep.mubr.bf16.mxu1 %v12013_v25  ;;  %v12136_v24 = vld [vmem:[%s16441_s0 + $0x27c] ss:$52 sps:$4 sm:$0xff]   ;;  %v12138_v25 = vld [vmem:[%s16441_s0 + $0x294] ss:$52 sps:$4 sm:$0xff]  }
 0x16c   :  { %6632 = vmatprep.mubr.bf16.mxu0 %v12015_v26  ;;  %v12140_v26 = vld [vmem:[%s16441_s0 + $0x278] ss:$52 sps:$4 sm:$0xff]  }
 0x172   :  { %5214 = vmatmul.mubr.bf16.gmra.mrb[152].mxu1 %v12017_v27  ;;  %v12141_v27 = vld [vmem:[%s16441_s0 + $0x290] ss:$52 sps:$4 sm:$0xff]  }
 0x173   :  { %6633 = vmatmul.mubr.bf16.gmra.mrb[152].mxu0 %v12021_v28  ;;  %5223 = vmatprep.mubr.bf16.mxu1 %v12028_v29  ;;  %v12142_v28 = vld [vmem:[%s16441_s0 + $0x2e4] ss:$52 sps:$4 sm:$0xff]   ;;  %v12144_v29 = vld [vmem:[%s16441_s0 + $0x2fc] ss:$52 sps:$4 sm:$0xff]  }
 0x174   :  { %6642 = vmatprep.mubr.bf16.mxu0 %v12030_v30  ;;  %v12253_v30 = vld [vmem:[%s16440_s1 + $0x580] ss:$8 sps:$4 sm:$0xff]  }
 0x17a   :  { %5224 = vmatmul.mubr.bf16.gmra.mrb[156].mxu1 %v12032_v31  ;;  %v12255_v31 = vld [vmem:[%s16440_s1 + $0x584] ss:$8 sps:$4 sm:$0xff]  }
 0x17b   :  { %6643 = vmatmul.mubr.bf16.gmra.mrb[156].mxu0 %v12036_v32  ;;  %5233 = vmatprep.mubr.bf16.mxu1 %v12040_v33  ;;  %v12146_v32 = vld [vmem:[%s16441_s0 + $0x2e0] ss:$52 sps:$4 sm:$0xff]   ;;  %v12147_v33 = vld [vmem:[%s16441_s0 + $0x2f8] ss:$52 sps:$4 sm:$0xff]  }
 0x17c   :  { %6652 = vmatprep.mubr.bf16.mxu0 %v12042_v34  ;;  %v12148_v34 = vld [vmem:[%s16441_s0 + $0x34c] ss:$52 sps:$4 sm:$0xff]  }
 0x182   :  { %5234 = vmatmul.mubr.bf16.gmra.mrb[160].mxu1 %v12044_v35  ;;  %v12150_v35 = vld [vmem:[%s16441_s0 + $0x364] ss:$52 sps:$4 sm:$0xff]  }
 0x183   :  { %6653 = vmatmul.mubr.bf16.gmra.mrb[160].mxu0 %v12048_v36  ;;  %5243 = vmatprep.mubr.bf16.mxu1 %v12052_v37  ;;  %v12152_v36 = vld [vmem:[%s16441_s0 + $0x348] ss:$52 sps:$4 sm:$0xff]   ;;  %v12153_v37 = vld [vmem:[%s16441_s0 + $0x360] ss:$52 sps:$4 sm:$0xff]  }
 0x184   :  { %6662 = vmatprep.mubr.bf16.mxu0 %v12054_v38  ;;  %v12157_v38 = vld [vmem:[%s16441_s0 + $0x3b4] ss:$52 sps:$4 sm:$0xff]  }
 0x18a   :  { %5244 = vmatmul.mubr.bf16.gmra.mrb[164].mxu1 %v12056_v39  ;;  %v12159_v39 = vld [vmem:[%s16441_s0 + $0x3cc] ss:$52 sps:$4 sm:$0xff]  }
 0x18b   :  { %6663 = vmatmul.mubr.bf16.gmra.mrb[164].mxu0 %v12060_v40  ;;  %5253 = vmatprep.mubr.bf16.mxu1 %v12067_v41  ;;  %v12268_v40 = vld [vmem:[%s16440_s1 + $0x590] ss:$8 sps:$4 sm:$0xff]   ;;  %v12270_v41 = vld [vmem:[%s16440_s1 + $0x594] ss:$8 sps:$4 sm:$0xff]  }
 0x18c   :  { %6672 = vmatprep.mubr.bf16.mxu0 %v12069_v42  ;;  %v12161_v42 = vld [vmem:[%s16441_s0 + $0x3b0] ss:$52 sps:$4 sm:$0xff]  }
 0x192   :  { %5254 = vmatmul.mubr.bf16.gmra.mrb[168].mxu1 %v12071_v43  ;;  %v12162_v43 = vld [vmem:[%s16441_s0 + $0x3c8] ss:$52 sps:$4 sm:$0xff]  }
 0x193   :  { %6673 = vmatmul.mubr.bf16.gmra.mrb[168].mxu0 %v12075_v44  ;;  %5263 = vmatprep.mubr.bf16.mxu1 %v12079_v45  ;;  %v12163_v44 = vld [vmem:[%s16441_s0 + $0x41c] ss:$52 sps:$4 sm:$0xff]   ;;  %v12165_v45 = vld [vmem:[%s16441_s0 + $0x434] ss:$52 sps:$4 sm:$0xff]  }
 0x194   :  { %6682 = vmatprep.mubr.bf16.mxu0 %v12081_v46  ;;  %v12167_v46 = vld [vmem:[%s16441_s0 + $0x418] ss:$52 sps:$4 sm:$0xff]  }
 0x19a   :  { %5264 = vmatmul.mubr.bf16.gmra.mrb[172].mxu1 %v12083_v47  ;;  %v12168_v47 = vld [vmem:[%s16441_s0 + $0x430] ss:$52 sps:$4 sm:$0xff]  }
 0x19b   :  { %6683 = vmatmul.mubr.bf16.gmra.mrb[172].mxu0 %v12087_v48  ;;  %5306 = vmatprep.mubr.bf16.mxu1 %v12093_v49  ;;  %v12169_v48 = vld [vmem:[%s16441_s0 + $0x484] ss:$52 sps:$4 sm:$0xff]   ;;  %v12171_v49 = vld [vmem:[%s16441_s0 + $0x49c] ss:$52 sps:$4 sm:$0xff]  }
 0x19c   :  { %6725 = vmatprep.mubr.bf16.mxu0 %v12096_v50  ;;  %v12173_v50 = vld [vmem:[%s16441_s0 + $0x480] ss:$52 sps:$4 sm:$0xff]  }
 0x1a2   :  { %5307 = vmatmul.mubr.bf16.vlgmr.msra.gmra.mrb[0].mxu1 %v12091_v51  ;;  %v12174_v51 = vld [vmem:[%s16441_s0 + $0x498] ss:$52 sps:$4 sm:$0xff]  }
 0x1a3   :  { %6726 = vmatmul.mubr.bf16.vlgmr.msra.gmra.mrb[0].mxu0 %v12094_v52  ;;  %5316 = vmatprep.mubr.bf16.mxu1 %v12100_v54  ;;  %v12178_v52 = vld [vmem:[%s16441_s0 + $0x4ec] ss:$52 sps:$4 sm:$0xff]  }
 0x1a4   :  { %7167 = vmatpush1.bf16.msra.mxu0 %v12097_v53  ;;  %6735 = vmatprep.mubr.bf16.mxu0 %v12102_v55  ;;  %v12180_v53 = vld [vmem:[%s16441_s0 + $0x504] ss:$52 sps:$4 sm:$0xff]   ;;  %v12289_v54 = vld [vmem:[%s16440_s1 + $0x5a0] ss:$8 sps:$4 sm:$0xff]  }
 0x1a5   :  { %7168 = vmatprep.subr.bf16.mxu0 %v12114_v56  ;;  %v12291_v55 = vld [vmem:[%s16440_s1 + $0x5a4] ss:$8 sps:$4 sm:$0xff]   ;;  %v12292_v56 = vld [vmem:[%s16440_s1 + $0x200] ss:$8 sps:$4 sm:$0xff]  }
 0x1a8   :  { %7169 = vmatpush1.bf16.msra.mxu0 %v12112_v57  ;;  %v12294_v57 = vld [vmem:[%s16440_s1 + $0x204] ss:$8 sps:$4 sm:$0xff]  }
 0x1a9   :  { %7170 = vmatprep.subr.bf16.mxu0 %v12135_v58  ;;  %5747 = vmatprep.subr.bf16.mxu1 %v12294_v57  ;;  %v12182_v58 = vld [vmem:[%s16441_s0 + $0x4e8] ss:$52 sps:$4 sm:$0xff]   ;;  %v12261_v57 = vld [vmem:[%s16441_s0 + $0x978] ss:$52 sps:$4 sm:$0xff]  }
 0x1aa   :  { %5317 = vmatmul.mubr.bf16.gmra.mrb[4].mxu1 %v12104_v59  ;;  %v12183_v59 = vld [vmem:[%s16441_s0 + $0x500] ss:$52 sps:$4 sm:$0xff]  }
 0x1ab   :  { %6736 = vmatmul.mubr.bf16.gmra.mrb[4].mxu0 %v12105_v60  ;;  %5326 = vmatprep.mubr.bf16.mxu1 %v12106_v61  ;;  %v12184_v60 = vld [vmem:[%s16441_s0 + $0x554] ss:$52 sps:$4 sm:$0xff]   ;;  %v12186_v61 = vld [vmem:[%s16441_s0 + $0x56c] ss:$52 sps:$4 sm:$0xff]  }
 0x1ac   :  { %6745 = vmatprep.mubr.bf16.mxu0 %v12108_v62  ;;  %7171 = vmatpush1.bf16.msra.mxu0 %v12133_v63  ;;  %v12188_v62 = vld [vmem:[%s16441_s0 + $0x550] ss:$52 sps:$4 sm:$0xff]   ;;  %v12189_v63 = vld [vmem:[%s16441_s0 + $0x568] ss:$52 sps:$4 sm:$0xff]  }
 0x1ad   :  { %7172 = vmatprep.subr.bf16.mxu0 %v12156_v0  ;;  %5748 = vmatpush1.bf16.msra.mxu1 %v12292_v56  ;;  %v12193_v0 = vld [vmem:[%s16441_s0 + $0x5bc] ss:$52 sps:$4 sm:$0xff]   ;;  %v12260_v56 = vld [vmem:[%s16441_s0 + $0x960] ss:$52 sps:$4 sm:$0xff]  }
 0x1b0   :  { %7173 = vmatpush1.bf16.msra.mxu0 %v12154_v1  ;;  %v12195_v1 = vld [vmem:[%s16441_s0 + $0x5d4] ss:$52 sps:$4 sm:$0xff]  }
 0x1b1   :  { %7174 = vmatprep.subr.bf16.mxu0 %v12177_v2  ;;  %v12197_v2 = vld [vmem:[%s16441_s0 + $0x5b8] ss:$52 sps:$4 sm:$0xff]  }
 0x1b2   :  { %5327 = vmatmul.mubr.bf16.gmra.mrb[8].mxu1 %v12110_v3  ;;  %v12198_v3 = vld [vmem:[%s16441_s0 + $0x5d0] ss:$52 sps:$4 sm:$0xff]  }
 0x1b3   :  { %6746 = vmatmul.mubr.bf16.gmra.mrb[8].mxu0 %v12111_v4  ;;  %5336 = vmatprep.mubr.bf16.mxu1 %v12115_v5  ;;  %v12199_v4 = vld [vmem:[%s16441_s0 + $0x624] ss:$52 sps:$4 sm:$0xff]   ;;  %v12201_v5 = vld [vmem:[%s16441_s0 + $0x63c] ss:$52 sps:$4 sm:$0xff]  }
 0x1b4   :  { %6755 = vmatprep.mubr.bf16.mxu0 %v12117_v6  ;;  %7175 = vmatpush1.bf16.msra.mxu0 %v12175_v7  ;;  %v12313_v6 = vld [vmem:[%s16440_s1 + $0x5b0] ss:$8 sps:$4 sm:$0xff]   ;;  %v12315_v7 = vld [vmem:[%s16440_s1 + $0x5b4] ss:$8 sps:$4 sm:$0xff]  }
 0x1b5   :  { %7176 = vmatprep.subr.bf16.mxu0 %v12192_v8  ;;  %v12316_v8 = vld [vmem:[%s16440_s1 + $0x210] ss:$8 sps:$4 sm:$0xff]  }
 0x1b8   :  { %7177 = vmatpush1.bf16.msra.mxu0 %v12190_v9  ;;  %v12318_v9 = vld [vmem:[%s16440_s1 + $0x214] ss:$8 sps:$4 sm:$0xff]  }
 0x1b9   :  { %7178 = vmatprep.subr.bf16.mxu0 %v12213_v10  ;;  %5749 = vmatprep.subr.bf16.mxu1 %v12318_v9  ;;  %v12203_v10 = vld [vmem:[%s16441_s0 + $0x620] ss:$52 sps:$4 sm:$0xff]   ;;  %v12276_v9 = vld [vmem:[%s16441_s0 + $0xa48] ss:$52 sps:$4 sm:$0xff]  }
 0x1ba   :  { %5337 = vmatmul.mubr.bf16.gmra.mrb[12].mxu1 %v12119_v11  ;;  %v12204_v11 = vld [vmem:[%s16441_s0 + $0x638] ss:$52 sps:$4 sm:$0xff]  }
 0x1bb   :  { %6756 = vmatmul.mubr.bf16.gmra.mrb[12].mxu0 %v12120_v12  ;;  %5346 = vmatprep.mubr.bf16.mxu1 %v12121_v13  ;;  %v12205_v12 = vld [vmem:[%s16441_s0 + $0x68c] ss:$52 sps:$4 sm:$0xff]   ;;  %v12207_v13 = vld [vmem:[%s16441_s0 + $0x6a4] ss:$52 sps:$4 sm:$0xff]  }
 0x1bc   :  { %6765 = vmatprep.mubr.bf16.mxu0 %v12123_v14  ;;  %7179 = vmatpush1.bf16.msra.mxu0 %v12211_v15  ;;  %v12209_v14 = vld [vmem:[%s16441_s0 + $0x688] ss:$52 sps:$4 sm:$0xff]   ;;  %v12210_v15 = vld [vmem:[%s16441_s0 + $0x6a0] ss:$52 sps:$4 sm:$0xff]  }
 0x1bd   :  { %7180 = vmatprep.subr.bf16.mxu0 %v12234_v16  ;;  %5750 = vmatpush1.bf16.msra.mxu1 %v12316_v8  ;;  %v12214_v16 = vld [vmem:[%s16441_s0 + $0x6f4] ss:$52 sps:$4 sm:$0xff]   ;;  %v12275_v8 = vld [vmem:[%s16441_s0 + $0xa30] ss:$52 sps:$4 sm:$0xff]  }
 0x1c0   :  { %7181 = vmatpush1.bf16.msra.mxu0 %v12232_v17  ;;  %v12216_v17 = vld [vmem:[%s16441_s0 + $0x70c] ss:$52 sps:$4 sm:$0xff]  }
 0x1c1   :  { %7182 = vmatprep.subr.bf16.mxu0 %v12255_v31  ;;  %v12231_v31 = vld [vmem:[%s16441_s0 + $0x7d8] ss:$52 sps:$4 sm:$0xff]  }
 0x1c2   :  { %5347 = vmatmul.mubr.bf16.gmra.mrb[16].mxu1 %v12125_v18  ;;  %v12218_v18 = vld [vmem:[%s16441_s0 + $0x6f0] ss:$52 sps:$4 sm:$0xff]  }
 0x1c3   :  { %6766 = vmatmul.mubr.bf16.gmra.mrb[16].mxu0 %v12126_v19  ;;  %5356 = vmatprep.mubr.bf16.mxu1 %v12127_v20  ;;  %v12219_v19 = vld [vmem:[%s16441_s0 + $0x708] ss:$52 sps:$4 sm:$0xff]  }
 0x1c4   :  { %6775 = vmatprep.mubr.bf16.mxu0 %v12129_v21  ;;  %7183 = vmatpush1.bf16.msra.mxu0 %v12253_v30  ;;  %v12220_v20 = vld [vmem:[%s16441_s0 + $0x75c] ss:$52 sps:$4 sm:$0xff]   ;;  %v12222_v21 = vld [vmem:[%s16441_s0 + $0x774] ss:$52 sps:$4 sm:$0xff]  }
 0x1c5   :  { %7184 = vmatprep.subr.bf16.mxu0 %v12270_v41  ;;  %v12230_v30 = vld [vmem:[%s16441_s0 + $0x7c0] ss:$52 sps:$4 sm:$0xff]  }
 0x1c6   :  { %v12365_v41 = vld [vmem:[%s16440_s1 + $0x234] ss:$8 sps:$4 sm:$0xff]  }
 0x1c8   :  { %7185 = vmatpush1.bf16.msra.mxu0 %v12268_v40  ;;  %v12363_v40 = vld [vmem:[%s16440_s1 + $0x230] ss:$8 sps:$4 sm:$0xff]  }
 0x1c9   :  { %7186 = vmatprep.subr.bf16.mxu0 %v12291_v55  ;;  %v12382_v55 = vld [vmem:[%s16440_s1 + $0x250] ss:$8 sps:$4 sm:$0xff]  }
 0x1ca   :  { %5357 = vmatmul.mubr.bf16.gmra.mrb[20].mxu1 %v12131_v22  ;;  %v12337_v22 = vld [vmem:[%s16440_s1 + $0x5c0] ss:$8 sps:$4 sm:$0xff]  }
 0x1cb   :  { %6776 = vmatmul.mubr.bf16.gmra.mrb[20].mxu0 %v12132_v23  ;;  %5366 = vmatprep.mubr.bf16.mxu1 %v12136_v24  ;;  %v12339_v23 = vld [vmem:[%s16440_s1 + $0x5c4] ss:$8 sps:$4 sm:$0xff]   ;;  %v12340_v24 = vld [vmem:[%s16440_s1 + $0x220] ss:$8 sps:$4 sm:$0xff]  }
 0x1cc   :  { %6785 = vmatprep.mubr.bf16.mxu0 %v12138_v25  ;;  %7187 = vmatpush1.bf16.msra.mxu0 %v12289_v54  ;;  %v12342_v25 = vld [vmem:[%s16440_s1 + $0x224] ss:$8 sps:$4 sm:$0xff]  }
 0x1cd   :  { %7188 = vmatprep.subr.bf16.mxu0 %v12315_v7  ;;  %5751 = vmatprep.subr.bf16.mxu1 %v12342_v25  ;;  %v12387_v54 = vld [vmem:[%s16440_s1 + $0x5e4] ss:$8 sps:$4 sm:$0xff]   ;;  %v12409_v7 = vld [vmem:[%s16440_s1 + $0x290] ss:$8 sps:$4 sm:$0xff]  }
 0x1ce   :  { %5752 = vmatpush1.bf16.msra.mxu1 %v12340_v24  ;;  %v12438_v24 = vld [vmem:[%s16440_s1 + $0x2d4] ss:$8 sps:$4 sm:$0xff]   ;;  %v12436_v25 = vld [vmem:[%s16440_s1 + $0x2d0] ss:$8 sps:$4 sm:$0xff]  }
 0x1cf   :  { %5753 = vmatprep.subr.bf16.mxu1 %v12365_v41  ;;  %v12307_v41 = vld [vmem:[%s16441_s0 + $0xc3c] ss:$52 sps:$4 sm:$0xff]  }
 0x1d0   :  { %7189 = vmatpush1.bf16.msra.mxu0 %v12313_v6  ;;  %v12411_v6 = vld [vmem:[%s16440_s1 + $0x294] ss:$8 sps:$4 sm:$0xff]  }
 0x1d1   :  { %7190 = vmatprep.subr.bf16.mxu0 %v12339_v23  ;;  %v12432_v23 = vld [vmem:[%s16440_s1 + $0x2c0] ss:$8 sps:$4 sm:$0xff]  }
 0x1d2   :  { %5367 = vmatmul.mubr.bf16.gmra.mrb[24].mxu1 %v12140_v26  ;;  %v12224_v26 = vld [vmem:[%s16441_s0 + $0x758] ss:$52 sps:$4 sm:$0xff]  }
 0x1d3   :  { %6786 = vmatmul.mubr.bf16.gmra.mrb[24].mxu0 %v12141_v27  ;;  %5376 = vmatprep.mubr.bf16.mxu1 %v12142_v28  ;;  %v12225_v27 = vld [vmem:[%s16441_s0 + $0x770] ss:$52 sps:$4 sm:$0xff]  }
 0x1d4   :  { %6795 = vmatprep.mubr.bf16.mxu0 %v12144_v29  ;;  %7191 = vmatpush1.bf16.msra.mxu0 %v12337_v22  ;;  %v12226_v28 = vld [vmem:[%s16441_s0 + $0x7c4] ss:$52 sps:$4 sm:$0xff]   ;;  %v12228_v29 = vld [vmem:[%s16441_s0 + $0x7dc] ss:$52 sps:$4 sm:$0xff]  }
 0x1d5   :  { %5754 = vmatpush1.bf16.msra.mxu1 %v12363_v40  ;;  %v12434_v22 = vld [vmem:[%s16440_s1 + $0x2c4] ss:$8 sps:$4 sm:$0xff]   ;;  %v12306_v40 = vld [vmem:[%s16441_s0 + $0xbe8] ss:$52 sps:$4 sm:$0xff]  }
 0x1da   :  { %5377 = vmatmul.mubr.bf16.gmra.mrb[28].mxu1 %v12146_v32  ;;  %v12235_v32 = vld [vmem:[%s16441_s0 + $0x82c] ss:$52 sps:$4 sm:$0xff]  }
 0x1db   :  { %6796 = vmatmul.mubr.bf16.gmra.mrb[28].mxu0 %v12147_v33  ;;  %5386 = vmatprep.mubr.bf16.mxu1 %v12148_v34  ;;  %v12237_v33 = vld [vmem:[%s16441_s0 + $0x844] ss:$52 sps:$4 sm:$0xff]  }
 0x1dc   :  { %6805 = vmatprep.mubr.bf16.mxu0 %v12150_v35  ;;  %v12355_v34 = vld [vmem:[%s16440_s1 + $0x5d0] ss:$8 sps:$4 sm:$0xff]   ;;  %v12357_v35 = vld [vmem:[%s16440_s1 + $0x5d4] ss:$8 sps:$4 sm:$0xff]  }
 0x1dd   :  { %7192 = vmatprep.subr.bf16.mxu0 %v12357_v35  ;;  %v12300_v35 = vld [vmem:[%s16441_s0 + $0xb80] ss:$52 sps:$4 sm:$0xff]  }
 0x1de   :  { %7193 = vmatpush1.bf16.msra.mxu0 %v12355_v34  ;;  %v12299_v34 = vld [vmem:[%s16441_s0 + $0xb68] ss:$52 sps:$4 sm:$0xff]  }
 0x1df   :  { %7194 = vmatprep.subr.bf16.mxu0 %v12387_v54  ;;  %v12333_v54 = vld [vmem:[%s16441_s0 + $0xd8c] ss:$52 sps:$4 sm:$0xff]  }
 0x1e2   :  { %5387 = vmatmul.mubr.bf16.gmra.mrb[32].mxu1 %v12152_v36  ;;  %v12239_v36 = vld [vmem:[%s16441_s0 + $0x828] ss:$52 sps:$4 sm:$0xff]  }
 0x1e3   :  { %6806 = vmatmul.mubr.bf16.gmra.mrb[32].mxu0 %v12153_v37  ;;  %5396 = vmatprep.mubr.bf16.mxu1 %v12157_v38  ;;  %v12240_v37 = vld [vmem:[%s16441_s0 + $0x840] ss:$52 sps:$4 sm:$0xff]  }
 0x1e4   :  { %6815 = vmatprep.mubr.bf16.mxu0 %v12159_v39  ;;  %v12241_v38 = vld [vmem:[%s16441_s0 + $0x894] ss:$52 sps:$4 sm:$0xff]   ;;  %v12243_v39 = vld [vmem:[%s16441_s0 + $0x8ac] ss:$52 sps:$4 sm:$0xff]  }
 0x1ea   :  { %5397 = vmatmul.mubr.bf16.gmra.mrb[36].mxu1 %v12161_v42  ;;  %v12245_v42 = vld [vmem:[%s16441_s0 + $0x890] ss:$52 sps:$4 sm:$0xff]  }
 0x1eb   :  { %6816 = vmatmul.mubr.bf16.gmra.mrb[36].mxu0 %v12162_v43  ;;  %5406 = vmatprep.mubr.bf16.mxu1 %v12163_v44  ;;  %v12246_v43 = vld [vmem:[%s16441_s0 + $0x8a8] ss:$52 sps:$4 sm:$0xff]  }
 0x1ec   :  { %6825 = vmatprep.mubr.bf16.mxu0 %v12165_v45  ;;  %v12247_v44 = vld [vmem:[%s16441_s0 + $0x8fc] ss:$52 sps:$4 sm:$0xff]   ;;  %v12249_v45 = vld [vmem:[%s16441_s0 + $0x914] ss:$52 sps:$4 sm:$0xff]  }
 0x1f2   :  { %5407 = vmatmul.mubr.bf16.gmra.mrb[40].mxu1 %v12167_v46  ;;  %v12251_v46 = vld [vmem:[%s16441_s0 + $0x8f8] ss:$52 sps:$4 sm:$0xff]  }
 0x1f3   :  { %6826 = vmatmul.mubr.bf16.gmra.mrb[40].mxu0 %v12168_v47  ;;  %5416 = vmatprep.mubr.bf16.mxu1 %v12169_v48  ;;  %v12252_v47 = vld [vmem:[%s16441_s0 + $0x910] ss:$52 sps:$4 sm:$0xff]  }
 0x1f4   :  { %6835 = vmatprep.mubr.bf16.mxu0 %v12171_v49  ;;  %v12256_v48 = vld [vmem:[%s16441_s0 + $0x964] ss:$52 sps:$4 sm:$0xff]   ;;  %v12258_v49 = vld [vmem:[%s16441_s0 + $0x97c] ss:$52 sps:$4 sm:$0xff]  }
 0x1fa   :  { %5417 = vmatmul.mubr.bf16.gmra.mrb[44].mxu1 %v12173_v50  ;;  %v12380_v50 = vld [vmem:[%s16440_s1 + $0x244] ss:$8 sps:$4 sm:$0xff]  }
 0x1fb   :  { %6836 = vmatmul.mubr.bf16.gmra.mrb[44].mxu0 %v12174_v51  ;;  %5426 = vmatprep.mubr.bf16.mxu1 %v12178_v52  ;;  %v12378_v51 = vld [vmem:[%s16440_s1 + $0x240] ss:$8 sps:$4 sm:$0xff]   ;;  %v12384_v52 = vld [vmem:[%s16440_s1 + $0x254] ss:$8 sps:$4 sm:$0xff]  }
 0x1fc   :  { %6845 = vmatprep.mubr.bf16.mxu0 %v12180_v53  ;;  %v12385_v53 = vld [vmem:[%s16440_s1 + $0x5e0] ss:$8 sps:$4 sm:$0xff]   ;;  %5755 = vmatprep.subr.bf16.mxu1 %v12380_v50  ;;  %v12327_v50 = vld [vmem:[%s16441_s0 + $0xd24] ss:$52 sps:$4 sm:$0xff]  }
 0x1fd   :  { %5756 = vmatpush1.bf16.msra.mxu1 %v12378_v51  ;;  %7195 = vmatpush1.bf16.msra.mxu0 %v12385_v53  ;;  %v12329_v51 = vld [vmem:[%s16441_s0 + $0xd08] ss:$52 sps:$4 sm:$0xff]  }
 0x1fe   :  { %5757 = vmatprep.subr.bf16.mxu1 %v12384_v52  ;;  %v12330_v52 = vld [vmem:[%s16441_s0 + $0xd20] ss:$52 sps:$4 sm:$0xff]  }
 0x1ff   :  { %v12331_v53 = vld [vmem:[%s16441_s0 + $0xd74] ss:$52 sps:$4 sm:$0xff]  }
 0x201   :  { %5758 = vmatpush1.bf16.msra.mxu1 %v12382_v55  ;;  %v12335_v55 = vld [vmem:[%s16441_s0 + $0xd70] ss:$52 sps:$4 sm:$0xff]  }
 0x202   :  { %5427 = vmatmul.mubr.bf16.gmra.mrb[48].mxu1 %v12182_v58  ;;  %v12262_v58 = vld [vmem:[%s16441_s0 + $0x9cc] ss:$52 sps:$4 sm:$0xff]  }
 0x203   :  { %6846 = vmatmul.mubr.bf16.gmra.mrb[48].mxu0 %v12183_v59  ;;  %5436 = vmatprep.mubr.bf16.mxu1 %v12184_v60  ;;  %v12264_v59 = vld [vmem:[%s16441_s0 + $0x9e4] ss:$52 sps:$4 sm:$0xff]  }
 0x204   :  { %6855 = vmatprep.mubr.bf16.mxu0 %v12186_v61  ;;  %v12395_v60 = vld [vmem:[%s16440_s1 + $0x264] ss:$8 sps:$4 sm:$0xff]   ;;  %v12393_v61 = vld [vmem:[%s16440_s1 + $0x260] ss:$8 sps:$4 sm:$0xff]  }
 0x205   :  { %5759 = vmatprep.subr.bf16.mxu1 %v12395_v60  ;;  %v12348_v60 = vld [vmem:[%s16441_s0 + $0xdf0] ss:$52 sps:$4 sm:$0xff]  }
 0x206   :  { %5760 = vmatpush1.bf16.msra.mxu1 %v12393_v61  ;;  %v12349_v61 = vld [vmem:[%s16441_s0 + $0xe44] ss:$52 sps:$4 sm:$0xff]  }
 0x20a   :  { %5437 = vmatmul.mubr.bf16.gmra.mrb[52].mxu1 %v12188_v62  ;;  %v12399_v62 = vld [vmem:[%s16440_s1 + $0x274] ss:$8 sps:$4 sm:$0xff]  }
 0x20b   :  { %6856 = vmatmul.mubr.bf16.gmra.mrb[52].mxu0 %v12189_v63  ;;  %5446 = vmatprep.mubr.bf16.mxu1 %v12193_v0  ;;  %v12397_v63 = vld [vmem:[%s16440_s1 + $0x270] ss:$8 sps:$4 sm:$0xff]   ;;  %v12266_v0 = vld [vmem:[%s16441_s0 + $0x9c8] ss:$52 sps:$4 sm:$0xff]  }
 0x20c   :  { %6865 = vmatprep.mubr.bf16.mxu0 %v12195_v1  ;;  %v12267_v1 = vld [vmem:[%s16441_s0 + $0x9e0] ss:$52 sps:$4 sm:$0xff]   ;;  %5761 = vmatprep.subr.bf16.mxu1 %v12399_v62  ;;  %v12351_v62 = vld [vmem:[%s16441_s0 + $0xe5c] ss:$52 sps:$4 sm:$0xff]  }
 0x20d   :  { %5762 = vmatpush1.bf16.msra.mxu1 %v12397_v63  ;;  %v12353_v63 = vld [vmem:[%s16441_s0 + $0xe40] ss:$52 sps:$4 sm:$0xff]  }
 0x212   :  { %5447 = vmatmul.mubr.bf16.gmra.mrb[56].mxu1 %v12197_v2  ;;  %v12271_v2 = vld [vmem:[%s16441_s0 + $0xa34] ss:$52 sps:$4 sm:$0xff]  }
 0x213   :  { %6866 = vmatmul.mubr.bf16.gmra.mrb[56].mxu0 %v12198_v3  ;;  %5456 = vmatprep.mubr.bf16.mxu1 %v12199_v4  ;;  %v12273_v3 = vld [vmem:[%s16441_s0 + $0xa4c] ss:$52 sps:$4 sm:$0xff]  }
 0x214   :  { %6875 = vmatprep.mubr.bf16.mxu0 %v12201_v5  ;;  %v12407_v4 = vld [vmem:[%s16440_s1 + $0x284] ss:$8 sps:$4 sm:$0xff]   ;;  %v12405_v5 = vld [vmem:[%s16440_s1 + $0x280] ss:$8 sps:$4 sm:$0xff]  }
 0x215   :  { %5763 = vmatprep.subr.bf16.mxu1 %v12407_v4  ;;  %v12366_v4 = vld [vmem:[%s16441_s0 + $0xec0] ss:$52 sps:$4 sm:$0xff]  }
 0x216   :  { %5764 = vmatpush1.bf16.msra.mxu1 %v12405_v5  ;;  %v12367_v5 = vld [vmem:[%s16441_s0 + $0xf14] ss:$52 sps:$4 sm:$0xff]  }
 0x217   :  { %5765 = vmatprep.subr.bf16.mxu1 %v12411_v6  ;;  %v12369_v6 = vld [vmem:[%s16441_s0 + $0xf2c] ss:$52 sps:$4 sm:$0xff]  }
 0x21a   :  { %5457 = vmatmul.mubr.bf16.gmra.mrb[60].mxu1 %v12203_v10  ;;  %v12277_v10 = vld [vmem:[%s16441_s0 + $0xa9c] ss:$52 sps:$4 sm:$0xff]  }
 0x21b   :  { %6876 = vmatmul.mubr.bf16.gmra.mrb[60].mxu0 %v12204_v11  ;;  %5466 = vmatprep.mubr.bf16.mxu1 %v12205_v12  ;;  %v12279_v11 = vld [vmem:[%s16441_s0 + $0xab4] ss:$52 sps:$4 sm:$0xff]   ;;  %v12419_v12 = vld [vmem:[%s16440_s1 + $0x2a4] ss:$8 sps:$4 sm:$0xff]  }
 0x21c   :  { %6885 = vmatprep.mubr.bf16.mxu0 %v12207_v13  ;;  %5766 = vmatpush1.bf16.msra.mxu1 %v12409_v7  ;;  %v12417_v13 = vld [vmem:[%s16440_s1 + $0x2a0] ss:$8 sps:$4 sm:$0xff]   ;;  %v12371_v7 = vld [vmem:[%s16441_s0 + $0xf10] ss:$52 sps:$4 sm:$0xff]  }
 0x21d   :  { %5767 = vmatprep.subr.bf16.mxu1 %v12419_v12  ;;  %v12381_v12 = vld [vmem:[%s16441_s0 + $0xf90] ss:$52 sps:$4 sm:$0xff]  }
 0x220   :  { %5768 = vmatpush1.bf16.msra.mxu1 %v12417_v13  ;;  %v12388_v13 = vld [vmem:[%s16441_s0 + $0xfe4] ss:$52 sps:$4 sm:$0xff]  }
 0x222   :  { %5467 = vmatmul.mubr.bf16.gmra.mrb[64].mxu1 %v12209_v14  ;;  %v12421_v14 = vld [vmem:[%s16440_s1 + $0x5f0] ss:$8 sps:$4 sm:$0xff]  }
 0x223   :  { %6886 = vmatmul.mubr.bf16.gmra.mrb[64].mxu0 %v12210_v15  ;;  %5476 = vmatprep.mubr.bf16.mxu1 %v12214_v16  ;;  %v12423_v15 = vld [vmem:[%s16440_s1 + $0x5f4] ss:$8 sps:$4 sm:$0xff]  }
 0x224   :  { %6895 = vmatprep.mubr.bf16.mxu0 %v12216_v17  ;;  %v12426_v16 = vld [vmem:[%s16440_s1 + $0x2b4] ss:$8 sps:$4 sm:$0xff]   ;;  %7196 = vmatprep.subr.bf16.mxu0 %v12423_v15  ;;  %v12424_v17 = vld [vmem:[%s16440_s1 + $0x2b0] ss:$8 sps:$4 sm:$0xff]  }
 0x225   :  { %7197 = vmatpush1.bf16.msra.mxu0 %v12421_v14  ;;  %5769 = vmatprep.subr.bf16.mxu1 %v12426_v16  ;;  %v12390_v14 = vld [vmem:[%s16441_s0 + $0xffc] ss:$52 sps:$4 sm:$0xff]   ;;  %v12392_v15 = vld [vmem:[%s16441_s0 + $0xfe0] ss:$52 sps:$4 sm:$0xff]   ;;  %v12396_v16 = vld [vmem:[%s16441_s0 + $0xff8] ss:$52 sps:$4 sm:$0xff]  }
 0x226   :  { %5770 = vmatpush1.bf16.msra.mxu1 %v12424_v17  ;;  %v12400_v17 = vld [vmem:[%s16441_s0 + $0x104c] ss:$52 sps:$4 sm:$0xff]  }
 0x227   :  { %5771 = vmatprep.subr.bf16.mxu1 %v12434_v22  ;;  %v12414_v22 = vld [vmem:[%s16441_s0 + $0x10cc] ss:$52 sps:$4 sm:$0xff]  }
 0x22a   :  { %5477 = vmatmul.mubr.bf16.gmra.mrb[68].mxu1 %v12218_v18  ;;  %v12281_v18 = vld [vmem:[%s16441_s0 + $0xa98] ss:$52 sps:$4 sm:$0xff]  }
 0x22b   :  { %6896 = vmatmul.mubr.bf16.gmra.mrb[68].mxu0 %v12219_v19  ;;  %5486 = vmatprep.mubr.bf16.mxu1 %v12220_v20  ;;  %v12282_v19 = vld [vmem:[%s16441_s0 + $0xab0] ss:$52 sps:$4 sm:$0xff]  }
 0x22c   :  { %6905 = vmatprep.mubr.bf16.mxu0 %v12222_v21  ;;  %v12283_v20 = vld [vmem:[%s16441_s0 + $0xb04] ss:$52 sps:$4 sm:$0xff]   ;;  %v12285_v21 = vld [vmem:[%s16441_s0 + $0xb1c] ss:$52 sps:$4 sm:$0xff]   ;;  %5772 = vmatpush1.bf16.msra.mxu1 %v12432_v23 }
 0x22d   :  { %5773 = vmatprep.subr.bf16.mxu1 %v12438_v24  ;;  %v12416_v23 = vld [vmem:[%s16441_s0 + $0x10b0] ss:$52 sps:$4 sm:$0xff]   ;;  %v12420_v24 = vld [vmem:[%s16441_s0 + $0x10c8] ss:$52 sps:$4 sm:$0xff]  }
 0x230   :  { %5774 = vmatpush1.bf16.msra.mxu1 %v12436_v25  ;;  %v12427_v25 = vld [vmem:[%s16441_s0 + $0x111c] ss:$52 sps:$4 sm:$0xff]  }
 0x232   :  { %5487 = vmatmul.mubr.bf16.gmra.mrb[72].mxu1 %v12224_v26  ;;  %v12287_v26 = vld [vmem:[%s16441_s0 + $0xb00] ss:$52 sps:$4 sm:$0xff]  }
 0x233   :  { %6906 = vmatmul.mubr.bf16.gmra.mrb[72].mxu0 %v12225_v27  ;;  %5496 = vmatprep.mubr.bf16.mxu1 %v12226_v28  ;;  %v12288_v27 = vld [vmem:[%s16441_s0 + $0xb18] ss:$52 sps:$4 sm:$0xff]  }
 0x234   :  { %6915 = vmatprep.mubr.bf16.mxu0 %v12228_v29  ;;  %v12295_v28 = vld [vmem:[%s16441_s0 + $0xb6c] ss:$52 sps:$4 sm:$0xff]   ;;  %v12297_v29 = vld [vmem:[%s16441_s0 + $0xb84] ss:$52 sps:$4 sm:$0xff]  }
 0x23a   :  { %5497 = vmatmul.mubr.bf16.gmra.mrb[76].mxu1 %v12230_v30  ;;  %v12446_v30 = vld [vmem:[%s16440_s1 + $0x2e4] ss:$8 sps:$4 sm:$0xff]  }
 0x23b   :  { %6916 = vmatmul.mubr.bf16.gmra.mrb[76].mxu0 %v12231_v31  ;;  %5506 = vmatprep.mubr.bf16.mxu1 %v12235_v32  ;;  %v12444_v31 = vld [vmem:[%s16440_s1 + $0x2e0] ss:$8 sps:$4 sm:$0xff]   ;;  %v12450_v32 = vld [vmem:[%s16440_s1 + $0x2f4] ss:$8 sps:$4 sm:$0xff]  }
 0x23c   :  { %6925 = vmatprep.mubr.bf16.mxu0 %v12237_v33  ;;  %5775 = vmatprep.subr.bf16.mxu1 %v12446_v30  ;;  %v12448_v33 = vld [vmem:[%s16440_s1 + $0x2f0] ss:$8 sps:$4 sm:$0xff]  }
 0x23d   :  { %5776 = vmatpush1.bf16.msra.mxu1 %v12444_v31  ;;  %v12441_v30 = vld [vmem:[%s16441_s0 + $0x119c] ss:$52 sps:$4 sm:$0xff]   ;;  %v12443_v31 = vld [vmem:[%s16441_s0 + $0x1180] ss:$52 sps:$4 sm:$0xff]  }
 0x23e   :  { %5777 = vmatprep.subr.bf16.mxu1 %v12450_v32  ;;  %v12447_v32 = vld [vmem:[%s16441_s0 + $0x1198] ss:$52 sps:$4 sm:$0xff]  }
 0x241   :  { %5778 = vmatpush1.bf16.msra.mxu1 %v12448_v33  ;;  %v12453_v33 = vld [vmem:[%s16441_s0 + $0x14] ss:$52 sps:$4 sm:$0xff]  }
 0x242   :  { %5507 = vmatmul.mubr.bf16.gmra.mrb[80].mxu1 %v12239_v36  ;;  %v12301_v36 = vld [vmem:[%s16441_s0 + $0xbd4] ss:$52 sps:$4 sm:$0xff]  }
 0x243   :  { %6926 = vmatmul.mubr.bf16.gmra.mrb[80].mxu0 %v12240_v37  ;;  %5516 = vmatprep.mubr.bf16.mxu1 %v12241_v38  ;;  %v12303_v37 = vld [vmem:[%s16441_s0 + $0xbec] ss:$52 sps:$4 sm:$0xff]  }
 0x244   :  { %6935 = vmatprep.mubr.bf16.mxu0 %v12243_v39  ;;  %v12459_v38 = vld [vmem:[%s16440_s1 + $0x604] ss:$8 sps:$4 sm:$0xff]  }
 0x245   :  { %7639 = vmatprep.subr.bf16.mxu0 %v12459_v38  ;;  %v12305_v39 = vld [vmem:[%s16441_s0 + $0xbd0] ss:$52 sps:$4 sm:$0xff]  }
 0x246   :  { %v12460_v38 = vld [vmem:[%s16441_s0 + $0x7c] ss:$52 sps:$4 sm:$0xff]  }
 0x24a   :  { %5517 = vmatmul.mubr.bf16.gmra.mrb[84].mxu1 %v12245_v42  ;;  %v12309_v42 = vld [vmem:[%s16441_s0 + $0xc54] ss:$52 sps:$4 sm:$0xff]  }
 0x24b   :  { %6936 = vmatmul.mubr.bf16.gmra.mrb[84].mxu0 %v12246_v43  ;;  %5526 = vmatprep.mubr.bf16.mxu1 %v12247_v44  ;;  %v12311_v43 = vld [vmem:[%s16441_s0 + $0xc38] ss:$52 sps:$4 sm:$0xff]   ;;  %v12312_v44 = vld [vmem:[%s16441_s0 + $0xc50] ss:$52 sps:$4 sm:$0xff]  }
 0x24c   :  { %6945 = vmatprep.mubr.bf16.mxu0 %v12249_v45  ;;  %v12319_v45 = vld [vmem:[%s16441_s0 + $0xca4] ss:$52 sps:$4 sm:$0xff]  }
 0x252   :  { %5527 = vmatmul.mubr.bf16.gmra.mrb[88].mxu1 %v12251_v46  ;;  %v12321_v46 = vld [vmem:[%s16441_s0 + $0xcbc] ss:$52 sps:$4 sm:$0xff]  }
 0x253   :  { %6946 = vmatmul.mubr.bf16.gmra.mrb[88].mxu0 %v12252_v47  ;;  %5536 = vmatprep.mubr.bf16.mxu1 %v12256_v48  ;;  %v12323_v47 = vld [vmem:[%s16441_s0 + $0xca0] ss:$52 sps:$4 sm:$0xff]   ;;  %v12324_v48 = vld [vmem:[%s16441_s0 + $0xcb8] ss:$52 sps:$4 sm:$0xff]  }
 0x254   :  { %6955 = vmatprep.mubr.bf16.mxu0 %v12258_v49  ;;  %v12325_v49 = vld [vmem:[%s16441_s0 + $0xd0c] ss:$52 sps:$4 sm:$0xff]  }
 0x25a   :  { %5537 = vmatmul.mubr.bf16.gmra.mrb[92].mxu1 %v12260_v56  ;;  %v12336_v56 = vld [vmem:[%s16441_s0 + $0xd88] ss:$52 sps:$4 sm:$0xff]  }
 0x25b   :  { %6956 = vmatmul.mubr.bf16.gmra.mrb[92].mxu0 %v12261_v57  ;;  %5546 = vmatprep.mubr.bf16.mxu1 %v12262_v58  ;;  %v12343_v57 = vld [vmem:[%s16441_s0 + $0xddc] ss:$52 sps:$4 sm:$0xff]   ;;  %v12345_v58 = vld [vmem:[%s16441_s0 + $0xdf4] ss:$52 sps:$4 sm:$0xff]  }
 0x25c   :  { %6965 = vmatprep.mubr.bf16.mxu0 %v12264_v59  ;;  %v12347_v59 = vld [vmem:[%s16441_s0 + $0xdd8] ss:$52 sps:$4 sm:$0xff]  }
 0x262   :  { %5547 = vmatmul.mubr.bf16.gmra.mrb[96].mxu1 %v12266_v0  ;;  %v12354_v0 = vld [vmem:[%s16441_s0 + $0xe58] ss:$52 sps:$4 sm:$0xff]  }
 0x263   :  { %6966 = vmatmul.mubr.bf16.gmra.mrb[96].mxu0 %v12267_v1  ;;  %5556 = vmatprep.mubr.bf16.mxu1 %v12271_v2  ;;  %v12358_v1 = vld [vmem:[%s16441_s0 + $0xeac] ss:$52 sps:$4 sm:$0xff]   ;;  %v12360_v2 = vld [vmem:[%s16441_s0 + $0xec4] ss:$52 sps:$4 sm:$0xff]  }
 0x264   :  { %6975 = vmatprep.mubr.bf16.mxu0 %v12273_v3  ;;  %v12362_v3 = vld [vmem:[%s16441_s0 + $0xea8] ss:$52 sps:$4 sm:$0xff]  }
 0x26a   :  { %5557 = vmatmul.mubr.bf16.gmra.mrb[100].mxu1 %v12275_v8  ;;  %v12372_v8 = vld [vmem:[%s16441_s0 + $0xf28] ss:$52 sps:$4 sm:$0xff]  }
 0x26b   :  { %6976 = vmatmul.mubr.bf16.gmra.mrb[100].mxu0 %v12276_v9  ;;  %5566 = vmatprep.mubr.bf16.mxu1 %v12277_v10  ;;  %v12373_v9 = vld [vmem:[%s16441_s0 + $0xf7c] ss:$52 sps:$4 sm:$0xff]   ;;  %v12375_v10 = vld [vmem:[%s16441_s0 + $0xf94] ss:$52 sps:$4 sm:$0xff]  }
 0x26c   :  { %6985 = vmatprep.mubr.bf16.mxu0 %v12279_v11  ;;  %v12377_v11 = vld [vmem:[%s16441_s0 + $0xf78] ss:$52 sps:$4 sm:$0xff]  }
 0x272   :  { %5567 = vmatmul.mubr.bf16.gmra.mrb[104].mxu1 %v12281_v18  ;;  %v12402_v18 = vld [vmem:[%s16441_s0 + $0x1064] ss:$52 sps:$4 sm:$0xff]  }
 0x273   :  { %6986 = vmatmul.mubr.bf16.gmra.mrb[104].mxu0 %v12282_v19  ;;  %5576 = vmatprep.mubr.bf16.mxu1 %v12283_v20  ;;  %v12404_v19 = vld [vmem:[%s16441_s0 + $0x1048] ss:$52 sps:$4 sm:$0xff]   ;;  %v12408_v20 = vld [vmem:[%s16441_s0 + $0x1060] ss:$52 sps:$4 sm:$0xff]  }
 0x274   :  { %6995 = vmatprep.mubr.bf16.mxu0 %v12285_v21  ;;  %v12412_v21 = vld [vmem:[%s16441_s0 + $0x10b4] ss:$52 sps:$4 sm:$0xff]  }
 0x27a   :  { %5577 = vmatmul.mubr.bf16.gmra.mrb[108].mxu1 %v12287_v26  ;;  %v12429_v26 = vld [vmem:[%s16441_s0 + $0x1134] ss:$52 sps:$4 sm:$0xff]  }
 0x27b   :  { %6996 = vmatmul.mubr.bf16.gmra.mrb[108].mxu0 %v12288_v27  ;;  %5586 = vmatprep.mubr.bf16.mxu1 %v12295_v28  ;;  %v12431_v27 = vld [vmem:[%s16441_s0 + $0x1118] ss:$52 sps:$4 sm:$0xff]   ;;  %v12435_v28 = vld [vmem:[%s16441_s0 + $0x1130] ss:$52 sps:$4 sm:$0xff]  }
 0x27c   :  { %7005 = vmatprep.mubr.bf16.mxu0 %v12297_v29  ;;  %v12439_v29 = vld [vmem:[%s16441_s0 + $0x1184] ss:$52 sps:$4 sm:$0xff]  }
 0x282   :  { %5587 = vmatmul.mubr.bf16.gmra.mrb[112].mxu1 %v12299_v34  ;;  %v12456_v34 = vld [vmem:[%s16441_s0 + $0x2c] ss:$52 sps:$4 sm:$0xff]  }
 0x283   :  { %7006 = vmatmul.mubr.bf16.gmra.mrb[112].mxu0 %v12300_v35  ;;  %5596 = vmatprep.mubr.bf16.mxu1 %v12301_v36  ;;  %v12451_v35 = vld [vmem:[%s16441_s0 + $0x10] ss:$52 sps:$4 sm:$0xff]   ;;  %v12454_v36 = vld [vmem:[%s16441_s0 + $0x28] ss:$52 sps:$4 sm:$0xff]  }
 0x284   :  { %7015 = vmatprep.mubr.bf16.mxu0 %v12303_v37  ;;  %v12457_v37 = vld [vmem:[%s16440_s1 + $0x600] ss:$8 sps:$4 sm:$0xff]  }
 0x28a   :  { %5597 = vmatmul.mubr.bf16.gmra.mrb[116].mxu1 %v12305_v39  ;;  %v12462_v39 = vld [vmem:[%s16441_s0 + $0x94] ss:$52 sps:$4 sm:$0xff]  }
 0x28b   :  { %7016 = vmatmul.mubr.bf16.gmra.mrb[116].mxu0 %v12306_v40  ;;  %5606 = vmatprep.mubr.bf16.mxu1 %v12307_v41  ;;  %v12492_v40 = vld [vmem:[%s16440_s1 + $0x614] ss:$8 sps:$4 sm:$0xff]   ;;  %v12490_v41 = vld [vmem:[%s16440_s1 + $0x610] ss:$8 sps:$4 sm:$0xff]  }
 0x28c   :  { %7025 = vmatprep.mubr.bf16.mxu0 %v12309_v42  ;;  %v12531_v42 = vld [vmem:[%s16440_s1 + $0x624] ss:$8 sps:$4 sm:$0xff]  }
 0x292   :  { %5607 = vmatmul.mubr.bf16.gmra.mrb[120].mxu1 %v12311_v43  ;;  %v12464_v43 = vld [vmem:[%s16441_s0 + $0x78] ss:$52 sps:$4 sm:$0xff]  }
 0x293   :  { %7026 = vmatmul.mubr.bf16.gmra.mrb[120].mxu0 %v12312_v44  ;;  %5616 = vmatprep.mubr.bf16.mxu1 %v12319_v45  ;;  %v12465_v44 = vld [vmem:[%s16441_s0 + $0x90] ss:$52 sps:$4 sm:$0xff]  }
 0x294   :  { %7035 = vmatprep.mubr.bf16.mxu0 %v12321_v46  ;;  %v12466_v45 = vld [vmem:[%s16441_s0 + $0xe4] ss:$52 sps:$4 sm:$0xff]   ;;  %v12468_v46 = vld [vmem:[%s16441_s0 + $0xfc] ss:$52 sps:$4 sm:$0xff]  }
 0x29a   :  { %5617 = vmatmul.mubr.bf16.gmra.mrb[124].mxu1 %v12323_v47  ;;  %v12529_v47 = vld [vmem:[%s16440_s1 + $0x620] ss:$8 sps:$4 sm:$0xff]  }
 0x29b   :  { %7036 = vmatmul.mubr.bf16.gmra.mrb[124].mxu0 %v12324_v48  ;;  %5626 = vmatprep.mubr.bf16.mxu1 %v12325_v49  ;;  %v12564_v48 = vld [vmem:[%s16440_s1 + $0x634] ss:$8 sps:$4 sm:$0xff]   ;;  %v12562_v49 = vld [vmem:[%s16440_s1 + $0x630] ss:$8 sps:$4 sm:$0xff]  }
 0x29c   :  { %7045 = vmatprep.mubr.bf16.mxu0 %v12327_v50  ;;  %v12470_v50 = vld [vmem:[%s16441_s0 + $0xe0] ss:$52 sps:$4 sm:$0xff]  }
 0x2a2   :  { %5627 = vmatmul.mubr.bf16.gmra.mrb[128].mxu1 %v12329_v51  ;;  %v12471_v51 = vld [vmem:[%s16441_s0 + $0xf8] ss:$52 sps:$4 sm:$0xff]  }
 0x2a3   :  { %7046 = vmatmul.mubr.bf16.gmra.mrb[128].mxu0 %v12330_v52  ;;  %5636 = vmatprep.mubr.bf16.mxu1 %v12331_v53  ;;  %v12472_v52 = vld [vmem:[%s16441_s0 + $0x14c] ss:$52 sps:$4 sm:$0xff]   ;;  %v12474_v53 = vld [vmem:[%s16441_s0 + $0x164] ss:$52 sps:$4 sm:$0xff]  }
 0x2a4   :  { %7055 = vmatprep.mubr.bf16.mxu0 %v12333_v54  ;;  %v12476_v54 = vld [vmem:[%s16441_s0 + $0x148] ss:$52 sps:$4 sm:$0xff]  }
 0x2aa   :  { %5637 = vmatmul.mubr.bf16.gmra.mrb[132].mxu1 %v12335_v55  ;;  %v12477_v55 = vld [vmem:[%s16441_s0 + $0x160] ss:$52 sps:$4 sm:$0xff]  }
 0x2ab   :  { %7056 = vmatmul.mubr.bf16.gmra.mrb[132].mxu0 %v12336_v56  ;;  %5646 = vmatprep.mubr.bf16.mxu1 %v12343_v57  ;;  %v12478_v56 = vld [vmem:[%s16441_s0 + $0x1b4] ss:$52 sps:$4 sm:$0xff]   ;;  %v12480_v57 = vld [vmem:[%s16441_s0 + $0x1cc] ss:$52 sps:$4 sm:$0xff]  }
 0x2ac   :  { %7065 = vmatprep.mubr.bf16.mxu0 %v12345_v58  ;;  %v12482_v58 = vld [vmem:[%s16441_s0 + $0x1b0] ss:$52 sps:$4 sm:$0xff]  }
 0x2b2   :  { %5647 = vmatmul.mubr.bf16.gmra.mrb[136].mxu1 %v12347_v59  ;;  %v12483_v59 = vld [vmem:[%s16441_s0 + $0x1c8] ss:$52 sps:$4 sm:$0xff]  }
 0x2b3   :  { %7066 = vmatmul.mubr.bf16.gmra.mrb[136].mxu0 %v12348_v60  ;;  %5656 = vmatprep.mubr.bf16.mxu1 %v12349_v61  ;;  %v12484_v60 = vld [vmem:[%s16441_s0 + $0x21c] ss:$52 sps:$4 sm:$0xff]   ;;  %v12486_v61 = vld [vmem:[%s16441_s0 + $0x234] ss:$52 sps:$4 sm:$0xff]  }
 0x2b4   :  { %7075 = vmatprep.mubr.bf16.mxu0 %v12351_v62  ;;  %v12488_v62 = vld [vmem:[%s16441_s0 + $0x218] ss:$52 sps:$4 sm:$0xff]  }
 0x2ba   :  { %5657 = vmatmul.mubr.bf16.gmra.mrb[140].mxu1 %v12353_v63  ;;  %v12489_v63 = vld [vmem:[%s16441_s0 + $0x230] ss:$52 sps:$4 sm:$0xff]  }
 0x2bb   :  { %7076 = vmatmul.mubr.bf16.gmra.mrb[140].mxu0 %v12354_v0  ;;  %5666 = vmatprep.mubr.bf16.mxu1 %v12358_v1  ;;  %v12493_v0 = vld [vmem:[%s16441_s0 + $0x284] ss:$52 sps:$4 sm:$0xff]   ;;  %v12495_v1 = vld [vmem:[%s16441_s0 + $0x29c] ss:$52 sps:$4 sm:$0xff]  }
 0x2bc   :  { %7085 = vmatprep.mubr.bf16.mxu0 %v12360_v2  ;;  %v12497_v2 = vld [vmem:[%s16441_s0 + $0x280] ss:$52 sps:$4 sm:$0xff]  }
 0x2c2   :  { %5667 = vmatmul.mubr.bf16.gmra.mrb[144].mxu1 %v12362_v3  ;;  %v12498_v3 = vld [vmem:[%s16441_s0 + $0x298] ss:$52 sps:$4 sm:$0xff]  }
 0x2c3   :  { %7086 = vmatmul.mubr.bf16.gmra.mrb[144].mxu0 %v12366_v4  ;;  %5676 = vmatprep.mubr.bf16.mxu1 %v12367_v5  ;;  %v12499_v4 = vld [vmem:[%s16441_s0 + $0x2ec] ss:$52 sps:$4 sm:$0xff]   ;;  %v12501_v5 = vld [vmem:[%s16441_s0 + $0x304] ss:$52 sps:$4 sm:$0xff]  }
 0x2c4   :  { %7095 = vmatprep.mubr.bf16.mxu0 %v12369_v6  ;;  %v12601_v6 = vld [vmem:[%s16440_s1 + $0x640] ss:$8 sps:$4 sm:$0xff]  }
 0x2ca   :  { %5677 = vmatmul.mubr.bf16.gmra.mrb[148].mxu1 %v12371_v7  ;;  %v12603_v7 = vld [vmem:[%s16440_s1 + $0x644] ss:$8 sps:$4 sm:$0xff]  }
 0x2cb   :  { %7096 = vmatmul.mubr.bf16.gmra.mrb[148].mxu0 %v12372_v8  ;;  %5686 = vmatprep.mubr.bf16.mxu1 %v12373_v9  ;;  %v12503_v8 = vld [vmem:[%s16441_s0 + $0x2e8] ss:$52 sps:$4 sm:$0xff]   ;;  %v12504_v9 = vld [vmem:[%s16441_s0 + $0x300] ss:$52 sps:$4 sm:$0xff]  }
 0x2cc   :  { %7105 = vmatprep.mubr.bf16.mxu0 %v12375_v10  ;;  %v12505_v10 = vld [vmem:[%s16441_s0 + $0x354] ss:$52 sps:$4 sm:$0xff]  }
 0x2d2   :  { %5687 = vmatmul.mubr.bf16.gmra.mrb[152].mxu1 %v12377_v11  ;;  %v12507_v11 = vld [vmem:[%s16441_s0 + $0x36c] ss:$52 sps:$4 sm:$0xff]  }
 0x2d3   :  { %7106 = vmatmul.mubr.bf16.gmra.mrb[152].mxu0 %v12381_v12  ;;  %5696 = vmatprep.mubr.bf16.mxu1 %v12388_v13  ;;  %v12509_v12 = vld [vmem:[%s16441_s0 + $0x350] ss:$52 sps:$4 sm:$0xff]   ;;  %v12510_v13 = vld [vmem:[%s16441_s0 + $0x368] ss:$52 sps:$4 sm:$0xff]  }
 0x2d4   :  { %7115 = vmatprep.mubr.bf16.mxu0 %v12390_v14  ;;  %v12511_v14 = vld [vmem:[%s16441_s0 + $0x3bc] ss:$52 sps:$4 sm:$0xff]  }
 0x2da   :  { %5697 = vmatmul.mubr.bf16.gmra.mrb[156].mxu1 %v12392_v15  ;;  %v12513_v15 = vld [vmem:[%s16441_s0 + $0x3d4] ss:$52 sps:$4 sm:$0xff]  }
 0x2db   :  { %7116 = vmatmul.mubr.bf16.gmra.mrb[156].mxu0 %v12396_v16  ;;  %5706 = vmatprep.mubr.bf16.mxu1 %v12400_v17  ;;  %v12515_v16 = vld [vmem:[%s16441_s0 + $0x3b8] ss:$52 sps:$4 sm:$0xff]   ;;  %v12516_v17 = vld [vmem:[%s16441_s0 + $0x3d0] ss:$52 sps:$4 sm:$0xff]  }
 0x2dc   :  { %7125 = vmatprep.mubr.bf16.mxu0 %v12402_v18  ;;  %v12517_v18 = vld [vmem:[%s16441_s0 + $0x424] ss:$52 sps:$4 sm:$0xff]  }
 0x2e2   :  { %5707 = vmatmul.mubr.bf16.gmra.mrb[160].mxu1 %v12404_v19  ;;  %v12519_v19 = vld [vmem:[%s16441_s0 + $0x43c] ss:$52 sps:$4 sm:$0xff]  }
 0x2e3   :  { %7126 = vmatmul.mubr.bf16.gmra.mrb[160].mxu0 %v12408_v20  ;;  %5716 = vmatprep.mubr.bf16.mxu1 %v12412_v21  ;;  %v12521_v20 = vld [vmem:[%s16441_s0 + $0x420] ss:$52 sps:$4 sm:$0xff]   ;;  %v12522_v21 = vld [vmem:[%s16441_s0 + $0x438] ss:$52 sps:$4 sm:$0xff]  }
 0x2e4   :  { %7135 = vmatprep.mubr.bf16.mxu0 %v12414_v22  ;;  %v12523_v22 = vld [vmem:[%s16441_s0 + $0x48c] ss:$52 sps:$4 sm:$0xff]  }
 0x2ea   :  { %5717 = vmatmul.mubr.bf16.gmra.mrb[164].mxu1 %v12416_v23  ;;  %v12525_v23 = vld [vmem:[%s16441_s0 + $0x4a4] ss:$52 sps:$4 sm:$0xff]  }
 0x2eb   :  { %7136 = vmatmul.mubr.bf16.gmra.mrb[164].mxu0 %v12420_v24  ;;  %5726 = vmatprep.mubr.bf16.mxu1 %v12427_v25  ;;  %v12527_v24 = vld [vmem:[%s16441_s0 + $0x488] ss:$52 sps:$4 sm:$0xff]   ;;  %v12528_v25 = vld [vmem:[%s16441_s0 + $0x4a0] ss:$52 sps:$4 sm:$0xff]  }
 0x2ec   :  { %7145 = vmatprep.mubr.bf16.mxu0 %v12429_v26  ;;  %v12532_v26 = vld [vmem:[%s16441_s0 + $0x4f4] ss:$52 sps:$4 sm:$0xff]  }
 0x2f2   :  { %5727 = vmatmul.mubr.bf16.gmra.mrb[168].mxu1 %v12431_v27  ;;  %v12534_v27 = vld [vmem:[%s16441_s0 + $0x50c] ss:$52 sps:$4 sm:$0xff]  }
 0x2f3   :  { %7146 = vmatmul.mubr.bf16.gmra.mrb[168].mxu0 %v12435_v28  ;;  %5736 = vmatprep.mubr.bf16.mxu1 %v12439_v29  ;;  %v12536_v28 = vld [vmem:[%s16441_s0 + $0x4f0] ss:$52 sps:$4 sm:$0xff]   ;;  %v12537_v29 = vld [vmem:[%s16441_s0 + $0x508] ss:$52 sps:$4 sm:$0xff]  }
 0x2f4   :  { %7155 = vmatprep.mubr.bf16.mxu0 %v12441_v30  ;;  %v12634_v30 = vld [vmem:[%s16440_s1 + $0x650] ss:$8 sps:$4 sm:$0xff]  }
 0x2fa   :  { %5737 = vmatmul.mubr.bf16.gmra.mrb[172].mxu1 %v12443_v31  ;;  %v12636_v31 = vld [vmem:[%s16440_s1 + $0x654] ss:$8 sps:$4 sm:$0xff]  }
 0x2fb   :  { %7156 = vmatmul.mubr.bf16.gmra.mrb[172].mxu0 %v12447_v32  ;;  %5779 = vmatprep.mubr.bf16.mxu1 %v12453_v33  ;;  %v12538_v32 = vld [vmem:[%s16441_s0 + $0x55c] ss:$52 sps:$4 sm:$0xff]   ;;  %v12540_v33 = vld [vmem:[%s16441_s0 + $0x574] ss:$52 sps:$4 sm:$0xff]  }
 0x2fc   :  { %7198 = vmatprep.mubr.bf16.mxu0 %v12456_v34  ;;  %v16446_v34 = vmov 0  }
 0x2fd   :  { %8511 = vmatprep.subr.bf16.mxu1 %v16446_v34 }
 0x302   :  { %5780 = vmatmul.mubr.bf16.vlgmr.msra.gmra.mrb[0].mxu1 %v12451_v35  ;;  %v12641_v35 = vld [vmem:[%s16442_s3] sm:$0xff]  }
 0x303   :  { %7199 = vmatmul.mubr.bf16.vlgmr.msra.gmra.mrb[0].mxu0 %v12454_v36  ;;  %5789 = vmatprep.mubr.bf16.mxu1 %v12460_v38  ;;  %v12542_v36 = vld [vmem:[%s16441_s0 + $0x558] ss:$52 sps:$4 sm:$0xff]  }
 0x304   :  { %7640 = vmatpush1.bf16.msra.mxu0 %v12457_v37  ;;  %7208 = vmatprep.mubr.bf16.mxu0 %v12462_v39  ;;  %v12543_v37 = vld [vmem:[%s16441_s0 + $0x570] ss:$52 sps:$4 sm:$0xff]  }
 0x305   :  { %7641 = vmatprep.subr.bf16.mxu0 %v12492_v40  ;;  %8512 = vmatpush1.bf16.msra.mxu1 %v12641_v35  ;;  %v12544_v38 = vld [vmem:[%s16441_s0 + $0x5c4] ss:$52 sps:$4 sm:$0xff]   ;;  %v12546_v39 = vld [vmem:[%s16441_s0 + $0x5dc] ss:$52 sps:$4 sm:$0xff]   ;;  %v12548_v40 = vld [vmem:[%s16441_s0 + $0x5c0] ss:$52 sps:$4 sm:$0xff]  }
 0x306   :  { %8513 = vmatprep.subr.bf16.mxu1 %v16446_v34  ;;  %v12628_v35 = vld [vmem:[%s16441_s0 + $0xb0c] ss:$52 sps:$4 sm:$0xff]  }
 0x308   :  { %7642 = vmatpush1.bf16.msra.mxu0 %v12490_v41  ;;  %v12549_v41 = vld [vmem:[%s16441_s0 + $0x5d8] ss:$52 sps:$4 sm:$0xff]  }
 0x309   :  { %7643 = vmatprep.subr.bf16.mxu0 %v12531_v42  ;;  %v12550_v42 = vld [vmem:[%s16441_s0 + $0x62c] ss:$52 sps:$4 sm:$0xff]  }
 0x30a   :  { %5790 = vmatmul.mubr.bf16.gmra.mrb[4].mxu1 %v12464_v43  ;;  %v12552_v43 = vld [vmem:[%s16441_s0 + $0x644] ss:$52 sps:$4 sm:$0xff]  }
 0x30b   :  { %7209 = vmatmul.mubr.bf16.gmra.mrb[4].mxu0 %v12465_v44  ;;  %5799 = vmatprep.mubr.bf16.mxu1 %v12466_v45  ;;  %v12554_v44 = vld [vmem:[%s16441_s0 + $0x628] ss:$52 sps:$4 sm:$0xff]   ;;  %v12555_v45 = vld [vmem:[%s16441_s0 + $0x640] ss:$52 sps:$4 sm:$0xff]  }
 0x30c   :  { %7218 = vmatprep.mubr.bf16.mxu0 %v12468_v46  ;;  %7644 = vmatpush1.bf16.msra.mxu0 %v12529_v47  ;;  %v12556_v46 = vld [vmem:[%s16441_s0 + $0x694] ss:$52 sps:$4 sm:$0xff]   ;;  %v12558_v47 = vld [vmem:[%s16441_s0 + $0x6ac] ss:$52 sps:$4 sm:$0xff]  }
 0x30d   :  { %7645 = vmatprep.subr.bf16.mxu0 %v12564_v48  ;;  %v12656_v48 = vld [vmem:[%s16442_s3 + $0x8] sm:$0xff]  }
 0x30e   :  { %8514 = vmatpush1.bf16.msra.mxu1 %v12656_v48  ;;  %v12642_v48 = vld [vmem:[%s16441_s0 + $0xb70] ss:$52 sps:$4 sm:$0xff]  }
 0x30f   :  { %8515 = vmatprep.subr.bf16.mxu1 %v16446_v34 }
 0x310   :  { %7646 = vmatpush1.bf16.msra.mxu0 %v12562_v49  ;;  %v12560_v49 = vld [vmem:[%s16441_s0 + $0x690] ss:$52 sps:$4 sm:$0xff]  }
 0x311   :  { %7647 = vmatprep.subr.bf16.mxu0 %v12603_v7  ;;  %v12591_v7 = vld [vmem:[%s16441_s0 + $0x8b4] ss:$52 sps:$4 sm:$0xff]  }
 0x312   :  { %5800 = vmatmul.mubr.bf16.gmra.mrb[8].mxu1 %v12470_v50  ;;  %v12561_v50 = vld [vmem:[%s16441_s0 + $0x6a8] ss:$52 sps:$4 sm:$0xff]  }
 0x313   :  { %7219 = vmatmul.mubr.bf16.gmra.mrb[8].mxu0 %v12471_v51  ;;  %5809 = vmatprep.mubr.bf16.mxu1 %v12472_v52  ;;  %v12565_v51 = vld [vmem:[%s16441_s0 + $0x6fc] ss:$52 sps:$4 sm:$0xff]   ;;  %v12567_v52 = vld [vmem:[%s16441_s0 + $0x714] ss:$52 sps:$4 sm:$0xff]  }
 0x314   :  { %7228 = vmatprep.mubr.bf16.mxu0 %v12474_v53  ;;  %7648 = vmatpush1.bf16.msra.mxu0 %v12601_v6  ;;  %v12569_v53 = vld [vmem:[%s16441_s0 + $0x6f8] ss:$52 sps:$4 sm:$0xff]   ;;  %v12589_v6 = vld [vmem:[%s16441_s0 + $0x89c] ss:$52 sps:$4 sm:$0xff]  }
 0x315   :  { %7649 = vmatprep.subr.bf16.mxu0 %v12636_v31  ;;  %v12624_v31 = vld [vmem:[%s16441_s0 + $0xabc] ss:$52 sps:$4 sm:$0xff]  }
 0x318   :  { %7650 = vmatpush1.bf16.msra.mxu0 %v12634_v30  ;;  %v12622_v30 = vld [vmem:[%s16441_s0 + $0xaa4] ss:$52 sps:$4 sm:$0xff]  }
 0x31a   :  { %5810 = vmatmul.mubr.bf16.gmra.mrb[12].mxu1 %v12476_v54  ;;  %v12570_v54 = vld [vmem:[%s16441_s0 + $0x710] ss:$52 sps:$4 sm:$0xff]  }
 0x31b   :  { %7229 = vmatmul.mubr.bf16.gmra.mrb[12].mxu0 %v12477_v55  ;;  %5819 = vmatprep.mubr.bf16.mxu1 %v12478_v56  ;;  %v12571_v55 = vld [vmem:[%s16441_s0 + $0x764] ss:$52 sps:$4 sm:$0xff]   ;;  %v12573_v56 = vld [vmem:[%s16441_s0 + $0x77c] ss:$52 sps:$4 sm:$0xff]  }
 0x31c   :  { %7238 = vmatprep.mubr.bf16.mxu0 %v12480_v57  ;;  %v12675_v57 = vld [vmem:[%s16440_s1 + $0x660] ss:$8 sps:$4 sm:$0xff]  }
 0x322   :  { %5820 = vmatmul.mubr.bf16.gmra.mrb[16].mxu1 %v12482_v58  ;;  %v12677_v58 = vld [vmem:[%s16440_s1 + $0x664] ss:$8 sps:$4 sm:$0xff]  }
 0x323   :  { %7239 = vmatmul.mubr.bf16.gmra.mrb[16].mxu0 %v12483_v59  ;;  %5829 = vmatprep.mubr.bf16.mxu1 %v12484_v60  ;;  %v12678_v59 = vld [vmem:[%s16442_s3 + $0x10] sm:$0xff]  }
 0x324   :  { %7248 = vmatprep.mubr.bf16.mxu0 %v12486_v61  ;;  %7651 = vmatprep.subr.bf16.mxu0 %v12677_v58  ;;  %v12575_v60 = vld [vmem:[%s16441_s0 + $0x760] ss:$52 sps:$4 sm:$0xff]   ;;  %v12576_v61 = vld [vmem:[%s16441_s0 + $0x778] ss:$52 sps:$4 sm:$0xff]   ;;  %v12649_v58 = vld [vmem:[%s16441_s0 + $0xbf0] ss:$52 sps:$4 sm:$0xff]  }
 0x325   :  { %7652 = vmatpush1.bf16.msra.mxu0 %v12675_v57  ;;  %8516 = vmatpush1.bf16.msra.mxu1 %v12678_v59  ;;  %v12648_v57 = vld [vmem:[%s16441_s0 + $0xbd8] ss:$52 sps:$4 sm:$0xff]  }
 0x326   :  { %8517 = vmatprep.subr.bf16.mxu1 %v16446_v34 }
 0x32a   :  { %5830 = vmatmul.mubr.bf16.gmra.mrb[20].mxu1 %v12488_v62  ;;  %v12577_v62 = vld [vmem:[%s16441_s0 + $0x7cc] ss:$52 sps:$4 sm:$0xff]  }
 0x32b   :  { %7249 = vmatmul.mubr.bf16.gmra.mrb[20].mxu0 %v12489_v63  ;;  %5839 = vmatprep.mubr.bf16.mxu1 %v12493_v0  ;;  %v12579_v63 = vld [vmem:[%s16441_s0 + $0x7e4] ss:$52 sps:$4 sm:$0xff]   ;;  %v12581_v0 = vld [vmem:[%s16441_s0 + $0x7c8] ss:$52 sps:$4 sm:$0xff]  }
 0x32c   :  { %7258 = vmatprep.mubr.bf16.mxu0 %v12495_v1  ;;  %v12582_v1 = vld [vmem:[%s16441_s0 + $0x7e0] ss:$52 sps:$4 sm:$0xff]  }
 0x332   :  { %5840 = vmatmul.mubr.bf16.gmra.mrb[24].mxu1 %v12497_v2  ;;  %v12583_v2 = vld [vmem:[%s16441_s0 + $0x834] ss:$52 sps:$4 sm:$0xff]  }
 0x333   :  { %7259 = vmatmul.mubr.bf16.gmra.mrb[24].mxu0 %v12498_v3  ;;  %5849 = vmatprep.mubr.bf16.mxu1 %v12499_v4  ;;  %v12585_v3 = vld [vmem:[%s16441_s0 + $0x84c] ss:$52 sps:$4 sm:$0xff]   ;;  %v12587_v4 = vld [vmem:[%s16441_s0 + $0x830] ss:$52 sps:$4 sm:$0xff]  }
 0x334   :  { %7268 = vmatprep.mubr.bf16.mxu0 %v12501_v5  ;;  %v12588_v5 = vld [vmem:[%s16441_s0 + $0x848] ss:$52 sps:$4 sm:$0xff]  }
 0x33a   :  { %5850 = vmatmul.mubr.bf16.gmra.mrb[28].mxu1 %v12503_v8  ;;  %v12697_v8 = vld [vmem:[%s16442_s3 + $0x18] sm:$0xff]  }
 0x33b   :  { %7269 = vmatmul.mubr.bf16.gmra.mrb[28].mxu0 %v12504_v9  ;;  %5859 = vmatprep.mubr.bf16.mxu1 %v12505_v10  ;;  %v12593_v9 = vld [vmem:[%s16441_s0 + $0x898] ss:$52 sps:$4 sm:$0xff]   ;;  %v12594_v10 = vld [vmem:[%s16441_s0 + $0x8b0] ss:$52 sps:$4 sm:$0xff]  }
 0x33c   :  { %7278 = vmatprep.mubr.bf16.mxu0 %v12507_v11  ;;  %8518 = vmatpush1.bf16.msra.mxu1 %v12697_v8  ;;  %v12595_v11 = vld [vmem:[%s16441_s0 + $0x904] ss:$52 sps:$4 sm:$0xff]  }
 0x33d   :  { %8519 = vmatprep.subr.bf16.mxu1 %v16446_v34 }
 0x342   :  { %5860 = vmatmul.mubr.bf16.gmra.mrb[32].mxu1 %v12509_v12  ;;  %v12597_v12 = vld [vmem:[%s16441_s0 + $0x91c] ss:$52 sps:$4 sm:$0xff]  }
 0x343   :  { %7279 = vmatmul.mubr.bf16.gmra.mrb[32].mxu0 %v12510_v13  ;;  %5869 = vmatprep.mubr.bf16.mxu1 %v12511_v14  ;;  %v12599_v13 = vld [vmem:[%s16441_s0 + $0x900] ss:$52 sps:$4 sm:$0xff]   ;;  %v12600_v14 = vld [vmem:[%s16441_s0 + $0x918] ss:$52 sps:$4 sm:$0xff]  }
 0x344   :  { %7288 = vmatprep.mubr.bf16.mxu0 %v12513_v15  ;;  %v12604_v15 = vld [vmem:[%s16441_s0 + $0x96c] ss:$52 sps:$4 sm:$0xff]  }
 0x34a   :  { %5870 = vmatmul.mubr.bf16.gmra.mrb[36].mxu1 %v12515_v16  ;;  %v12606_v16 = vld [vmem:[%s16441_s0 + $0x984] ss:$52 sps:$4 sm:$0xff]  }
 0x34b   :  { %7289 = vmatmul.mubr.bf16.gmra.mrb[36].mxu0 %v12516_v17  ;;  %5879 = vmatprep.mubr.bf16.mxu1 %v12517_v18  ;;  %v12608_v17 = vld [vmem:[%s16441_s0 + $0x968] ss:$52 sps:$4 sm:$0xff]   ;;  %v12609_v18 = vld [vmem:[%s16441_s0 + $0x980] ss:$52 sps:$4 sm:$0xff]  }
 0x34c   :  { %7298 = vmatprep.mubr.bf16.mxu0 %v12519_v19  ;;  %v12710_v19 = vld [vmem:[%s16440_s1 + $0x670] ss:$8 sps:$4 sm:$0xff]  }
 0x352   :  { %5880 = vmatmul.mubr.bf16.gmra.mrb[40].mxu1 %v12521_v20  ;;  %v12712_v20 = vld [vmem:[%s16440_s1 + $0x674] ss:$8 sps:$4 sm:$0xff]  }
 0x353   :  { %7299 = vmatmul.mubr.bf16.gmra.mrb[40].mxu0 %v12522_v21  ;;  %5889 = vmatprep.mubr.bf16.mxu1 %v12523_v22  ;;  %v12610_v21 = vld [vmem:[%s16441_s0 + $0x9d4] ss:$52 sps:$4 sm:$0xff]   ;;  %v12612_v22 = vld [vmem:[%s16441_s0 + $0x9ec] ss:$52 sps:$4 sm:$0xff]  }
 0x354   :  { %7308 = vmatprep.mubr.bf16.mxu0 %v12525_v23  ;;  %7653 = vmatprep.subr.bf16.mxu0 %v12712_v20  ;;  %v12717_v23 = vld [vmem:[%s16442_s3 + $0x20] sm:$0xff]  }
 0x355   :  { %7654 = vmatpush1.bf16.msra.mxu0 %v12710_v19  ;;  %8520 = vmatpush1.bf16.msra.mxu1 %v12717_v23  ;;  %v12668_v19 = vld [vmem:[%s16441_s0 + $0xd28] ss:$52 sps:$4 sm:$0xff]  }
 0x356   :  { %8521 = vmatprep.subr.bf16.mxu1 %v16446_v34 }
 0x35a   :  { %5890 = vmatmul.mubr.bf16.gmra.mrb[44].mxu1 %v12527_v24  ;;  %v12614_v24 = vld [vmem:[%s16441_s0 + $0x9d0] ss:$52 sps:$4 sm:$0xff]  }
 0x35b   :  { %7309 = vmatmul.mubr.bf16.gmra.mrb[44].mxu0 %v12528_v25  ;;  %5899 = vmatprep.mubr.bf16.mxu1 %v12532_v26  ;;  %v12615_v25 = vld [vmem:[%s16441_s0 + $0x9e8] ss:$52 sps:$4 sm:$0xff]  }
 0x35c   :  { %7318 = vmatprep.mubr.bf16.mxu0 %v12534_v27  ;;  %v12616_v26 = vld [vmem:[%s16441_s0 + $0xa3c] ss:$52 sps:$4 sm:$0xff]   ;;  %v12618_v27 = vld [vmem:[%s16441_s0 + $0xa54] ss:$52 sps:$4 sm:$0xff]  }
 0x362   :  { %5900 = vmatmul.mubr.bf16.gmra.mrb[48].mxu1 %v12536_v28  ;;  %v12620_v28 = vld [vmem:[%s16441_s0 + $0xa38] ss:$52 sps:$4 sm:$0xff]  }
 0x363   :  { %7319 = vmatmul.mubr.bf16.gmra.mrb[48].mxu0 %v12537_v29  ;;  %5909 = vmatprep.mubr.bf16.mxu1 %v12538_v32  ;;  %v12621_v29 = vld [vmem:[%s16441_s0 + $0xa50] ss:$52 sps:$4 sm:$0xff]   ;;  %v12626_v32 = vld [vmem:[%s16441_s0 + $0xaa0] ss:$52 sps:$4 sm:$0xff]  }
 0x364   :  { %7328 = vmatprep.mubr.bf16.mxu0 %v12540_v33  ;;  %v12627_v33 = vld [vmem:[%s16441_s0 + $0xab8] ss:$52 sps:$4 sm:$0xff]  }
 0x36a   :  { %5910 = vmatmul.mubr.bf16.gmra.mrb[52].mxu1 %v12542_v36  ;;  %v12630_v36 = vld [vmem:[%s16441_s0 + $0xb24] ss:$52 sps:$4 sm:$0xff]  }
 0x36b   :  { %7329 = vmatmul.mubr.bf16.gmra.mrb[52].mxu0 %v12543_v37  ;;  %5919 = vmatprep.mubr.bf16.mxu1 %v12544_v38  ;;  %v12732_v37 = vld [vmem:[%s16442_s3 + $0x28] sm:$0xff]  }
 0x36c   :  { %7338 = vmatprep.mubr.bf16.mxu0 %v12546_v39  ;;  %8522 = vmatpush1.bf16.msra.mxu1 %v12732_v37 }
 0x36d   :  { %8523 = vmatprep.subr.bf16.mxu1 %v16446_v34 }
 0x372   :  { %5920 = vmatmul.mubr.bf16.gmra.mrb[56].mxu1 %v12548_v40  ;;  %v12632_v40 = vld [vmem:[%s16441_s0 + $0xb08] ss:$52 sps:$4 sm:$0xff]  }
 0x373   :  { %7339 = vmatmul.mubr.bf16.gmra.mrb[56].mxu0 %v12549_v41  ;;  %5929 = vmatprep.mubr.bf16.mxu1 %v12550_v42  ;;  %v12633_v41 = vld [vmem:[%s16441_s0 + $0xb20] ss:$52 sps:$4 sm:$0xff]  }
 0x374   :  { %7348 = vmatprep.mubr.bf16.mxu0 %v12552_v43  ;;  %v12637_v43 = vld [vmem:[%s16441_s0 + $0xb74] ss:$52 sps:$4 sm:$0xff]  }
 0x37a   :  { %5930 = vmatmul.mubr.bf16.gmra.mrb[60].mxu1 %v12554_v44  ;;  %v12639_v44 = vld [vmem:[%s16441_s0 + $0xb8c] ss:$52 sps:$4 sm:$0xff]  }
 0x37b   :  { %7349 = vmatmul.mubr.bf16.gmra.mrb[60].mxu0 %v12555_v45  ;;  %5939 = vmatprep.mubr.bf16.mxu1 %v12556_v46 }
 0x37c   :  { %7358 = vmatprep.mubr.bf16.mxu0 %v12558_v47 }
 0x382   :  { %5940 = vmatmul.mubr.bf16.gmra.mrb[64].mxu1 %v12560_v49  ;;  %v12643_v49 = vld [vmem:[%s16441_s0 + $0xb88] ss:$52 sps:$4 sm:$0xff]  }
 0x383   :  { %7359 = vmatmul.mubr.bf16.gmra.mrb[64].mxu0 %v12561_v50  ;;  %5949 = vmatprep.mubr.bf16.mxu1 %v12565_v51  ;;  %v12644_v51 = vld [vmem:[%s16441_s0 + $0xbdc] ss:$52 sps:$4 sm:$0xff]  }
 0x384   :  { %7368 = vmatprep.mubr.bf16.mxu0 %v12567_v52  ;;  %v12646_v52 = vld [vmem:[%s16441_s0 + $0xbf4] ss:$52 sps:$4 sm:$0xff]  }
 0x38a   :  { %5950 = vmatmul.mubr.bf16.gmra.mrb[68].mxu1 %v12569_v53 }
 0x38b   :  { %7369 = vmatmul.mubr.bf16.gmra.mrb[68].mxu0 %v12570_v54  ;;  %5959 = vmatprep.mubr.bf16.mxu1 %v12571_v55  ;;  %v12746_v55 = vld [vmem:[%s16442_s3 + $0x30] sm:$0xff]  }
 0x38c   :  { %7378 = vmatprep.mubr.bf16.mxu0 %v12573_v56  ;;  %8524 = vmatpush1.bf16.msra.mxu1 %v12746_v55 }
 0x38d   :  { %8525 = vmatprep.subr.bf16.mxu1 %v16446_v34 }
 0x392   :  { %5960 = vmatmul.mubr.bf16.gmra.mrb[72].mxu1 %v12575_v60  ;;  %v12650_v60 = vld [vmem:[%s16441_s0 + $0xc44] ss:$52 sps:$4 sm:$0xff]  }
 0x393   :  { %7379 = vmatmul.mubr.bf16.gmra.mrb[72].mxu0 %v12576_v61  ;;  %5969 = vmatprep.mubr.bf16.mxu1 %v12577_v62  ;;  %v12652_v61 = vld [vmem:[%s16441_s0 + $0xc5c] ss:$52 sps:$4 sm:$0xff]  }
 0x394   :  { %7388 = vmatprep.mubr.bf16.mxu0 %v12579_v63 }
 0x39a   :  { %5970 = vmatmul.mubr.bf16.gmra.mrb[76].mxu1 %v12581_v0 }
 0x39b   :  { %7389 = vmatmul.mubr.bf16.gmra.mrb[76].mxu0 %v12582_v1  ;;  %5979 = vmatprep.mubr.bf16.mxu1 %v12583_v2  ;;  %v12654_v1 = vld [vmem:[%s16441_s0 + $0xc40] ss:$52 sps:$4 sm:$0xff]   ;;  %v12655_v2 = vld [vmem:[%s16441_s0 + $0xc58] ss:$52 sps:$4 sm:$0xff]  }
 0x39c   :  { %7398 = vmatprep.mubr.bf16.mxu0 %v12585_v3 }
 0x3a2   :  { %5980 = vmatmul.mubr.bf16.gmra.mrb[80].mxu1 %v12587_v4  ;;  %v12657_v4 = vld [vmem:[%s16441_s0 + $0xcac] ss:$52 sps:$4 sm:$0xff]  }
 0x3a3   :  { %7399 = vmatmul.mubr.bf16.gmra.mrb[80].mxu0 %v12588_v5  ;;  %5989 = vmatprep.mubr.bf16.mxu1 %v12589_v6  ;;  %v12659_v5 = vld [vmem:[%s16441_s0 + $0xcc4] ss:$52 sps:$4 sm:$0xff]  }
 0x3a4   :  { %7408 = vmatprep.mubr.bf16.mxu0 %v12591_v7 }
 0x3aa   :  { %5990 = vmatmul.mubr.bf16.gmra.mrb[84].mxu1 %v12593_v9  ;;  %v12661_v9 = vld [vmem:[%s16441_s0 + $0xca8] ss:$52 sps:$4 sm:$0xff]  }
 0x3ab   :  { %7409 = vmatmul.mubr.bf16.gmra.mrb[84].mxu0 %v12594_v10  ;;  %5999 = vmatprep.mubr.bf16.mxu1 %v12595_v11  ;;  %v12662_v10 = vld [vmem:[%s16441_s0 + $0xcc0] ss:$52 sps:$4 sm:$0xff]  }
 0x3ac   :  { %7418 = vmatprep.mubr.bf16.mxu0 %v12597_v12  ;;  %v12663_v12 = vld [vmem:[%s16441_s0 + $0xd14] ss:$52 sps:$4 sm:$0xff]  }
 0x3b2   :  { %6000 = vmatmul.mubr.bf16.gmra.mrb[88].mxu1 %v12599_v13  ;;  %v12665_v13 = vld [vmem:[%s16441_s0 + $0xd2c] ss:$52 sps:$4 sm:$0xff]  }
 0x3b3   :  { %7419 = vmatmul.mubr.bf16.gmra.mrb[88].mxu0 %v12600_v14  ;;  %6009 = vmatprep.mubr.bf16.mxu1 %v12604_v15  ;;  %v12750_v15 = vld [vmem:[%s16442_s3 + $0x38] sm:$0xff]  }
 0x3b4   :  { %7428 = vmatprep.mubr.bf16.mxu0 %v12606_v16  ;;  %8526 = vmatpush1.bf16.msra.mxu1 %v12750_v15 }
 0x3b5   :  { %8527 = vmatprep.subr.bf16.mxu1 %v16446_v34 }
 0x3ba   :  { %6010 = vmatmul.mubr.bf16.gmra.mrb[92].mxu1 %v12608_v17 }
 0x3bb   :  { %7429 = vmatmul.mubr.bf16.gmra.mrb[92].mxu0 %v12609_v18  ;;  %6019 = vmatprep.mubr.bf16.mxu1 %v12610_v21  ;;  %v12667_v18 = vld [vmem:[%s16441_s0 + $0xd10] ss:$52 sps:$4 sm:$0xff]  }
 0x3bc   :  { %7438 = vmatprep.mubr.bf16.mxu0 %v12612_v22  ;;  %v12669_v21 = vld [vmem:[%s16441_s0 + $0xd7c] ss:$52 sps:$4 sm:$0xff]   ;;  %v12671_v22 = vld [vmem:[%s16441_s0 + $0xd94] ss:$52 sps:$4 sm:$0xff]  }
 0x3c2   :  { %6020 = vmatmul.mubr.bf16.gmra.mrb[96].mxu1 %v12614_v24 }
 0x3c3   :  { %7439 = vmatmul.mubr.bf16.gmra.mrb[96].mxu0 %v12615_v25  ;;  %6029 = vmatprep.mubr.bf16.mxu1 %v12616_v26  ;;  %v12673_v26 = vld [vmem:[%s16441_s0 + $0xd78] ss:$52 sps:$4 sm:$0xff]  }
 0x3c4   :  { %7448 = vmatprep.mubr.bf16.mxu0 %v12618_v27  ;;  %v12674_v27 = vld [vmem:[%s16441_s0 + $0xd90] ss:$52 sps:$4 sm:$0xff]  }
 0x3ca   :  { %6030 = vmatmul.mubr.bf16.gmra.mrb[100].mxu1 %v12620_v28 }
 0x3cb   :  { %7449 = vmatmul.mubr.bf16.gmra.mrb[100].mxu0 %v12621_v29  ;;  %6039 = vmatprep.mubr.bf16.mxu1 %v12622_v30  ;;  %v12679_v29 = vld [vmem:[%s16441_s0 + $0xde4] ss:$52 sps:$4 sm:$0xff]   ;;  %v12681_v30 = vld [vmem:[%s16441_s0 + $0xdfc] ss:$52 sps:$4 sm:$0xff]  }
 0x3cc   :  { %7458 = vmatprep.mubr.bf16.mxu0 %v12624_v31 }
 0x3d2   :  { %6040 = vmatmul.mubr.bf16.gmra.mrb[104].mxu1 %v12626_v32 }
 0x3d3   :  { %7459 = vmatmul.mubr.bf16.gmra.mrb[104].mxu0 %v12627_v33  ;;  %6049 = vmatprep.mubr.bf16.mxu1 %v12628_v35  ;;  %v12683_v35 = vld [vmem:[%s16441_s0 + $0xde0] ss:$52 sps:$4 sm:$0xff]  }
 0x3d4   :  { %7468 = vmatprep.mubr.bf16.mxu0 %v12630_v36  ;;  %v12684_v36 = vld [vmem:[%s16441_s0 + $0xdf8] ss:$52 sps:$4 sm:$0xff]  }
 0x3d5   :  { %v14866_v38 = vpop.f32.mrb[0].mxu1 }
 0x3d6   :  { %v14868_v39 = vpop.f32.mrb[1].mxu1 }
 0x3d7   :  { %v14876_v42 = vpop.f32.mrb[2].mxu1 }
 0x3d8   :  { %v14884_v45 = vpop.f32.mrb[3].mxu1 }
 0x3da   :  { %6050 = vmatmul.mubr.bf16.gmra.mrb[108].mxu1 %v12632_v40  ;;  %v12685_v40 = vld [vmem:[%s16441_s0 + $0xe4c] ss:$52 sps:$4 sm:$0xff]  }
 0x3db   :  { %7469 = vmatmul.mubr.bf16.gmra.mrb[108].mxu0 %v12633_v41  ;;  %6059 = vmatprep.mubr.bf16.mxu1 %v12637_v43  ;;  %v12687_v41 = vld [vmem:[%s16441_s0 + $0xe64] ss:$52 sps:$4 sm:$0xff]  }
 0x3dc   :  { %7478 = vmatprep.mubr.bf16.mxu0 %v12639_v44  ;;  %v12753_v44 = vld [vmem:[%s16442_s3 + $0x40] sm:$0xff]  }
 0x3dd   :  { %v14886_v46 = vpop.f32.mrb[4].mxu1  ;;  %8528 = vmatpush1.bf16.msra.mxu1 %v12753_v44  ;;  %v12713_v44 = vld [vmem:[%s16441_s0 + $0xfec] ss:$52 sps:$4 sm:$0xff]  }
 0x3de   :  { %v14888_v47 = vpop.f32.mrb[5].mxu1  ;;  %8529 = vmatprep.subr.bf16.mxu1 %v16446_v34 }
 0x3df   :  { %v14896_v50 = vpop.f32.mrb[6].mxu1 }
 0x3e0   :  { %v14904_v53 = vpop.f32.mrb[7].mxu1 }
 0x3e2   :  { %6060 = vmatmul.mubr.bf16.gmra.mrb[112].mxu1 %v12642_v48 }
 0x3e3   :  { %7479 = vmatmul.mubr.bf16.gmra.mrb[112].mxu0 %v12643_v49  ;;  %6069 = vmatprep.mubr.bf16.mxu1 %v12644_v51  ;;  %v12689_v51 = vld [vmem:[%s16441_s0 + $0xe48] ss:$52 sps:$4 sm:$0xff]  }
 0x3e4   :  { %7488 = vmatprep.mubr.bf16.mxu0 %v12646_v52  ;;  %v12690_v52 = vld [vmem:[%s16441_s0 + $0xe60] ss:$52 sps:$4 sm:$0xff]  }
 0x3e5   :  { %v14906_v54 = vpop.f32.mrb[8].mxu1 }
 0x3e6   :  { %v14911_v56 = vpop.f32.mrb[9].mxu1 }
 0x3e7   :  { %v14919_v59 = vpop.f32.mrb[10].mxu1 }
 0x3e8   :  { %v14927_v62 = vpop.f32.mrb[11].mxu1 }
 0x3ea   :  { %6070 = vmatmul.mubr.bf16.gmra.mrb[116].mxu1 %v12648_v57  ;;  %v12691_v57 = vld [vmem:[%s16441_s0 + $0xeb4] ss:$52 sps:$4 sm:$0xff]  }
 0x3eb   :  { %7489 = vmatmul.mubr.bf16.gmra.mrb[116].mxu0 %v12649_v58  ;;  %6079 = vmatprep.mubr.bf16.mxu1 %v12650_v60  ;;  %v12693_v58 = vld [vmem:[%s16441_s0 + $0xecc] ss:$52 sps:$4 sm:$0xff]  }
 0x3ec   :  { %7498 = vmatprep.mubr.bf16.mxu0 %v12652_v61 }
 0x3ed   :  { %v14930_v63 = vpop.f32.mrb[12].mxu1 }
 0x3ee   :  { %v14932_v0 = vpop.f32.mrb[13].mxu1 }
 0x3ef   :  { %v14940_v3 = vpop.f32.mrb[14].mxu1 }
 0x3f0   :  { %v14948_v6 = vpop.f32.mrb[15].mxu1 }
 0x3f2   :  { %6080 = vmatmul.mubr.bf16.gmra.mrb[120].mxu1 %v12654_v1 }
 0x3f3   :  { %7499 = vmatmul.mubr.bf16.gmra.mrb[120].mxu0 %v12655_v2  ;;  %6089 = vmatprep.mubr.bf16.mxu1 %v12657_v4  ;;  %v12695_v2 = vld [vmem:[%s16441_s0 + $0xeb0] ss:$52 sps:$4 sm:$0xff]   ;;  %v12696_v4 = vld [vmem:[%s16441_s0 + $0xec8] ss:$52 sps:$4 sm:$0xff]  }
 0x3f4   :  { %7508 = vmatprep.mubr.bf16.mxu0 %v12659_v5 }
 0x3f5   :  { %v14950_v7 = vpop.f32.mrb[16].mxu1 }
 0x3f6   :  { %v14952_v8 = vpop.f32.mrb[17].mxu1 }
 0x3f7   :  { %v14960_v11 = vpop.f32.mrb[18].mxu1 }
 0x3f8   :  { %v14968_v14 = vpop.f32.mrb[19].mxu1 }
 0x3fa   :  { %6090 = vmatmul.mubr.bf16.gmra.mrb[124].mxu1 %v12661_v9  ;;  %v12698_v9 = vld [vmem:[%s16441_s0 + $0xf1c] ss:$52 sps:$4 sm:$0xff]  }
 0x3fb   :  { %7509 = vmatmul.mubr.bf16.gmra.mrb[124].mxu0 %v12662_v10  ;;  %6099 = vmatprep.mubr.bf16.mxu1 %v12663_v12  ;;  %v12700_v10 = vld [vmem:[%s16441_s0 + $0xf34] ss:$52 sps:$4 sm:$0xff]  }
 0x3fc   :  { %7518 = vmatprep.mubr.bf16.mxu0 %v12665_v13 }
 0x3fd   :  { %v14973_v16 = vpop.f32.mrb[20].mxu1 }
 0x3fe   :  { %v14976_v17 = vpop.f32.mrb[21].mxu1 }
 0x3ff   :  { %v14984_v20 = vpop.f32.mrb[22].mxu1 }
 0x400   :  { %v14992_v23 = vpop.f32.mrb[23].mxu1 }
 0x402   :  { %6100 = vmatmul.mubr.bf16.gmra.mrb[128].mxu1 %v12667_v18  ;;  %v12702_v18 = vld [vmem:[%s16441_s0 + $0xf18] ss:$52 sps:$4 sm:$0xff]  }
 0x403   :  { %7519 = vmatmul.mubr.bf16.gmra.mrb[128].mxu0 %v12668_v19  ;;  %6109 = vmatprep.mubr.bf16.mxu1 %v12669_v21  ;;  %v12703_v19 = vld [vmem:[%s16441_s0 + $0xf30] ss:$52 sps:$4 sm:$0xff]  }
 0x404   :  { %7528 = vmatprep.mubr.bf16.mxu0 %v12671_v22  ;;  %v12704_v22 = vld [vmem:[%s16441_s0 + $0xf84] ss:$52 sps:$4 sm:$0xff]  }
 0x405   :  { %v14994_v24 = vpop.f32.mrb[24].mxu1 }
 0x406   :  { %v14996_v25 = vpop.f32.mrb[25].mxu1 }
 0x407   :  { %v15004_v28 = vpop.f32.mrb[26].mxu1 }
 0x408   :  { %v15012_v31 = vpop.f32.mrb[27].mxu1 }
 0x40a   :  { %6110 = vmatmul.mubr.bf16.gmra.mrb[132].mxu1 %v12673_v26  ;;  %v12706_v26 = vld [vmem:[%s16441_s0 + $0xf9c] ss:$52 sps:$4 sm:$0xff]  }
 0x40b   :  { %7529 = vmatmul.mubr.bf16.gmra.mrb[132].mxu0 %v12674_v27  ;;  %6119 = vmatprep.mubr.bf16.mxu1 %v12679_v29  ;;  %v12757_v29 = vld [vmem:[%s16442_s3 + $0x48] sm:$0xff]  }
 0x40c   :  { %7538 = vmatprep.mubr.bf16.mxu0 %v12681_v30  ;;  %8530 = vmatpush1.bf16.msra.mxu1 %v12757_v29  ;;  %v12724_v29 = vld [vmem:[%s16441_s0 + $0x1050] ss:$52 sps:$4 sm:$0xff]  }
 0x40d   :  { %v15014_v32 = vpop.f32.mrb[28].mxu1  ;;  %8531 = vmatprep.subr.bf16.mxu1 %v16446_v34 }
 0x40e   :  { %v15016_v33 = vpop.f32.mrb[29].mxu1 }
 0x40f   :  { %v15024_v37 = vpop.f32.mrb[30].mxu1 }
 0x410   :  { %v15032_v43 = vpop.f32.mrb[31].mxu1 }
 0x412   :  { %6120 = vmatmul.mubr.bf16.gmra.mrb[136].mxu1 %v12683_v35 }
 0x413   :  { %7539 = vmatmul.mubr.bf16.gmra.mrb[136].mxu0 %v12684_v36  ;;  %6129 = vmatprep.mubr.bf16.mxu1 %v12685_v40  ;;  %v12708_v36 = vld [vmem:[%s16441_s0 + $0xf80] ss:$52 sps:$4 sm:$0xff]   ;;  %v12709_v40 = vld [vmem:[%s16441_s0 + $0xf98] ss:$52 sps:$4 sm:$0xff]  }
 0x414   :  { %7548 = vmatprep.mubr.bf16.mxu0 %v12687_v41 }
 0x415   :  { %v15037_v48 = vpop.f32.mrb[32].mxu1 }
 0x416   :  { %v15040_v49 = vpop.f32.mrb[33].mxu1 }
 0x417   :  { %v15048_v55 = vpop.f32.mrb[34].mxu1 }
 0x418   :  { %v15056_v60 = vpop.f32.mrb[35].mxu1 }
 0x41a   :  { %6130 = vmatmul.mubr.bf16.gmra.mrb[140].mxu1 %v12689_v51  ;;  %v12715_v51 = vld [vmem:[%s16441_s0 + $0x1004] ss:$52 sps:$4 sm:$0xff]  }
 0x41b   :  { %7549 = vmatmul.mubr.bf16.gmra.mrb[140].mxu0 %v12690_v52  ;;  %6139 = vmatprep.mubr.bf16.mxu1 %v12691_v57 }
 0x41c   :  { %7558 = vmatprep.mubr.bf16.mxu0 %v12693_v58 }
 0x41d   :  { %v15058_v61 = vpop.f32.mrb[36].mxu1 }
 0x41e   :  { %v15060_v1 = vpop.f32.mrb[37].mxu1 }
 0x41f   :  { %v15068_v5 = vpop.f32.mrb[38].mxu1 }
 0x420   :  { %v15076_v12 = vpop.f32.mrb[39].mxu1 }
 0x422   :  { %6140 = vmatmul.mubr.bf16.gmra.mrb[144].mxu1 %v12695_v2  ;;  %v12718_v2 = vld [vmem:[%s16441_s0 + $0xfe8] ss:$52 sps:$4 sm:$0xff]  }
 0x423   :  { %7559 = vmatmul.mubr.bf16.gmra.mrb[144].mxu0 %v12696_v4  ;;  %6149 = vmatprep.mubr.bf16.mxu1 %v12698_v9  ;;  %v12719_v4 = vld [vmem:[%s16441_s0 + $0x1000] ss:$52 sps:$4 sm:$0xff]  }
 0x424   :  { %7568 = vmatprep.mubr.bf16.mxu0 %v12700_v10  ;;  %v12720_v10 = vld [vmem:[%s16441_s0 + $0x1054] ss:$52 sps:$4 sm:$0xff]  }
 0x425   :  { %v15078_v13 = vpop.f32.mrb[40].mxu1 }
 0x426   :  { %v15080_v15 = vpop.f32.mrb[41].mxu1 }
 0x427   :  { %v15088_v21 = vpop.f32.mrb[42].mxu1 }
 0x428   :  { %v15096_v27 = vpop.f32.mrb[43].mxu1 }
 0x42a   :  { %6150 = vmatmul.mubr.bf16.gmra.mrb[148].mxu1 %v12702_v18  ;;  %v12722_v18 = vld [vmem:[%s16441_s0 + $0x106c] ss:$52 sps:$4 sm:$0xff]  }
 0x42b   :  { %7569 = vmatmul.mubr.bf16.gmra.mrb[148].mxu0 %v12703_v19  ;;  %6159 = vmatprep.mubr.bf16.mxu1 %v12704_v22 }
 0x42c   :  { %7578 = vmatprep.mubr.bf16.mxu0 %v12706_v26 }
 0x42d   :  { %v15101_v30 = vpop.f32.mrb[44].mxu1 }
 0x42e   :  { %v15104_v35 = vpop.f32.mrb[45].mxu1 }
 0x42f   :  { %v15112_v41 = vpop.f32.mrb[46].mxu1 }
 0x430   :  { %16448 = vst [vmem:[#allocation2_spill] sm:$0xff] %v15112_v41  ;;  %v15120_v52 = vpop.f32.mrb[47].mxu1 }
 0x431   :  { %16449 = vst [vmem:[#allocation3_spill] sm:$0xff] %v15120_v52 }
 0x432   :  { %6160 = vmatmul.mubr.bf16.gmra.mrb[152].mxu1 %v12708_v36  ;;  %v12725_v36 = vld [vmem:[%s16441_s0 + $0x1068] ss:$52 sps:$4 sm:$0xff]  }
 0x433   :  { %7579 = vmatmul.mubr.bf16.gmra.mrb[152].mxu0 %v12709_v40  ;;  %6169 = vmatprep.mubr.bf16.mxu1 %v12713_v44  ;;  %v12761_v40 = vld [vmem:[%s16442_s3 + $0x50] sm:$0xff]  }
 0x434   :  { %7588 = vmatprep.mubr.bf16.mxu0 %v12715_v51  ;;  %v12726_v51 = vld [vmem:[%s16441_s0 + $0x10bc] ss:$52 sps:$4 sm:$0xff]   ;;  %8532 = vmatpush1.bf16.msra.mxu1 %v12761_v40 }
 0x435   :  { %v15122_v57 = vpop.f32.mrb[48].mxu1  ;;  %8533 = vmatprep.subr.bf16.mxu1 %v16446_v34  ;;  %v12737_v34 = vld [vmem:[%s16441_s0 + $0x1120] ss:$52 sps:$4 sm:$0xff]  }
 0x436   :  { %16450 = vst [vmem:[#allocation4_spill] sm:$0xff] %v15122_v57  ;;  %v15124_v58 = vpop.f32.mrb[49].mxu1 }
 0x437   :  { %16451 = vst [vmem:[#allocation5_spill] sm:$0xff] %v15124_v58  ;;  %v15132_v9 = vpop.f32.mrb[50].mxu1 }
 0x438   :  { %16452 = vst [vmem:[#allocation6_spill] sm:$0xff] %v15132_v9  ;;  %v15140_v19 = vpop.f32.mrb[51].mxu1 }
 0x439   :  { %16453 = vst [vmem:[#allocation7_spill] sm:$0xff] %v15140_v19 }
 0x43a   :  { %6170 = vmatmul.mubr.bf16.gmra.mrb[156].mxu1 %v12718_v2  ;;  %v12728_v2 = vld [vmem:[%s16441_s0 + $0x10d4] ss:$52 sps:$4 sm:$0xff]  }
 0x43b   :  { %7589 = vmatmul.mubr.bf16.gmra.mrb[156].mxu0 %v12719_v4  ;;  %6179 = vmatprep.mubr.bf16.mxu1 %v12720_v10 }
 0x43c   :  { %7598 = vmatprep.mubr.bf16.mxu0 %v12722_v18 }
 0x43d   :  { %v15142_v22 = vpop.f32.mrb[52].mxu1 }
 0x43e   :  { %16454 = vst [vmem:[#allocation8_spill] sm:$0xff] %v15142_v22  ;;  %v15144_v26 = vpop.f32.mrb[53].mxu1 }
 0x43f   :  { %16455 = vst [vmem:[#allocation9_spill] sm:$0xff] %v15144_v26  ;;  %v15155_v44 = vpop.f32.mrb[54].mxu1  ;;  %v12731_v26 = vld [vmem:[%s16441_s0 + $0x10d0] ss:$52 sps:$4 sm:$0xff]  }
 0x440   :  { %16456 = vst [vmem:[#allocation10_spill] sm:$0xff] %v15155_v44  ;;  %v15163_v4 = vpop.f32.mrb[55].mxu1  ;;  %v12730_v44 = vld [vmem:[%s16441_s0 + $0x10b8] ss:$52 sps:$4 sm:$0xff]  }
 0x441   :  { %16457 = vst [vmem:[#allocation11_spill] sm:$0xff] %v15163_v4 }
 0x442   :  { %6180 = vmatmul.mubr.bf16.gmra.mrb[160].mxu1 %v12724_v29  ;;  %v12733_v29 = vld [vmem:[%s16441_s0 + $0x1124] ss:$52 sps:$4 sm:$0xff]  }
 0x443   :  { %7599 = vmatmul.mubr.bf16.gmra.mrb[160].mxu0 %v12725_v36  ;;  %6189 = vmatprep.mubr.bf16.mxu1 %v12726_v51  ;;  %v12735_v36 = vld [vmem:[%s16441_s0 + $0x113c] ss:$52 sps:$4 sm:$0xff]  }
 0x444   :  { %7608 = vmatprep.mubr.bf16.mxu0 %v12728_v2 }
 0x445   :  { %v15166_v10 = vpop.f32.mrb[56].mxu1 }
 0x446   :  { %16458 = vst [vmem:[#allocation12_spill] sm:$0xff] %v15166_v10  ;;  %v15168_v18 = vpop.f32.mrb[57].mxu1 }
 0x447   :  { %16459 = vst [vmem:[#allocation13_spill] sm:$0xff] %v15168_v18  ;;  %v15176_v4 = vpop.f32.mrb[58].mxu1 }
 0x448   :  { %16460 = vst [vmem:[#allocation14_spill] sm:$0xff] %v15176_v4  ;;  %v15184_v40 = vpop.f32.mrb[59].mxu1  ;;  %v12738_v4 = vld [vmem:[%s16441_s0 + $0x1138] ss:$52 sps:$4 sm:$0xff]  }
 0x449   :  { %16461 = vst [vmem:[#allocation15_spill] sm:$0xff] %v15184_v40  ;;  %v12743_v40 = vld [vmem:[%s16441_s0 + $0x1188] ss:$52 sps:$4 sm:$0xff]  }
 0x44a   :  { %6190 = vmatmul.mubr.bf16.gmra.mrb[164].mxu1 %v12730_v44  ;;  %v12741_v44 = vld [vmem:[%s16441_s0 + $0x11a4] ss:$52 sps:$4 sm:$0xff]  }
 0x44b   :  { %7609 = vmatmul.mubr.bf16.gmra.mrb[164].mxu0 %v12731_v26  ;;  %6199 = vmatprep.mubr.bf16.mxu1 %v12733_v29  ;;  %v12739_v26 = vld [vmem:[%s16441_s0 + $0x118c] ss:$52 sps:$4 sm:$0xff]  }
 0x44c   :  { %7618 = vmatprep.mubr.bf16.mxu0 %v12735_v36  ;;  %v12765_v36 = vld [vmem:[%s16442_s3 + $0x58] sm:$0xff]  }
 0x44d   :  { %v15186_v51 = vpop.f32.mrb[60].mxu1  ;;  %8534 = vmatpush1.bf16.msra.mxu1 %v12765_v36  ;;  %v12745_v36 = vld [vmem:[%s16441_s0 + $0x30] ss:$52 sps:$4 sm:$0xff]  }
 0x44e   :  { %16462 = vst [vmem:[#allocation16_spill] sm:$0xff] %v15186_v51  ;;  %v15188_v2 = vpop.f32.mrb[61].mxu1 }
 0x44f   :  { %16463 = vst [vmem:[#allocation17_spill] sm:$0xff] %v15188_v2  ;;  %v15196_v18 = vpop.f32.mrb[62].mxu1  ;;  %v16467_v2 = vmov 0  }
 0x450   :  { %16464 = vst [vmem:[#allocation18_spill] sm:$0xff] %v15196_v18  ;;  %v15204_v29 = vpop.f32.mrb[63].mxu1  ;;  %8535 = vmatprep.subr.bf16.mxu1 %v16467_v2 }
 0x451   :  { %16465 = vst [vmem:[#allocation19_spill] sm:$0xff] %v15204_v29 }
 0x452   :  { %6200 = vmatmul.mubr.bf16.gmra.mrb[168].mxu1 %v12737_v34  ;;  %v12744_v34 = vld [vmem:[%s16441_s0 + $0x11a0] ss:$52 sps:$4 sm:$0xff]  }
 0x453   :  { %7619 = vmatmul.mubr.bf16.gmra.mrb[168].mxu0 %v12738_v4  ;;  %6209 = vmatprep.mubr.bf16.mxu1 %v12739_v26 }
 0x454   :  { %7628 = vmatprep.mubr.bf16.mxu0 %v12741_v44 }
 0x455   :  { %v15209_v18 = vpop.f32.mrb[64].mxu1 }
 0x456   :  { %16466 = vst [vmem:[#allocation20_spill] sm:$0xff] %v15209_v18  ;;  %v15212_v51 = vpop.f32.mrb[65].mxu1 }
 0x457   :  { %16468 = vst [vmem:[#allocation21_spill] sm:$0xff] %v15212_v51  ;;  %v15220_v4 = vpop.f32.mrb[66].mxu1 }
 0x458   :  { %16469 = vst [vmem:[#allocation22_spill] sm:$0xff] %v15220_v4  ;;  %v15222_v29 = vpop.f32.mrb[67].mxu1 }
 0x459   :  { %16470 = vst [vmem:[#allocation23_spill] sm:$0xff] %v15222_v29 }
 0x45a   :  { %6210 = vmatmul.mubr.bf16.gmra.mrb[172].mxu1 %v12743_v40 }
 0x45b   :  { %7629 = vmatmul.mubr.bf16.gmra.mrb[172].mxu0 %v12744_v34  ;;  %v12747_v34 = vld [vmem:[%s16441_s0 + $0x98] ss:$52 sps:$4 sm:$0xff]  }
 0x45c   :  { %7671 = vmatprep.mubr.bf16.mxu0 %v16467_v2 }
 0x45d   :  { %v15225_v26 = vpop.f32.mrb[68].mxu1 }
 0x45e   :  { %16471 = vst [vmem:[#allocation24_spill] sm:$0xff] %v15225_v26  ;;  %v15227_v44 = vpop.f32.mrb[69].mxu1 }
 0x45f   :  { %16472 = vst [vmem:[#allocation25_spill] sm:$0xff] %v15227_v44  ;;  %v15232_v51 = vpop.f32.mrb[70].mxu1 }
 0x460   :  { %16473 = vst [vmem:[#allocation26_spill] sm:$0xff] %v15232_v51  ;;  %v15234_v18 = vpop.f32.mrb[71].mxu1  ;;  %v12768_v51 = vld [vmem:[%s16442_s3 + $0x60] sm:$0xff]  }
 0x461   :  { %16474 = vst [vmem:[#allocation27_spill] sm:$0xff] %v15234_v18  ;;  %8536 = vmatpush1.bf16.msra.mxu1 %v12768_v51 }
 0x462   :  { %8537 = vmatprep.subr.bf16.mxu1 %v16467_v2 }
 0x463   :  { %7672 = vmatmul.mubr.bf16.vlgmr.msra.gmra.mrb[0].mxu0 %v12745_v36 }
 0x464   :  { %7681 = vmatprep.mubr.bf16.mxu0 %v16467_v2 }
 0x465   :  { %v15237_v29 = vpop.f32.mrb[72].mxu1 }
 0x466   :  { %16475 = vst [vmem:[#allocation28_spill] sm:$0xff] %v15237_v29  ;;  %v15239_v40 = vpop.f32.mrb[73].mxu1 }
 0x467   :  { %16476 = vst [vmem:[#allocation29_spill] sm:$0xff] %v15239_v40  ;;  %v15244_v44 = vpop.f32.mrb[74].mxu1 }
 0x468   :  { %16477 = vst [vmem:[#allocation30_spill] sm:$0xff] %v15244_v44  ;;  %v15246_v26 = vpop.f32.mrb[75].mxu1  ;;  %v12748_v44 = vld [vmem:[%s16441_s0 + $0x100] ss:$52 sps:$4 sm:$0xff]  }
 0x469   :  { %16478 = vst [vmem:[#allocation31_spill] sm:$0xff] %v15246_v26 }
 0x46b   :  { %7682 = vmatmul.mubr.bf16.gmra.mrb[4].mxu0 %v12747_v34 }
 0x46c   :  { %7691 = vmatprep.mubr.bf16.mxu0 %v16467_v2 }
 0x46d   :  { %v15253_v36 = vpop.f32.mrb[76].mxu1 }
 0x46e   :  { %16479 = vst [vmem:[#allocation32_spill] sm:$0xff] %v15253_v36  ;;  %v15255_v40 = vpop.f32.mrb[77].mxu1  ;;  %v12749_v36 = vld [vmem:[%s16441_s0 + $0x168] ss:$52 sps:$4 sm:$0xff]  }
 0x46f   :  { %16480 = vst [vmem:[#allocation33_spill] sm:$0xff] %v15255_v40  ;;  %v15260_v29 = vpop.f32.mrb[78].mxu1 }
 0x470   :  { %16481 = vst [vmem:[#allocation34_spill] sm:$0xff] %v15260_v29  ;;  %v15262_v26 = vpop.f32.mrb[79].mxu1 }
 0x471   :  { %16482 = vst [vmem:[#allocation35_spill] sm:$0xff] %v15262_v26 }
 0x473   :  { %7692 = vmatmul.mubr.bf16.gmra.mrb[8].mxu0 %v12748_v44 }
 0x474   :  { %7701 = vmatprep.mubr.bf16.mxu0 %v16467_v2 }
 0x475   :  { %v15265_v34 = vpop.f32.mrb[80].mxu1 }
 0x476   :  { %16483 = vst [vmem:[#allocation36_spill] sm:$0xff] %v15265_v34  ;;  %v15267_v51 = vpop.f32.mrb[81].mxu1  ;;  %v12751_v34 = vld [vmem:[%s16441_s0 + $0x1d0] ss:$52 sps:$4 sm:$0xff]  }
 0x477   :  { %16484 = vst [vmem:[#allocation37_spill] sm:$0xff] %v15267_v51  ;;  %v15272_v40 = vpop.f32.mrb[82].mxu1 }
 0x478   :  { %16485 = vst [vmem:[#allocation38_spill] sm:$0xff] %v15272_v40  ;;  %v15274_v18 = vpop.f32.mrb[83].mxu1  ;;  %v12772_v40 = vld [vmem:[%s16442_s3 + $0x68] sm:$0xff]  }
 0x479   :  { %16486 = vst [vmem:[#allocation39_spill] sm:$0xff] %v15274_v18  ;;  %8538 = vmatpush1.bf16.msra.mxu1 %v12772_v40 }
 0x47a   :  { %8539 = vmatprep.subr.bf16.mxu1 %v16467_v2 }
 0x47b   :  { %7702 = vmatmul.mubr.bf16.gmra.mrb[12].mxu0 %v12749_v36 }
 0x47c   :  { %7711 = vmatprep.mubr.bf16.mxu0 %v16467_v2 }
 0x47d   :  { %v15277_v29 = vpop.f32.mrb[84].mxu1 }
 0x47e   :  { %16487 = vst [vmem:[#allocation40_spill] sm:$0xff] %v15277_v29  ;;  %v15279_v44 = vpop.f32.mrb[85].mxu1 }
 0x47f   :  { %16488 = vst [vmem:[#allocation41_spill] sm:$0xff] %v15279_v44  ;;  %v15284_v51 = vpop.f32.mrb[86].mxu1 }
 0x480   :  { %16489 = vst [vmem:[#allocation42_spill] sm:$0xff] %v15284_v51  ;;  %v15286_v26 = vpop.f32.mrb[87].mxu1  ;;  %v12752_v51 = vld [vmem:[%s16441_s0 + $0x238] ss:$52 sps:$4 sm:$0xff]  }
 0x481   :  { %16490 = vst [vmem:[#allocation43_spill] sm:$0xff] %v15286_v26 }
 0x483   :  { %7712 = vmatmul.mubr.bf16.gmra.mrb[16].mxu0 %v12751_v34 }
 0x484   :  { %7721 = vmatprep.mubr.bf16.mxu0 %v16467_v2 }
 0x485   :  { %v15293_v36 = vpop.f32.mrb[88].mxu1 }
 0x486   :  { %16491 = vst [vmem:[#allocation44_spill] sm:$0xff] %v15293_v36  ;;  %v15295_v44 = vpop.f32.mrb[89].mxu1  ;;  %v12754_v36 = vld [vmem:[%s16441_s0 + $0x2a0] ss:$52 sps:$4 sm:$0xff]  }
 0x487   :  { %16492 = vst [vmem:[#allocation45_spill] sm:$0xff] %v15295_v44  ;;  %v15300_v29 = vpop.f32.mrb[90].mxu1 }
 0x488   :  { %16493 = vst [vmem:[#allocation46_spill] sm:$0xff] %v15300_v29  ;;  %v15302_v26 = vpop.f32.mrb[91].mxu1 }
 0x489   :  { %16494 = vst [vmem:[#allocation47_spill] sm:$0xff] %v15302_v26 }
 0x48b   :  { %7722 = vmatmul.mubr.bf16.gmra.mrb[20].mxu0 %v12752_v51 }
 0x48c   :  { %7731 = vmatprep.mubr.bf16.mxu0 %v16467_v2 }
 0x48d   :  { %v15305_v40 = vpop.f32.mrb[92].mxu1 }
 0x48e   :  { %16495 = vst [vmem:[#allocation48_spill] sm:$0xff] %v15305_v40  ;;  %v15307_v34 = vpop.f32.mrb[93].mxu1  ;;  %v12755_v40 = vld [vmem:[%s16441_s0 + $0x308] ss:$52 sps:$4 sm:$0xff]  }
 0x48f   :  { %16496 = vst [vmem:[#allocation49_spill] sm:$0xff] %v15307_v34  ;;  %v15312_v44 = vpop.f32.mrb[94].mxu1  ;;  %v12776_v34 = vld [vmem:[%s16442_s3 + $0x70] sm:$0xff]  }
 0x490   :  { %16497 = vst [vmem:[#allocation50_spill] sm:$0xff] %v15312_v44  ;;  %v15314_v18 = vpop.f32.mrb[95].mxu1  ;;  %8540 = vmatpush1.bf16.msra.mxu1 %v12776_v34 }
 0x491   :  { %16498 = vst [vmem:[#allocation51_spill] sm:$0xff] %v15314_v18  ;;  %8541 = vmatprep.subr.bf16.mxu1 %v16467_v2 }
 0x493   :  { %7732 = vmatmul.mubr.bf16.gmra.mrb[24].mxu0 %v12754_v36 }
 0x494   :  { %7741 = vmatprep.mubr.bf16.mxu0 %v16467_v2 }
 0x495   :  { %v15317_v29 = vpop.f32.mrb[96].mxu1 }
 0x496   :  { %16499 = vst [vmem:[#allocation52_spill] sm:$0xff] %v15317_v29  ;;  %v15319_v51 = vpop.f32.mrb[97].mxu1  ;;  %v12756_v29 = vld [vmem:[%s16441_s0 + $0x370] ss:$52 sps:$4 sm:$0xff]  }
 0x497   :  { %16500 = vst [vmem:[#allocation53_spill] sm:$0xff] %v15319_v51  ;;  %v15327_v26 = vpop.f32.mrb[98].mxu1 }
 0x498   :  { %16501 = vst [vmem:[#allocation54_spill] sm:$0xff] %v15327_v26  ;;  %v15329_v44 = vpop.f32.mrb[99].mxu1 }
 0x499   :  { %16502 = vst [vmem:[#allocation55_spill] sm:$0xff] %v15329_v44 }
 0x49b   :  { %7742 = vmatmul.mubr.bf16.gmra.mrb[28].mxu0 %v12755_v40 }
 0x49c   :  { %7751 = vmatprep.mubr.bf16.mxu0 %v16467_v2 }
 0x49d   :  { %v15333_v36 = vpop.f32.mrb[100].mxu1 }
 0x49e   :  { %16503 = vst [vmem:[#allocation56_spill] sm:$0xff] %v15333_v36  ;;  %v15335_v51 = vpop.f32.mrb[101].mxu1  ;;  %v12758_v36 = vld [vmem:[%s16441_s0 + $0x3d8] ss:$52 sps:$4 sm:$0xff]  }
 0x49f   :  { %16504 = vst [vmem:[#allocation57_spill] sm:$0xff] %v15335_v51  ;;  %v15340_v18 = vpop.f32.mrb[102].mxu1 }
 0x4a0   :  { %16505 = vst [vmem:[#allocation58_spill] sm:$0xff] %v15340_v18  ;;  %v15342_v4 = vpop.f32.mrb[103].mxu1 }
 0x4a1   :  { %16506 = vst [vmem:[#allocation59_spill] sm:$0xff] %v15342_v4  ;;  %v12780_v4 = vld [vmem:[%s16442_s3 + $0x78] sm:$0xff]  }
 0x4a2   :  { %8542 = vmatpush1.bf16.msra.mxu1 %v12780_v4  ;;  %v12760_v4 = vld [vmem:[%s16441_s0 + $0x4a8] ss:$52 sps:$4 sm:$0xff]  }
 0x4a3   :  { %7752 = vmatmul.mubr.bf16.gmra.mrb[32].mxu0 %v12756_v29 }
 0x4a4   :  { %7761 = vmatprep.mubr.bf16.mxu0 %v16467_v2 }
 0x4a5   :  { %v15345_v34 = vpop.f32.mrb[104].mxu1 }
 0x4a6   :  { %16507 = vst [vmem:[#allocation60_spill] sm:$0xff] %v15345_v34  ;;  %v15347_v40 = vpop.f32.mrb[105].mxu1 }
 0x4a7   :  { %16508 = vst [vmem:[#allocation61_spill] sm:$0xff] %v15347_v40  ;;  %v15352_v51 = vpop.f32.mrb[106].mxu1  ;;  %v12759_v40 = vld [vmem:[%s16441_s0 + $0x440] ss:$52 sps:$4 sm:$0xff]  }
 0x4a8   :  { %16509 = vst [vmem:[#allocation62_spill] sm:$0xff] %v15352_v51  ;;  %v15354_v44 = vpop.f32.mrb[107].mxu1 }
 0x4a9   :  { %16510 = vst [vmem:[#allocation63_spill] sm:$0xff] %v15354_v44 }
 0x4ab   :  { %7762 = vmatmul.mubr.bf16.gmra.mrb[36].mxu0 %v12758_v36 }
 0x4ac   :  { %7771 = vmatprep.mubr.bf16.mxu0 %v16467_v2 }
 0x4ad   :  { %v15360_v29 = vpop.f32.mrb[108].mxu1 }
 0x4ae   :  { %16511 = vst [vmem:[#allocation64_spill] sm:$0xff] %v15360_v29  ;;  %v15362_v34 = vpop.f32.mrb[109].mxu1 }
 0x4af   :  { %16512 = vst [vmem:[#allocation65_spill] sm:$0xff] %v15362_v34  ;;  %v15367_v18 = vpop.f32.mrb[110].mxu1 }
 0x4b0   :  { %16513 = vst [vmem:[#allocation66_spill] sm:$0xff] %v15367_v18  ;;  %v15369_v51 = vpop.f32.mrb[111].mxu1 }
 0x4b1   :  { %16514 = vst [vmem:[#allocation67_spill] sm:$0xff] %v15369_v51 }
 0x4b3   :  { %7772 = vmatmul.mubr.bf16.gmra.mrb[40].mxu0 %v12759_v40 }
 0x4b4   :  { %7781 = vmatprep.mubr.bf16.mxu0 %v16467_v2 }
 0x4b5   :  { %v15372_v36 = vpop.f32.mrb[112].mxu1 }
 0x4b6   :  { %16515 = vst [vmem:[#allocation68_spill] sm:$0xff] %v15372_v36  ;;  %v15374_v44 = vpop.f32.mrb[113].mxu1  ;;  %v12762_v36 = vld [vmem:[%s16441_s0 + $0x510] ss:$52 sps:$4 sm:$0xff]  }
 0x4b7   :  { %16516 = vst [vmem:[#allocation69_spill] sm:$0xff] %v15374_v44  ;;  %v15379_v34 = vpop.f32.mrb[114].mxu1 }
 0x4b8   :  { %16517 = vst [vmem:[#allocation70_spill] sm:$0xff] %v15379_v34  ;;  %v15381_v29 = vpop.f32.mrb[115].mxu1 }
 0x4b9   :  { %16518 = vst [vmem:[#allocation71_spill] sm:$0xff] %v15381_v29 }
 0x4bb   :  { %7782 = vmatmul.mubr.bf16.gmra.mrb[44].mxu0 %v12760_v4 }
 0x4bc   :  { %7791 = vmatprep.mubr.bf16.mxu0 %v16467_v2 }
 0x4bd   :  { %v15384_v18 = vpop.f32.mrb[116].mxu1 }
 0x4be   :  { %16519 = vst [vmem:[#allocation72_spill] sm:$0xff] %v15384_v18  ;;  %v15386_v40 = vpop.f32.mrb[117].mxu1  ;;  %v12763_v18 = vld [vmem:[%s16441_s0 + $0x578] ss:$52 sps:$4 sm:$0xff]  }
 0x4bf   :  { %16520 = vst [vmem:[#allocation73_spill] sm:$0xff] %v15386_v40  ;;  %v15391_v44 = vpop.f32.mrb[118].mxu1 }
 0x4c0   :  { %16521 = vst [vmem:[#allocation74_spill] sm:$0xff] %v15391_v44  ;;  %v15393_v51 = vpop.f32.mrb[119].mxu1 }
 0x4c1   :  { %16522 = vst [vmem:[#allocation75_spill] sm:$0xff] %v15393_v51 }
 0x4c3   :  { %7792 = vmatmul.mubr.bf16.gmra.mrb[48].mxu0 %v12762_v36 }
 0x4c4   :  { %7801 = vmatprep.mubr.bf16.mxu0 %v16467_v2 }
 0x4c5   :  { %v15396_v34 = vpop.f32.mrb[120].mxu1 }
 0x4c6   :  { %16523 = vst [vmem:[#allocation76_spill] sm:$0xff] %v15396_v34  ;;  %v15398_v4 = vpop.f32.mrb[121].mxu1  ;;  %v12764_v34 = vld [vmem:[%s16441_s0 + $0x5e0] ss:$52 sps:$4 sm:$0xff]  }
 0x4c7   :  { %16524 = vst [vmem:[#allocation77_spill] sm:$0xff] %v15398_v4  ;;  %v15403_v40 = vpop.f32.mrb[122].mxu1 }
 0x4c8   :  { %16525 = vst [vmem:[#allocation78_spill] sm:$0xff] %v15403_v40  ;;  %v15405_v29 = vpop.f32.mrb[123].mxu1 }
 0x4c9   :  { %16526 = vst [vmem:[#allocation79_spill] sm:$0xff] %v15405_v29 }
 0x4cb   :  { %7802 = vmatmul.mubr.bf16.gmra.mrb[52].mxu0 %v12763_v18 }
 0x4cc   :  { %7811 = vmatprep.mubr.bf16.mxu0 %v16467_v2 }
 0x4cd   :  { %v15408_v44 = vpop.f32.mrb[124].mxu1 }
 0x4ce   :  { %16527 = vst [vmem:[#allocation80_spill] sm:$0xff] %v15408_v44  ;;  %v15410_v36 = vpop.f32.mrb[125].mxu1  ;;  %v12766_v44 = vld [vmem:[%s16441_s0 + $0x648] ss:$52 sps:$4 sm:$0xff]  }
 0x4cf   :  { %16528 = vst [vmem:[#allocation81_spill] sm:$0xff] %v15410_v36  ;;  %v15415_v4 = vpop.f32.mrb[126].mxu1 }
 0x4d0   :  { %16529 = vst [vmem:[#allocation82_spill] sm:$0xff] %v15415_v4  ;;  %v15417_v51 = vpop.f32.mrb[127].mxu1 }
 0x4d1   :  { %16530 = vst [vmem:[#allocation83_spill] sm:$0xff] %v15417_v51 }
 0x4d3   :  { %7812 = vmatmul.mubr.bf16.gmra.mrb[56].mxu0 %v12764_v34 }
 0x4d4   :  { %7821 = vmatprep.mubr.bf16.mxu0 %v16467_v2 }
 0x4d5   :  { %v15420_v40 = vpop.f32.mrb[128].mxu1 }
 0x4d6   :  { %16531 = vst [vmem:[#allocation84_spill] sm:$0xff] %v15420_v40  ;;  %v15422_v18 = vpop.f32.mrb[129].mxu1  ;;  %v12767_v40 = vld [vmem:[%s16441_s0 + $0x6b0] ss:$52 sps:$4 sm:$0xff]  }
 0x4d7   :  { %16532 = vst [vmem:[#allocation85_spill] sm:$0xff] %v15422_v18  ;;  %v15427_v36 = vpop.f32.mrb[130].mxu1 }
 0x4d8   :  { %16533 = vst [vmem:[#allocation86_spill] sm:$0xff] %v15427_v36  ;;  %v15429_v29 = vpop.f32.mrb[131].mxu1 }
 0x4d9   :  { %16534 = vst [vmem:[#allocation87_spill] sm:$0xff] %v15429_v29 }
 0x4db   :  { %7822 = vmatmul.mubr.bf16.gmra.mrb[60].mxu0 %v12766_v44 }
 0x4dc   :  { %7831 = vmatprep.mubr.bf16.mxu0 %v16467_v2 }
 0x4dd   :  { %v15432_v4 = vpop.f32.mrb[132].mxu1 }
 0x4de   :  { %16535 = vst [vmem:[#allocation88_spill] sm:$0xff] %v15432_v4  ;;  %v15434_v34 = vpop.f32.mrb[133].mxu1  ;;  %v12769_v4 = vld [vmem:[%s16441_s0 + $0x718] ss:$52 sps:$4 sm:$0xff]  }
 0x4df   :  { %16536 = vst [vmem:[#allocation89_spill] sm:$0xff] %v15434_v34  ;;  %v15439_v18 = vpop.f32.mrb[134].mxu1 }
 0x4e0   :  { %16537 = vst [vmem:[#allocation90_spill] sm:$0xff] %v15439_v18  ;;  %v15441_v51 = vpop.f32.mrb[135].mxu1 }
 0x4e1   :  { %16538 = vst [vmem:[#allocation91_spill] sm:$0xff] %v15441_v51 }
 0x4e3   :  { %7832 = vmatmul.mubr.bf16.gmra.mrb[64].mxu0 %v12767_v40 }
 0x4e4   :  { %7841 = vmatprep.mubr.bf16.mxu0 %v16467_v2 }
 0x4e5   :  { %v15444_v36 = vpop.f32.mrb[136].mxu1 }
 0x4e6   :  { %16539 = vst [vmem:[#allocation92_spill] sm:$0xff] %v15444_v36  ;;  %v15446_v44 = vpop.f32.mrb[137].mxu1  ;;  %v12770_v36 = vld [vmem:[%s16441_s0 + $0x780] ss:$52 sps:$4 sm:$0xff]  }
 0x4e7   :  { %16540 = vst [vmem:[#allocation93_spill] sm:$0xff] %v15446_v44  ;;  %v15451_v34 = vpop.f32.mrb[138].mxu1 }
 0x4e8   :  { %16541 = vst [vmem:[#allocation94_spill] sm:$0xff] %v15451_v34  ;;  %v15453_v29 = vpop.f32.mrb[139].mxu1 }
 0x4e9   :  { %16542 = vst [vmem:[#allocation95_spill] sm:$0xff] %v15453_v29 }
 0x4eb   :  { %7842 = vmatmul.mubr.bf16.gmra.mrb[68].mxu0 %v12769_v4 }
 0x4ec   :  { %7851 = vmatprep.mubr.bf16.mxu0 %v16467_v2 }
 0x4ed   :  { %v15456_v18 = vpop.f32.mrb[140].mxu1 }
 0x4ee   :  { %16543 = vst [vmem:[#allocation96_spill] sm:$0xff] %v15456_v18  ;;  %v15458_v40 = vpop.f32.mrb[141].mxu1  ;;  %v12771_v18 = vld [vmem:[%s16441_s0 + $0x7e8] ss:$52 sps:$4 sm:$0xff]  }
 0x4ef   :  { %16544 = vst [vmem:[#allocation97_spill] sm:$0xff] %v15458_v40  ;;  %v15463_v44 = vpop.f32.mrb[142].mxu1 }
 0x4f0   :  { %16545 = vst [vmem:[#allocation98_spill] sm:$0xff] %v15463_v44  ;;  %v15465_v51 = vpop.f32.mrb[143].mxu1 }
 0x4f1   :  { %16546 = vst [vmem:[#allocation99_spill] sm:$0xff] %v15465_v51 }
 0x4f3   :  { %7852 = vmatmul.mubr.bf16.gmra.mrb[72].mxu0 %v12770_v36 }
 0x4f4   :  { %7861 = vmatprep.mubr.bf16.mxu0 %v16467_v2 }
 0x4f5   :  { %v15468_v34 = vpop.f32.mrb[144].mxu1 }
 0x4f6   :  { %16547 = vst [vmem:[#allocation100_spill] sm:$0xff] %v15468_v34  ;;  %v15470_v4 = vpop.f32.mrb[145].mxu1  ;;  %v12773_v34 = vld [vmem:[%s16441_s0 + $0x850] ss:$52 sps:$4 sm:$0xff]  }
 0x4f7   :  { %16548 = vst [vmem:[#allocation101_spill] sm:$0xff] %v15470_v4  ;;  %v15475_v40 = vpop.f32.mrb[146].mxu1 }
 0x4f8   :  { %16549 = vst [vmem:[#allocation102_spill] sm:$0xff] %v15475_v40  ;;  %v15477_v29 = vpop.f32.mrb[147].mxu1 }
 0x4f9   :  { %16550 = vst [vmem:[#allocation103_spill] sm:$0xff] %v15477_v29 }
 0x4fb   :  { %7862 = vmatmul.mubr.bf16.gmra.mrb[76].mxu0 %v12771_v18 }
 0x4fc   :  { %7871 = vmatprep.mubr.bf16.mxu0 %v16467_v2 }
 0x4fd   :  { %v15480_v44 = vpop.f32.mrb[148].mxu1 }
 0x4fe   :  { %16551 = vst [vmem:[#allocation104_spill] sm:$0xff] %v15480_v44  ;;  %v15482_v36 = vpop.f32.mrb[149].mxu1  ;;  %v12774_v44 = vld [vmem:[%s16441_s0 + $0x8b8] ss:$52 sps:$4 sm:$0xff]  }
 0x4ff   :  { %16552 = vst [vmem:[#allocation105_spill] sm:$0xff] %v15482_v36  ;;  %v15487_v4 = vpop.f32.mrb[150].mxu1 }
 0x500   :  { %16553 = vst [vmem:[#allocation106_spill] sm:$0xff] %v15487_v4  ;;  %v15489_v51 = vpop.f32.mrb[151].mxu1 }
 0x501   :  { %16554 = vst [vmem:[#allocation107_spill] sm:$0xff] %v15489_v51 }
 0x503   :  { %7872 = vmatmul.mubr.bf16.gmra.mrb[80].mxu0 %v12773_v34 }
 0x504   :  { %7881 = vmatprep.mubr.bf16.mxu0 %v16467_v2 }
 0x505   :  { %v15492_v40 = vpop.f32.mrb[152].mxu1 }
 0x506   :  { %16555 = vst [vmem:[#allocation108_spill] sm:$0xff] %v15492_v40  ;;  %v15494_v18 = vpop.f32.mrb[153].mxu1  ;;  %v12775_v40 = vld [vmem:[%s16441_s0 + $0x920] ss:$52 sps:$4 sm:$0xff]  }
 0x507   :  { %16556 = vst [vmem:[#allocation109_spill] sm:$0xff] %v15494_v18  ;;  %v15499_v36 = vpop.f32.mrb[154].mxu1 }
 0x508   :  { %16557 = vst [vmem:[#allocation110_spill] sm:$0xff] %v15499_v36  ;;  %v15501_v29 = vpop.f32.mrb[155].mxu1 }
 0x509   :  { %16558 = vst [vmem:[#allocation111_spill] sm:$0xff] %v15501_v29 }
 0x50b   :  { %7882 = vmatmul.mubr.bf16.gmra.mrb[84].mxu0 %v12774_v44 }
 0x50c   :  { %7891 = vmatprep.mubr.bf16.mxu0 %v16467_v2 }
 0x50d   :  { %v15504_v4 = vpop.f32.mrb[156].mxu1 }
 0x50e   :  { %16559 = vst [vmem:[#allocation112_spill] sm:$0xff] %v15504_v4  ;;  %v15506_v34 = vpop.f32.mrb[157].mxu1  ;;  %v12777_v4 = vld [vmem:[%s16441_s0 + $0x988] ss:$52 sps:$4 sm:$0xff]  }
 0x50f   :  { %16560 = vst [vmem:[#allocation113_spill] sm:$0xff] %v15506_v34  ;;  %v15511_v18 = vpop.f32.mrb[158].mxu1 }
 0x510   :  { %16561 = vst [vmem:[#allocation114_spill] sm:$0xff] %v15511_v18  ;;  %v15513_v51 = vpop.f32.mrb[159].mxu1 }
 0x511   :  { %16562 = vst [vmem:[#allocation115_spill] sm:$0xff] %v15513_v51 }
 0x513   :  { %7892 = vmatmul.mubr.bf16.gmra.mrb[88].mxu0 %v12775_v40 }
 0x514   :  { %7901 = vmatprep.mubr.bf16.mxu0 %v16467_v2 }
 0x515   :  { %v15516_v36 = vpop.f32.mrb[160].mxu1 }
 0x516   :  { %16563 = vst [vmem:[#allocation116_spill] sm:$0xff] %v15516_v36  ;;  %v15518_v44 = vpop.f32.mrb[161].mxu1  ;;  %v12778_v36 = vld [vmem:[%s16441_s0 + $0x9f0] ss:$52 sps:$4 sm:$0xff]  }
 0x517   :  { %16564 = vst [vmem:[#allocation117_spill] sm:$0xff] %v15518_v44  ;;  %v15523_v34 = vpop.f32.mrb[162].mxu1 }
 0x518   :  { %16565 = vst [vmem:[#allocation118_spill] sm:$0xff] %v15523_v34  ;;  %v15525_v29 = vpop.f32.mrb[163].mxu1  ;;  %v847_v34 = vlaneseq }
 0x519   :  { %16566 = vst [vmem:[#allocation119_spill] sm:$0xff] %v15525_v29 }
 0x51a   :  { %v848_v26 = vshrl.u32 %v847_v34, 7 }
 0x51b   :  { %7902 = vmatmul.mubr.bf16.gmra.mrb[92].mxu0 %v12777_v4 }
 0x51c   :  { %7911 = vmatprep.mubr.bf16.mxu0 %v16467_v2 }
 0x51d   :  { %v15528_v18 = vpop.f32.mrb[164].mxu1 }
 0x51e   :  { %16567 = vst [vmem:[#allocation120_spill] sm:$0xff] %v15528_v18  ;;  %v15530_v40 = vpop.f32.mrb[165].mxu1 }
 0x51f   :  { %16568 = vst [vmem:[#allocation121_spill] sm:$0xff] %v15530_v40  ;;  %v15535_v44 = vpop.f32.mrb[166].mxu1  ;;  %v12779_v40 = vld [vmem:[%s16441_s0 + $0xa58] ss:$52 sps:$4 sm:$0xff]  }
 0x520   :  { %16569 = vst [vmem:[#allocation122_spill] sm:$0xff] %v15535_v44  ;;  %v15537_v51 = vpop.f32.mrb[167].mxu1 }
 0x521   :  { %16570 = vst [vmem:[#allocation123_spill] sm:$0xff] %v15537_v51  ;;  %v845_v51 = vld [vmem:[%s16443_s2] sm:$0x3] }
 0x523   :  { %7912 = vmatmul.mubr.bf16.gmra.mrb[96].mxu0 %v12778_v36  ;;  %v849_v36 = vsub.s32 0, %v848_v26 }
 0x524   :  { %7921 = vmatprep.mubr.bf16.mxu0 %v16467_v2 }
 0x525   :  { %v15540_v29 = vpop.f32.mrb[168].mxu1 }
 0x526   :  { %16571 = vst [vmem:[#allocation124_spill] sm:$0xff] %v15540_v29  ;;  %v15542_v4 = vpop.f32.mrb[169].mxu1  ;;  %v853_v29 = vsub.s32 1, %v848_v26 }
 0x527   :  { %16572 = vst [vmem:[#allocation125_spill] sm:$0xff] %v15542_v4  ;;  %v15547_v18 = vpop.f32.mrb[170].mxu1 }
 0x528   :  { %16573 = vst [vmem:[#allocation126_spill] sm:$0xff] %v15547_v18  ;;  %v15549_v10 = vpop.f32.mrb[171].mxu1  ;;  %v12781_v18 = vld [vmem:[%s16441_s0 + $0xac0] ss:$52 sps:$4 sm:$0xff]   ;;  %v15568_v22 = vrot.slane %v845_v51, %v853_v29 }
 0x529   :  { %16574 = vst [vmem:[#allocation127_spill] sm:$0xff] %v15549_v10  ;;  %v15564_v10 = vrot.slane %v845_v51, %v849_v36  ;;  %v12782_v51 = vld [vmem:[%s16441_s0 + $0xb28] ss:$52 sps:$4 sm:$0xff]  }
 0x52b   :  { %7922 = vmatmul.mubr.bf16.gmra.mrb[100].mxu0 %v12779_v40  ;;  %v10402_v26 = vadd.f32 %v14866_v38, %v15564_v10  ;;  %v10406_v36 = vadd.f32 %v14876_v42, %v15564_v10 }
 0x52c   :  { %7931 = vmatprep.mubr.bf16.mxu0 %v16467_v2 }
 0x52d   :  { %v15555_v44 = vpop.f32.mrb[172].mxu1 }
 0x52e   :  { %16575 = vst [vmem:[#allocation128_spill] sm:$0xff] %v15555_v44  ;;  %v15557_v4 = vpop.f32.mrb[173].mxu1 }
 0x52f   :  { %16576 = vst [vmem:[#allocation129_spill] sm:$0xff] %v15557_v4  ;;  %v15562_v34 = vpop.f32.mrb[174].mxu1  ;;  %v10404_v4 = vadd.f32 %v14868_v39, %v15568_v22 }
 0x530   :  { %16577 = vst [vmem:[#allocation130_spill] sm:$0xff] %v15562_v34  ;;  %v15566_v40 = vpop.f32.mrb[175].mxu1 }
 0x531   :  { %16578 = vst [vmem:[#allocation131_spill] sm:$0xff] %v15566_v40  ;;  %v10408_v40 = vadd.f32 %v14884_v45, %v15568_v22 }
 0x533   :  { %7932 = vmatmul.mubr.bf16.gmra.mrb[104].mxu0 %v12781_v18 }
 0x534   :  { %7941 = vmatprep.mubr.bf16.mxu0 %v16467_v2 }
 0x536   :  { %v7673_v44 = vpop.f32.mrb[0].mxu0 }
 0x537   :  { %v10403_v19 = vadd.f32 %v10402_v26, %v7673_v44  ;;  %v7675_v9 = vpop.f32.mrb[1].mxu0  ;;  %v10410_v26 = vadd.f32 %v14886_v46, %v15564_v10  ;;  %v10416_v46 = vadd.f32 %v14904_v53, %v15568_v22  ;;  %v10420_v53 = vadd.f32 %v14911_v56, %v15568_v22 }
 0x538   :  { %v10405_v29 = vadd.f32 %v10404_v4, %v7675_v9  ;;  %v7677_v18 = vpop.f32.mrb[2].mxu0  ;;  %v10412_v4 = vadd.f32 %v14888_v47, %v15568_v22 }
 0x539   :  { %v10407_v34 = vadd.f32 %v10406_v36, %v7677_v18  ;;  %v7679_v38 = vpop.f32.mrb[3].mxu0  ;;  %v8112_v57 = vmax.f32 %v10403_v19, 0.0  ;;  %v10414_v19 = vadd.f32 %v14896_v50, %v15564_v10 }
 0x53a   :  { %v10409_v58 = vadd.f32 %v10408_v40, %v7679_v38  ;;  %v8113_v39 = vmax.f32 %v10405_v29, 0.0 }
 0x53b   :  { %v8114_v52 = vmax.f32 %v10407_v34, 0.0  ;;  %7942 = vmatmul.mubr.bf16.gmra.mrb[108].mxu0 %v12782_v51 }
 0x53c   :  { %v8115_v44 = vmax.f32 %v10409_v58, 0.0  ;;  %7951 = vmatprep.mubr.bf16.mxu0 %v16467_v2  ;;  %v12783_v58 = vld [vmem:[%s16441_s0 + $0xb90] ss:$52 sps:$4 sm:$0xff]  }
 0x53d   :  { %v8288_v42 = vpack.c.bf16 %v8114_v52, %v8112_v57 }
 0x53e   :  { %v8289_v41 = vpack.c.bf16 %v8115_v44, %v8113_v39  ;;  %v7683_v9 = vpop.f32.mrb[4].mxu0  ;;  %v10418_v39 = vadd.f32 %v14906_v54, %v15564_v10  ;;  %v10424_v54 = vadd.f32 %v14927_v62, %v15568_v22  ;;  %v10428_v62 = vadd.f32 %v14932_v0, %v15568_v22 }
 0x53f   :  { %v10411_v45 = vadd.f32 %v10410_v26, %v7683_v9  ;;  %v7685_v36 = vpop.f32.mrb[5].mxu0 }
 0x540   :  { %v10413_v34 = vadd.f32 %v10412_v4, %v7685_v36  ;;  %v7687_v40 = vpop.f32.mrb[6].mxu0  ;;  %8543 = vmatprep.mubr.bf16.mxu1 %v8289_v41  ;;  %v12784_v4 = vld [vmem:[%s16441_s0 + $0xbf8] ss:$52 sps:$4 sm:$0xff]  }
 0x541   :  { %v10415_v52 = vadd.f32 %v10414_v19, %v7687_v40  ;;  %v7689_v57 = vpop.f32.mrb[7].mxu0  ;;  %8544 = vmatmul.mubr.bf16.vlgmr.msra.gmra.mrb[176].mxu1 %v8288_v42  ;;  %v8116_v47 = vmax.f32 %v10411_v45, 0.0  ;;  %v10422_v42 = vadd.f32 %v14919_v59, %v15564_v10 }
 0x542   :  { %v10417_v51 = vadd.f32 %v10416_v46, %v7689_v57  ;;  %v8117_v18 = vmax.f32 %v10413_v34, 0.0  ;;  %v10426_v57 = vadd.f32 %v14930_v63, %v15564_v10  ;;  %v10432_v63 = vadd.f32 %v14948_v6, %v15568_v22 }
 0x543   :  { %v8118_v29 = vmax.f32 %v10415_v52, 0.0  ;;  %7952 = vmatmul.mubr.bf16.gmra.mrb[112].mxu0 %v12783_v58  ;;  %v10436_v6 = vadd.f32 %v14952_v8, %v15568_v22 }
 0x544   :  { %v8119_v38 = vmax.f32 %v10417_v51, 0.0  ;;  %7961 = vmatprep.mubr.bf16.mxu0 %v16467_v2 }
 0x545   :  { %v8290_v50 = vpack.c.bf16 %v8118_v29, %v8116_v47 }
 0x546   :  { %v8291_v44 = vpack.c.bf16 %v8119_v38, %v8117_v18  ;;  %v7693_v41 = vpop.f32.mrb[8].mxu0  ;;  %v10430_v38 = vadd.f32 %v14940_v3, %v15564_v10 }
 0x547   :  { %v10419_v26 = vadd.f32 %v10418_v39, %v7693_v41  ;;  %v7695_v9 = vpop.f32.mrb[9].mxu0 }
 0x548   :  { %v10421_v45 = vadd.f32 %v10420_v53, %v7695_v9  ;;  %v7697_v36 = vpop.f32.mrb[10].mxu0  ;;  %8551 = vmatprep.mubr.bf16.mxu1 %v8291_v44 }
 0x549   :  { %v10423_v19 = vadd.f32 %v10422_v42, %v7697_v36  ;;  %v7699_v58 = vpop.f32.mrb[11].mxu0  ;;  %8552 = vmatmul.mubr.bf16.gmra.mrb[180].mxu1 %v8290_v50  ;;  %v8120_v56 = vmax.f32 %v10419_v26, 0.0  ;;  %v12785_v50 = vld [vmem:[%s16441_s0 + $0xc60] ss:$52 sps:$4 sm:$0xff]  }
 0x54a   :  { %v10425_v34 = vadd.f32 %v10424_v54, %v7699_v58  ;;  %v8121_v46 = vmax.f32 %v10421_v45, 0.0  ;;  %v10434_v45 = vadd.f32 %v14950_v7, %v15564_v10  ;;  %v10440_v7 = vadd.f32 %v14968_v14, %v15568_v22 }
 0x54b   :  { %v8122_v40 = vmax.f32 %v10423_v19, 0.0  ;;  %7962 = vmatmul.mubr.bf16.gmra.mrb[116].mxu0 %v12784_v4  ;;  %v10444_v14 = vadd.f32 %v14976_v17, %v15568_v22 }
 0x54c   :  { %v8123_v52 = vmax.f32 %v10425_v34, 0.0  ;;  %7971 = vmatprep.mubr.bf16.mxu0 %v16467_v2  ;;  %v10438_v34 = vadd.f32 %v14960_v11, %v15564_v10 }
 0x54d   :  { %v8292_v59 = vpack.c.bf16 %v8122_v40, %v8120_v56  ;;  %v12786_v56 = vld [vmem:[%s16441_s0 + $0xcc8] ss:$52 sps:$4 sm:$0xff]  }
 0x54e   :  { %v8293_v51 = vpack.c.bf16 %v8123_v52, %v8121_v46  ;;  %v7703_v47 = vpop.f32.mrb[12].mxu0 }
 0x54f   :  { %v10427_v29 = vadd.f32 %v10426_v57, %v7703_v47  ;;  %v7705_v18 = vpop.f32.mrb[13].mxu0 }
 0x550   :  { %v10429_v39 = vadd.f32 %v10428_v62, %v7705_v18  ;;  %v7707_v44 = vpop.f32.mrb[14].mxu0  ;;  %8559 = vmatprep.mubr.bf16.mxu1 %v8293_v51 }
 0x551   :  { %v10431_v41 = vadd.f32 %v10430_v38, %v7707_v44  ;;  %v7709_v53 = vpop.f32.mrb[15].mxu0  ;;  %8560 = vmatmul.mubr.bf16.gmra.mrb[184].mxu1 %v8292_v59  ;;  %v8124_v0 = vmax.f32 %v10427_v29, 0.0  ;;  %v10442_v29 = vadd.f32 %v14973_v16, %v15564_v10  ;;  %v10446_v44 = vadd.f32 %v14984_v20, %v15564_v10 }
 0x552   :  { %v10433_v26 = vadd.f32 %v10432_v63, %v7709_v53  ;;  %v8125_v42 = vmax.f32 %v10429_v39, 0.0  ;;  %v12787_v63 = vld [vmem:[%s16441_s0 + $0xd30] ss:$52 sps:$4 sm:$0xff]   ;;  %v10448_v16 = vadd.f32 %v14992_v23, %v15568_v22  ;;  %v10452_v23 = vadd.f32 %v14996_v25, %v15568_v22 }
 0x553   :  { %v8126_v9 = vmax.f32 %v10431_v41, 0.0  ;;  %7972 = vmatmul.mubr.bf16.gmra.mrb[120].mxu0 %v12785_v50 }
 0x554   :  { %v8127_v4 = vmax.f32 %v10433_v26, 0.0  ;;  %7981 = vmatprep.mubr.bf16.mxu0 %v16467_v2 }
 0x555   :  { %v8294_v3 = vpack.c.bf16 %v8126_v9, %v8124_v0 }
 0x556   :  { %v8295_v36 = vpack.c.bf16 %v8127_v4, %v8125_v42  ;;  %v7713_v54 = vpop.f32.mrb[16].mxu0 }
 0x557   :  { %v10435_v19 = vadd.f32 %v10434_v45, %v7713_v54  ;;  %v7715_v58 = vpop.f32.mrb[17].mxu0  ;;  %v10450_v45 = vadd.f32 %v14994_v24, %v15564_v10  ;;  %v10456_v24 = vadd.f32 %v15012_v31, %v15568_v22  ;;  %v10460_v31 = vadd.f32 %v15016_v33, %v15568_v22 }
 0x558   :  { %v10437_v40 = vadd.f32 %v10436_v6, %v7715_v58  ;;  %v7717_v46 = vpop.f32.mrb[18].mxu0  ;;  %8567 = vmatprep.mubr.bf16.mxu1 %v8295_v36  ;;  %v10454_v58 = vadd.f32 %v15004_v28, %v15564_v10 }
 0x559   :  { %v10439_v52 = vadd.f32 %v10438_v34, %v7717_v46  ;;  %v7719_v59 = vpop.f32.mrb[19].mxu0  ;;  %8568 = vmatmul.mubr.bf16.gmra.mrb[188].mxu1 %v8294_v3  ;;  %v8128_v8 = vmax.f32 %v10435_v19, 0.0  ;;  %v12788_v34 = vld [vmem:[%s16441_s0 + $0xd98] ss:$52 sps:$4 sm:$0xff]  }
 0x55a   :  { %v10441_v57 = vadd.f32 %v10440_v7, %v7719_v59  ;;  %v8129_v47 = vmax.f32 %v10437_v40, 0.0 }
 0x55b   :  { %v8130_v51 = vmax.f32 %v10439_v52, 0.0  ;;  %7982 = vmatmul.mubr.bf16.gmra.mrb[124].mxu0 %v12786_v56 }
 0x55c   :  { %v8131_v62 = vmax.f32 %v10441_v57, 0.0  ;;  %7991 = vmatprep.mubr.bf16.mxu0 %v16467_v2 }
 0x55d   :  { %v8296_v11 = vpack.c.bf16 %v8130_v51, %v8128_v8  ;;  %v10458_v51 = vadd.f32 %v15014_v32, %v15564_v10  ;;  %v10464_v32 = vadd.f32 %v15032_v43, %v15568_v22  ;;  %v10468_v43 = vadd.f32 %v15040_v49, %v15568_v22 }
 0x55e   :  { %v8297_v18 = vpack.c.bf16 %v8131_v62, %v8129_v47  ;;  %v7723_v38 = vpop.f32.mrb[20].mxu0 }
 0x55f   :  { %v10443_v50 = vadd.f32 %v10442_v29, %v7723_v38  ;;  %v7725_v39 = vpop.f32.mrb[21].mxu0  ;;  %v12789_v38 = vld [vmem:[%s16441_s0 + $0xe00] ss:$52 sps:$4 sm:$0xff]  }
 0x560   :  { %v10445_v41 = vadd.f32 %v10444_v14, %v7725_v39  ;;  %v7727_v53 = vpop.f32.mrb[22].mxu0  ;;  %8575 = vmatprep.mubr.bf16.mxu1 %v8297_v18  ;;  %v10462_v18 = vadd.f32 %v15024_v37, %v15564_v10 }
 0x561   :  { %v10447_v26 = vadd.f32 %v10446_v44, %v7727_v53  ;;  %v7729_v0 = vpop.f32.mrb[23].mxu0  ;;  %8576 = vmatmul.mubr.bf16.gmra.mrb[192].mxu1 %v8296_v11  ;;  %v8132_v17 = vmax.f32 %v10443_v50, 0.0 }
 0x562   :  { %v10449_v9 = vadd.f32 %v10448_v16, %v7729_v0  ;;  %v8133_v4 = vmax.f32 %v10445_v41, 0.0 }
 0x563   :  { %v8134_v42 = vmax.f32 %v10447_v26, 0.0  ;;  %7992 = vmatmul.mubr.bf16.gmra.mrb[128].mxu0 %v12787_v63  ;;  %v10466_v26 = vadd.f32 %v15037_v48, %v15564_v10  ;;  %v10472_v48 = vadd.f32 %v15056_v60, %v15568_v22  ;;  %v10476_v60 = vadd.f32 %v15060_v1, %v15568_v22 }
 0x564   :  { %v8135_v3 = vmax.f32 %v10449_v9, 0.0  ;;  %8001 = vmatprep.mubr.bf16.mxu0 %v16467_v2 }
 0x565   :  { %v8298_v20 = vpack.c.bf16 %v8134_v42, %v8132_v17 }
 0x566   :  { %v8299_v36 = vpack.c.bf16 %v8135_v3, %v8133_v4  ;;  %v7733_v54 = vpop.f32.mrb[24].mxu0  ;;  %v10470_v4 = vadd.f32 %v15048_v55, %v15564_v10  ;;  %v12790_v3 = vld [vmem:[%s16441_s0 + $0xe68] ss:$52 sps:$4 sm:$0xff]  }
 0x567   :  { %v10451_v6 = vadd.f32 %v10450_v45, %v7733_v54  ;;  %v7735_v19 = vpop.f32.mrb[25].mxu0 }
 0x568   :  { %v10453_v56 = vadd.f32 %v10452_v23, %v7735_v19  ;;  %v7737_v40 = vpop.f32.mrb[26].mxu0  ;;  %8583 = vmatprep.mubr.bf16.mxu1 %v8299_v36 }
 0x569   :  { %v10455_v46 = vadd.f32 %v10454_v58, %v7737_v40  ;;  %v7739_v7 = vpop.f32.mrb[27].mxu0  ;;  %8584 = vmatmul.mubr.bf16.gmra.mrb[196].mxu1 %v8298_v20  ;;  %v8136_v25 = vmax.f32 %v10451_v6, 0.0 }
 0x56a   :  { %v10457_v52 = vadd.f32 %v10456_v24, %v7739_v7  ;;  %v8137_v57 = vmax.f32 %v10453_v56, 0.0  ;;  %v10478_v7 = vadd.f32 %v15068_v5, %v15564_v10 }
 0x56b   :  { %v8138_v59 = vmax.f32 %v10455_v46, 0.0  ;;  %8002 = vmatmul.mubr.bf16.gmra.mrb[132].mxu0 %v12788_v34  ;;  %v10474_v34 = vadd.f32 %v15058_v61, %v15564_v10  ;;  %v10480_v61 = vadd.f32 %v15076_v12, %v15568_v22  ;;  %v10484_v12 = vadd.f32 %v15080_v15, %v15568_v22 }
 0x56c   :  { %v8139_v8 = vmax.f32 %v10457_v52, 0.0  ;;  %8011 = vmatprep.mubr.bf16.mxu0 %v16467_v2  ;;  %v12791_v52 = vld [vmem:[%s16441_s0 + $0xed0] ss:$52 sps:$4 sm:$0xff]  }
 0x56d   :  { %v8300_v28 = vpack.c.bf16 %v8138_v59, %v8136_v25 }
 0x56e   :  { %v8301_v47 = vpack.c.bf16 %v8139_v8, %v8137_v57  ;;  %v7743_v62 = vpop.f32.mrb[28].mxu0 }
 0x56f   :  { %v10459_v11 = vadd.f32 %v10458_v51, %v7743_v62  ;;  %v7745_v29 = vpop.f32.mrb[29].mxu0 }
 0x570   :  { %v10461_v14 = vadd.f32 %v10460_v31, %v7745_v29  ;;  %v7747_v50 = vpop.f32.mrb[30].mxu0  ;;  %8591 = vmatprep.mubr.bf16.mxu1 %v8301_v47  ;;  %v10482_v31 = vadd.f32 %v15078_v13, %v15564_v10  ;;  %v10488_v13 = vadd.f32 %v15096_v27, %v15568_v22  ;;  %v10492_v27 = vadd.f32 %v15104_v35, %v15568_v22 }
 0x571   :  { %v10463_v39 = vadd.f32 %v10462_v18, %v7747_v50  ;;  %v7749_v44 = vpop.f32.mrb[31].mxu0  ;;  %8592 = vmatmul.mubr.bf16.gmra.mrb[200].mxu1 %v8300_v28  ;;  %v8140_v33 = vmax.f32 %v10459_v11, 0.0  ;;  %v12792_v50 = vld [vmem:[%s16441_s0 + $0xf38] ss:$52 sps:$4 sm:$0xff]  }
 0x572   :  { %v10465_v63 = vadd.f32 %v10464_v32, %v7749_v44  ;;  %v8141_v53 = vmax.f32 %v10461_v14, 0.0  ;;  %v10486_v14 = vadd.f32 %v15088_v21, %v15564_v10 }
 0x573   :  { %v8142_v41 = vmax.f32 %v10463_v39, 0.0  ;;  %8012 = vmatmul.mubr.bf16.gmra.mrb[136].mxu0 %v12789_v38 }
 0x574   :  { %v8143_v16 = vmax.f32 %v10465_v63, 0.0  ;;  %8021 = vmatprep.mubr.bf16.mxu0 %v16467_v2 }
 0x575   :  { %v8302_v37 = vpack.c.bf16 %v8142_v41, %v8140_v33 }
 0x576   :  { %v8303_v0 = vpack.c.bf16 %v8143_v16, %v8141_v53  ;;  %v7753_v9 = vpop.f32.mrb[32].mxu0 }
 0x577   :  { %v10467_v17 = vadd.f32 %v10466_v26, %v7753_v9  ;;  %v7755_v42 = vpop.f32.mrb[33].mxu0 }
 0x578   :  { %v10469_v20 = vadd.f32 %v10468_v43, %v7755_v42  ;;  %v7757_v45 = vpop.f32.mrb[34].mxu0  ;;  %8599 = vmatprep.mubr.bf16.mxu1 %v8303_v0 }
 0x579   :  { %v10471_v36 = vadd.f32 %v10470_v4, %v7757_v45  ;;  %v7759_v54 = vpop.f32.mrb[35].mxu0  ;;  %8600 = vmatmul.mubr.bf16.gmra.mrb[204].mxu1 %v8302_v37  ;;  %v8144_v49 = vmax.f32 %v10467_v17, 0.0  ;;  %v10490_v37 = vadd.f32 %v15101_v30, %v15564_v10  ;;  %v16579_v17 = vld [vmem:[#allocation2_spill] sm:$0xff]  ;;  %v16580_v45 = vld [vmem:[#allocation3_spill] sm:$0xff] }
 0x57a   :  { %v10473_v23 = vadd.f32 %v10472_v48, %v7759_v54  ;;  %v8145_v19 = vmax.f32 %v10469_v20, 0.0  ;;  %v10494_v42 = vadd.f32 %v16579_v17, %v15564_v10  ;;  %v12793_v4 = vld [vmem:[%s16441_s0 + $0xfa0] ss:$52 sps:$4 sm:$0xff]   ;;  %v10496_v30 = vadd.f32 %v16580_v45, %v15568_v22 }
 0x57b   :  { %v8146_v6 = vmax.f32 %v10471_v36, 0.0  ;;  %8022 = vmatmul.mubr.bf16.gmra.mrb[140].mxu0 %v12790_v3  ;;  %v16589_v17 = vld [vmem:[#allocation12_spill] sm:$0xff] }
 0x57c   :  { %v8147_v58 = vmax.f32 %v10473_v23, 0.0  ;;  %8031 = vmatprep.mubr.bf16.mxu0 %v16467_v2 }
 0x57d   :  { %v8304_v55 = vpack.c.bf16 %v8146_v6, %v8144_v49 }
 0x57e   :  { %v8305_v56 = vpack.c.bf16 %v8147_v58, %v8145_v19  ;;  %v7763_v40 = vpop.f32.mrb[36].mxu0  ;;  %v16581_v58 = vld [vmem:[#allocation4_spill] sm:$0xff] }
 0x57f   :  { %v10475_v24 = vadd.f32 %v10474_v34, %v7763_v40  ;;  %v7765_v46 = vpop.f32.mrb[37].mxu0  ;;  %v16582_v40 = vld [vmem:[#allocation5_spill] sm:$0xff] }
 0x580   :  { %v10477_v25 = vadd.f32 %v10476_v60, %v7765_v46  ;;  %v7767_v59 = vpop.f32.mrb[38].mxu0  ;;  %8607 = vmatprep.mubr.bf16.mxu1 %v8305_v56  ;;  %v10500_v60 = vadd.f32 %v16582_v40, %v15568_v22 }
 0x581   :  { %v10479_v57 = vadd.f32 %v10478_v7, %v7767_v59  ;;  %v7769_v8 = vpop.f32.mrb[39].mxu0  ;;  %8608 = vmatmul.mubr.bf16.gmra.mrb[208].mxu1 %v8304_v55  ;;  %v8148_v1 = vmax.f32 %v10475_v24, 0.0  ;;  %v10498_v55 = vadd.f32 %v16581_v58, %v15564_v10  ;;  %v16583_v7 = vld [vmem:[#allocation6_spill] sm:$0xff] }
 0x582   :  { %v10481_v28 = vadd.f32 %v10480_v61, %v7769_v8  ;;  %v8149_v47 = vmax.f32 %v10477_v25, 0.0  ;;  %v12794_v25 = vld [vmem:[%s16441_s0 + $0x1008] ss:$52 sps:$4 sm:$0xff]  }
 0x583   :  { %v8150_v51 = vmax.f32 %v10479_v57, 0.0  ;;  %8032 = vmatmul.mubr.bf16.gmra.mrb[144].mxu0 %v12791_v52  ;;  %v10502_v52 = vadd.f32 %v16583_v7, %v15564_v10  ;;  %v16584_v57 = vld [vmem:[#allocation7_spill] sm:$0xff]  ;;  %v16593_v7 = vld [vmem:[#allocation16_spill] sm:$0xff] }
 0x584   :  { %v8151_v62 = vmax.f32 %v10481_v28, 0.0  ;;  %8041 = vmatprep.mubr.bf16.mxu0 %v16467_v2  ;;  %v10504_v8 = vadd.f32 %v16584_v57, %v15568_v22 }
 0x585   :  { %v8306_v5 = vpack.c.bf16 %v8150_v51, %v8148_v1 }
 0x586   :  { %v8307_v11 = vpack.c.bf16 %v8151_v62, %v8149_v47  ;;  %v7773_v29 = vpop.f32.mrb[40].mxu0 }
 0x587   :  { %v10483_v18 = vadd.f32 %v10482_v31, %v7773_v29  ;;  %v7775_v38 = vpop.f32.mrb[41].mxu0  ;;  %v16585_v29 = vld [vmem:[#allocation8_spill] sm:$0xff] }
 0x588   :  { %v10485_v32 = vadd.f32 %v10484_v12, %v7775_v38  ;;  %v7777_v39 = vpop.f32.mrb[42].mxu0  ;;  %8615 = vmatprep.mubr.bf16.mxu1 %v8307_v11  ;;  %v10506_v12 = vadd.f32 %v16585_v29, %v15564_v10 }
 0x589   :  { %v10487_v44 = vadd.f32 %v10486_v14, %v7777_v39  ;;  %v7779_v63 = vpop.f32.mrb[43].mxu0  ;;  %8616 = vmatmul.mubr.bf16.gmra.mrb[212].mxu1 %v8306_v5  ;;  %v8152_v15 = vmax.f32 %v10483_v18, 0.0  ;;  %v16586_v14 = vld [vmem:[#allocation9_spill] sm:$0xff] }
 0x58a   :  { %v10489_v33 = vadd.f32 %v10488_v13, %v7779_v63  ;;  %v8153_v53 = vmax.f32 %v10485_v32, 0.0  ;;  %v16587_v13 = vld [vmem:[#allocation10_spill] sm:$0xff] }
 0x58b   :  { %v8154_v41 = vmax.f32 %v10487_v44, 0.0  ;;  %8042 = vmatmul.mubr.bf16.gmra.mrb[148].mxu0 %v12792_v50  ;;  %v10508_v50 = vadd.f32 %v16586_v14, %v15568_v22  ;;  %v10510_v44 = vadd.f32 %v16587_v13, %v15564_v10  ;;  %v12795_v63 = vld [vmem:[%s16441_s0 + $0x1070] ss:$52 sps:$4 sm:$0xff]  }
 0x58c   :  { %v8155_v16 = vmax.f32 %v10489_v33, 0.0  ;;  %8051 = vmatprep.mubr.bf16.mxu0 %v16467_v2  ;;  %v16597_v13 = vld [vmem:[#allocation20_spill] sm:$0xff] }
 0x58d   :  { %v8308_v21 = vpack.c.bf16 %v8154_v41, %v8152_v15  ;;  %v16588_v41 = vld [vmem:[#allocation11_spill] sm:$0xff] }
 0x58e   :  { %v8309_v26 = vpack.c.bf16 %v8155_v16, %v8153_v53  ;;  %v7783_v0 = vpop.f32.mrb[44].mxu0  ;;  %v10512_v53 = vadd.f32 %v16588_v41, %v15568_v22 }
 0x58f   :  { %v10491_v9 = vadd.f32 %v10490_v37, %v7783_v0  ;;  %v7785_v43 = vpop.f32.mrb[45].mxu0 }
 0x590   :  { %v10493_v3 = vadd.f32 %v10492_v27, %v7785_v43  ;;  %v7787_v20 = vpop.f32.mrb[46].mxu0  ;;  %8623 = vmatprep.mubr.bf16.mxu1 %v8309_v26 }
 0x591   :  { %v10495_v48 = vadd.f32 %v10494_v42, %v7787_v20  ;;  %v7789_v36 = vpop.f32.mrb[47].mxu0  ;;  %8624 = vmatmul.mubr.bf16.gmra.mrb[216].mxu1 %v8308_v21  ;;  %v8156_v35 = vmax.f32 %v10491_v9, 0.0  ;;  %v10514_v42 = vadd.f32 %v16589_v17, %v15564_v10  ;;  %v16590_v20 = vld [vmem:[#allocation13_spill] sm:$0xff] }
 0x592   :  { %v10497_v54 = vadd.f32 %v10496_v30, %v7789_v36  ;;  %v8157_v49 = vmax.f32 %v10493_v3, 0.0  ;;  %v10516_v45 = vadd.f32 %v16590_v20, %v15568_v22  ;;  %v16591_v36 = vld [vmem:[#allocation14_spill] sm:$0xff] }
 0x593   :  { %v8158_v23 = vmax.f32 %v10495_v48, 0.0  ;;  %8052 = vmatmul.mubr.bf16.gmra.mrb[152].mxu0 %v12793_v4 }
 0x594   :  { %v8159_v6 = vmax.f32 %v10497_v54, 0.0  ;;  %8061 = vmatprep.mubr.bf16.mxu0 %v16467_v2  ;;  %v10518_v54 = vadd.f32 %v16591_v36, %v15564_v10 }
 0x595   :  { %v8310_v19 = vpack.c.bf16 %v8158_v23, %v8156_v35  ;;  %v12796_v35 = vld [vmem:[%s16441_s0 + $0x10d8] ss:$52 sps:$4 sm:$0xff]  }
 0x596   :  { %v8311_v34 = vpack.c.bf16 %v8159_v6, %v8157_v49  ;;  %v7793_v56 = vpop.f32.mrb[48].mxu0  ;;  %v16592_v6 = vld [vmem:[#allocation15_spill] sm:$0xff] }
 0x597   :  { %v10499_v24 = vadd.f32 %v10498_v55, %v7793_v56  ;;  %v7795_v46 = vpop.f32.mrb[49].mxu0 }
 0x598   :  { %v10501_v59 = vadd.f32 %v10500_v60, %v7795_v46  ;;  %v7797_v61 = vpop.f32.mrb[50].mxu0  ;;  %8631 = vmatprep.mubr.bf16.mxu1 %v8311_v34 }
 0x599   :  { %v10503_v28 = vadd.f32 %v10502_v52, %v7797_v61  ;;  %v7799_v1 = vpop.f32.mrb[51].mxu0  ;;  %8632 = vmatmul.mubr.bf16.gmra.mrb[220].mxu1 %v8310_v19  ;;  %v8160_v47 = vmax.f32 %v10499_v24, 0.0  ;;  %v10520_v19 = vadd.f32 %v16592_v6, %v15568_v22  ;;  %v10522_v52 = vadd.f32 %v16593_v7, %v15564_v10  ;;  %v16594_v61 = vld [vmem:[#allocation17_spill] sm:$0xff] }
 0x59a   :  { %v10505_v51 = vadd.f32 %v10504_v8, %v7799_v1  ;;  %v8161_v5 = vmax.f32 %v10501_v59, 0.0  ;;  %v10524_v57 = vadd.f32 %v16594_v61, %v15568_v22  ;;  %v16595_v1 = vld [vmem:[#allocation18_spill] sm:$0xff] }
 0x59b   :  { %v8162_v62 = vmax.f32 %v10503_v28, 0.0  ;;  %8062 = vmatmul.mubr.bf16.gmra.mrb[156].mxu0 %v12794_v25 }
 0x59c   :  { %v8163_v31 = vmax.f32 %v10505_v51, 0.0  ;;  %8071 = vmatprep.mubr.bf16.mxu0 %v16467_v2  ;;  %v10526_v51 = vadd.f32 %v16595_v1, %v15564_v10 }
 0x59d   :  { %v8312_v11 = vpack.c.bf16 %v8162_v62, %v8160_v47  ;;  %v12797_v47 = vld [vmem:[%s16441_s0 + $0x1140] ss:$52 sps:$4 sm:$0xff]  }
 0x59e   :  { %v8313_v18 = vpack.c.bf16 %v8163_v31, %v8161_v5  ;;  %v7803_v38 = vpop.f32.mrb[52].mxu0  ;;  %v16596_v31 = vld [vmem:[#allocation19_spill] sm:$0xff] }
 0x59f   :  { %v10507_v32 = vadd.f32 %v10506_v12, %v7803_v38  ;;  %v7805_v39 = vpop.f32.mrb[53].mxu0 }
 0x5a0   :  { %v10509_v33 = vadd.f32 %v10508_v50, %v7805_v39  ;;  %v7807_v15 = vpop.f32.mrb[54].mxu0  ;;  %8639 = vmatprep.mubr.bf16.mxu1 %v8313_v18 }
 0x5a1   :  { %v10511_v16 = vadd.f32 %v10510_v44, %v7807_v15  ;;  %v7809_v21 = vpop.f32.mrb[55].mxu0  ;;  %8640 = vmatmul.mubr.bf16.gmra.mrb[224].mxu1 %v8312_v11  ;;  %v8164_v26 = vmax.f32 %v10507_v32, 0.0  ;;  %v10528_v11 = vadd.f32 %v16596_v31, %v15568_v22  ;;  %v10530_v44 = vadd.f32 %v16597_v13, %v15564_v10  ;;  %v16598_v15 = vld [vmem:[#allocation21_spill] sm:$0xff] }
 0x5a2   :  { %v10513_v37 = vadd.f32 %v10512_v53, %v7809_v21  ;;  %v8165_v27 = vmax.f32 %v10509_v33, 0.0  ;;  %v10532_v41 = vadd.f32 %v16598_v15, %v15568_v22  ;;  %v16599_v21 = vld [vmem:[#allocation22_spill] sm:$0xff] }
 0x5a3   :  { %v8166_v0 = vmax.f32 %v10511_v16, 0.0  ;;  %8072 = vmatmul.mubr.bf16.gmra.mrb[160].mxu0 %v12795_v63 }
 0x5a4   :  { %v8167_v9 = vmax.f32 %v10513_v37, 0.0  ;;  %8081 = vmatprep.mubr.bf16.mxu0 %v16467_v2  ;;  %v10534_v37 = vadd.f32 %v16599_v21, %v15564_v10 }
 0x5a5   :  { %v8314_v43 = vpack.c.bf16 %v8166_v0, %v8164_v26  ;;  %v12798_v26 = vld [vmem:[%s16441_s0 + $0x11a8] ss:$52 sps:$4 sm:$0xff]  }
 0x5a6   :  { %v8315_v4 = vpack.c.bf16 %v8167_v9, %v8165_v27  ;;  %v7813_v3 = vpop.f32.mrb[56].mxu0  ;;  %v16600_v27 = vld [vmem:[#allocation23_spill] sm:$0xff] }
 0x5a7   :  { %v10515_v30 = vadd.f32 %v10514_v42, %v7813_v3  ;;  %v7815_v48 = vpop.f32.mrb[57].mxu0  ;;  %v10536_v9 = vadd.f32 %v16600_v27, %v15568_v22  ;;  %v16611_v27 = vld [vmem:[#allocation34_spill] sm:$0xff] }
 0x5a8   :  { %v10517_v23 = vadd.f32 %v10516_v45, %v7815_v48  ;;  %v7817_v49 = vpop.f32.mrb[58].mxu0  ;;  %8647 = vmatprep.mubr.bf16.mxu1 %v8315_v4  ;;  %v16601_v48 = vld [vmem:[#allocation24_spill] sm:$0xff] }
 0x5a9   :  { %v10519_v58 = vadd.f32 %v10518_v54, %v7817_v49  ;;  %v7819_v55 = vpop.f32.mrb[59].mxu0  ;;  %8648 = vmatmul.mubr.bf16.gmra.mrb[228].mxu1 %v8314_v43  ;;  %v8168_v56 = vmax.f32 %v10515_v30, 0.0  ;;  %v10538_v36 = vadd.f32 %v16601_v48, %v15564_v10 }
 0x5aa   :  { %v10521_v34 = vadd.f32 %v10520_v19, %v7819_v55  ;;  %v8169_v60 = vmax.f32 %v10517_v23, 0.0  ;;  %v16602_v23 = vld [vmem:[#allocation25_spill] sm:$0xff] }
 0x5ab   :  { %v8170_v40 = vmax.f32 %v10519_v58, 0.0  ;;  %8082 = vmatmul.mubr.bf16.gmra.mrb[164].mxu0 %v12796_v35  ;;  %v10540_v49 = vadd.f32 %v16602_v23, %v15568_v22  ;;  %v16603_v58 = vld [vmem:[#allocation26_spill] sm:$0xff]  ;;  %v16613_v23 = vld [vmem:[#allocation36_spill] sm:$0xff] }
 0x5ac   :  { %v8171_v24 = vmax.f32 %v10521_v34, 0.0  ;;  %8091 = vmatprep.mubr.bf16.mxu0 %v16467_v2  ;;  %v10542_v55 = vadd.f32 %v16603_v58, %v15564_v10  ;;  %v16614_v58 = vld [vmem:[#allocation37_spill] sm:$0xff] }
 0x5ad   :  { %v8316_v46 = vpack.c.bf16 %v8170_v40, %v8168_v56  ;;  %v16604_v40 = vld [vmem:[#allocation27_spill] sm:$0xff] }
 0x5ae   :  { %v8317_v25 = vpack.c.bf16 %v8171_v24, %v8169_v60  ;;  %v7823_v59 = vpop.f32.mrb[60].mxu0  ;;  %v10544_v60 = vadd.f32 %v16604_v40, %v15568_v22  ;;  %v16615_v40 = vld [vmem:[#allocation38_spill] sm:$0xff] }
 0x5af   :  { %v10523_v8 = vadd.f32 %v10522_v52, %v7823_v59  ;;  %v7825_v28 = vpop.f32.mrb[61].mxu0 }
 0x5b0   :  { %v10525_v62 = vadd.f32 %v10524_v57, %v7825_v28  ;;  %v7827_v5 = vpop.f32.mrb[62].mxu0  ;;  %8655 = vmatprep.mubr.bf16.mxu1 %v8317_v25 }
 0x5b1   :  { %v10527_v29 = vadd.f32 %v10526_v51, %v7827_v5  ;;  %v7829_v12 = vpop.f32.mrb[63].mxu0  ;;  %8656 = vmatmul.mubr.bf16.gmra.mrb[232].mxu1 %v8316_v46  ;;  %v8172_v38 = vmax.f32 %v10523_v8, 0.0  ;;  %v16605_v8 = vld [vmem:[#allocation28_spill] sm:$0xff] }
 0x5b2   :  { %v10529_v18 = vadd.f32 %v10528_v11, %v7829_v12  ;;  %v8173_v50 = vmax.f32 %v10525_v62, 0.0  ;;  %v10546_v28 = vadd.f32 %v16605_v8, %v15564_v10  ;;  %v16607_v11 = vld [vmem:[#allocation30_spill] sm:$0xff] }
 0x5b3   :  { %v8174_v14 = vmax.f32 %v10527_v29, 0.0  ;;  %8092 = vmatmul.mubr.bf16.gmra.mrb[168].mxu0 %v12797_v47  ;;  %v16606_v47 = vld [vmem:[#allocation29_spill] sm:$0xff]  ;;  %v10550_v29 = vadd.f32 %v16607_v11, %v15564_v10 }
 0x5b4   :  { %v8175_v32 = vmax.f32 %v10529_v18, 0.0  ;;  %8101 = vmatprep.mubr.bf16.mxu0 %v16467_v2  ;;  %v10548_v62 = vadd.f32 %v16606_v47, %v15568_v22  ;;  %v16617_v47 = vld [vmem:[#allocation40_spill] sm:$0xff]  ;;  %v16618_v11 = vld [vmem:[#allocation41_spill] sm:$0xff] }
 0x5b5   :  { %v8318_v39 = vpack.c.bf16 %v8174_v14, %v8172_v38  ;;  %v16608_v38 = vld [vmem:[#allocation31_spill] sm:$0xff] }
 0x5b6   :  { %v8319_v63 = vpack.c.bf16 %v8175_v32, %v8173_v50  ;;  %v7833_v33 = vpop.f32.mrb[64].mxu0  ;;  %v10552_v14 = vadd.f32 %v16608_v38, %v15568_v22  ;;  %v16619_v38 = vld [vmem:[#allocation42_spill] sm:$0xff] }
 0x5b7   :  { %v10531_v53 = vadd.f32 %v10530_v44, %v7833_v33  ;;  %v7835_v16 = vpop.f32.mrb[65].mxu0 }
 0x5b8   :  { %v10533_v0 = vadd.f32 %v10532_v41, %v7835_v16  ;;  %v7837_v2 = vpop.f32.mrb[66].mxu0  ;;  %8663 = vmatprep.mubr.bf16.mxu1 %v8319_v63  ;;  %v16609_v41 = vld [vmem:[#allocation32_spill] sm:$0xff] }
 0x5b9   :  { %v10535_v43 = vadd.f32 %v10534_v37, %v7837_v2  ;;  %v7839_v17 = vpop.f32.mrb[67].mxu0  ;;  %8664 = vmatmul.mubr.bf16.gmra.mrb[236].mxu1 %v8318_v39  ;;  %v8176_v4 = vmax.f32 %v10531_v53, 0.0  ;;  %v10554_v53 = vadd.f32 %v16609_v41, %v15564_v10  ;;  %v16610_v37 = vld [vmem:[#allocation33_spill] sm:$0xff] }
 0x5ba   :  { %v10537_v42 = vadd.f32 %v10536_v9, %v7839_v17  ;;  %v8177_v20 = vmax.f32 %v10533_v0, 0.0  ;;  %v10558_v9 = vadd.f32 %v16611_v27, %v15564_v10  ;;  %v16622_v27 = vld [vmem:[#allocation45_spill] sm:$0xff] }
 0x5bb   :  { %v8178_v3 = vmax.f32 %v10535_v43, 0.0  ;;  %8102 = vmatmul.mubr.bf16.gmra.mrb[172].mxu0 %v12798_v26  ;;  %v10556_v26 = vadd.f32 %v16610_v37, %v15568_v22  ;;  %v16621_v37 = vld [vmem:[#allocation44_spill] sm:$0xff] }
 0x5bc   :  { %v8179_v45 = vmax.f32 %v10537_v42, 0.0  ;;  %v16612_v42 = vld [vmem:[#allocation35_spill] sm:$0xff] }
 0x5bd   :  { %v8320_v30 = vpack.c.bf16 %v8178_v3, %v8176_v4  ;;  %v10560_v4 = vadd.f32 %v16612_v42, %v15568_v22  ;;  %v16623_v42 = vld [vmem:[#allocation46_spill] sm:$0xff] }
 0x5be   :  { %v8321_v54 = vpack.c.bf16 %v8179_v45, %v8177_v20  ;;  %v7843_v35 = vpop.f32.mrb[68].mxu0 }
 0x5bf   :  { %v10539_v6 = vadd.f32 %v10538_v36, %v7843_v35  ;;  %v7845_v19 = vpop.f32.mrb[69].mxu0 }
 0x5c0   :  { %v10541_v34 = vadd.f32 %v10540_v49, %v7845_v19  ;;  %v7847_v56 = vpop.f32.mrb[70].mxu0  ;;  %8671 = vmatprep.mubr.bf16.mxu1 %v8321_v54  ;;  %v10562_v49 = vadd.f32 %v16613_v23, %v15564_v10 }
 0x5c1   :  { %v10543_v24 = vadd.f32 %v10542_v55, %v7847_v56  ;;  %v7849_v46 = vpop.f32.mrb[71].mxu0  ;;  %8672 = vmatmul.mubr.bf16.gmra.mrb[240].mxu1 %v8320_v30  ;;  %v8180_v52 = vmax.f32 %v10539_v6, 0.0  ;;  %v10564_v55 = vadd.f32 %v16614_v58, %v15568_v22  ;;  %v16625_v58 = vld [vmem:[#allocation48_spill] sm:$0xff] }
 0x5c2   :  { %v10545_v7 = vadd.f32 %v10544_v60, %v7849_v46  ;;  %v8181_v59 = vmax.f32 %v10541_v34, 0.0  ;;  %v10566_v60 = vadd.f32 %v16615_v40, %v15564_v10  ;;  %v16626_v40 = vld [vmem:[#allocation49_spill] sm:$0xff] }
 0x5c3   :  { %v8182_v25 = vmax.f32 %v10543_v24, 0.0 }
 0x5c4   :  { %v8183_v61 = vmax.f32 %v10545_v7, 0.0  ;;  %v16616_v7 = vld [vmem:[#allocation39_spill] sm:$0xff] }
 0x5c5   :  { %v8322_v57 = vpack.c.bf16 %v8182_v25, %v8180_v52  ;;  %v10568_v52 = vadd.f32 %v16616_v7, %v15568_v22  ;;  %v16627_v7 = vld [vmem:[#allocation50_spill] sm:$0xff] }
 0x5c6   :  { %v8323_v1 = vpack.c.bf16 %v8183_v61, %v8181_v59  ;;  %v7853_v51 = vpop.f32.mrb[72].mxu0 }
 0x5c7   :  { %v10547_v5 = vadd.f32 %v10546_v28, %v7853_v51  ;;  %v7855_v31 = vpop.f32.mrb[73].mxu0 }
 0x5c8   :  { %v10549_v12 = vadd.f32 %v10548_v62, %v7855_v31  ;;  %v7857_v18 = vpop.f32.mrb[74].mxu0  ;;  %8679 = vmatprep.mubr.bf16.mxu1 %v8323_v1  ;;  %v10570_v62 = vadd.f32 %v16617_v47, %v15564_v10 }
 0x5c9   :  { %v10551_v50 = vadd.f32 %v10550_v29, %v7857_v18  ;;  %v7859_v32 = vpop.f32.mrb[75].mxu0  ;;  %8680 = vmatmul.mubr.bf16.gmra.mrb[244].mxu1 %v8322_v57  ;;  %v8184_v13 = vmax.f32 %v10547_v5, 0.0  ;;  %v10572_v29 = vadd.f32 %v16618_v11, %v15568_v22 }
 0x5ca   :  { %v10553_v39 = vadd.f32 %v10552_v14, %v7859_v32  ;;  %v8185_v63 = vmax.f32 %v10549_v12, 0.0  ;;  %v10574_v14 = vadd.f32 %v16619_v38, %v15564_v10 }
 0x5cb   :  { %v8186_v44 = vmax.f32 %v10551_v50, 0.0 }
 0x5cc   :  { %v8187_v33 = vmax.f32 %v10553_v39, 0.0  ;;  %v16620_v39 = vld [vmem:[#allocation43_spill] sm:$0xff] }
 0x5cd   :  { %v8324_v15 = vpack.c.bf16 %v8186_v44, %v8184_v13  ;;  %v10576_v13 = vadd.f32 %v16620_v39, %v15568_v22 }
 0x5ce   :  { %v8325_v16 = vpack.c.bf16 %v8187_v33, %v8185_v63  ;;  %v7863_v21 = vpop.f32.mrb[76].mxu0 }
 0x5cf   :  { %v10555_v0 = vadd.f32 %v10554_v53, %v7863_v21  ;;  %v7865_v2 = vpop.f32.mrb[77].mxu0 }
 0x5d0   :  { %v10557_v43 = vadd.f32 %v10556_v26, %v7865_v2  ;;  %v7867_v17 = vpop.f32.mrb[78].mxu0  ;;  %8687 = vmatprep.mubr.bf16.mxu1 %v8325_v16  ;;  %v10578_v26 = vadd.f32 %v16621_v37, %v15564_v10 }
 0x5d1   :  { %v10559_v3 = vadd.f32 %v10558_v9, %v7867_v17  ;;  %v7869_v20 = vpop.f32.mrb[79].mxu0  ;;  %8688 = vmatmul.mubr.bf16.gmra.mrb[248].mxu1 %v8324_v15  ;;  %v8188_v30 = vmax.f32 %v10555_v0, 0.0  ;;  %v10580_v9 = vadd.f32 %v16622_v27, %v15568_v22 }
 0x5d2   :  { %v10561_v45 = vadd.f32 %v10560_v4, %v7869_v20  ;;  %v8189_v36 = vmax.f32 %v10557_v43, 0.0  ;;  %v10582_v4 = vadd.f32 %v16623_v42, %v15564_v10 }
 0x5d3   :  { %v8190_v48 = vmax.f32 %v10559_v3, 0.0 }
 0x5d4   :  { %v8191_v54 = vmax.f32 %v10561_v45, 0.0  ;;  %v16624_v45 = vld [vmem:[#allocation47_spill] sm:$0xff] }
 0x5d5   :  { %v8326_v35 = vpack.c.bf16 %v8190_v48, %v8188_v30  ;;  %v10584_v30 = vadd.f32 %v16624_v45, %v15568_v22 }
 0x5d6   :  { %v8327_v6 = vpack.c.bf16 %v8191_v54, %v8189_v36  ;;  %v7873_v19 = vpop.f32.mrb[80].mxu0 }
 0x5d7   :  { %v10563_v34 = vadd.f32 %v10562_v49, %v7873_v19  ;;  %v7875_v56 = vpop.f32.mrb[81].mxu0 }
 0x5d8   :  { %v10565_v24 = vadd.f32 %v10564_v55, %v7875_v56  ;;  %v7877_v46 = vpop.f32.mrb[82].mxu0  ;;  %8695 = vmatprep.mubr.bf16.mxu1 %v8327_v6  ;;  %v10586_v55 = vadd.f32 %v16625_v58, %v15564_v10 }
 0x5d9   :  { %v10567_v25 = vadd.f32 %v10566_v60, %v7877_v46  ;;  %v7879_v59 = vpop.f32.mrb[83].mxu0  ;;  %8696 = vmatmul.mubr.bf16.gmra.mrb[252].mxu1 %v8326_v35  ;;  %v8192_v57 = vmax.f32 %v10563_v34, 0.0  ;;  %v10588_v60 = vadd.f32 %v16626_v40, %v15568_v22 }
 0x5da   :  { %v10569_v61 = vadd.f32 %v10568_v52, %v7879_v59  ;;  %v8193_v28 = vmax.f32 %v10565_v24, 0.0  ;;  %v10590_v52 = vadd.f32 %v16627_v7, %v15564_v10 }
 0x5db   :  { %v8194_v8 = vmax.f32 %v10567_v25, 0.0 }
 0x5dc   :  { %v8195_v1 = vmax.f32 %v10569_v61, 0.0  ;;  %v16628_v61 = vld [vmem:[#allocation51_spill] sm:$0xff] }
 0x5dd   :  { %v8328_v51 = vpack.c.bf16 %v8194_v8, %v8192_v57  ;;  %v10592_v57 = vadd.f32 %v16628_v61, %v15568_v22 }
 0x5de   :  { %v8329_v5 = vpack.c.bf16 %v8195_v1, %v8193_v28  ;;  %v7883_v31 = vpop.f32.mrb[84].mxu0 }
 0x5df   :  { %v10571_v12 = vadd.f32 %v10570_v62, %v7883_v31  ;;  %v7885_v18 = vpop.f32.mrb[85].mxu0  ;;  %v16629_v31 = vld [vmem:[#allocation52_spill] sm:$0xff] }
 0x5e0   :  { %v10573_v50 = vadd.f32 %v10572_v29, %v7885_v18  ;;  %v7887_v32 = vpop.f32.mrb[86].mxu0  ;;  %8703 = vmatprep.mubr.bf16.mxu1 %v8329_v5  ;;  %v10594_v11 = vadd.f32 %v16629_v31, %v15564_v10 }
 0x5e1   :  { %v10575_v44 = vadd.f32 %v10574_v14, %v7887_v32  ;;  %v7889_v63 = vpop.f32.mrb[87].mxu0  ;;  %8704 = vmatmul.mubr.bf16.gmra.mrb[0].mxu1 %v8328_v51  ;;  %v8196_v15 = vmax.f32 %v10571_v12, 0.0  ;;  %v16630_v12 = vld [vmem:[#allocation53_spill] sm:$0xff] }
 0x5e2   :  { %v10577_v33 = vadd.f32 %v10576_v13, %v7889_v63  ;;  %v8197_v53 = vmax.f32 %v10573_v50, 0.0  ;;  %v10596_v18 = vadd.f32 %v16630_v12, %v15568_v22  ;;  %v16631_v50 = vld [vmem:[#allocation54_spill] sm:$0xff] }
 0x5e3   :  { %v8198_v41 = vmax.f32 %v10575_v44, 0.0  ;;  %v10598_v32 = vadd.f32 %v16631_v50, %v15564_v10  ;;  %v16632_v44 = vld [vmem:[#allocation55_spill] sm:$0xff]  ;;  %v16642_v50 = vld [vmem:[#allocation65_spill] sm:$0xff] }
 0x5e4   :  { %v8199_v16 = vmax.f32 %v10577_v33, 0.0  ;;  %v10600_v63 = vadd.f32 %v16632_v44, %v15568_v22  ;;  %v16643_v44 = vld [vmem:[#allocation66_spill] sm:$0xff] }
 0x5e5   :  { %v8330_v21 = vpack.c.bf16 %v8198_v41, %v8196_v15 }
 0x5e6   :  { %v8331_v0 = vpack.c.bf16 %v8199_v16, %v8197_v53  ;;  %v7893_v2 = vpop.f32.mrb[88].mxu0 }
 0x5e7   :  { %v10579_v43 = vadd.f32 %v10578_v26, %v7893_v2  ;;  %v7895_v17 = vpop.f32.mrb[89].mxu0  ;;  %v16633_v2 = vld [vmem:[#allocation56_spill] sm:$0xff] }
 0x5e8   :  { %v10581_v3 = vadd.f32 %v10580_v9, %v7895_v17  ;;  %v7897_v20 = vpop.f32.mrb[90].mxu0  ;;  %8711 = vmatprep.mubr.bf16.mxu1 %v8331_v0  ;;  %v10602_v27 = vadd.f32 %v16633_v2, %v15564_v10  ;;  %v15865_v2 = vld [vmem:[%s16444_s4] ss:$0 sm:$0xff] }
 0x5e9   :  { %v10583_v48 = vadd.f32 %v10582_v4, %v7897_v20  ;;  %v7899_v36 = vpop.f32.mrb[91].mxu0  ;;  %8712 = vmatmul.mubr.bf16.gmra.mrb[4].mxu1 %v8330_v21  ;;  %v8200_v35 = vmax.f32 %v10579_v43, 0.0  ;;  %v16634_v43 = vld [vmem:[#allocation57_spill] sm:$0xff] }
 0x5ea   :  { %v10585_v54 = vadd.f32 %v10584_v30, %v7899_v36  ;;  %v8201_v49 = vmax.f32 %v10581_v3, 0.0  ;;  %v10604_v17 = vadd.f32 %v16634_v43, %v15568_v22  ;;  %v16635_v3 = vld [vmem:[#allocation58_spill] sm:$0xff] }
 0x5eb   :  { %v8202_v23 = vmax.f32 %v10583_v48, 0.0  ;;  %v10606_v20 = vadd.f32 %v16635_v3, %v15564_v10  ;;  %v16636_v48 = vld [vmem:[#allocation59_spill] sm:$0xff] }
 0x5ec   :  { %v8203_v6 = vmax.f32 %v10585_v54, 0.0  ;;  %v10608_v36 = vadd.f32 %v16636_v48, %v15568_v22  ;;  %v16646_v48 = vld [vmem:[#allocation69_spill] sm:$0xff] }
 0x5ed   :  { %v8332_v19 = vpack.c.bf16 %v8202_v23, %v8200_v35 }
 0x5ee   :  { %v8333_v34 = vpack.c.bf16 %v8203_v6, %v8201_v49  ;;  %v7903_v56 = vpop.f32.mrb[92].mxu0 }
 0x5ef   :  { %v10587_v24 = vadd.f32 %v10586_v55, %v7903_v56  ;;  %v7905_v46 = vpop.f32.mrb[93].mxu0  ;;  %v16637_v56 = vld [vmem:[#allocation60_spill] sm:$0xff] }
 0x5f0   :  { %v10589_v25 = vadd.f32 %v10588_v60, %v7905_v46  ;;  %v7907_v59 = vpop.f32.mrb[94].mxu0  ;;  %8719 = vmatprep.mubr.bf16.mxu1 %v8333_v34  ;;  %v10610_v40 = vadd.f32 %v16637_v56, %v15564_v10 }
 0x5f1   :  { %v10591_v8 = vadd.f32 %v10590_v52, %v7907_v59  ;;  %v7909_v28 = vpop.f32.mrb[95].mxu0  ;;  %8720 = vmatmul.mubr.bf16.gmra.mrb[8].mxu1 %v8332_v19  ;;  %v8204_v51 = vmax.f32 %v10587_v24, 0.0  ;;  %v16638_v24 = vld [vmem:[#allocation61_spill] sm:$0xff] }
 0x5f2   :  { %v10593_v1 = vadd.f32 %v10592_v57, %v7909_v28  ;;  %v8205_v62 = vmax.f32 %v10589_v25, 0.0  ;;  %v10612_v46 = vadd.f32 %v16638_v24, %v15568_v22  ;;  %v16639_v25 = vld [vmem:[#allocation62_spill] sm:$0xff] }
 0x5f3   :  { %v8206_v47 = vmax.f32 %v10591_v8, 0.0  ;;  %v10614_v59 = vadd.f32 %v16639_v25, %v15564_v10  ;;  %v16640_v8 = vld [vmem:[#allocation63_spill] sm:$0xff] }
 0x5f4   :  { %v8207_v5 = vmax.f32 %v10593_v1, 0.0  ;;  %v10616_v28 = vadd.f32 %v16640_v8, %v15568_v22 }
 0x5f5   :  { %v8334_v29 = vpack.c.bf16 %v8206_v47, %v8204_v51 }
 0x5f6   :  { %v8335_v38 = vpack.c.bf16 %v8207_v5, %v8205_v62  ;;  %v7913_v14 = vpop.f32.mrb[96].mxu0 }
 0x5f7   :  { %v10595_v39 = vadd.f32 %v10594_v11, %v7913_v14  ;;  %v7915_v13 = vpop.f32.mrb[97].mxu0 }
 0x5f8   :  { %v10597_v33 = vadd.f32 %v10596_v18, %v7915_v13  ;;  %v7917_v15 = vpop.f32.mrb[98].mxu0  ;;  %8727 = vmatprep.mubr.bf16.mxu1 %v8335_v38  ;;  %v16641_v18 = vld [vmem:[#allocation64_spill] sm:$0xff] }
 0x5f9   :  { %v10599_v41 = vadd.f32 %v10598_v32, %v7917_v15  ;;  %v7919_v53 = vpop.f32.mrb[99].mxu0  ;;  %8728 = vmatmul.mubr.bf16.gmra.mrb[12].mxu1 %v8334_v29  ;;  %v8208_v21 = vmax.f32 %v10595_v39, 0.0  ;;  %v10618_v38 = vadd.f32 %v16641_v18, %v15564_v10  ;;  %v10620_v32 = vadd.f32 %v16642_v50, %v15568_v22 }
 0x5fa   :  { %v10601_v16 = vadd.f32 %v10600_v63, %v7919_v53  ;;  %v8209_v26 = vmax.f32 %v10597_v33, 0.0  ;;  %v10622_v63 = vadd.f32 %v16643_v44, %v15564_v10 }
 0x5fb   :  { %v8210_v37 = vmax.f32 %v10599_v41, 0.0  ;;  %v16644_v41 = vld [vmem:[#allocation67_spill] sm:$0xff] }
 0x5fc   :  { %v8211_v0 = vmax.f32 %v10601_v16, 0.0  ;;  %v10624_v53 = vadd.f32 %v16644_v41, %v15568_v22  ;;  %v16652_v41 = vld [vmem:[#allocation75_spill] sm:$0xff] }
 0x5fd   :  { %v8336_v9 = vpack.c.bf16 %v8210_v37, %v8208_v21 }
 0x5fe   :  { %v8337_v42 = vpack.c.bf16 %v8211_v0, %v8209_v26  ;;  %v7923_v4 = vpop.f32.mrb[100].mxu0 }
 0x5ff   :  { %v10603_v45 = vadd.f32 %v10602_v27, %v7923_v4  ;;  %v7925_v30 = vpop.f32.mrb[101].mxu0  ;;  %v16645_v4 = vld [vmem:[#allocation68_spill] sm:$0xff] }
 0x600   :  { %v10605_v54 = vadd.f32 %v10604_v17, %v7925_v30  ;;  %v7927_v35 = vpop.f32.mrb[102].mxu0  ;;  %8735 = vmatprep.mubr.bf16.mxu1 %v8337_v42  ;;  %v10626_v3 = vadd.f32 %v16645_v4, %v15564_v10 }
 0x601   :  { %v10607_v23 = vadd.f32 %v10606_v20, %v7927_v35  ;;  %v7929_v49 = vpop.f32.mrb[103].mxu0  ;;  %8736 = vmatmul.mubr.bf16.gmra.mrb[16].mxu1 %v8336_v9  ;;  %v8212_v19 = vmax.f32 %v10603_v45, 0.0 }
 0x602   :  { %v10609_v6 = vadd.f32 %v10608_v36, %v7929_v49  ;;  %v8213_v55 = vmax.f32 %v10605_v54, 0.0  ;;  %v10628_v36 = vadd.f32 %v16646_v48, %v15568_v22  ;;  %v16647_v49 = vld [vmem:[#allocation70_spill] sm:$0xff] }
 0x603   :  { %v8214_v58 = vmax.f32 %v10607_v23, 0.0 }
 0x604   :  { %v8215_v34 = vmax.f32 %v10609_v6, 0.0  ;;  %v10630_v6 = vadd.f32 %v16647_v49, %v15564_v10 }
 0x605   :  { %v8338_v60 = vpack.c.bf16 %v8214_v58, %v8212_v19 }
 0x606   :  { %v8339_v7 = vpack.c.bf16 %v8215_v34, %v8213_v55  ;;  %v7933_v52 = vpop.f32.mrb[104].mxu0 }
 0x607   :  { %v10611_v61 = vadd.f32 %v10610_v40, %v7933_v52  ;;  %v7935_v57 = vpop.f32.mrb[105].mxu0  ;;  %v16648_v40 = vld [vmem:[#allocation71_spill] sm:$0xff] }
 0x608   :  { %v10613_v1 = vadd.f32 %v10612_v46, %v7935_v57  ;;  %v7937_v51 = vpop.f32.mrb[106].mxu0  ;;  %8743 = vmatprep.mubr.bf16.mxu1 %v8339_v7 }
 0x609   :  { %v10615_v47 = vadd.f32 %v10614_v59, %v7937_v51  ;;  %v7939_v62 = vpop.f32.mrb[107].mxu0  ;;  %8744 = vmatmul.mubr.bf16.gmra.mrb[20].mxu1 %v8338_v60  ;;  %v8216_v31 = vmax.f32 %v10611_v61, 0.0  ;;  %v10632_v60 = vadd.f32 %v16648_v40, %v15568_v22 }
 0x60a   :  { %v10617_v5 = vadd.f32 %v10616_v28, %v7939_v62  ;;  %v8217_v29 = vmax.f32 %v10613_v1, 0.0  ;;  %v16649_v62 = vld [vmem:[#allocation72_spill] sm:$0xff] }
 0x60b   :  { %v8218_v11 = vmax.f32 %v10615_v47, 0.0 }
 0x60c   :  { %v8219_v12 = vmax.f32 %v10617_v5, 0.0  ;;  %v10634_v5 = vadd.f32 %v16649_v62, %v15564_v10 }
 0x60d   :  { %v8340_v14 = vpack.c.bf16 %v8218_v11, %v8216_v31 }
 0x60e   :  { %v8341_v39 = vpack.c.bf16 %v8219_v12, %v8217_v29  ;;  %v7943_v13 = vpop.f32.mrb[108].mxu0  ;;  %v16650_v12 = vld [vmem:[#allocation73_spill] sm:$0xff] }
 0x60f   :  { %v10619_v33 = vadd.f32 %v10618_v38, %v7943_v13  ;;  %v7945_v15 = vpop.f32.mrb[109].mxu0  ;;  %v10636_v18 = vadd.f32 %v16650_v12, %v15568_v22 }
 0x610   :  { %v10621_v16 = vadd.f32 %v10620_v32, %v7945_v15  ;;  %v7947_v21 = vpop.f32.mrb[110].mxu0  ;;  %8751 = vmatprep.mubr.bf16.mxu1 %v8341_v39  ;;  %v16651_v32 = vld [vmem:[#allocation74_spill] sm:$0xff] }
 0x611   :  { %v10623_v37 = vadd.f32 %v10622_v63, %v7947_v21  ;;  %v7949_v26 = vpop.f32.mrb[111].mxu0  ;;  %8752 = vmatmul.mubr.bf16.gmra.mrb[24].mxu1 %v8340_v14  ;;  %v8220_v27 = vmax.f32 %v10619_v33, 0.0  ;;  %v10638_v39 = vadd.f32 %v16651_v32, %v15564_v10 }
 0x612   :  { %v10625_v0 = vadd.f32 %v10624_v53, %v7949_v26  ;;  %v8221_v43 = vmax.f32 %v10621_v16, 0.0  ;;  %v10640_v53 = vadd.f32 %v16652_v41, %v15568_v22 }
 0x613   :  { %v8222_v9 = vmax.f32 %v10623_v37, 0.0 }
 0x614   :  { %v8223_v17 = vmax.f32 %v10625_v0, 0.0  ;;  %v8545_v42 = vpop.f32.mrb[176].mxu1 }
 0x615   :  { %v8342_v20 = vpack.c.bf16 %v8222_v9, %v8220_v27  ;;  %v8546_v45 = vadd.f32 %v15865_v2, %v8545_v42  ;;  %v8547_v30 = vpop.f32.mrb[177].mxu1 }
 0x616   :  { %v8343_v54 = vpack.c.bf16 %v8223_v17, %v8221_v43  ;;  %v7953_v35 = vpop.f32.mrb[112].mxu0  ;;  %v8548_v23 = vpop.f32.mrb[178].mxu1 }
 0x617   :  { %v8896_v19 = vmax.f32 %v8546_v45, 0.0  ;;  %v10627_v58 = vadd.f32 %v10626_v3, %v7953_v35  ;;  %v8549_v55 = vadd.f32 %v15865_v2, %v8548_v23  ;;  %v7955_v34 = vpop.f32.mrb[113].mxu0  ;;  %v8550_v56 = vpop.f32.mrb[179].mxu1  ;;  %v16653_v45 = vld [vmem:[#allocation76_spill] sm:$0xff]  ;;  %v16654_v35 = vld [vmem:[#allocation77_spill] sm:$0xff] }
 0x618   :  { %v10629_v24 = vadd.f32 %v10628_v36, %v7955_v34  ;;  %v7957_v46 = vpop.f32.mrb[114].mxu0  ;;  %8759 = vmatprep.mubr.bf16.mxu1 %v8343_v54  ;;  %v10642_v30 = vadd.f32 %v16653_v45, %v15564_v10  ;;  %v10644_v23 = vadd.f32 %v16654_v35, %v15568_v22 }
 0x619   :  { %v10314_v7 = vpack.c.bf16 %v8896_v19, %v8896_v19  ;;  %v8897_v52 = vmax.f32 %v8549_v55, 0.0  ;;  %v10631_v25 = vadd.f32 %v10630_v6, %v7957_v46  ;;  %v7959_v59 = vpop.f32.mrb[115].mxu0  ;;  %8760 = vmatmul.mubr.bf16.gmra.mrb[28].mxu1 %v8342_v20  ;;  %v8224_v57 = vmax.f32 %v10627_v58, 0.0  ;;  %v16655_v58 = vld [vmem:[#allocation78_spill] sm:$0xff]  ;;  %v16656_v46 = vld [vmem:[#allocation79_spill] sm:$0xff] }
 0x61a   :  { %v10633_v61 = vadd.f32 %v10632_v60, %v7959_v59  ;;  %v8225_v1 = vmax.f32 %v10629_v24, 0.0  ;;  %v10646_v55 = vadd.f32 %v16655_v58, %v15564_v10 }
 0x61b   :  { %9337 = vst.msk [vmem:[%s16445_s5] sm:$0xf] %vm9336_vm0, %v10314_v7  ;;  %v10315_v8 = vpack.c.bf16 %v8897_v52, %v8897_v52  ;;  %v8226_v28 = vmax.f32 %v10631_v25, 0.0  ;;  %v10648_v7 = vadd.f32 %v16656_v46, %v15568_v22 }
 0x61c   :  { %v8227_v51 = vmax.f32 %v10633_v61, 0.0  ;;  %v8553_v47 = vpop.f32.mrb[180].mxu1 }
 0x61d   :  { %9338 = vst.msk [vmem:[%s16445_s5 + $0x4] sm:$0xf] %vm9336_vm0, %v10315_v8  ;;  %v8344_v31 = vpack.c.bf16 %v8226_v28, %v8224_v57  ;;  %v8554_v11 = vadd.f32 %v15865_v2, %v8553_v47  ;;  %v8555_v29 = vpop.f32.mrb[181].mxu1 }
 0x61e   :  { %v8345_v38 = vpack.c.bf16 %v8227_v51, %v8225_v1  ;;  %v7963_v14 = vpop.f32.mrb[116].mxu0  ;;  %v8556_v50 = vpop.f32.mrb[182].mxu1 }
 0x61f   :  { %v8898_v13 = vmax.f32 %v8554_v11, 0.0  ;;  %v10635_v44 = vadd.f32 %v10634_v5, %v7963_v14  ;;  %v8557_v63 = vadd.f32 %v15865_v2, %v8556_v50  ;;  %v7965_v33 = vpop.f32.mrb[117].mxu0  ;;  %v8558_v15 = vpop.f32.mrb[183].mxu1  ;;  %v16657_v11 = vld [vmem:[#allocation80_spill] sm:$0xff]  ;;  %v16658_v14 = vld [vmem:[#allocation81_spill] sm:$0xff] }
 0x620   :  { %v10637_v16 = vadd.f32 %v10636_v18, %v7965_v33  ;;  %v7967_v21 = vpop.f32.mrb[118].mxu0  ;;  %8767 = vmatprep.mubr.bf16.mxu1 %v8345_v38  ;;  %v10650_v29 = vadd.f32 %v16657_v11, %v15564_v10  ;;  %v10652_v50 = vadd.f32 %v16658_v14, %v15568_v22 }
 0x621   :  { %v10316_v37 = vpack.c.bf16 %v8898_v13, %v8898_v13  ;;  %v8899_v26 = vmax.f32 %v8557_v63, 0.0  ;;  %v10639_v0 = vadd.f32 %v10638_v39, %v7967_v21  ;;  %v7969_v27 = vpop.f32.mrb[119].mxu0  ;;  %8768 = vmatmul.mubr.bf16.gmra.mrb[32].mxu1 %v8344_v31  ;;  %v8228_v43 = vmax.f32 %v10635_v44, 0.0  ;;  %v16659_v44 = vld [vmem:[#allocation82_spill] sm:$0xff]  ;;  %v16660_v21 = vld [vmem:[#allocation83_spill] sm:$0xff] }
 0x622   :  { %v10641_v9 = vadd.f32 %v10640_v53, %v7969_v27  ;;  %v8229_v4 = vmax.f32 %v10637_v16, 0.0  ;;  %v10654_v63 = vadd.f32 %v16659_v44, %v15564_v10 }
 0x623   :  { %9339 = vst.msk [vmem:[%s16445_s5 + $0x8] sm:$0xf] %vm9336_vm0, %v10316_v37  ;;  %v10317_v17 = vpack.c.bf16 %v8899_v26, %v8899_v26  ;;  %v8230_v42 = vmax.f32 %v10639_v0, 0.0  ;;  %v10656_v37 = vadd.f32 %v16660_v21, %v15568_v22 }
 0x624   :  { %v8231_v3 = vmax.f32 %v10641_v9, 0.0  ;;  %v8561_v20 = vpop.f32.mrb[184].mxu1 }
 0x625   :  { %9340 = vst.msk [vmem:[%s16445_s5 + $0xc] sm:$0xf] %vm9336_vm0, %v10317_v17  ;;  %v8346_v48 = vpack.c.bf16 %v8230_v42, %v8228_v43  ;;  %v8562_v36 = vadd.f32 %v15865_v2, %v8561_v20  ;;  %v8563_v54 = vpop.f32.mrb[185].mxu1 }
 0x626   :  { %v8347_v49 = vpack.c.bf16 %v8231_v3, %v8229_v4  ;;  %v7973_v6 = vpop.f32.mrb[120].mxu0  ;;  %v8564_v19 = vpop.f32.mrb[186].mxu1 }
 0x627   :  { %v8900_v34 = vmax.f32 %v8562_v36, 0.0  ;;  %v10643_v56 = vadd.f32 %v10642_v30, %v7973_v6  ;;  %v8565_v40 = vadd.f32 %v15865_v2, %v8564_v19  ;;  %v7975_v60 = vpop.f32.mrb[121].mxu0  ;;  %v8566_v24 = vpop.f32.mrb[187].mxu1  ;;  %v16661_v36 = vld [vmem:[#allocation84_spill] sm:$0xff]  ;;  %v16662_v6 = vld [vmem:[#allocation85_spill] sm:$0xff] }
 0x628   :  { %v10645_v52 = vadd.f32 %v10644_v23, %v7975_v60  ;;  %v7977_v25 = vpop.f32.mrb[122].mxu0  ;;  %8775 = vmatprep.mubr.bf16.mxu1 %v8347_v49  ;;  %v10658_v54 = vadd.f32 %v16661_v36, %v15564_v10  ;;  %v10660_v19 = vadd.f32 %v16662_v6, %v15568_v22 }
 0x629   :  { %v10318_v59 = vpack.c.bf16 %v8900_v34, %v8900_v34  ;;  %v8901_v61 = vmax.f32 %v8565_v40, 0.0  ;;  %v10647_v57 = vadd.f32 %v10646_v55, %v7977_v25  ;;  %v7979_v8 = vpop.f32.mrb[123].mxu0  ;;  %8776 = vmatmul.mubr.bf16.gmra.mrb[36].mxu1 %v8346_v48  ;;  %v8232_v1 = vmax.f32 %v10643_v56, 0.0  ;;  %v16663_v56 = vld [vmem:[#allocation86_spill] sm:$0xff]  ;;  %v16664_v25 = vld [vmem:[#allocation87_spill] sm:$0xff] }
 0x62a   :  { %v10649_v28 = vadd.f32 %v10648_v7, %v7979_v8  ;;  %v8233_v62 = vmax.f32 %v10645_v52, 0.0  ;;  %v10662_v40 = vadd.f32 %v16663_v56, %v15564_v10 }
 0x62b   :  { %9341 = vst.msk [vmem:[%s16445_s5 + $0x10] sm:$0xf] %vm9336_vm0, %v10318_v59  ;;  %v10319_v51 = vpack.c.bf16 %v8901_v61, %v8901_v61  ;;  %v8234_v47 = vmax.f32 %v10647_v57, 0.0  ;;  %v10664_v59 = vadd.f32 %v16664_v25, %v15568_v22 }
 0x62c   :  { %v8235_v5 = vmax.f32 %v10649_v28, 0.0  ;;  %v8569_v31 = vpop.f32.mrb[188].mxu1 }
 0x62d   :  { %9342 = vst.msk [vmem:[%s16445_s5 + $0x14] sm:$0xf] %vm9336_vm0, %v10319_v51  ;;  %v8348_v12 = vpack.c.bf16 %v8234_v47, %v8232_v1  ;;  %v8570_v18 = vadd.f32 %v15865_v2, %v8569_v31  ;;  %v8571_v38 = vpop.f32.mrb[189].mxu1 }
 0x62e   :  { %v8349_v32 = vpack.c.bf16 %v8235_v5, %v8233_v62  ;;  %v7983_v39 = vpop.f32.mrb[124].mxu0  ;;  %v8572_v13 = vpop.f32.mrb[190].mxu1 }
 0x62f   :  { %v8902_v33 = vmax.f32 %v8570_v18, 0.0  ;;  %v10651_v15 = vadd.f32 %v10650_v29, %v7983_v39  ;;  %v8573_v41 = vadd.f32 %v15865_v2, %v8572_v13  ;;  %v7985_v53 = vpop.f32.mrb[125].mxu0  ;;  %v8574_v16 = vpop.f32.mrb[191].mxu1  ;;  %v16665_v18 = vld [vmem:[#allocation88_spill] sm:$0xff]  ;;  %v16666_v39 = vld [vmem:[#allocation89_spill] sm:$0xff] }
 0x630   :  { %v10653_v26 = vadd.f32 %v10652_v50, %v7985_v53  ;;  %v7987_v0 = vpop.f32.mrb[126].mxu0  ;;  %8783 = vmatprep.mubr.bf16.mxu1 %v8349_v32  ;;  %v10666_v38 = vadd.f32 %v16665_v18, %v15564_v10  ;;  %v10668_v13 = vadd.f32 %v16666_v39, %v15568_v22 }
 0x631   :  { %v10320_v27 = vpack.c.bf16 %v8902_v33, %v8902_v33  ;;  %v8903_v9 = vmax.f32 %v8573_v41, 0.0  ;;  %v10655_v43 = vadd.f32 %v10654_v63, %v7987_v0  ;;  %v7989_v17 = vpop.f32.mrb[127].mxu0  ;;  %8784 = vmatmul.mubr.bf16.gmra.mrb[40].mxu1 %v8348_v12  ;;  %v8236_v4 = vmax.f32 %v10651_v15, 0.0  ;;  %v16667_v15 = vld [vmem:[#allocation90_spill] sm:$0xff]  ;;  %v16668_v0 = vld [vmem:[#allocation91_spill] sm:$0xff] }
 0x632   :  { %v10657_v42 = vadd.f32 %v10656_v37, %v7989_v17  ;;  %v8237_v45 = vmax.f32 %v10653_v26, 0.0  ;;  %v10670_v41 = vadd.f32 %v16667_v15, %v15564_v10 }
 0x633   :  { %9343 = vst.msk [vmem:[%s16445_s5 + $0x18] sm:$0xf] %vm9336_vm0, %v10320_v27  ;;  %v10321_v3 = vpack.c.bf16 %v8903_v9, %v8903_v9  ;;  %v8238_v20 = vmax.f32 %v10655_v43, 0.0  ;;  %v10672_v27 = vadd.f32 %v16668_v0, %v15568_v22 }
 0x634   :  { %v8239_v30 = vmax.f32 %v10657_v42, 0.0  ;;  %v8577_v48 = vpop.f32.mrb[192].mxu1 }
 0x635   :  { %9344 = vst.msk [vmem:[%s16445_s5 + $0x1c] sm:$0xf] %vm9336_vm0, %v10321_v3  ;;  %v8350_v35 = vpack.c.bf16 %v8238_v20, %v8236_v4  ;;  %v8578_v23 = vadd.f32 %v15865_v2, %v8577_v48  ;;  %v8579_v49 = vpop.f32.mrb[193].mxu1 }
 0x636   :  { %v8351_v58 = vpack.c.bf16 %v8239_v30, %v8237_v45  ;;  %v7993_v55 = vpop.f32.mrb[128].mxu0  ;;  %v8580_v34 = vpop.f32.mrb[194].mxu1 }
 0x637   :  { %v8904_v60 = vmax.f32 %v8578_v23, 0.0  ;;  %v10659_v24 = vadd.f32 %v10658_v54, %v7993_v55  ;;  %v8581_v46 = vadd.f32 %v15865_v2, %v8580_v34  ;;  %v7995_v7 = vpop.f32.mrb[129].mxu0  ;;  %v8582_v52 = vpop.f32.mrb[195].mxu1  ;;  %v16669_v23 = vld [vmem:[#allocation92_spill] sm:$0xff]  ;;  %v16670_v55 = vld [vmem:[#allocation93_spill] sm:$0xff] }
 0x638   :  { %v10661_v61 = vadd.f32 %v10660_v19, %v7995_v7  ;;  %v7997_v57 = vpop.f32.mrb[130].mxu0  ;;  %8791 = vmatprep.mubr.bf16.mxu1 %v8351_v58  ;;  %v10674_v49 = vadd.f32 %v16669_v23, %v15564_v10  ;;  %v10676_v34 = vadd.f32 %v16670_v55, %v15568_v22 }
 0x639   :  { %v10322_v8 = vpack.c.bf16 %v8904_v60, %v8904_v60  ;;  %v8905_v28 = vmax.f32 %v8581_v46, 0.0  ;;  %v10663_v1 = vadd.f32 %v10662_v40, %v7997_v57  ;;  %v7999_v51 = vpop.f32.mrb[131].mxu0  ;;  %8792 = vmatmul.mubr.bf16.gmra.mrb[44].mxu1 %v8350_v35  ;;  %v8240_v62 = vmax.f32 %v10659_v24, 0.0  ;;  %v16671_v24 = vld [vmem:[#allocation94_spill] sm:$0xff]  ;;  %v16672_v57 = vld [vmem:[#allocation95_spill] sm:$0xff] }
 0x63a   :  { %v10665_v47 = vadd.f32 %v10664_v59, %v7999_v51  ;;  %v8241_v11 = vmax.f32 %v10661_v61, 0.0  ;;  %v10678_v46 = vadd.f32 %v16671_v24, %v15564_v10 }
 0x63b   :  { %9345 = vst.msk [vmem:[%s16445_s5 + $0x20] sm:$0xf] %vm9336_vm0, %v10322_v8  ;;  %v10323_v5 = vpack.c.bf16 %v8905_v28, %v8905_v28  ;;  %v8242_v31 = vmax.f32 %v10663_v1, 0.0  ;;  %v10680_v8 = vadd.f32 %v16672_v57, %v15568_v22 }
 0x63c   :  { %v8243_v29 = vmax.f32 %v10665_v47, 0.0  ;;  %v8585_v12 = vpop.f32.mrb[196].mxu1 }
 0x63d   :  { %9346 = vst.msk [vmem:[%s16445_s5 + $0x24] sm:$0xf] %vm9336_vm0, %v10323_v5  ;;  %v8352_v14 = vpack.c.bf16 %v8242_v31, %v8240_v62  ;;  %v8586_v50 = vadd.f32 %v15865_v2, %v8585_v12  ;;  %v8587_v32 = vpop.f32.mrb[197].mxu1 }
 0x63e   :  { %v8353_v44 = vpack.c.bf16 %v8243_v29, %v8241_v11  ;;  %v8003_v63 = vpop.f32.mrb[132].mxu0  ;;  %v8588_v33 = vpop.f32.mrb[198].mxu1 }
 0x63f   :  { %v8906_v53 = vmax.f32 %v8586_v50, 0.0  ;;  %v10667_v16 = vadd.f32 %v10666_v38, %v8003_v63  ;;  %v8589_v21 = vadd.f32 %v15865_v2, %v8588_v33  ;;  %v8005_v37 = vpop.f32.mrb[133].mxu0  ;;  %v8590_v26 = vpop.f32.mrb[199].mxu1  ;;  %v16673_v50 = vld [vmem:[#allocation96_spill] sm:$0xff]  ;;  %v16674_v63 = vld [vmem:[#allocation97_spill] sm:$0xff] }
 0x640   :  { %v10669_v9 = vadd.f32 %v10668_v13, %v8005_v37  ;;  %v8007_v43 = vpop.f32.mrb[134].mxu0  ;;  %8799 = vmatprep.mubr.bf16.mxu1 %v8353_v44  ;;  %v10682_v32 = vadd.f32 %v16673_v50, %v15564_v10  ;;  %v10684_v33 = vadd.f32 %v16674_v63, %v15568_v22 }
 0x641   :  { %v10324_v17 = vpack.c.bf16 %v8906_v53, %v8906_v53  ;;  %v8907_v42 = vmax.f32 %v8589_v21, 0.0  ;;  %v10671_v4 = vadd.f32 %v10670_v41, %v8007_v43  ;;  %v8009_v3 = vpop.f32.mrb[135].mxu0  ;;  %8800 = vmatmul.mubr.bf16.gmra.mrb[48].mxu1 %v8352_v14  ;;  %v8244_v45 = vmax.f32 %v10667_v16, 0.0  ;;  %v16675_v16 = vld [vmem:[#allocation98_spill] sm:$0xff]  ;;  %v16676_v43 = vld [vmem:[#allocation99_spill] sm:$0xff] }
 0x642   :  { %v10673_v20 = vadd.f32 %v10672_v27, %v8009_v3  ;;  %v8245_v36 = vmax.f32 %v10669_v9, 0.0  ;;  %v10686_v21 = vadd.f32 %v16675_v16, %v15564_v10 }
 0x643   :  { %9347 = vst.msk [vmem:[%s16445_s5 + $0x28] sm:$0xf] %vm9336_vm0, %v10324_v17  ;;  %v10325_v30 = vpack.c.bf16 %v8907_v42, %v8907_v42  ;;  %v8246_v48 = vmax.f32 %v10671_v4, 0.0  ;;  %v10688_v17 = vadd.f32 %v16676_v43, %v15568_v22 }
 0x644   :  { %v8247_v54 = vmax.f32 %v10673_v20, 0.0  ;;  %v8593_v35 = vpop.f32.mrb[200].mxu1 }
 0x645   :  { %9348 = vst.msk [vmem:[%s16445_s5 + $0x2c] sm:$0xf] %vm9336_vm0, %v10325_v30  ;;  %v8354_v6 = vpack.c.bf16 %v8246_v48, %v8244_v45  ;;  %v8594_v19 = vadd.f32 %v15865_v2, %v8593_v35  ;;  %v8595_v58 = vpop.f32.mrb[201].mxu1 }
 0x646   :  { %v8355_v56 = vpack.c.bf16 %v8247_v54, %v8245_v36  ;;  %v8013_v40 = vpop.f32.mrb[136].mxu0  ;;  %v8596_v60 = vpop.f32.mrb[202].mxu1 }
 0x647   :  { %v8908_v7 = vmax.f32 %v8594_v19, 0.0  ;;  %v10675_v52 = vadd.f32 %v10674_v49, %v8013_v40  ;;  %v8597_v25 = vadd.f32 %v15865_v2, %v8596_v60  ;;  %v8015_v59 = vpop.f32.mrb[137].mxu0  ;;  %v8598_v61 = vpop.f32.mrb[203].mxu1  ;;  %v16677_v19 = vld [vmem:[#allocation100_spill] sm:$0xff]  ;;  %v16678_v40 = vld [vmem:[#allocation101_spill] sm:$0xff] }
 0x648   :  { %v10677_v28 = vadd.f32 %v10676_v34, %v8015_v59  ;;  %v8017_v1 = vpop.f32.mrb[138].mxu0  ;;  %8807 = vmatprep.mubr.bf16.mxu1 %v8355_v56  ;;  %v10690_v58 = vadd.f32 %v16677_v19, %v15564_v10  ;;  %v10692_v60 = vadd.f32 %v16678_v40, %v15568_v22 }
 0x649   :  { %v10326_v51 = vpack.c.bf16 %v8908_v7, %v8908_v7  ;;  %v8909_v47 = vmax.f32 %v8597_v25, 0.0  ;;  %v10679_v62 = vadd.f32 %v10678_v46, %v8017_v1  ;;  %v8019_v5 = vpop.f32.mrb[139].mxu0  ;;  %8808 = vmatmul.mubr.bf16.gmra.mrb[52].mxu1 %v8354_v6  ;;  %v8248_v11 = vmax.f32 %v10675_v52, 0.0  ;;  %v16679_v52 = vld [vmem:[#allocation102_spill] sm:$0xff]  ;;  %v16680_v1 = vld [vmem:[#allocation103_spill] sm:$0xff] }
 0x64a   :  { %v10681_v31 = vadd.f32 %v10680_v8, %v8019_v5  ;;  %v8249_v18 = vmax.f32 %v10677_v28, 0.0  ;;  %v10694_v25 = vadd.f32 %v16679_v52, %v15564_v10 }
 0x64b   :  { %9349 = vst.msk [vmem:[%s16445_s5 + $0x30] sm:$0xf] %vm9336_vm0, %v10326_v51  ;;  %v10327_v29 = vpack.c.bf16 %v8909_v47, %v8909_v47  ;;  %v8250_v12 = vmax.f32 %v10679_v62, 0.0  ;;  %v10696_v51 = vadd.f32 %v16680_v1, %v15568_v22 }
 0x64c   :  { %v8251_v38 = vmax.f32 %v10681_v31, 0.0  ;;  %v8601_v14 = vpop.f32.mrb[204].mxu1 }
 0x64d   :  { %9350 = vst.msk [vmem:[%s16445_s5 + $0x34] sm:$0xf] %vm9336_vm0, %v10327_v29  ;;  %v8356_v39 = vpack.c.bf16 %v8250_v12, %v8248_v11  ;;  %v8602_v13 = vadd.f32 %v15865_v2, %v8601_v14  ;;  %v8603_v44 = vpop.f32.mrb[205].mxu1 }
 0x64e   :  { %v8357_v15 = vpack.c.bf16 %v8251_v38, %v8249_v18  ;;  %v8023_v41 = vpop.f32.mrb[140].mxu0  ;;  %v8604_v53 = vpop.f32.mrb[206].mxu1 }
 0x64f   :  { %v8910_v37 = vmax.f32 %v8602_v13, 0.0  ;;  %v10683_v26 = vadd.f32 %v10682_v32, %v8023_v41  ;;  %v8605_v0 = vadd.f32 %v15865_v2, %v8604_v53  ;;  %v8025_v27 = vpop.f32.mrb[141].mxu0  ;;  %v8606_v9 = vpop.f32.mrb[207].mxu1  ;;  %v16681_v13 = vld [vmem:[#allocation104_spill] sm:$0xff]  ;;  %v16682_v41 = vld [vmem:[#allocation105_spill] sm:$0xff] }
 0x650   :  { %v10685_v42 = vadd.f32 %v10684_v33, %v8025_v27  ;;  %v8027_v4 = vpop.f32.mrb[142].mxu0  ;;  %8815 = vmatprep.mubr.bf16.mxu1 %v8357_v15  ;;  %v10698_v44 = vadd.f32 %v16681_v13, %v15564_v10  ;;  %v10700_v53 = vadd.f32 %v16682_v41, %v15568_v22 }
 0x651   :  { %v10328_v3 = vpack.c.bf16 %v8910_v37, %v8910_v37  ;;  %v8911_v20 = vmax.f32 %v8605_v0, 0.0  ;;  %v10687_v45 = vadd.f32 %v10686_v21, %v8027_v4  ;;  %v8029_v30 = vpop.f32.mrb[143].mxu0  ;;  %8816 = vmatmul.mubr.bf16.gmra.mrb[56].mxu1 %v8356_v39  ;;  %v8252_v36 = vmax.f32 %v10683_v26, 0.0  ;;  %v16683_v26 = vld [vmem:[#allocation106_spill] sm:$0xff]  ;;  %v16684_v4 = vld [vmem:[#allocation107_spill] sm:$0xff] }
 0x652   :  { %v10689_v48 = vadd.f32 %v10688_v17, %v8029_v30  ;;  %v8253_v23 = vmax.f32 %v10685_v42, 0.0  ;;  %v10702_v0 = vadd.f32 %v16683_v26, %v15564_v10 }
 0x653   :  { %9351 = vst.msk [vmem:[%s16445_s5 + $0x38] sm:$0xf] %vm9336_vm0, %v10328_v3  ;;  %v10329_v54 = vpack.c.bf16 %v8911_v20, %v8911_v20  ;;  %v8254_v35 = vmax.f32 %v10687_v45, 0.0  ;;  %v10704_v3 = vadd.f32 %v16684_v4, %v15568_v22 }
 0x654   :  { %v8255_v49 = vmax.f32 %v10689_v48, 0.0  ;;  %v8609_v6 = vpop.f32.mrb[208].mxu1 }
 0x655   :  { %9352 = vst.msk [vmem:[%s16445_s5 + $0x3c] sm:$0xf] %vm9336_vm0, %v10329_v54  ;;  %v8358_v55 = vpack.c.bf16 %v8254_v35, %v8252_v36  ;;  %v8610_v34 = vadd.f32 %v15865_v2, %v8609_v6  ;;  %v8611_v56 = vpop.f32.mrb[209].mxu1 }
 0x656   :  { %v8359_v24 = vpack.c.bf16 %v8255_v49, %v8253_v23  ;;  %v8033_v46 = vpop.f32.mrb[144].mxu0  ;;  %v8612_v7 = vpop.f32.mrb[210].mxu1 }
 0x657   :  { %v8912_v59 = vmax.f32 %v8610_v34, 0.0  ;;  %v10691_v61 = vadd.f32 %v10690_v58, %v8033_v46  ;;  %v8613_v57 = vadd.f32 %v15865_v2, %v8612_v7  ;;  %v8035_v8 = vpop.f32.mrb[145].mxu0  ;;  %v8614_v28 = vpop.f32.mrb[211].mxu1  ;;  %v16685_v34 = vld [vmem:[#allocation108_spill] sm:$0xff]  ;;  %v16686_v46 = vld [vmem:[#allocation109_spill] sm:$0xff] }
 0x658   :  { %v10693_v47 = vadd.f32 %v10692_v60, %v8035_v8  ;;  %v8037_v62 = vpop.f32.mrb[146].mxu0  ;;  %8823 = vmatprep.mubr.bf16.mxu1 %v8359_v24  ;;  %v10706_v56 = vadd.f32 %v16685_v34, %v15564_v10  ;;  %v10708_v7 = vadd.f32 %v16686_v46, %v15568_v22 }
 0x659   :  { %v10330_v5 = vpack.c.bf16 %v8912_v59, %v8912_v59  ;;  %v8913_v31 = vmax.f32 %v8613_v57, 0.0  ;;  %v10695_v11 = vadd.f32 %v10694_v25, %v8037_v62  ;;  %v8039_v29 = vpop.f32.mrb[147].mxu0  ;;  %8824 = vmatmul.mubr.bf16.gmra.mrb[60].mxu1 %v8358_v55  ;;  %v8256_v18 = vmax.f32 %v10691_v61, 0.0  ;;  %v16687_v61 = vld [vmem:[#allocation110_spill] sm:$0xff]  ;;  %v16688_v62 = vld [vmem:[#allocation111_spill] sm:$0xff] }
 0x65a   :  { %v10697_v12 = vadd.f32 %v10696_v51, %v8039_v29  ;;  %v8257_v50 = vmax.f32 %v10693_v47, 0.0  ;;  %v10710_v57 = vadd.f32 %v16687_v61, %v15564_v10 }
 0x65b   :  { %9353 = vst.msk [vmem:[%s16445_s5 + $0x40] sm:$0xf] %vm9336_vm0, %v10330_v5  ;;  %v10331_v38 = vpack.c.bf16 %v8913_v31, %v8913_v31  ;;  %v8258_v14 = vmax.f32 %v10695_v11, 0.0  ;;  %v10712_v5 = vadd.f32 %v16688_v62, %v15568_v22 }
 0x65c   :  { %v8259_v32 = vmax.f32 %v10697_v12, 0.0  ;;  %v8617_v39 = vpop.f32.mrb[212].mxu1 }
 0x65d   :  { %9354 = vst.msk [vmem:[%s16445_s5 + $0x44] sm:$0xf] %vm9336_vm0, %v10331_v38  ;;  %v8360_v63 = vpack.c.bf16 %v8258_v14, %v8256_v18  ;;  %v8618_v33 = vadd.f32 %v15865_v2, %v8617_v39  ;;  %v8619_v15 = vpop.f32.mrb[213].mxu1 }
 0x65e   :  { %v8361_v16 = vpack.c.bf16 %v8259_v32, %v8257_v50  ;;  %v8043_v21 = vpop.f32.mrb[148].mxu0  ;;  %v8620_v37 = vpop.f32.mrb[214].mxu1 }
 0x65f   :  { %v8914_v27 = vmax.f32 %v8618_v33, 0.0  ;;  %v10699_v9 = vadd.f32 %v10698_v44, %v8043_v21  ;;  %v8621_v43 = vadd.f32 %v15865_v2, %v8620_v37  ;;  %v8045_v17 = vpop.f32.mrb[149].mxu0  ;;  %v8622_v42 = vpop.f32.mrb[215].mxu1  ;;  %v16689_v33 = vld [vmem:[#allocation112_spill] sm:$0xff]  ;;  %v16690_v21 = vld [vmem:[#allocation113_spill] sm:$0xff] }
 0x660   :  { %v10701_v20 = vadd.f32 %v10700_v53, %v8045_v17  ;;  %v8047_v45 = vpop.f32.mrb[150].mxu0  ;;  %8831 = vmatprep.mubr.bf16.mxu1 %v8361_v16  ;;  %v10714_v15 = vadd.f32 %v16689_v33, %v15564_v10  ;;  %v10716_v37 = vadd.f32 %v16690_v21, %v15568_v22 }
 0x661   :  { %v10332_v30 = vpack.c.bf16 %v8914_v27, %v8914_v27  ;;  %v8915_v48 = vmax.f32 %v8621_v43, 0.0  ;;  %v10703_v36 = vadd.f32 %v10702_v0, %v8047_v45  ;;  %v8049_v54 = vpop.f32.mrb[151].mxu0  ;;  %8832 = vmatmul.mubr.bf16.gmra.mrb[64].mxu1 %v8360_v63  ;;  %v8260_v23 = vmax.f32 %v10699_v9, 0.0  ;;  %v16691_v9 = vld [vmem:[#allocation114_spill] sm:$0xff]  ;;  %v16692_v45 = vld [vmem:[#allocation115_spill] sm:$0xff] }
 0x662   :  { %v10705_v35 = vadd.f32 %v10704_v3, %v8049_v54  ;;  %v8261_v19 = vmax.f32 %v10701_v20, 0.0  ;;  %v10718_v43 = vadd.f32 %v16691_v9, %v15564_v10 }
 0x663   :  { %9355 = vst.msk [vmem:[%s16445_s5 + $0x48] sm:$0xf] %vm9336_vm0, %v10332_v30  ;;  %v10333_v49 = vpack.c.bf16 %v8915_v48, %v8915_v48  ;;  %v8262_v6 = vmax.f32 %v10703_v36, 0.0  ;;  %v10720_v30 = vadd.f32 %v16692_v45, %v15568_v22 }
 0x664   :  { %v8263_v58 = vmax.f32 %v10705_v35, 0.0  ;;  %v8625_v55 = vpop.f32.mrb[216].mxu1 }
 0x665   :  { %9356 = vst.msk [vmem:[%s16445_s5 + $0x4c] sm:$0xf] %vm9336_vm0, %v10333_v49  ;;  %v8362_v40 = vpack.c.bf16 %v8262_v6, %v8260_v23  ;;  %v8626_v60 = vadd.f32 %v15865_v2, %v8625_v55  ;;  %v8627_v24 = vpop.f32.mrb[217].mxu1 }
 0x666   :  { %v8363_v52 = vpack.c.bf16 %v8263_v58, %v8261_v19  ;;  %v8053_v25 = vpop.f32.mrb[152].mxu0  ;;  %v8628_v59 = vpop.f32.mrb[218].mxu1 }
 0x667   :  { %v8916_v8 = vmax.f32 %v8626_v60, 0.0  ;;  %v10707_v28 = vadd.f32 %v10706_v56, %v8053_v25  ;;  %v8629_v1 = vadd.f32 %v15865_v2, %v8628_v59  ;;  %v8055_v51 = vpop.f32.mrb[153].mxu0  ;;  %v8630_v47 = vpop.f32.mrb[219].mxu1  ;;  %v16693_v60 = vld [vmem:[#allocation116_spill] sm:$0xff]  ;;  %v16694_v25 = vld [vmem:[#allocation117_spill] sm:$0xff] }
 0x668   :  { %v10709_v31 = vadd.f32 %v10708_v7, %v8055_v51  ;;  %v8057_v11 = vpop.f32.mrb[154].mxu0  ;;  %8839 = vmatprep.mubr.bf16.mxu1 %v8363_v52  ;;  %v10722_v24 = vadd.f32 %v16693_v60, %v15564_v10  ;;  %v10724_v59 = vadd.f32 %v16694_v25, %v15568_v22 }
 0x669   :  { %v10334_v29 = vpack.c.bf16 %v8916_v8, %v8916_v8  ;;  %v8917_v12 = vmax.f32 %v8629_v1, 0.0  ;;  %v10711_v18 = vadd.f32 %v10710_v57, %v8057_v11  ;;  %v8059_v38 = vpop.f32.mrb[155].mxu0  ;;  %8840 = vmatmul.mubr.bf16.gmra.mrb[68].mxu1 %v8362_v40  ;;  %v8264_v50 = vmax.f32 %v10707_v28, 0.0  ;;  %v16695_v28 = vld [vmem:[#allocation118_spill] sm:$0xff]  ;;  %v16696_v11 = vld [vmem:[#allocation119_spill] sm:$0xff] }
 0x66a   :  { %v10713_v14 = vadd.f32 %v10712_v5, %v8059_v38  ;;  %v8265_v13 = vmax.f32 %v10709_v31, 0.0  ;;  %v10726_v1 = vadd.f32 %v16695_v28, %v15564_v10 }
 0x66b   :  { %9357 = vst.msk [vmem:[%s16445_s5 + $0x50] sm:$0xf] %vm9336_vm0, %v10334_v29  ;;  %v10335_v32 = vpack.c.bf16 %v8917_v12, %v8917_v12  ;;  %v8266_v39 = vmax.f32 %v10711_v18, 0.0  ;;  %v10728_v29 = vadd.f32 %v16696_v11, %v15568_v22 }
 0x66c   :  { %v8267_v44 = vmax.f32 %v10713_v14, 0.0  ;;  %v8633_v63 = vpop.f32.mrb[220].mxu1 }
 0x66d   :  { %9358 = vst.msk [vmem:[%s16445_s5 + $0x54] sm:$0xf] %vm9336_vm0, %v10335_v32  ;;  %v8364_v41 = vpack.c.bf16 %v8266_v39, %v8264_v50  ;;  %v8634_v53 = vadd.f32 %v15865_v2, %v8633_v63  ;;  %v8635_v16 = vpop.f32.mrb[221].mxu1 }
 0x66e   :  { %v8365_v26 = vpack.c.bf16 %v8267_v44, %v8265_v13  ;;  %v8063_v0 = vpop.f32.mrb[156].mxu0  ;;  %v8636_v27 = vpop.f32.mrb[222].mxu1 }
 0x66f   :  { %v8918_v17 = vmax.f32 %v8634_v53, 0.0  ;;  %v10715_v42 = vadd.f32 %v10714_v15, %v8063_v0  ;;  %v8637_v4 = vadd.f32 %v15865_v2, %v8636_v27  ;;  %v8065_v3 = vpop.f32.mrb[157].mxu0  ;;  %v8638_v20 = vpop.f32.mrb[223].mxu1  ;;  %v16697_v53 = vld [vmem:[#allocation120_spill] sm:$0xff]  ;;  %v16698_v0 = vld [vmem:[#allocation121_spill] sm:$0xff] }
 0x670   :  { %v10717_v48 = vadd.f32 %v10716_v37, %v8065_v3  ;;  %v8067_v36 = vpop.f32.mrb[158].mxu0  ;;  %8847 = vmatprep.mubr.bf16.mxu1 %v8365_v26  ;;  %v10730_v16 = vadd.f32 %v16697_v53, %v15564_v10  ;;  %v10732_v27 = vadd.f32 %v16698_v0, %v15568_v22 }
 0x671   :  { %v10336_v54 = vpack.c.bf16 %v8918_v17, %v8918_v17  ;;  %v8919_v35 = vmax.f32 %v8637_v4, 0.0  ;;  %v10719_v23 = vadd.f32 %v10718_v43, %v8067_v36  ;;  %v8069_v49 = vpop.f32.mrb[159].mxu0  ;;  %8848 = vmatmul.mubr.bf16.gmra.mrb[72].mxu1 %v8364_v41  ;;  %v8268_v19 = vmax.f32 %v10715_v42, 0.0  ;;  %v16699_v42 = vld [vmem:[#allocation122_spill] sm:$0xff]  ;;  %v16700_v36 = vld [vmem:[#allocation123_spill] sm:$0xff] }
 0x672   :  { %v10721_v6 = vadd.f32 %v10720_v30, %v8069_v49  ;;  %v8269_v34 = vmax.f32 %v10717_v48, 0.0  ;;  %v10734_v4 = vadd.f32 %v16699_v42, %v15564_v10 }
 0x673   :  { %9359 = vst.msk [vmem:[%s16445_s5 + $0x58] sm:$0xf] %vm9336_vm0, %v10336_v54  ;;  %v10337_v58 = vpack.c.bf16 %v8919_v35, %v8919_v35  ;;  %v8270_v55 = vmax.f32 %v10719_v23, 0.0  ;;  %v10736_v54 = vadd.f32 %v16700_v36, %v15568_v22 }
 0x674   :  { %v8271_v56 = vmax.f32 %v10721_v6, 0.0  ;;  %v8641_v40 = vpop.f32.mrb[224].mxu1 }
 0x675   :  { %9360 = vst.msk [vmem:[%s16445_s5 + $0x5c] sm:$0xf] %vm9336_vm0, %v10337_v58  ;;  %v8366_v46 = vpack.c.bf16 %v8270_v55, %v8268_v19  ;;  %v8642_v7 = vadd.f32 %v15865_v2, %v8641_v40  ;;  %v8643_v52 = vpop.f32.mrb[225].mxu1 }
 0x676   :  { %v8367_v61 = vpack.c.bf16 %v8271_v56, %v8269_v34  ;;  %v8073_v57 = vpop.f32.mrb[160].mxu0  ;;  %v8644_v8 = vpop.f32.mrb[226].mxu1 }
 0x677   :  { %v8920_v51 = vmax.f32 %v8642_v7, 0.0  ;;  %v10723_v47 = vadd.f32 %v10722_v24, %v8073_v57  ;;  %v8645_v62 = vadd.f32 %v15865_v2, %v8644_v8  ;;  %v8075_v5 = vpop.f32.mrb[161].mxu0  ;;  %v8646_v31 = vpop.f32.mrb[227].mxu1  ;;  %v16701_v7 = vld [vmem:[#allocation124_spill] sm:$0xff]  ;;  %v16702_v57 = vld [vmem:[#allocation125_spill] sm:$0xff] }
 0x678   :  { %v10725_v12 = vadd.f32 %v10724_v59, %v8075_v5  ;;  %v8077_v18 = vpop.f32.mrb[162].mxu0  ;;  %8855 = vmatprep.mubr.bf16.mxu1 %v8367_v61  ;;  %v10738_v52 = vadd.f32 %v16701_v7, %v15564_v10  ;;  %v10740_v8 = vadd.f32 %v16702_v57, %v15568_v22 }
 0x679   :  { %v10338_v38 = vpack.c.bf16 %v8920_v51, %v8920_v51  ;;  %v8921_v14 = vmax.f32 %v8645_v62, 0.0  ;;  %v10727_v50 = vadd.f32 %v10726_v1, %v8077_v18  ;;  %v8079_v32 = vpop.f32.mrb[163].mxu0  ;;  %8856 = vmatmul.mubr.bf16.gmra.mrb[76].mxu1 %v8366_v46  ;;  %v8272_v13 = vmax.f32 %v10723_v47, 0.0  ;;  %v16703_v47 = vld [vmem:[#allocation126_spill] sm:$0xff]  ;;  %v16704_v18 = vld [vmem:[#allocation127_spill] sm:$0xff] }
 0x67a   :  { %v10729_v39 = vadd.f32 %v10728_v29, %v8079_v32  ;;  %v8273_v33 = vmax.f32 %v10725_v12, 0.0  ;;  %v10742_v62 = vadd.f32 %v16703_v47, %v15564_v10 }
 0x67b   :  { %9361 = vst.msk [vmem:[%s16445_s5 + $0x60] sm:$0xf] %vm9336_vm0, %v10338_v38  ;;  %v10339_v44 = vpack.c.bf16 %v8921_v14, %v8921_v14  ;;  %v8274_v63 = vmax.f32 %v10727_v50, 0.0  ;;  %v10744_v38 = vadd.f32 %v16704_v18, %v15568_v22 }
 0x67c   :  { %v8275_v15 = vmax.f32 %v10729_v39, 0.0  ;;  %v8649_v41 = vpop.f32.mrb[228].mxu1 }
 0x67d   :  { %9362 = vst.msk [vmem:[%s16445_s5 + $0x64] sm:$0xf] %vm9336_vm0, %v10339_v44  ;;  %v8368_v21 = vpack.c.bf16 %v8274_v63, %v8272_v13  ;;  %v8650_v37 = vadd.f32 %v15865_v2, %v8649_v41  ;;  %v8651_v26 = vpop.f32.mrb[229].mxu1 }
 0x67e   :  { %v8369_v9 = vpack.c.bf16 %v8275_v15, %v8273_v33  ;;  %v8083_v43 = vpop.f32.mrb[164].mxu0  ;;  %v8652_v17 = vpop.f32.mrb[230].mxu1 }
 0x67f   :  { %v8922_v3 = vmax.f32 %v8650_v37, 0.0  ;;  %v10731_v20 = vadd.f32 %v10730_v16, %v8083_v43  ;;  %v8653_v45 = vadd.f32 %v15865_v2, %v8652_v17  ;;  %v8085_v30 = vpop.f32.mrb[165].mxu0  ;;  %v8654_v48 = vpop.f32.mrb[231].mxu1  ;;  %v16705_v37 = vld [vmem:[#allocation128_spill] sm:$0xff]  ;;  %v16706_v43 = vld [vmem:[#allocation129_spill] sm:$0xff] }
 0x680   :  { %v10733_v35 = vadd.f32 %v10732_v27, %v8085_v30  ;;  %v8087_v23 = vpop.f32.mrb[166].mxu0  ;;  %8863 = vmatprep.mubr.bf16.mxu1 %v8369_v9  ;;  %v10746_v26 = vadd.f32 %v16705_v37, %v15564_v10  ;;  %v10748_v17 = vadd.f32 %v16706_v43, %v15568_v22 }
 0x681   :  { %v10340_v49 = vpack.c.bf16 %v8922_v3, %v8922_v3  ;;  %v8923_v6 = vmax.f32 %v8653_v45, 0.0  ;;  %v10735_v19 = vadd.f32 %v10734_v4, %v8087_v23  ;;  %v8089_v58 = vpop.f32.mrb[167].mxu0  ;;  %8864 = vmatmul.mubr.bf16.gmra.mrb[80].mxu1 %v8368_v21  ;;  %v8276_v34 = vmax.f32 %v10731_v20, 0.0  ;;  %v16707_v20 = vld [vmem:[#allocation130_spill] sm:$0xff]  ;;  %v16708_v23 = vld [vmem:[#allocation131_spill] sm:$0xff] }
 0x682   :  { %v10737_v55 = vadd.f32 %v10736_v54, %v8089_v58  ;;  %v8277_v60 = vmax.f32 %v10733_v35, 0.0  ;;  %v10750_v45 = vadd.f32 %v16707_v20, %v15564_v10 }
 0x683   :  { %9363 = vst.msk [vmem:[%s16445_s5 + $0x68] sm:$0xf] %vm9336_vm0, %v10340_v49  ;;  %v10341_v56 = vpack.c.bf16 %v8923_v6, %v8923_v6  ;;  %v8278_v40 = vmax.f32 %v10735_v19, 0.0  ;;  %v10752_v49 = vadd.f32 %v16708_v23, %v15568_v22 }
 0x684   :  { %v8279_v24 = vmax.f32 %v10737_v55, 0.0  ;;  %v8657_v46 = vpop.f32.mrb[232].mxu1 }
 0x685   :  { %9364 = vst.msk [vmem:[%s16445_s5 + $0x6c] sm:$0xf] %vm9336_vm0, %v10341_v56  ;;  %v8370_v25 = vpack.c.bf16 %v8278_v40, %v8276_v34  ;;  %v8658_v59 = vadd.f32 %v15865_v2, %v8657_v46  ;;  %v8659_v61 = vpop.f32.mrb[233].mxu1 }
 0x686   :  { %v8371_v28 = vpack.c.bf16 %v8279_v24, %v8277_v60  ;;  %v8093_v1 = vpop.f32.mrb[168].mxu0  ;;  %v8660_v51 = vpop.f32.mrb[234].mxu1 }
 0x687   :  { %v8924_v5 = vmax.f32 %v8658_v59, 0.0  ;;  %v10739_v31 = vadd.f32 %v10738_v52, %v8093_v1  ;;  %v8661_v11 = vadd.f32 %v15865_v2, %v8660_v51  ;;  %v8095_v29 = vpop.f32.mrb[169].mxu0  ;;  %v8662_v12 = vpop.f32.mrb[235].mxu1  ;;  %v16158_v52 = vld [vmem:[%s16444_s4] ss:$0 sm:$0xff] }
 0x688   :  { %v10741_v14 = vadd.f32 %v10740_v8, %v8095_v29  ;;  %v8097_v50 = vpop.f32.mrb[170].mxu0  ;;  %8871 = vmatprep.mubr.bf16.mxu1 %v8371_v28 }
 0x689   :  { %v10342_v32 = vpack.c.bf16 %v8924_v5, %v8924_v5  ;;  %v8925_v39 = vmax.f32 %v8661_v11, 0.0  ;;  %v10743_v13 = vadd.f32 %v10742_v62, %v8097_v50  ;;  %v8099_v44 = vpop.f32.mrb[171].mxu0  ;;  %8872 = vmatmul.mubr.bf16.gmra.mrb[84].mxu1 %v8370_v25  ;;  %v8280_v33 = vmax.f32 %v10739_v31, 0.0 }
 0x68a   :  { %v10745_v63 = vadd.f32 %v10744_v38, %v8099_v44  ;;  %v8281_v53 = vmax.f32 %v10741_v14, 0.0 }
 0x68b   :  { %9365 = vst.msk [vmem:[%s16445_s5 + $0x70] sm:$0xf] %vm9336_vm0, %v10342_v32  ;;  %v10343_v15 = vpack.c.bf16 %v8925_v39, %v8925_v39  ;;  %v8282_v41 = vmax.f32 %v10743_v13, 0.0 }
 0x68c   :  { %v8283_v16 = vmax.f32 %v10745_v63, 0.0  ;;  %v8665_v21 = vpop.f32.mrb[236].mxu1 }
 0x68d   :  { %9366 = vst.msk [vmem:[%s16445_s5 + $0x74] sm:$0xf] %vm9336_vm0, %v10343_v15  ;;  %v8372_v0 = vpack.c.bf16 %v8282_v41, %v8280_v33  ;;  %v8666_v27 = vadd.f32 %v15865_v2, %v8665_v21  ;;  %v8667_v9 = vpop.f32.mrb[237].mxu1 }
 0x68e   :  { %v8373_v42 = vpack.c.bf16 %v8283_v16, %v8281_v53  ;;  %v8103_v4 = vpop.f32.mrb[172].mxu0  ;;  %v8668_v3 = vpop.f32.mrb[238].mxu1 }
 0x68f   :  { %v8926_v30 = vmax.f32 %v8666_v27, 0.0  ;;  %v10747_v48 = vadd.f32 %v10746_v26, %v8103_v4  ;;  %v8669_v36 = vadd.f32 %v15865_v2, %v8668_v3  ;;  %v8105_v54 = vpop.f32.mrb[173].mxu0  ;;  %v8670_v35 = vpop.f32.mrb[239].mxu1 }
 0x690   :  { %v10749_v6 = vadd.f32 %v10748_v17, %v8105_v54  ;;  %v8107_v19 = vpop.f32.mrb[174].mxu0  ;;  %8879 = vmatprep.mubr.bf16.mxu1 %v8373_v42 }
 0x691   :  { %v10344_v58 = vpack.c.bf16 %v8926_v30, %v8926_v30  ;;  %v8927_v55 = vmax.f32 %v8669_v36, 0.0  ;;  %v10751_v34 = vadd.f32 %v10750_v45, %v8107_v19  ;;  %v8109_v56 = vpop.f32.mrb[175].mxu0  ;;  %8880 = vmatmul.mubr.bf16.gmra.mrb[88].mxu1 %v8372_v0  ;;  %v8284_v10 = vmax.f32 %v10747_v48, 0.0 }
 0x692   :  { %v10753_v40 = vadd.f32 %v10752_v49, %v8109_v56  ;;  %v8285_v24 = vmax.f32 %v10749_v6, 0.0 }
 0x693   :  { %9367 = vst.msk [vmem:[%s16445_s5 + $0x78] sm:$0xf] %vm9336_vm0, %v10344_v58  ;;  %v10345_v2 = vpack.c.bf16 %v8927_v55, %v8927_v55  ;;  %v8286_v60 = vmax.f32 %v10751_v34, 0.0 }
 0x694   :  { %v8287_v46 = vmax.f32 %v10753_v40, 0.0  ;;  %v8673_v22 = vpop.f32.mrb[240].mxu1 }
 0x695   :  { %9368 = vst.msk [vmem:[%s16445_s5 + $0x7c] sm:$0xf] %vm9336_vm0, %v10345_v2  ;;  %v8374_v7 = vpack.c.bf16 %v8286_v60, %v8284_v10  ;;  %v8674_v25 = vadd.f32 %v16158_v52, %v8673_v22  ;;  %v8675_v59 = vpop.f32.mrb[241].mxu1 }
 0x696   :  { %v8375_v61 = vpack.c.bf16 %v8287_v46, %v8285_v24  ;;  %v8676_v57 = vpop.f32.mrb[242].mxu1 }
 0x697   :  { %v8928_v8 = vmax.f32 %v8674_v25, 0.0  ;;  %v8677_v28 = vadd.f32 %v16158_v52, %v8676_v57  ;;  %v8678_v1 = vpop.f32.mrb[243].mxu1 }
 0x698   :  { %8887 = vmatprep.mubr.bf16.mxu1 %v8375_v61 }
 0x699   :  { %v10346_v51 = vpack.c.bf16 %v8928_v8, %v8928_v8  ;;  %v8929_v47 = vmax.f32 %v8677_v28, 0.0  ;;  %8888 = vmatmul.mubr.bf16.gmra.mrb[92].mxu1 %v8374_v7 }
 0x69b   :  { %9369 = vst.msk [vmem:[%s16445_s5 + $0x80] sm:$0xf] %vm9336_vm0, %v10346_v51  ;;  %v10347_v62 = vpack.c.bf16 %v8929_v47, %v8929_v47 }
 0x69c   :  { %v8681_v5 = vpop.f32.mrb[244].mxu1 }
 0x69d   :  { %9370 = vst.msk [vmem:[%s16445_s5 + $0x84] sm:$0xf] %vm9336_vm0, %v10347_v62  ;;  %v8682_v31 = vadd.f32 %v16158_v52, %v8681_v5  ;;  %v8683_v11 = vpop.f32.mrb[245].mxu1 }
 0x69e   :  { %v8684_v29 = vpop.f32.mrb[246].mxu1 }
 0x69f   :  { %v8930_v12 = vmax.f32 %v8682_v31, 0.0  ;;  %v8685_v18 = vadd.f32 %v16158_v52, %v8684_v29  ;;  %v8686_v38 = vpop.f32.mrb[247].mxu1 }
 0x6a1   :  { %v10348_v14 = vpack.c.bf16 %v8930_v12, %v8930_v12  ;;  %v8931_v50 = vmax.f32 %v8685_v18, 0.0 }
 0x6a3   :  { %9371 = vst.msk [vmem:[%s16445_s5 + $0x88] sm:$0xf] %vm9336_vm0, %v10348_v14  ;;  %v10349_v32 = vpack.c.bf16 %v8931_v50, %v8931_v50 }
 0x6a4   :  { %v8689_v39 = vpop.f32.mrb[248].mxu1 }
 0x6a5   :  { %9372 = vst.msk [vmem:[%s16445_s5 + $0x8c] sm:$0xf] %vm9336_vm0, %v10349_v32  ;;  %v8690_v13 = vadd.f32 %v16158_v52, %v8689_v39  ;;  %v8691_v44 = vpop.f32.mrb[249].mxu1 }
 0x6a6   :  { %v8692_v63 = vpop.f32.mrb[250].mxu1 }
 0x6a7   :  { %v8932_v33 = vmax.f32 %v8690_v13, 0.0  ;;  %v8693_v15 = vadd.f32 %v16158_v52, %v8692_v63  ;;  %v8694_v41 = vpop.f32.mrb[251].mxu1 }
 0x6a9   :  { %v10350_v53 = vpack.c.bf16 %v8932_v33, %v8932_v33  ;;  %v8933_v16 = vmax.f32 %v8693_v15, 0.0 }
 0x6ab   :  { %9373 = vst.msk [vmem:[%s16445_s5 + $0x90] sm:$0xf] %vm9336_vm0, %v10350_v53  ;;  %v10351_v21 = vpack.c.bf16 %v8933_v16, %v8933_v16 }
 0x6ac   :  { %v8697_v37 = vpop.f32.mrb[252].mxu1 }
 0x6ad   :  { %9374 = vst.msk [vmem:[%s16445_s5 + $0x94] sm:$0xf] %vm9336_vm0, %v10351_v21  ;;  %v8698_v26 = vadd.f32 %v16158_v52, %v8697_v37  ;;  %v8699_v0 = vpop.f32.mrb[253].mxu1 }
 0x6ae   :  { %v8700_v27 = vpop.f32.mrb[254].mxu1 }
 0x6af   :  { %v8934_v9 = vmax.f32 %v8698_v26, 0.0  ;;  %v8701_v43 = vadd.f32 %v16158_v52, %v8700_v27  ;;  %v8702_v17 = vpop.f32.mrb[255].mxu1 }
 0x6b1   :  { %v10352_v42 = vpack.c.bf16 %v8934_v9, %v8934_v9  ;;  %v8935_v4 = vmax.f32 %v8701_v43, 0.0 }
 0x6b3   :  { %9375 = vst.msk [vmem:[%s16445_s5 + $0x98] sm:$0xf] %vm9336_vm0, %v10352_v42  ;;  %v10353_v3 = vpack.c.bf16 %v8935_v4, %v8935_v4 }
 0x6b4   :  { %v8705_v20 = vpop.f32.mrb[0].mxu1 }
 0x6b5   :  { %9376 = vst.msk [vmem:[%s16445_s5 + $0x9c] sm:$0xf] %vm9336_vm0, %v10353_v3  ;;  %v8706_v45 = vadd.f32 %v16158_v52, %v8705_v20  ;;  %v8707_v30 = vpop.f32.mrb[1].mxu1 }
 0x6b6   :  { %v8708_v48 = vpop.f32.mrb[2].mxu1 }
 0x6b7   :  { %v8936_v36 = vmax.f32 %v8706_v45, 0.0  ;;  %v8709_v54 = vadd.f32 %v16158_v52, %v8708_v48  ;;  %v8710_v35 = vpop.f32.mrb[3].mxu1 }
 0x6b9   :  { %v10354_v23 = vpack.c.bf16 %v8936_v36, %v8936_v36  ;;  %v8937_v49 = vmax.f32 %v8709_v54, 0.0 }
 0x6bb   :  { %9377 = vst.msk [vmem:[%s16445_s5 + $0xa0] sm:$0xf] %vm9336_vm0, %v10354_v23  ;;  %v10355_v6 = vpack.c.bf16 %v8937_v49, %v8937_v49 }
 0x6bc   :  { %v8713_v19 = vpop.f32.mrb[4].mxu1 }
 0x6bd   :  { %9378 = vst.msk [vmem:[%s16445_s5 + $0xa4] sm:$0xf] %vm9336_vm0, %v10355_v6  ;;  %v8714_v58 = vadd.f32 %v16158_v52, %v8713_v19  ;;  %v8715_v55 = vpop.f32.mrb[5].mxu1 }
 0x6be   :  { %v8716_v34 = vpop.f32.mrb[6].mxu1 }
 0x6bf   :  { %v8938_v56 = vmax.f32 %v8714_v58, 0.0  ;;  %v8717_v40 = vadd.f32 %v16158_v52, %v8716_v34  ;;  %v8718_v10 = vpop.f32.mrb[7].mxu1 }
 0x6c1   :  { %v10356_v2 = vpack.c.bf16 %v8938_v56, %v8938_v56  ;;  %v8939_v60 = vmax.f32 %v8717_v40, 0.0 }
 0x6c3   :  { %9379 = vst.msk [vmem:[%s16445_s5 + $0xa8] sm:$0xf] %vm9336_vm0, %v10356_v2  ;;  %v10357_v24 = vpack.c.bf16 %v8939_v60, %v8939_v60 }
 0x6c4   :  { %v8721_v46 = vpop.f32.mrb[8].mxu1 }
 0x6c5   :  { %9380 = vst.msk [vmem:[%s16445_s5 + $0xac] sm:$0xf] %vm9336_vm0, %v10357_v24  ;;  %v8722_v22 = vadd.f32 %v16158_v52, %v8721_v46  ;;  %v8723_v7 = vpop.f32.mrb[9].mxu1 }
 0x6c6   :  { %v8724_v25 = vpop.f32.mrb[10].mxu1 }
 0x6c7   :  { %v8940_v59 = vmax.f32 %v8722_v22, 0.0  ;;  %v8725_v61 = vadd.f32 %v16158_v52, %v8724_v25  ;;  %v8726_v57 = vpop.f32.mrb[11].mxu1 }
 0x6c9   :  { %v10358_v8 = vpack.c.bf16 %v8940_v59, %v8940_v59  ;;  %v8941_v28 = vmax.f32 %v8725_v61, 0.0 }
 0x6cb   :  { %9381 = vst.msk [vmem:[%s16445_s5 + $0xb0] sm:$0xf] %vm9336_vm0, %v10358_v8  ;;  %v10359_v1 = vpack.c.bf16 %v8941_v28, %v8941_v28 }
 0x6cc   :  { %v8729_v51 = vpop.f32.mrb[12].mxu1 }
 0x6cd   :  { %9382 = vst.msk [vmem:[%s16445_s5 + $0xb4] sm:$0xf] %vm9336_vm0, %v10359_v1  ;;  %v8730_v47 = vadd.f32 %v16158_v52, %v8729_v51  ;;  %v8731_v62 = vpop.f32.mrb[13].mxu1 }
 0x6ce   :  { %v8732_v5 = vpop.f32.mrb[14].mxu1 }
 0x6cf   :  { %v8942_v31 = vmax.f32 %v8730_v47, 0.0  ;;  %v8733_v11 = vadd.f32 %v16158_v52, %v8732_v5  ;;  %v8734_v29 = vpop.f32.mrb[15].mxu1 }
 0x6d1   :  { %v10360_v12 = vpack.c.bf16 %v8942_v31, %v8942_v31  ;;  %v8943_v18 = vmax.f32 %v8733_v11, 0.0 }
 0x6d3   :  { %9383 = vst.msk [vmem:[%s16445_s5 + $0xb8] sm:$0xf] %vm9336_vm0, %v10360_v12  ;;  %v10361_v38 = vpack.c.bf16 %v8943_v18, %v8943_v18 }
 0x6d4   :  { %v8737_v14 = vpop.f32.mrb[16].mxu1 }
 0x6d5   :  { %9384 = vst.msk [vmem:[%s16445_s5 + $0xbc] sm:$0xf] %vm9336_vm0, %v10361_v38  ;;  %v8738_v50 = vadd.f32 %v16158_v52, %v8737_v14  ;;  %v8739_v32 = vpop.f32.mrb[17].mxu1 }
 0x6d6   :  { %v8740_v39 = vpop.f32.mrb[18].mxu1 }
 0x6d7   :  { %v8944_v13 = vmax.f32 %v8738_v50, 0.0  ;;  %v8741_v44 = vadd.f32 %v16158_v52, %v8740_v39  ;;  %v8742_v63 = vpop.f32.mrb[19].mxu1 }
 0x6d9   :  { %v10362_v33 = vpack.c.bf16 %v8944_v13, %v8944_v13  ;;  %v8945_v15 = vmax.f32 %v8741_v44, 0.0 }
 0x6db   :  { %9385 = vst.msk [vmem:[%s16445_s5 + $0xc0] sm:$0xf] %vm9336_vm0, %v10362_v33  ;;  %v10363_v41 = vpack.c.bf16 %v8945_v15, %v8945_v15 }
 0x6dc   :  { %v8745_v53 = vpop.f32.mrb[20].mxu1 }
 0x6dd   :  { %9386 = vst.msk [vmem:[%s16445_s5 + $0xc4] sm:$0xf] %vm9336_vm0, %v10363_v41  ;;  %v8746_v16 = vadd.f32 %v16158_v52, %v8745_v53  ;;  %v8747_v21 = vpop.f32.mrb[21].mxu1 }
 0x6de   :  { %v8748_v37 = vpop.f32.mrb[22].mxu1 }
 0x6df   :  { %v8946_v26 = vmax.f32 %v8746_v16, 0.0  ;;  %v8749_v0 = vadd.f32 %v16158_v52, %v8748_v37  ;;  %v8750_v27 = vpop.f32.mrb[23].mxu1 }
 0x6e1   :  { %v10364_v9 = vpack.c.bf16 %v8946_v26, %v8946_v26  ;;  %v8947_v43 = vmax.f32 %v8749_v0, 0.0 }
 0x6e3   :  { %9387 = vst.msk [vmem:[%s16445_s5 + $0xc8] sm:$0xf] %vm9336_vm0, %v10364_v9  ;;  %v10365_v17 = vpack.c.bf16 %v8947_v43, %v8947_v43 }
 0x6e4   :  { %v8753_v42 = vpop.f32.mrb[24].mxu1 }
 0x6e5   :  { %9388 = vst.msk [vmem:[%s16445_s5 + $0xcc] sm:$0xf] %vm9336_vm0, %v10365_v17  ;;  %v8754_v4 = vadd.f32 %v16158_v52, %v8753_v42  ;;  %v8755_v3 = vpop.f32.mrb[25].mxu1 }
 0x6e6   :  { %v8756_v20 = vpop.f32.mrb[26].mxu1 }
 0x6e7   :  { %v8948_v45 = vmax.f32 %v8754_v4, 0.0  ;;  %v8757_v30 = vadd.f32 %v16158_v52, %v8756_v20  ;;  %v8758_v48 = vpop.f32.mrb[27].mxu1 }
 0x6e9   :  { %v10366_v36 = vpack.c.bf16 %v8948_v45, %v8948_v45  ;;  %v8949_v54 = vmax.f32 %v8757_v30, 0.0 }
 0x6eb   :  { %9389 = vst.msk [vmem:[%s16445_s5 + $0xd0] sm:$0xf] %vm9336_vm0, %v10366_v36  ;;  %v10367_v35 = vpack.c.bf16 %v8949_v54, %v8949_v54 }
 0x6ec   :  { %v8761_v23 = vpop.f32.mrb[28].mxu1 }
 0x6ed   :  { %9390 = vst.msk [vmem:[%s16445_s5 + $0xd4] sm:$0xf] %vm9336_vm0, %v10367_v35  ;;  %v8762_v49 = vadd.f32 %v16158_v52, %v8761_v23  ;;  %v8763_v6 = vpop.f32.mrb[29].mxu1 }
 0x6ee   :  { %v8764_v19 = vpop.f32.mrb[30].mxu1 }
 0x6ef   :  { %v8950_v58 = vmax.f32 %v8762_v49, 0.0  ;;  %v8765_v55 = vadd.f32 %v16158_v52, %v8764_v19  ;;  %v8766_v34 = vpop.f32.mrb[31].mxu1 }
 0x6f1   :  { %v10368_v56 = vpack.c.bf16 %v8950_v58, %v8950_v58  ;;  %v8951_v40 = vmax.f32 %v8765_v55, 0.0 }
 0x6f3   :  { %9391 = vst.msk [vmem:[%s16445_s5 + $0xd8] sm:$0xf] %vm9336_vm0, %v10368_v56  ;;  %v10369_v10 = vpack.c.bf16 %v8951_v40, %v8951_v40 }
 0x6f4   :  { %v8769_v2 = vpop.f32.mrb[32].mxu1 }
 0x6f5   :  { %9392 = vst.msk [vmem:[%s16445_s5 + $0xdc] sm:$0xf] %vm9336_vm0, %v10369_v10  ;;  %v8770_v60 = vadd.f32 %v16158_v52, %v8769_v2  ;;  %v8771_v24 = vpop.f32.mrb[33].mxu1 }
 0x6f6   :  { %v8772_v46 = vpop.f32.mrb[34].mxu1 }
 0x6f7   :  { %v8952_v22 = vmax.f32 %v8770_v60, 0.0  ;;  %v8773_v7 = vadd.f32 %v16158_v52, %v8772_v46  ;;  %v8774_v25 = vpop.f32.mrb[35].mxu1 }
 0x6f9   :  { %v10370_v59 = vpack.c.bf16 %v8952_v22, %v8952_v22  ;;  %v8953_v61 = vmax.f32 %v8773_v7, 0.0 }
 0x6fb   :  { %9393 = vst.msk [vmem:[%s16445_s5 + $0xe0] sm:$0xf] %vm9336_vm0, %v10370_v59  ;;  %v10371_v57 = vpack.c.bf16 %v8953_v61, %v8953_v61 }
 0x6fc   :  { %v8777_v8 = vpop.f32.mrb[36].mxu1 }
 0x6fd   :  { %9394 = vst.msk [vmem:[%s16445_s5 + $0xe4] sm:$0xf] %vm9336_vm0, %v10371_v57  ;;  %v8778_v28 = vadd.f32 %v16158_v52, %v8777_v8  ;;  %v8779_v1 = vpop.f32.mrb[37].mxu1 }
 0x6fe   :  { %v8780_v51 = vpop.f32.mrb[38].mxu1 }
 0x6ff   :  { %v8954_v47 = vmax.f32 %v8778_v28, 0.0  ;;  %v8781_v62 = vadd.f32 %v16158_v52, %v8780_v51  ;;  %v8782_v5 = vpop.f32.mrb[39].mxu1 }
 0x701   :  { %v10372_v31 = vpack.c.bf16 %v8954_v47, %v8954_v47  ;;  %v8955_v11 = vmax.f32 %v8781_v62, 0.0 }
 0x703   :  { %9395 = vst.msk [vmem:[%s16445_s5 + $0xe8] sm:$0xf] %vm9336_vm0, %v10372_v31  ;;  %v10373_v29 = vpack.c.bf16 %v8955_v11, %v8955_v11 }
 0x704   :  { %v8785_v12 = vpop.f32.mrb[40].mxu1 }
 0x705   :  { %9396 = vst.msk [vmem:[%s16445_s5 + $0xec] sm:$0xf] %vm9336_vm0, %v10373_v29  ;;  %v8786_v18 = vadd.f32 %v16158_v52, %v8785_v12  ;;  %v8787_v38 = vpop.f32.mrb[41].mxu1 }
 0x706   :  { %v8788_v14 = vpop.f32.mrb[42].mxu1 }
 0x707   :  { %v8956_v50 = vmax.f32 %v8786_v18, 0.0  ;;  %v8789_v32 = vadd.f32 %v16158_v52, %v8788_v14  ;;  %v8790_v39 = vpop.f32.mrb[43].mxu1 }
 0x709   :  { %v10374_v13 = vpack.c.bf16 %v8956_v50, %v8956_v50  ;;  %v8957_v44 = vmax.f32 %v8789_v32, 0.0 }
 0x70b   :  { %9397 = vst.msk [vmem:[%s16445_s5 + $0xf0] sm:$0xf] %vm9336_vm0, %v10374_v13  ;;  %v10375_v63 = vpack.c.bf16 %v8957_v44, %v8957_v44 }
 0x70c   :  { %v8793_v33 = vpop.f32.mrb[44].mxu1 }
 0x70d   :  { %9398 = vst.msk [vmem:[%s16445_s5 + $0xf4] sm:$0xf] %vm9336_vm0, %v10375_v63  ;;  %v8794_v15 = vadd.f32 %v16158_v52, %v8793_v33  ;;  %v8795_v41 = vpop.f32.mrb[45].mxu1 }
 0x70e   :  { %v8796_v53 = vpop.f32.mrb[46].mxu1 }
 0x70f   :  { %v8958_v16 = vmax.f32 %v8794_v15, 0.0  ;;  %v8797_v21 = vadd.f32 %v16158_v52, %v8796_v53  ;;  %v8798_v37 = vpop.f32.mrb[47].mxu1 }
 0x711   :  { %v10376_v26 = vpack.c.bf16 %v8958_v16, %v8958_v16  ;;  %v8959_v0 = vmax.f32 %v8797_v21, 0.0 }
 0x713   :  { %9399 = vst.msk [vmem:[%s16445_s5 + $0xf8] sm:$0xf] %vm9336_vm0, %v10376_v26  ;;  %v10377_v27 = vpack.c.bf16 %v8959_v0, %v8959_v0 }
 0x714   :  { %v8801_v9 = vpop.f32.mrb[48].mxu1 }
 0x715   :  { %9400 = vst.msk [vmem:[%s16445_s5 + $0xfc] sm:$0xf] %vm9336_vm0, %v10377_v27  ;;  %v8802_v43 = vadd.f32 %v16158_v52, %v8801_v9  ;;  %v8803_v17 = vpop.f32.mrb[49].mxu1 }
 0x716   :  { %v8804_v42 = vpop.f32.mrb[50].mxu1 }
 0x717   :  { %v8960_v4 = vmax.f32 %v8802_v43, 0.0  ;;  %v8805_v3 = vadd.f32 %v16158_v52, %v8804_v42  ;;  %v8806_v20 = vpop.f32.mrb[51].mxu1 }
 0x719   :  { %v10378_v45 = vpack.c.bf16 %v8960_v4, %v8960_v4  ;;  %v8961_v30 = vmax.f32 %v8805_v3, 0.0 }
 0x71b   :  { %9401 = vst.msk [vmem:[%s16445_s5 + $0x100] sm:$0xf] %vm9336_vm0, %v10378_v45  ;;  %v10379_v48 = vpack.c.bf16 %v8961_v30, %v8961_v30 }
 0x71c   :  { %v8809_v36 = vpop.f32.mrb[52].mxu1 }
 0x71d   :  { %9402 = vst.msk [vmem:[%s16445_s5 + $0x104] sm:$0xf] %vm9336_vm0, %v10379_v48  ;;  %v8810_v54 = vadd.f32 %v16158_v52, %v8809_v36  ;;  %v8811_v35 = vpop.f32.mrb[53].mxu1 }
 0x71e   :  { %v8812_v23 = vpop.f32.mrb[54].mxu1 }
 0x71f   :  { %v8962_v49 = vmax.f32 %v8810_v54, 0.0  ;;  %v8813_v6 = vadd.f32 %v16158_v52, %v8812_v23  ;;  %v8814_v19 = vpop.f32.mrb[55].mxu1 }
 0x721   :  { %v10380_v58 = vpack.c.bf16 %v8962_v49, %v8962_v49  ;;  %v8963_v55 = vmax.f32 %v8813_v6, 0.0 }
 0x723   :  { %9403 = vst.msk [vmem:[%s16445_s5 + $0x108] sm:$0xf] %vm9336_vm0, %v10380_v58  ;;  %v10381_v34 = vpack.c.bf16 %v8963_v55, %v8963_v55 }
 0x724   :  { %v8817_v56 = vpop.f32.mrb[56].mxu1 }
 0x725   :  { %9404 = vst.msk [vmem:[%s16445_s5 + $0x10c] sm:$0xf] %vm9336_vm0, %v10381_v34  ;;  %v8818_v40 = vadd.f32 %v16158_v52, %v8817_v56  ;;  %v8819_v10 = vpop.f32.mrb[57].mxu1 }
 0x726   :  { %v8820_v2 = vpop.f32.mrb[58].mxu1 }
 0x727   :  { %v8964_v60 = vmax.f32 %v8818_v40, 0.0  ;;  %v8821_v24 = vadd.f32 %v16158_v52, %v8820_v2  ;;  %v8822_v46 = vpop.f32.mrb[59].mxu1 }
 0x729   :  { %v10382_v22 = vpack.c.bf16 %v8964_v60, %v8964_v60  ;;  %v8965_v7 = vmax.f32 %v8821_v24, 0.0 }
 0x72b   :  { %9405 = vst.msk [vmem:[%s16445_s5 + $0x110] sm:$0xf] %vm9336_vm0, %v10382_v22  ;;  %v10383_v25 = vpack.c.bf16 %v8965_v7, %v8965_v7 }
 0x72c   :  { %v8825_v59 = vpop.f32.mrb[60].mxu1 }
 0x72d   :  { %9406 = vst.msk [vmem:[%s16445_s5 + $0x114] sm:$0xf] %vm9336_vm0, %v10383_v25  ;;  %v8826_v61 = vadd.f32 %v16158_v52, %v8825_v59  ;;  %v8827_v57 = vpop.f32.mrb[61].mxu1 }
 0x72e   :  { %v8828_v8 = vpop.f32.mrb[62].mxu1 }
 0x72f   :  { %v8966_v28 = vmax.f32 %v8826_v61, 0.0  ;;  %v8829_v1 = vadd.f32 %v16158_v52, %v8828_v8  ;;  %v8830_v51 = vpop.f32.mrb[63].mxu1 }
 0x731   :  { %v10384_v47 = vpack.c.bf16 %v8966_v28, %v8966_v28  ;;  %v8967_v62 = vmax.f32 %v8829_v1, 0.0 }
 0x733   :  { %9407 = vst.msk [vmem:[%s16445_s5 + $0x118] sm:$0xf] %vm9336_vm0, %v10384_v47  ;;  %v10385_v5 = vpack.c.bf16 %v8967_v62, %v8967_v62 }
 0x734   :  { %v8833_v31 = vpop.f32.mrb[64].mxu1 }
 0x735   :  { %9408 = vst.msk [vmem:[%s16445_s5 + $0x11c] sm:$0xf] %vm9336_vm0, %v10385_v5  ;;  %v8834_v11 = vadd.f32 %v16158_v52, %v8833_v31  ;;  %v8835_v29 = vpop.f32.mrb[65].mxu1 }
 0x736   :  { %v8836_v12 = vpop.f32.mrb[66].mxu1 }
 0x737   :  { %v8968_v18 = vmax.f32 %v8834_v11, 0.0  ;;  %v8837_v38 = vadd.f32 %v16158_v52, %v8836_v12  ;;  %v8838_v14 = vpop.f32.mrb[67].mxu1 }
 0x739   :  { %v10386_v50 = vpack.c.bf16 %v8968_v18, %v8968_v18  ;;  %v8969_v32 = vmax.f32 %v8837_v38, 0.0 }
 0x73b   :  { %9409 = vst.msk [vmem:[%s16445_s5 + $0x120] sm:$0xf] %vm9336_vm0, %v10386_v50  ;;  %v10387_v39 = vpack.c.bf16 %v8969_v32, %v8969_v32 }
 0x73c   :  { %v8841_v13 = vpop.f32.mrb[68].mxu1 }
 0x73d   :  { %9410 = vst.msk [vmem:[%s16445_s5 + $0x124] sm:$0xf] %vm9336_vm0, %v10387_v39  ;;  %v8842_v44 = vadd.f32 %v16158_v52, %v8841_v13  ;;  %v8843_v63 = vpop.f32.mrb[69].mxu1 }
 0x73e   :  { %v8844_v33 = vpop.f32.mrb[70].mxu1 }
 0x73f   :  { %v8970_v15 = vmax.f32 %v8842_v44, 0.0  ;;  %v8845_v41 = vadd.f32 %v16158_v52, %v8844_v33  ;;  %v8846_v53 = vpop.f32.mrb[71].mxu1 }
 0x741   :  { %v10388_v16 = vpack.c.bf16 %v8970_v15, %v8970_v15  ;;  %v8971_v21 = vmax.f32 %v8845_v41, 0.0 }
 0x743   :  { %9411 = vst.msk [vmem:[%s16445_s5 + $0x128] sm:$0xf] %vm9336_vm0, %v10388_v16  ;;  %v10389_v37 = vpack.c.bf16 %v8971_v21, %v8971_v21 }
 0x744   :  { %v8849_v26 = vpop.f32.mrb[72].mxu1 }
 0x745   :  { %9412 = vst.msk [vmem:[%s16445_s5 + $0x12c] sm:$0xf] %vm9336_vm0, %v10389_v37  ;;  %v8850_v0 = vadd.f32 %v16158_v52, %v8849_v26  ;;  %v8851_v27 = vpop.f32.mrb[73].mxu1 }
 0x746   :  { %v8852_v9 = vpop.f32.mrb[74].mxu1 }
 0x747   :  { %v8972_v43 = vmax.f32 %v8850_v0, 0.0  ;;  %v8853_v17 = vadd.f32 %v16158_v52, %v8852_v9  ;;  %v8854_v42 = vpop.f32.mrb[75].mxu1 }
 0x749   :  { %v10390_v4 = vpack.c.bf16 %v8972_v43, %v8972_v43  ;;  %v8973_v3 = vmax.f32 %v8853_v17, 0.0 }
 0x74b   :  { %9413 = vst.msk [vmem:[%s16445_s5 + $0x130] sm:$0xf] %vm9336_vm0, %v10390_v4  ;;  %v10391_v20 = vpack.c.bf16 %v8973_v3, %v8973_v3 }
 0x74c   :  { %v8857_v45 = vpop.f32.mrb[76].mxu1 }
 0x74d   :  { %9414 = vst.msk [vmem:[%s16445_s5 + $0x134] sm:$0xf] %vm9336_vm0, %v10391_v20  ;;  %v8858_v30 = vadd.f32 %v16158_v52, %v8857_v45  ;;  %v8859_v48 = vpop.f32.mrb[77].mxu1 }
 0x74e   :  { %v8860_v36 = vpop.f32.mrb[78].mxu1 }
 0x74f   :  { %v8974_v54 = vmax.f32 %v8858_v30, 0.0  ;;  %v8861_v35 = vadd.f32 %v16158_v52, %v8860_v36  ;;  %v8862_v23 = vpop.f32.mrb[79].mxu1 }
 0x751   :  { %v10392_v49 = vpack.c.bf16 %v8974_v54, %v8974_v54  ;;  %v8975_v6 = vmax.f32 %v8861_v35, 0.0 }
 0x753   :  { %9415 = vst.msk [vmem:[%s16445_s5 + $0x138] sm:$0xf] %vm9336_vm0, %v10392_v49  ;;  %v10393_v19 = vpack.c.bf16 %v8975_v6, %v8975_v6 }
 0x754   :  { %v8865_v58 = vpop.f32.mrb[80].mxu1 }
 0x755   :  { %9416 = vst.msk [vmem:[%s16445_s5 + $0x13c] sm:$0xf] %vm9336_vm0, %v10393_v19  ;;  %v8866_v55 = vadd.f32 %v16158_v52, %v8865_v58  ;;  %v8867_v34 = vpop.f32.mrb[81].mxu1 }
 0x756   :  { %v8868_v56 = vpop.f32.mrb[82].mxu1 }
 0x757   :  { %v8976_v40 = vmax.f32 %v8866_v55, 0.0  ;;  %v8869_v10 = vadd.f32 %v16158_v52, %v8868_v56  ;;  %v8870_v2 = vpop.f32.mrb[83].mxu1 }
 0x759   :  { %v10394_v60 = vpack.c.bf16 %v8976_v40, %v8976_v40  ;;  %v8977_v24 = vmax.f32 %v8869_v10, 0.0 }
 0x75b   :  { %9417 = vst.msk [vmem:[%s16445_s5 + $0x140] sm:$0xf] %vm9336_vm0, %v10394_v60  ;;  %v10395_v46 = vpack.c.bf16 %v8977_v24, %v8977_v24 }
 0x75c   :  { %v8873_v22 = vpop.f32.mrb[84].mxu1 }
 0x75d   :  { %9418 = vst.msk [vmem:[%s16445_s5 + $0x144] sm:$0xf] %vm9336_vm0, %v10395_v46  ;;  %v8874_v7 = vadd.f32 %v16158_v52, %v8873_v22  ;;  %v8875_v25 = vpop.f32.mrb[85].mxu1 }
 0x75e   :  { %v8876_v59 = vpop.f32.mrb[86].mxu1 }
 0x75f   :  { %v8978_v61 = vmax.f32 %v8874_v7, 0.0  ;;  %v8877_v57 = vadd.f32 %v16158_v52, %v8876_v59  ;;  %v8878_v8 = vpop.f32.mrb[87].mxu1 }
 0x761   :  { %v10396_v28 = vpack.c.bf16 %v8978_v61, %v8978_v61  ;;  %v8979_v1 = vmax.f32 %v8877_v57, 0.0 }
 0x763   :  { %9419 = vst.msk [vmem:[%s16445_s5 + $0x148] sm:$0xf] %vm9336_vm0, %v10396_v28  ;;  %v10397_v51 = vpack.c.bf16 %v8979_v1, %v8979_v1 }
 0x764   :  { %v8881_v47 = vpop.f32.mrb[88].mxu1 }
 0x765   :  { %9420 = vst.msk [vmem:[%s16445_s5 + $0x14c] sm:$0xf] %vm9336_vm0, %v10397_v51  ;;  %v8882_v62 = vadd.f32 %v16158_v52, %v8881_v47  ;;  %v8883_v5 = vpop.f32.mrb[89].mxu1 }
 0x766   :  { %v8884_v31 = vpop.f32.mrb[90].mxu1 }
 0x767   :  { %v8980_v11 = vmax.f32 %v8882_v62, 0.0  ;;  %v8885_v29 = vadd.f32 %v16158_v52, %v8884_v31  ;;  %v8886_v12 = vpop.f32.mrb[91].mxu1 }
 0x769   :  { %v10398_v18 = vpack.c.bf16 %v8980_v11, %v8980_v11  ;;  %v8981_v38 = vmax.f32 %v8885_v29, 0.0 }
 0x76b   :  { %9421 = vst.msk [vmem:[%s16445_s5 + $0x150] sm:$0xf] %vm9336_vm0, %v10398_v18  ;;  %v10399_v14 = vpack.c.bf16 %v8981_v38, %v8981_v38 }
 0x76c   :  { %v8889_v50 = vpop.f32.mrb[92].mxu1 }
 0x76d   :  { %9422 = vst.msk [vmem:[%s16445_s5 + $0x154] sm:$0xf] %vm9336_vm0, %v10399_v14  ;;  %v8890_v32 = vadd.f32 %v16158_v52, %v8889_v50  ;;  %v8891_v39 = vpop.f32.mrb[93].mxu1 }
 0x76e   :  { %v8892_v13 = vpop.f32.mrb[94].mxu1 }
 0x76f   :  { %v8982_v44 = vmax.f32 %v8890_v32, 0.0  ;;  %v8893_v63 = vadd.f32 %v16158_v52, %v8892_v13  ;;  %v8894_v33 = vpop.f32.mrb[95].mxu1 }
 0x771   :  { %v10400_v15 = vpack.c.bf16 %v8982_v44, %v8982_v44  ;;  %v8983_v41 = vmax.f32 %v8893_v63, 0.0 }
 0x773   :  { %9423 = vst.msk [vmem:[%s16445_s5 + $0x158] sm:$0xf] %vm9336_vm0, %v10400_v15  ;;  %v10401_v53 = vpack.c.bf16 %v8983_v41, %v8983_v41 }
 0x775   :  { %9424 = vst.msk [vmem:[%s16445_s5 + $0x15c] sm:$0xf] %vm9336_vm0, %v10401_v53 }

</bundles_post_ra>
